<compile_context>
chip_gen: v6e
topology: v6e:2x2x1
jax: 0.10.0
libtpu: 0.0.40
codegen_flags: <defaults>
</compile_context>

<pallas_src>
import math

import jax
import jax.numpy as jnp
from jax import lax
from jax.experimental import pallas as pl
from jax.experimental.pallas import tpu as pltpu

# ----------------------------- model hyper-parameters --------------------------------------
DIM = 64          # transformer embedding dim
DEPTH = 2         # number of transformer blocks
HEADS = 4         # attention heads
DIM_HEAD = 16     # per-head dim
INNER = HEADS * DIM_HEAD
MLP_DIM = 128     # feed-forward hidden dim
N_CLASS = 2
SHEET_DIM = 135 - 2 * DIM     # mlp_head expects 135 = dim + dim + sheet_features -> 7
LN_EPS = 1e-5
ATTN_SCALE = DIM_HEAD ** (-0.5)

BRANCH_KEYS = ('emb_w', 'emb_b', 'emb_ln_g', 'emb_ln_b', 'cls', 'pos',
               'ln1_g', 'ln1_b', 'wqkv', 'wo', 'bo',
               'ln2_g', 'ln2_b', 'w1', 'b1', 'w2', 'b2')
HEAD_KEYS = ('ln_g', 'ln_b', 'w1', 'b1', 'w2', 'b2')


def _round_up(x, m):
    return ((x + m - 1) // m) * m


# ----------------------------- in-kernel helpers -------------------------------------------
def _layernorm(x, g, b):
    x = x.astype(jnp.float32)
    mu = jnp.mean(x, axis=-1, keepdims=True)
    xc = x - mu
    var = jnp.mean(xc * xc, axis=-1, keepdims=True)
    return xc * lax.rsqrt(var + LN_EPS) * g + b


def _gelu_exact(x):
    # exact (erf-based) GELU, matching torch.nn.GELU() default
    return 0.5 * x * (1.0 + lax.erf(x * (1.0 / math.sqrt(2.0))))


def _branch_body(img, refs, kh, Ho, W, BB):
    """One branch: folded embedding + CLS/pos + DEPTH transformer layers.  Returns [BB, DIM]."""
    (emb_w, emb_b, emb_g, emb_beta, cls_r, pos_r,
     ln1g, ln1b, wqkv, wo, bo, ln2g, ln2b, w1, b1, w2, b2) = refs

    n_tok = Ho + 1
    n_pad = _round_up(n_tok, 8)          # token rows padded to sublane multiple
    Ho_pad = _round_up(Ho, 8)
    K = 2 * kh * W
    M = BB * n_pad

    # ---- embedding: conv + rearrange + linear folded host-side into one [K, DIM] matmul ----
    wins = [img[:, ci, dh:dh + Ho, :] for ci in range(2) for dh in range(kh)]   # [BB, Ho, W]
    xw = jnp.concatenate(wins, axis=-1)                                          # [BB, Ho, K]
    if Ho_pad > Ho:
        xw = jnp.concatenate([xw, jnp.zeros((BB, Ho_pad - Ho, K), jnp.float32)], axis=1)
    emb = jnp.dot(xw.reshape(BB * Ho_pad, K), emb_w[...],
                  preferred_element_type=jnp.float32)                            # f32 matmul
    emb = _layernorm(emb + emb_b[...], emb_g[...], emb_beta[...])
    emb = emb.reshape(BB, Ho_pad, DIM)

    # ---- token sequence: [CLS] + patches (+ zero pad rows), plus positional embedding ----
    cls_tok = jnp.broadcast_to((cls_r[...] + pos_r[0:1, :]).reshape(1, 1, DIM), (BB, 1, DIM))
    pieces = [cls_tok, emb[:, :Ho, :] + pos_r[1:n_tok, :].reshape(1, Ho, DIM)]
    if n_pad > n_tok:
        pieces.append(jnp.zeros((BB, n_pad - n_tok, DIM), jnp.float32))
    x = jnp.concatenate(pieces, axis=1).reshape(M, DIM)                          # [M, DIM]

    # additive key mask for padded token rows (hoisted out of the layer loop)
    if n_pad > n_tok:
        col = lax.broadcasted_iota(jnp.int32, (1, n_pad, n_pad), 2)
        key_mask = jnp.where(col < n_tok, 0.0, -1e30).astype(jnp.float32)
    else:
        key_mask = None

    # ---- transformer layers (sequence stays resident in VMEM values) ----
    for l in range(DEPTH):
        # PreNorm multi-head self-attention + residual
        h = _layernorm(x, ln1g[l], ln1b[l])
        qkv = jnp.dot(h.astype(jnp.bfloat16), wqkv[l],
                      preferred_element_type=jnp.float32)                        # [M, 3*INNER]
        qkv = qkv.reshape(BB, n_pad, 3 * INNER)

        def _split_heads(off):
            parts = [qkv[:, :, off + hh * DIM_HEAD: off + (hh + 1) * DIM_HEAD]
                     for hh in range(HEADS)]
            return jnp.concatenate(parts, axis=0).astype(jnp.bfloat16)           # [H*BB, n, dh]

        q = _split_heads(0)
        k = _split_heads(INNER)
        v = _split_heads(2 * INNER)

        dots = lax.dot_general(q, k, (((2,), (2,)), ((0,), (0,))),
                               preferred_element_type=jnp.float32) * ATTN_SCALE  # [H*BB, n, n]
        if key_mask is not None:
            dots = dots + key_mask
        dots = dots - jnp.max(dots, axis=-1, keepdims=True)
        e = jnp.exp(dots)
        attn = e * pl.reciprocal(jnp.sum(e, axis=-1, keepdims=True), approx=True)
        ctx = lax.dot_general(attn.astype(jnp.bfloat16), v, (((2,), (1,)), ((0,), (0,))),
                              preferred_element_type=jnp.float32)                # [H*BB, n, dh]
        # merge heads into lanes (head-major 'b n (h d)') and project with one matmul
        ctx = jnp.concatenate([ctx[hh * BB:(hh + 1) * BB] for hh in range(HEADS)],
                              axis=-1).reshape(M, INNER)                         # [M, INNER]
        x = x + jnp.dot(ctx.astype(jnp.bfloat16), wo[l],
                        preferred_element_type=jnp.float32) + bo[l]

        # PreNorm feed-forward (GELU) + residual
        h2 = _layernorm(x, ln2g[l], ln2b[l])
        f = jnp.dot(h2.astype(jnp.bfloat16), w1[l],
                    preferred_element_type=jnp.float32) + b1[l]
        f = _gelu_exact(f)
        f = jnp.dot(f.astype(jnp.bfloat16), w2[l],
                    preferred_element_type=jnp.float32) + b2[l]
        x = x + f

    # pool='cls' -> extract row 0 of every sample via a masked sublane reduction
    x3d = x.reshape(BB, n_pad, DIM)
    row0 = (lax.broadcasted_iota(jnp.int32, (1, n_pad, 1), 1) == 0).astype(jnp.float32)
    return jnp.sum(x3d * row0, axis=1)                                           # [BB, DIM]


# ----------------------------- single fused kernel -----------------------------------------
def make_fused_kernel(H, W, BB, kh_patch=5, kh_chan=1):
    nP = len(BRANCH_KEYS)

    def kernel(*refs):
        img_ref, sheet_ref = refs[0], refs[1]
        p_refs = refs[2:2 + nP]
        c_refs = refs[2 + nP:2 + 2 * nP]
        hg, hb, hw1, hb1, hw2, hb2 = refs[2 + 2 * nP:2 + 2 * nP + len(HEAD_KEYS)]
        out_ref = refs[-1]

        img = img_ref[...].astype(jnp.float32)                     # [BB, 2, H, W]

        cls_p = _branch_body(img, p_refs, kh_patch, H - kh_patch + 1, W, BB)   # [BB, DIM]
        cls_c = _branch_body(img, c_refs, kh_chan, H - kh_chan + 1, W, BB)     # [BB, DIM]

        # mlp_head: concat -> LayerNorm(135) -> Linear(135,39) -> Linear(39,2)
        x3 = jnp.concatenate([cls_p, cls_c, sheet_ref[...].astype(jnp.float32)], axis=1)
        h = _layernorm(x3, hg[...], hb[...])
        y = jnp.dot(h.astype(jnp.bfloat16), hw1[...],
                    preferred_element_type=jnp.float32) + hb1[...]
        out_ref[...] = jnp.dot(y.astype(jnp.bfloat16), hw2[...],
                               preferred_element_type=jnp.float32) + hb2[...]

    return kernel


def _full_spec(a):
    return pl.BlockSpec(a.shape, lambda i, _n=a.ndim: (0,) * _n)


def _choose_bb(B):
    # Whole batch for small B; otherwise a multiple-of-8 divisor (keeps BlockSpec sublane rules).
    if B <= 32:
        return B
    for bb in (32, 24, 16, 8):
        if B % bb == 0:
            return bb
    return B


def fnirs_t_forward(kparams, img, sheet):
    B, _, H, W = img.shape
    BB = _choose_bb(B)
    nb = B // BB
    kernel = make_fused_kernel(H, W, BB)

    args = [img, sheet]
    args += [kparams['patch'][k] for k in BRANCH_KEYS]
    args += [kparams['chan'][k] for k in BRANCH_KEYS]
    args += [kparams['head'][k] for k in HEAD_KEYS]

    in_specs = [pl.BlockSpec((BB, 2, H, W), lambda i: (i, 0, 0, 0)),
                pl.BlockSpec((BB, SHEET_DIM), lambda i: (i, 0))]
    in_specs += [_full_spec(a) for a in args[2:]]

    return pl.pallas_call(
        kernel,
        out_shape=jax.ShapeDtypeStruct((B, N_CLASS), jnp.float32),
        grid=(nb,),
        in_specs=in_specs,
        out_specs=pl.BlockSpec((BB, N_CLASS), lambda i: (i, 0)),
        compiler_params=pltpu.CompilerParams(dimension_semantics=("parallel",)),
    )(*args)


# ----------------------------- parameters (torch-layout) -----------------------------------
def init_params(key, sampling_point):
    Wo = (sampling_point - 30) // 4 + 1
    lin_in = Wo * 8
    keys = iter(jax.random.split(key, 128))

    def nrm(shape, s=0.05):
        return (jax.random.normal(next(keys), shape) * s).astype(jnp.float32)

    def branch(kh):
        p = dict(
            conv_w=nrm((8, 2, kh, 30), 0.1),
            conv_b=nrm((8,), 0.1),
            lin_w=nrm((lin_in, DIM), 0.1),
            lin_b=nrm((DIM,), 0.1),
            ln_g=jnp.ones((1, DIM), jnp.float32),
            ln_b=jnp.zeros((1, DIM), jnp.float32),
            cls=nrm((1, 1, DIM), 1.0),
            pos=nrm((1, 101, DIM), 1.0),
            layers=[])
        for _ in range(DEPTH):
            p['layers'].append(dict(
                ln1_g=jnp.ones((1, DIM), jnp.float32),
                ln1_b=jnp.zeros((1, DIM), jnp.float32),
                wqkv=nrm((DIM, 3 * INNER)),
                wo=nrm((INNER, DIM)),
                bo=nrm((1, DIM)),
                ln2_g=jnp.ones((1, DIM), jnp.float32),
                ln2_b=jnp.zeros((1, DIM), jnp.float32),
                w1=nrm((DIM, MLP_DIM)),
                b1=nrm((1, MLP_DIM)),
                w2=nrm((MLP_DIM, DIM)),
                b2=nrm((1, DIM))))
        return p

    return dict(
        patch=branch(5),
        chan=branch(1),
        head_ln_g=jnp.ones((1, 135), jnp.float32),
        head_ln_b=jnp.zeros((1, 135), jnp.float32),
        head_w=nrm((135, 39)), head_b=nrm((1, 39)),
        fc1_w=nrm((39, N_CLASS)), fc1_b=nrm((1, N_CLASS)))


# ------------- host-side (one-time) re-layout: fold conv into linear ------------------------
def prepare_branch(p, kh, H, W):
    Wo = (W - 30) // 4 + 1
    Ho = H - kh + 1
    n_tok = Ho + 1
    lin_w3 = p['lin_w'].reshape(8, Wo, DIM)                          # [co, w, D]
    # w_full[ci,dh,x,d] = sum_{co, (w,dw):4w+dw=x} conv_w[co,ci,dh,dw] * lin_w[co*Wo+w, d]
    prod = jnp.einsum('ocat,owd->catwd', p['conv_w'], lin_w3)        # [ci, kh, 30, Wo, D]
    w_full = jnp.zeros((2, kh, W, DIM), jnp.float32)
    for w in range(Wo):
        w_full = w_full.at[:, :, 4 * w:4 * w + 30, :].add(prod[:, :, :, w, :])
    b_eff = p['lin_b'] + jnp.einsum('o,owd->d', p['conv_b'], lin_w3)

    def stack(name, dtype=jnp.float32):
        return jnp.stack([lp[name] for lp in p['layers']], axis=0).astype(dtype)

    return dict(
        emb_w=w_full.reshape(2 * kh * W, DIM),           # [2*kh*W, D], kept in f32
        emb_b=b_eff.reshape(1, DIM),
        emb_ln_g=p['ln_g'], emb_ln_b=p['ln_b'],
        cls=p['cls'].reshape(1, DIM),
        pos=p['pos'][0, :n_tok, :],                      # [n_tok, D]
        ln1_g=stack('ln1_g'), ln1_b=stack('ln1_b'),
        wqkv=stack('wqkv', jnp.bfloat16),                # [DEPTH, DIM, 3*INNER] original layout
        wo=stack('wo', jnp.bfloat16),                    # [DEPTH, INNER, DIM]   original layout
        bo=stack('bo'),
        ln2_g=stack('ln2_g'), ln2_b=stack('ln2_b'),
        w1=stack('w1', jnp.bfloat16), b1=stack('b1'),
        w2=stack('w2', jnp.bfloat16), b2=stack('b2'))


def prepare_params(params, H, W):
    return dict(
        patch=prepare_branch(params['patch'], 5, H, W),
        chan=prepare_branch(params['chan'], 1, H, W),
        head=dict(ln_g=params['head_ln_g'], ln_b=params['head_ln_b'],
                  w1=params['head_w'].astype(jnp.bfloat16), b1=params['head_b'],
                  w2=params['fc1_w'].astype(jnp.bfloat16), b2=params['fc1_b']))


# ----------------------------- pure-JAX reference (f32, torch-layout) ----------------------
def _ln_ref(x, g, b):
    mu = x.mean(-1, keepdims=True)
    var = ((x - mu) ** 2).mean(-1, keepdims=True)
    return (x - mu) / jnp.sqrt(var + LN_EPS) * g + b


def reference_forward(params, img, sheet):
    B, _, H, W = img.shape

    def branch(p, kh):
        Wo = (W - 30) // 4 + 1
        Ho = H - kh + 1
        conv = lax.conv_general_dilated(img, p['conv_w'], (1, 4), 'VALID',
                                        dimension_numbers=('NCHW', 'OIHW', 'NCHW'))
        conv = conv + p['conv_b'].reshape(1, 8, 1, 1)
        feat = conv.transpose(0, 2, 1, 3).reshape(B, Ho, 8 * Wo)      # 'b c h w -> b h (c w)'
        y = _ln_ref(feat @ p['lin_w'] + p['lin_b'], p['ln_g'], p['ln_b'])
        x = jnp.concatenate([jnp.broadcast_to(p['cls'], (B, 1, DIM)), y], axis=1)
        x = x + p['pos'][:, :Ho + 1]
        n = Ho + 1
        for lp in p['layers']:
            h = _ln_ref(x, lp['ln1_g'], lp['ln1_b'])
            qkv = h @ lp['wqkv']
            q, k, v = jnp.split(qkv, 3, axis=-1)
            q = q.reshape(B, n, HEADS, DIM_HEAD).transpose(0, 2, 1, 3)
            k = k.reshape(B, n, HEADS, DIM_HEAD).transpose(0, 2, 1, 3)
            v = v.reshape(B, n, HEADS, DIM_HEAD).transpose(0, 2, 1, 3)
            dots = jnp.einsum('bhid,bhjd->bhij', q, k) * ATTN_SCALE
            attn = jax.nn.softmax(dots, axis=-1)
            o = jnp.einsum('bhij,bhjd->bhid', attn, v)
            o = o.transpose(0, 2, 1, 3).reshape(B, n, INNER)
            x = x + o @ lp['wo'] + lp['bo']
            h2 = _ln_ref(x, lp['ln2_g'], lp['ln2_b'])
            f = h2 @ lp['w1'] + lp['b1']
            f = 0.5 * f * (1.0 + lax.erf(f / math.sqrt(2.0)))
            x = x + f @ lp['w2'] + lp['b2']
        return x[:, 0]

    xp = branch(params['patch'], 5)
    xc = branch(params['chan'], 1)
    x3 = jnp.concatenate([xp, xc, sheet], axis=1)
    x3 = _ln_ref(x3, params['head_ln_g'], params['head_ln_b'])
    x3 = x3 @ params['head_w'] + params['head_b']
    return x3 @ params['fc1_w'] + params['fc1_b']


# ----------------------------- main ---------------------------------------------------------
if __name__ == "__main__":
    B, FNIRS_CH, SAMPLING_POINT = 2, 16, 50      # small but valid (sampling >= 30)
    key = jax.random.PRNGKey(0)
    kp, ki, ks = jax.random.split(key, 3)

    params = init_params(kp, SAMPLING_POINT)
    img = jax.random.normal(ki, (B, 2, FNIRS_CH, SAMPLING_POINT), jnp.float32)
    sheet = jax.random.normal(ks, (B, SHEET_DIM), jnp.float32)

    kparams = prepare_params(params, FNIRS_CH, SAMPLING_POINT)

    fwd = jax.jit(fnirs_t_forward)
    out = jax.block_until_ready(fwd(kparams, img, sheet))
    assert out.shape == (B, N_CLASS), out.shape
    assert bool(jnp.all(jnp.isfinite(out)))

    # correctness check vs pure-JAX f32 reference (loose tolerance: bf16 MXU operands)
    ref = reference_forward(params, img, sheet)
    err = float(jnp.max(jnp.abs(out - ref)))
    assert err < 5e-2, f"mismatch vs reference: max abs err = {err}"

    print("KERNEL_OK")
</pallas_src>

<mosaic_0001>
module attributes {stable_mosaic.version = 11 : i64} {
  func.func @kernel(%arg0: i32, %arg1: memref<2x2x16x50xf32, #tpu.memory_space<vmem>>, %arg2: memref<2x7xf32, #tpu.memory_space<vmem>>, %arg3: memref<500x64xf32, #tpu.memory_space<vmem>>, %arg4: memref<1x64xf32, #tpu.memory_space<vmem>>, %arg5: memref<1x64xf32, #tpu.memory_space<vmem>>, %arg6: memref<1x64xf32, #tpu.memory_space<vmem>>, %arg7: memref<1x64xf32, #tpu.memory_space<vmem>>, %arg8: memref<13x64xf32, #tpu.memory_space<vmem>>, %arg9: memref<2x1x64xf32, #tpu.memory_space<vmem>>, %arg10: memref<2x1x64xf32, #tpu.memory_space<vmem>>, %arg11: memref<2x64x192xbf16, #tpu.memory_space<vmem>>, %arg12: memref<2x64x64xbf16, #tpu.memory_space<vmem>>, %arg13: memref<2x1x64xf32, #tpu.memory_space<vmem>>, %arg14: memref<2x1x64xf32, #tpu.memory_space<vmem>>, %arg15: memref<2x1x64xf32, #tpu.memory_space<vmem>>, %arg16: memref<2x64x128xbf16, #tpu.memory_space<vmem>>, %arg17: memref<2x1x128xf32, #tpu.memory_space<vmem>>, %arg18: memref<2x128x64xbf16, #tpu.memory_space<vmem>>, %arg19: memref<2x1x64xf32, #tpu.memory_space<vmem>>, %arg20: memref<100x64xf32, #tpu.memory_space<vmem>>, %arg21: memref<1x64xf32, #tpu.memory_space<vmem>>, %arg22: memref<1x64xf32, #tpu.memory_space<vmem>>, %arg23: memref<1x64xf32, #tpu.memory_space<vmem>>, %arg24: memref<1x64xf32, #tpu.memory_space<vmem>>, %arg25: memref<17x64xf32, #tpu.memory_space<vmem>>, %arg26: memref<2x1x64xf32, #tpu.memory_space<vmem>>, %arg27: memref<2x1x64xf32, #tpu.memory_space<vmem>>, %arg28: memref<2x64x192xbf16, #tpu.memory_space<vmem>>, %arg29: memref<2x64x64xbf16, #tpu.memory_space<vmem>>, %arg30: memref<2x1x64xf32, #tpu.memory_space<vmem>>, %arg31: memref<2x1x64xf32, #tpu.memory_space<vmem>>, %arg32: memref<2x1x64xf32, #tpu.memory_space<vmem>>, %arg33: memref<2x64x128xbf16, #tpu.memory_space<vmem>>, %arg34: memref<2x1x128xf32, #tpu.memory_space<vmem>>, %arg35: memref<2x128x64xbf16, #tpu.memory_space<vmem>>, %arg36: memref<2x1x64xf32, #tpu.memory_space<vmem>>, %arg37: memref<1x135xf32, #tpu.memory_space<vmem>>, %arg38: memref<1x135xf32, #tpu.memory_space<vmem>>, %arg39: memref<135x39xbf16, #tpu.memory_space<vmem>>, %arg40: memref<1x39xf32, #tpu.memory_space<vmem>>, %arg41: memref<39x2xbf16, #tpu.memory_space<vmem>>, %arg42: memref<1x2xf32, #tpu.memory_space<vmem>>, %arg43: memref<2x2xf32, #tpu.memory_space<vmem>>) attributes {dimension_semantics = [#tpu.dimension_semantics<parallel>], iteration_bounds = array<i64: 1>, scalar_prefetch = 0 : i64, scratch_operands = 0 : i64, tpu.core_type = #tpu.core_type<tc>, window_params = [{transform_indices = @transform_0, window_bounds = array<i64: 2, 2, 16, 50>}, {transform_indices = @transform_1, window_bounds = array<i64: 2, 7>}, {pipeline_mode = #tpu.pipeline_mode<synchronous>, transform_indices = @transform_2, window_bounds = array<i64: 500, 64>}, {pipeline_mode = #tpu.pipeline_mode<synchronous>, transform_indices = @transform_3, window_bounds = array<i64: 1, 64>}, {pipeline_mode = #tpu.pipeline_mode<synchronous>, transform_indices = @transform_4, window_bounds = array<i64: 1, 64>}, {pipeline_mode = #tpu.pipeline_mode<synchronous>, transform_indices = @transform_5, window_bounds = array<i64: 1, 64>}, {pipeline_mode = #tpu.pipeline_mode<synchronous>, transform_indices = @transform_6, window_bounds = array<i64: 1, 64>}, {pipeline_mode = #tpu.pipeline_mode<synchronous>, transform_indices = @transform_7, window_bounds = array<i64: 13, 64>}, {pipeline_mode = #tpu.pipeline_mode<synchronous>, transform_indices = @transform_8, window_bounds = array<i64: 2, 1, 64>}, {pipeline_mode = #tpu.pipeline_mode<synchronous>, transform_indices = @transform_9, window_bounds = array<i64: 2, 1, 64>}, {pipeline_mode = #tpu.pipeline_mode<synchronous>, transform_indices = @transform_10, window_bounds = array<i64: 2, 64, 192>}, {pipeline_mode = #tpu.pipeline_mode<synchronous>, transform_indices = @transform_11, window_bounds = array<i64: 2, 64, 64>}, {pipeline_mode = #tpu.pipeline_mode<synchronous>, transform_indices = @transform_12, window_bounds = array<i64: 2, 1, 64>}, {pipeline_mode = #tpu.pipeline_mode<synchronous>, transform_indices = @transform_13, window_bounds = array<i64: 2, 1, 64>}, {pipeline_mode = #tpu.pipeline_mode<synchronous>, transform_indices = @transform_14, window_bounds = array<i64: 2, 1, 64>}, {pipeline_mode = #tpu.pipeline_mode<synchronous>, transform_indices = @transform_15, window_bounds = array<i64: 2, 64, 128>}, {pipeline_mode = #tpu.pipeline_mode<synchronous>, transform_indices = @transform_16, window_bounds = array<i64: 2, 1, 128>}, {pipeline_mode = #tpu.pipeline_mode<synchronous>, transform_indices = @transform_17, window_bounds = array<i64: 2, 128, 64>}, {pipeline_mode = #tpu.pipeline_mode<synchronous>, transform_indices = @transform_18, window_bounds = array<i64: 2, 1, 64>}, {pipeline_mode = #tpu.pipeline_mode<synchronous>, transform_indices = @transform_19, window_bounds = array<i64: 100, 64>}, {pipeline_mode = #tpu.pipeline_mode<synchronous>, transform_indices = @transform_20, window_bounds = array<i64: 1, 64>}, {pipeline_mode = #tpu.pipeline_mode<synchronous>, transform_indices = @transform_21, window_bounds = array<i64: 1, 64>}, {pipeline_mode = #tpu.pipeline_mode<synchronous>, transform_indices = @transform_22, window_bounds = array<i64: 1, 64>}, {pipeline_mode = #tpu.pipeline_mode<synchronous>, transform_indices = @transform_23, window_bounds = array<i64: 1, 64>}, {pipeline_mode = #tpu.pipeline_mode<synchronous>, transform_indices = @transform_24, window_bounds = array<i64: 17, 64>}, {pipeline_mode = #tpu.pipeline_mode<synchronous>, transform_indices = @transform_25, window_bounds = array<i64: 2, 1, 64>}, {pipeline_mode = #tpu.pipeline_mode<synchronous>, transform_indices = @transform_26, window_bounds = array<i64: 2, 1, 64>}, {pipeline_mode = #tpu.pipeline_mode<synchronous>, transform_indices = @transform_27, window_bounds = array<i64: 2, 64, 192>}, {pipeline_mode = #tpu.pipeline_mode<synchronous>, transform_indices = @transform_28, window_bounds = array<i64: 2, 64, 64>}, {pipeline_mode = #tpu.pipeline_mode<synchronous>, transform_indices = @transform_29, window_bounds = array<i64: 2, 1, 64>}, {pipeline_mode = #tpu.pipeline_mode<synchronous>, transform_indices = @transform_30, window_bounds = array<i64: 2, 1, 64>}, {pipeline_mode = #tpu.pipeline_mode<synchronous>, transform_indices = @transform_31, window_bounds = array<i64: 2, 1, 64>}, {pipeline_mode = #tpu.pipeline_mode<synchronous>, transform_indices = @transform_32, window_bounds = array<i64: 2, 64, 128>}, {pipeline_mode = #tpu.pipeline_mode<synchronous>, transform_indices = @transform_33, window_bounds = array<i64: 2, 1, 128>}, {pipeline_mode = #tpu.pipeline_mode<synchronous>, transform_indices = @transform_34, window_bounds = array<i64: 2, 128, 64>}, {pipeline_mode = #tpu.pipeline_mode<synchronous>, transform_indices = @transform_35, window_bounds = array<i64: 2, 1, 64>}, {pipeline_mode = #tpu.pipeline_mode<synchronous>, transform_indices = @transform_36, window_bounds = array<i64: 1, 135>}, {pipeline_mode = #tpu.pipeline_mode<synchronous>, transform_indices = @transform_37, window_bounds = array<i64: 1, 135>}, {pipeline_mode = #tpu.pipeline_mode<synchronous>, transform_indices = @transform_38, window_bounds = array<i64: 135, 39>}, {pipeline_mode = #tpu.pipeline_mode<synchronous>, transform_indices = @transform_39, window_bounds = array<i64: 1, 39>}, {pipeline_mode = #tpu.pipeline_mode<synchronous>, transform_indices = @transform_40, window_bounds = array<i64: 39, 2>}, {pipeline_mode = #tpu.pipeline_mode<synchronous>, transform_indices = @transform_41, window_bounds = array<i64: 1, 2>}, {transform_indices = @transform_42, window_bounds = array<i64: 2, 2>}]} {
    %c0 = arith.constant 0 : index
    %c0_0 = arith.constant 0 : index
    %c0_1 = arith.constant 0 : index
    %c0_2 = arith.constant 0 : index
    %0 = vector.load %arg1[%c0, %c0_0, %c0_1, %c0_2] : memref<2x2x16x50xf32, #tpu.memory_space<vmem>>, vector<2x2x16x50xf32>
    %1 = vector.extract_strided_slice %0 {offsets = [0, 0, 0, 0], sizes = [2, 1, 12, 50], strides = [1, 1, 1, 1]} : vector<2x2x16x50xf32> to vector<2x1x12x50xf32>
    %2 = vector.shape_cast %1 : vector<2x1x12x50xf32> to vector<2x12x50xf32>
    %3 = vector.extract_strided_slice %0 {offsets = [0, 0, 1, 0], sizes = [2, 1, 12, 50], strides = [1, 1, 1, 1]} : vector<2x2x16x50xf32> to vector<2x1x12x50xf32>
    %4 = vector.shape_cast %3 : vector<2x1x12x50xf32> to vector<2x12x50xf32>
    %5 = vector.extract_strided_slice %0 {offsets = [0, 0, 2, 0], sizes = [2, 1, 12, 50], strides = [1, 1, 1, 1]} : vector<2x2x16x50xf32> to vector<2x1x12x50xf32>
    %6 = vector.shape_cast %5 : vector<2x1x12x50xf32> to vector<2x12x50xf32>
    %7 = vector.extract_strided_slice %0 {offsets = [0, 0, 3, 0], sizes = [2, 1, 12, 50], strides = [1, 1, 1, 1]} : vector<2x2x16x50xf32> to vector<2x1x12x50xf32>
    %8 = vector.shape_cast %7 : vector<2x1x12x50xf32> to vector<2x12x50xf32>
    %9 = vector.extract_strided_slice %0 {offsets = [0, 0, 4, 0], sizes = [2, 1, 12, 50], strides = [1, 1, 1, 1]} : vector<2x2x16x50xf32> to vector<2x1x12x50xf32>
    %10 = vector.shape_cast %9 : vector<2x1x12x50xf32> to vector<2x12x50xf32>
    %11 = vector.extract_strided_slice %0 {offsets = [0, 1, 0, 0], sizes = [2, 1, 12, 50], strides = [1, 1, 1, 1]} : vector<2x2x16x50xf32> to vector<2x1x12x50xf32>
    %12 = vector.shape_cast %11 : vector<2x1x12x50xf32> to vector<2x12x50xf32>
    %13 = vector.extract_strided_slice %0 {offsets = [0, 1, 1, 0], sizes = [2, 1, 12, 50], strides = [1, 1, 1, 1]} : vector<2x2x16x50xf32> to vector<2x1x12x50xf32>
    %14 = vector.shape_cast %13 : vector<2x1x12x50xf32> to vector<2x12x50xf32>
    %15 = vector.extract_strided_slice %0 {offsets = [0, 1, 2, 0], sizes = [2, 1, 12, 50], strides = [1, 1, 1, 1]} : vector<2x2x16x50xf32> to vector<2x1x12x50xf32>
    %16 = vector.shape_cast %15 : vector<2x1x12x50xf32> to vector<2x12x50xf32>
    %17 = vector.extract_strided_slice %0 {offsets = [0, 1, 3, 0], sizes = [2, 1, 12, 50], strides = [1, 1, 1, 1]} : vector<2x2x16x50xf32> to vector<2x1x12x50xf32>
    %18 = vector.shape_cast %17 : vector<2x1x12x50xf32> to vector<2x12x50xf32>
    %19 = vector.extract_strided_slice %0 {offsets = [0, 1, 4, 0], sizes = [2, 1, 12, 50], strides = [1, 1, 1, 1]} : vector<2x2x16x50xf32> to vector<2x1x12x50xf32>
    %20 = vector.shape_cast %19 : vector<2x1x12x50xf32> to vector<2x12x50xf32>
    %21 = tpu.concatenate %2, %4, %6, %8, %10, %12, %14, %16, %18, %20 in 2 : vector<2x12x50xf32>, vector<2x12x50xf32>, vector<2x12x50xf32>, vector<2x12x50xf32>, vector<2x12x50xf32>, vector<2x12x50xf32>, vector<2x12x50xf32>, vector<2x12x50xf32>, vector<2x12x50xf32>, vector<2x12x50xf32> -> vector<2x12x500xf32>
    %cst = arith.constant 0.000000e+00 : f32
    %22 = vector.broadcast %cst : f32 to vector<2x4x500xf32>
    %23 = tpu.concatenate %21, %22 in 1 : vector<2x12x500xf32>, vector<2x4x500xf32> -> vector<2x16x500xf32>
    %24 = vector.shape_cast %23 : vector<2x16x500xf32> to vector<32x500xf32>
    %c0_3 = arith.constant 0 : index
    %c0_4 = arith.constant 0 : index
    %25 = vector.load %arg3[%c0_3, %c0_4] : memref<500x64xf32, #tpu.memory_space<vmem>>, vector<500x64xf32>
    %cst_5 = arith.constant dense<0.000000e+00> : vector<32x64xf32>
    %26 = tpu.matmul %24, %25, %cst_5 {dimension_numbers = #tpu.dot_dimension_numbers<[1], [0], [0], [1], [0, 0, 1, 1], [], []>} : vector<32x500xf32>, vector<500x64xf32>, vector<32x64xf32> -> vector<32x64xf32>
    %c0_6 = arith.constant 0 : index
    %c0_7 = arith.constant 0 : index
    %27 = vector.load %arg4[%c0_6, %c0_7] : memref<1x64xf32, #tpu.memory_space<vmem>>, vector<1x64xf32>
    %28 = vector.broadcast %27 : vector<1x64xf32> to vector<32x64xf32>
    %29 = arith.addf %26, %28 : vector<32x64xf32>
    %c0_8 = arith.constant 0 : index
    %c0_9 = arith.constant 0 : index
    %30 = vector.load %arg5[%c0_8, %c0_9] : memref<1x64xf32, #tpu.memory_space<vmem>>, vector<1x64xf32>
    %c0_10 = arith.constant 0 : index
    %c0_11 = arith.constant 0 : index
    %31 = vector.load %arg6[%c0_10, %c0_11] : memref<1x64xf32, #tpu.memory_space<vmem>>, vector<1x64xf32>
    %cst_12 = arith.constant dense<0.000000e+00> : vector<32xf32>
    %32 = vector.multi_reduction <add>, %29, %cst_12 [1] : vector<32x64xf32> to vector<32xf32>
    %33 = vector.shape_cast %32 : vector<32xf32> to vector<32x1xf32>
    %cst_13 = arith.constant 6.400000e+01 : f32
    %34 = vector.broadcast %cst_13 : f32 to vector<32x1xf32>
    %35 = arith.divf %33, %34 : vector<32x1xf32>
    %36 = vector.broadcast %35 : vector<32x1xf32> to vector<32x64xf32>
    %37 = arith.subf %29, %36 : vector<32x64xf32>
    %38 = arith.mulf %37, %37 : vector<32x64xf32>
    %cst_14 = arith.constant dense<0.000000e+00> : vector<32xf32>
    %39 = vector.multi_reduction <add>, %38, %cst_14 [1] : vector<32x64xf32> to vector<32xf32>
    %40 = vector.shape_cast %39 : vector<32xf32> to vector<32x1xf32>
    %cst_15 = arith.constant 6.400000e+01 : f32
    %41 = vector.broadcast %cst_15 : f32 to vector<32x1xf32>
    %42 = arith.divf %40, %41 : vector<32x1xf32>
    %cst_16 = arith.constant 9.99999974E-6 : f32
    %43 = vector.broadcast %cst_16 : f32 to vector<32x1xf32>
    %44 = arith.addf %42, %43 : vector<32x1xf32>
    %45 = math.rsqrt %44 : vector<32x1xf32>
    %46 = vector.broadcast %45 : vector<32x1xf32> to vector<32x64xf32>
    %47 = arith.mulf %37, %46 : vector<32x64xf32>
    %48 = vector.broadcast %30 : vector<1x64xf32> to vector<32x64xf32>
    %49 = arith.mulf %47, %48 : vector<32x64xf32>
    %50 = vector.broadcast %31 : vector<1x64xf32> to vector<32x64xf32>
    %51 = arith.addf %49, %50 : vector<32x64xf32>
    %52 = vector.shape_cast %51 : vector<32x64xf32> to vector<2x16x64xf32>
    %c0_17 = arith.constant 0 : index
    %c0_18 = arith.constant 0 : index
    %53 = vector.load %arg7[%c0_17, %c0_18] : memref<1x64xf32, #tpu.memory_space<vmem>>, vector<1x64xf32>
    %c0_19 = arith.constant 0 : index
    %c0_20 = arith.constant 0 : index
    %54 = vector.load %arg8[%c0_19, %c0_20] : memref<13x64xf32, #tpu.memory_space<vmem>>, vector<1x64xf32>
    %55 = arith.addf %53, %54 : vector<1x64xf32>
    %56 = vector.shape_cast %55 : vector<1x64xf32> to vector<1x1x64xf32>
    %57 = vector.shape_cast %56 : vector<1x1x64xf32> to vector<1x1x64xf32>
    %58 = vector.broadcast %57 : vector<1x1x64xf32> to vector<2x1x64xf32>
    %59 = vector.extract_strided_slice %52 {offsets = [0, 0, 0], sizes = [2, 12, 64], strides = [1, 1, 1]} : vector<2x16x64xf32> to vector<2x12x64xf32>
    %c1 = arith.constant 1 : index
    %c0_21 = arith.constant 0 : index
    %60 = vector.load %arg8[%c1, %c0_21] : memref<13x64xf32, #tpu.memory_space<vmem>>, vector<12x64xf32>
    %61 = vector.shape_cast %60 : vector<12x64xf32> to vector<1x12x64xf32>
    %62 = vector.broadcast %61 : vector<1x12x64xf32> to vector<2x12x64xf32>
    %63 = arith.addf %59, %62 : vector<2x12x64xf32>
    %cst_22 = arith.constant 0.000000e+00 : f32
    %64 = vector.broadcast %cst_22 : f32 to vector<2x3x64xf32>
    %65 = tpu.concatenate %58, %63, %64 in 1 : vector<2x1x64xf32>, vector<2x12x64xf32>, vector<2x3x64xf32> -> vector<2x16x64xf32>
    %66 = vector.shape_cast %65 : vector<2x16x64xf32> to vector<32x64xf32>
    %67 = tpu.iota {dimensions = array<i32: 2>} : vector<1x16x16xi32>
    %c13_i32 = arith.constant 13 : i32
    %68 = vector.broadcast %c13_i32 : i32 to vector<1x16x16xi32>
    %69 = arith.cmpi slt, %67, %68 : vector<1x16x16xi32>
    %cst_23 = arith.constant 0.000000e+00 : f32
    %cst_24 = arith.constant -1.000000e+30 : f32
    %70 = vector.broadcast %cst_23 : f32 to vector<1x16x16xf32>
    %71 = vector.broadcast %cst_24 : f32 to vector<1x16x16xf32>
    %72 = arith.select %69, %70, %71 : vector<1x16x16xi1>, vector<1x16x16xf32>
    %c0_25 = arith.constant 0 : index
    %c0_26 = arith.constant 0 : index
    %c0_27 = arith.constant 0 : index
    %73 = vector.load %arg9[%c0_25, %c0_26, %c0_27] : memref<2x1x64xf32, #tpu.memory_space<vmem>>, vector<1x1x64xf32>
    %74 = vector.shape_cast %73 : vector<1x1x64xf32> to vector<1x64xf32>
    %c0_28 = arith.constant 0 : index
    %c0_29 = arith.constant 0 : index
    %c0_30 = arith.constant 0 : index
    %75 = vector.load %arg10[%c0_28, %c0_29, %c0_30] : memref<2x1x64xf32, #tpu.memory_space<vmem>>, vector<1x1x64xf32>
    %76 = vector.shape_cast %75 : vector<1x1x64xf32> to vector<1x64xf32>
    %cst_31 = arith.constant dense<0.000000e+00> : vector<32xf32>
    %77 = vector.multi_reduction <add>, %66, %cst_31 [1] : vector<32x64xf32> to vector<32xf32>
    %78 = vector.shape_cast %77 : vector<32xf32> to vector<32x1xf32>
    %cst_32 = arith.constant 6.400000e+01 : f32
    %79 = vector.broadcast %cst_32 : f32 to vector<32x1xf32>
    %80 = arith.divf %78, %79 : vector<32x1xf32>
    %81 = vector.broadcast %80 : vector<32x1xf32> to vector<32x64xf32>
    %82 = arith.subf %66, %81 : vector<32x64xf32>
    %83 = arith.mulf %82, %82 : vector<32x64xf32>
    %cst_33 = arith.constant dense<0.000000e+00> : vector<32xf32>
    %84 = vector.multi_reduction <add>, %83, %cst_33 [1] : vector<32x64xf32> to vector<32xf32>
    %85 = vector.shape_cast %84 : vector<32xf32> to vector<32x1xf32>
    %cst_34 = arith.constant 6.400000e+01 : f32
    %86 = vector.broadcast %cst_34 : f32 to vector<32x1xf32>
    %87 = arith.divf %85, %86 : vector<32x1xf32>
    %cst_35 = arith.constant 9.99999974E-6 : f32
    %88 = vector.broadcast %cst_35 : f32 to vector<32x1xf32>
    %89 = arith.addf %87, %88 : vector<32x1xf32>
    %90 = math.rsqrt %89 : vector<32x1xf32>
    %91 = vector.broadcast %90 : vector<32x1xf32> to vector<32x64xf32>
    %92 = arith.mulf %82, %91 : vector<32x64xf32>
    %93 = vector.broadcast %74 : vector<1x64xf32> to vector<32x64xf32>
    %94 = arith.mulf %92, %93 : vector<32x64xf32>
    %95 = vector.broadcast %76 : vector<1x64xf32> to vector<32x64xf32>
    %96 = arith.addf %94, %95 : vector<32x64xf32>
    %97 = arith.truncf %96 : vector<32x64xf32> to vector<32x64xbf16>
    %c0_36 = arith.constant 0 : index
    %c0_37 = arith.constant 0 : index
    %c0_38 = arith.constant 0 : index
    %98 = vector.load %arg11[%c0_36, %c0_37, %c0_38] : memref<2x64x192xbf16, #tpu.memory_space<vmem>>, vector<1x64x192xbf16>
    %99 = vector.shape_cast %98 : vector<1x64x192xbf16> to vector<64x192xbf16>
    %cst_39 = arith.constant dense<0.000000e+00> : vector<32x192xf32>
    %100 = tpu.matmul %97, %99, %cst_39 {dimension_numbers = #tpu.dot_dimension_numbers<[1], [0], [0], [1], [0, 0, 1, 1], [], []>} : vector<32x64xbf16>, vector<64x192xbf16>, vector<32x192xf32> -> vector<32x192xf32>
    %101 = vector.shape_cast %100 : vector<32x192xf32> to vector<2x16x192xf32>
    %102 = vector.extract_strided_slice %101 {offsets = [0, 0, 0], sizes = [2, 16, 16], strides = [1, 1, 1]} : vector<2x16x192xf32> to vector<2x16x16xf32>
    %103 = vector.extract_strided_slice %101 {offsets = [0, 0, 16], sizes = [2, 16, 16], strides = [1, 1, 1]} : vector<2x16x192xf32> to vector<2x16x16xf32>
    %104 = vector.extract_strided_slice %101 {offsets = [0, 0, 32], sizes = [2, 16, 16], strides = [1, 1, 1]} : vector<2x16x192xf32> to vector<2x16x16xf32>
    %105 = vector.extract_strided_slice %101 {offsets = [0, 0, 48], sizes = [2, 16, 16], strides = [1, 1, 1]} : vector<2x16x192xf32> to vector<2x16x16xf32>
    %106 = tpu.concatenate %102, %103, %104, %105 in 0 : vector<2x16x16xf32>, vector<2x16x16xf32>, vector<2x16x16xf32>, vector<2x16x16xf32> -> vector<8x16x16xf32>
    %107 = arith.truncf %106 : vector<8x16x16xf32> to vector<8x16x16xbf16>
    %108 = vector.extract_strided_slice %101 {offsets = [0, 0, 64], sizes = [2, 16, 16], strides = [1, 1, 1]} : vector<2x16x192xf32> to vector<2x16x16xf32>
    %109 = vector.extract_strided_slice %101 {offsets = [0, 0, 80], sizes = [2, 16, 16], strides = [1, 1, 1]} : vector<2x16x192xf32> to vector<2x16x16xf32>
    %110 = vector.extract_strided_slice %101 {offsets = [0, 0, 96], sizes = [2, 16, 16], strides = [1, 1, 1]} : vector<2x16x192xf32> to vector<2x16x16xf32>
    %111 = vector.extract_strided_slice %101 {offsets = [0, 0, 112], sizes = [2, 16, 16], strides = [1, 1, 1]} : vector<2x16x192xf32> to vector<2x16x16xf32>
    %112 = tpu.concatenate %108, %109, %110, %111 in 0 : vector<2x16x16xf32>, vector<2x16x16xf32>, vector<2x16x16xf32>, vector<2x16x16xf32> -> vector<8x16x16xf32>
    %113 = arith.truncf %112 : vector<8x16x16xf32> to vector<8x16x16xbf16>
    %114 = vector.extract_strided_slice %101 {offsets = [0, 0, 128], sizes = [2, 16, 16], strides = [1, 1, 1]} : vector<2x16x192xf32> to vector<2x16x16xf32>
    %115 = vector.extract_strided_slice %101 {offsets = [0, 0, 144], sizes = [2, 16, 16], strides = [1, 1, 1]} : vector<2x16x192xf32> to vector<2x16x16xf32>
    %116 = vector.extract_strided_slice %101 {offsets = [0, 0, 160], sizes = [2, 16, 16], strides = [1, 1, 1]} : vector<2x16x192xf32> to vector<2x16x16xf32>
    %117 = vector.extract_strided_slice %101 {offsets = [0, 0, 176], sizes = [2, 16, 16], strides = [1, 1, 1]} : vector<2x16x192xf32> to vector<2x16x16xf32>
    %118 = tpu.concatenate %114, %115, %116, %117 in 0 : vector<2x16x16xf32>, vector<2x16x16xf32>, vector<2x16x16xf32>, vector<2x16x16xf32> -> vector<8x16x16xf32>
    %119 = arith.truncf %118 : vector<8x16x16xf32> to vector<8x16x16xbf16>
    %cst_40 = arith.constant dense<0.000000e+00> : vector<8x16x16xf32>
    %120 = tpu.matmul %107, %113, %cst_40 {dimension_numbers = #tpu.dot_dimension_numbers<[2], [2], [1], [1], [0, 0, 0, 1, 1, 1], [0], [0]>} : vector<8x16x16xbf16>, vector<8x16x16xbf16>, vector<8x16x16xf32> -> vector<8x16x16xf32>
    %cst_41 = arith.constant 2.500000e-01 : f32
    %121 = vector.broadcast %cst_41 : f32 to vector<8x16x16xf32>
    %122 = arith.mulf %120, %121 : vector<8x16x16xf32>
    %123 = vector.broadcast %72 : vector<1x16x16xf32> to vector<8x16x16xf32>
    %124 = arith.addf %122, %123 : vector<8x16x16xf32>
    %cst_42 = arith.constant dense<0xFF800000> : vector<8x16xf32>
    %125 = vector.multi_reduction <maximumf>, %124, %cst_42 [2] : vector<8x16x16xf32> to vector<8x16xf32>
    %126 = vector.shape_cast %125 : vector<8x16xf32> to vector<8x16x1xf32>
    %127 = vector.broadcast %126 : vector<8x16x1xf32> to vector<8x16x16xf32>
    %128 = arith.subf %124, %127 : vector<8x16x16xf32>
    %129 = math.exp %128 : vector<8x16x16xf32>
    %cst_43 = arith.constant dense<0.000000e+00> : vector<8x16xf32>
    %130 = vector.multi_reduction <add>, %129, %cst_43 [2] : vector<8x16x16xf32> to vector<8x16xf32>
    %131 = vector.shape_cast %130 : vector<8x16xf32> to vector<8x16x1xf32>
    %132 = tpu.reciprocal %131 {approx = true} : vector<8x16x1xf32> -> vector<8x16x1xf32>
    %133 = vector.broadcast %132 : vector<8x16x1xf32> to vector<8x16x16xf32>
    %134 = arith.mulf %129, %133 : vector<8x16x16xf32>
    %135 = arith.truncf %134 : vector<8x16x16xf32> to vector<8x16x16xbf16>
    %cst_44 = arith.constant dense<0.000000e+00> : vector<8x16x16xf32>
    %136 = tpu.matmul %135, %119, %cst_44 {dimension_numbers = #tpu.dot_dimension_numbers<[2], [1], [1], [2], [0, 0, 0, 1, 1, 2], [0], [0]>} : vector<8x16x16xbf16>, vector<8x16x16xbf16>, vector<8x16x16xf32> -> vector<8x16x16xf32>
    %137 = vector.extract_strided_slice %136 {offsets = [0, 0, 0], sizes = [2, 16, 16], strides = [1, 1, 1]} : vector<8x16x16xf32> to vector<2x16x16xf32>
    %138 = vector.extract_strided_slice %136 {offsets = [2, 0, 0], sizes = [2, 16, 16], strides = [1, 1, 1]} : vector<8x16x16xf32> to vector<2x16x16xf32>
    %139 = vector.extract_strided_slice %136 {offsets = [4, 0, 0], sizes = [2, 16, 16], strides = [1, 1, 1]} : vector<8x16x16xf32> to vector<2x16x16xf32>
    %140 = vector.extract_strided_slice %136 {offsets = [6, 0, 0], sizes = [2, 16, 16], strides = [1, 1, 1]} : vector<8x16x16xf32> to vector<2x16x16xf32>
    %141 = tpu.concatenate %137, %138, %139, %140 in 2 : vector<2x16x16xf32>, vector<2x16x16xf32>, vector<2x16x16xf32>, vector<2x16x16xf32> -> vector<2x16x64xf32>
    %142 = vector.shape_cast %141 : vector<2x16x64xf32> to vector<32x64xf32>
    %143 = arith.truncf %142 : vector<32x64xf32> to vector<32x64xbf16>
    %c0_45 = arith.constant 0 : index
    %c0_46 = arith.constant 0 : index
    %c0_47 = arith.constant 0 : index
    %144 = vector.load %arg12[%c0_45, %c0_46, %c0_47] : memref<2x64x64xbf16, #tpu.memory_space<vmem>>, vector<1x64x64xbf16>
    %145 = vector.shape_cast %144 : vector<1x64x64xbf16> to vector<64x64xbf16>
    %cst_48 = arith.constant dense<0.000000e+00> : vector<32x64xf32>
    %146 = tpu.matmul %143, %145, %cst_48 {dimension_numbers = #tpu.dot_dimension_numbers<[1], [0], [0], [1], [0, 0, 1, 1], [], []>} : vector<32x64xbf16>, vector<64x64xbf16>, vector<32x64xf32> -> vector<32x64xf32>
    %147 = arith.addf %66, %146 : vector<32x64xf32>
    %c0_49 = arith.constant 0 : index
    %c0_50 = arith.constant 0 : index
    %c0_51 = arith.constant 0 : index
    %148 = vector.load %arg13[%c0_49, %c0_50, %c0_51] : memref<2x1x64xf32, #tpu.memory_space<vmem>>, vector<1x1x64xf32>
    %149 = vector.shape_cast %148 : vector<1x1x64xf32> to vector<1x64xf32>
    %150 = vector.broadcast %149 : vector<1x64xf32> to vector<32x64xf32>
    %151 = arith.addf %147, %150 : vector<32x64xf32>
    %c0_52 = arith.constant 0 : index
    %c0_53 = arith.constant 0 : index
    %c0_54 = arith.constant 0 : index
    %152 = vector.load %arg14[%c0_52, %c0_53, %c0_54] : memref<2x1x64xf32, #tpu.memory_space<vmem>>, vector<1x1x64xf32>
    %153 = vector.shape_cast %152 : vector<1x1x64xf32> to vector<1x64xf32>
    %c0_55 = arith.constant 0 : index
    %c0_56 = arith.constant 0 : index
    %c0_57 = arith.constant 0 : index
    %154 = vector.load %arg15[%c0_55, %c0_56, %c0_57] : memref<2x1x64xf32, #tpu.memory_space<vmem>>, vector<1x1x64xf32>
    %155 = vector.shape_cast %154 : vector<1x1x64xf32> to vector<1x64xf32>
    %cst_58 = arith.constant dense<0.000000e+00> : vector<32xf32>
    %156 = vector.multi_reduction <add>, %151, %cst_58 [1] : vector<32x64xf32> to vector<32xf32>
    %157 = vector.shape_cast %156 : vector<32xf32> to vector<32x1xf32>
    %cst_59 = arith.constant 6.400000e+01 : f32
    %158 = vector.broadcast %cst_59 : f32 to vector<32x1xf32>
    %159 = arith.divf %157, %158 : vector<32x1xf32>
    %160 = vector.broadcast %159 : vector<32x1xf32> to vector<32x64xf32>
    %161 = arith.subf %151, %160 : vector<32x64xf32>
    %162 = arith.mulf %161, %161 : vector<32x64xf32>
    %cst_60 = arith.constant dense<0.000000e+00> : vector<32xf32>
    %163 = vector.multi_reduction <add>, %162, %cst_60 [1] : vector<32x64xf32> to vector<32xf32>
    %164 = vector.shape_cast %163 : vector<32xf32> to vector<32x1xf32>
    %cst_61 = arith.constant 6.400000e+01 : f32
    %165 = vector.broadcast %cst_61 : f32 to vector<32x1xf32>
    %166 = arith.divf %164, %165 : vector<32x1xf32>
    %cst_62 = arith.constant 9.99999974E-6 : f32
    %167 = vector.broadcast %cst_62 : f32 to vector<32x1xf32>
    %168 = arith.addf %166, %167 : vector<32x1xf32>
    %169 = math.rsqrt %168 : vector<32x1xf32>
    %170 = vector.broadcast %169 : vector<32x1xf32> to vector<32x64xf32>
    %171 = arith.mulf %161, %170 : vector<32x64xf32>
    %172 = vector.broadcast %153 : vector<1x64xf32> to vector<32x64xf32>
    %173 = arith.mulf %171, %172 : vector<32x64xf32>
    %174 = vector.broadcast %155 : vector<1x64xf32> to vector<32x64xf32>
    %175 = arith.addf %173, %174 : vector<32x64xf32>
    %176 = arith.truncf %175 : vector<32x64xf32> to vector<32x64xbf16>
    %c0_63 = arith.constant 0 : index
    %c0_64 = arith.constant 0 : index
    %c0_65 = arith.constant 0 : index
    %177 = vector.load %arg16[%c0_63, %c0_64, %c0_65] : memref<2x64x128xbf16, #tpu.memory_space<vmem>>, vector<1x64x128xbf16>
    %178 = vector.shape_cast %177 : vector<1x64x128xbf16> to vector<64x128xbf16>
    %cst_66 = arith.constant dense<0.000000e+00> : vector<32x128xf32>
    %179 = tpu.matmul %176, %178, %cst_66 {dimension_numbers = #tpu.dot_dimension_numbers<[1], [0], [0], [1], [0, 0, 1, 1], [], []>} : vector<32x64xbf16>, vector<64x128xbf16>, vector<32x128xf32> -> vector<32x128xf32>
    %c0_67 = arith.constant 0 : index
    %c0_68 = arith.constant 0 : index
    %c0_69 = arith.constant 0 : index
    %180 = vector.load %arg17[%c0_67, %c0_68, %c0_69] : memref<2x1x128xf32, #tpu.memory_space<vmem>>, vector<1x1x128xf32>
    %181 = vector.shape_cast %180 : vector<1x1x128xf32> to vector<1x128xf32>
    %182 = vector.broadcast %181 : vector<1x128xf32> to vector<32x128xf32>
    %183 = arith.addf %179, %182 : vector<32x128xf32>
    %cst_70 = arith.constant 5.000000e-01 : f32
    %184 = vector.broadcast %cst_70 : f32 to vector<32x128xf32>
    %185 = arith.mulf %184, %183 : vector<32x128xf32>
    %cst_71 = arith.constant 0.707106769 : f32
    %186 = vector.broadcast %cst_71 : f32 to vector<32x128xf32>
    %187 = arith.mulf %183, %186 : vector<32x128xf32>
    %188 = math.erf %187 : vector<32x128xf32>
    %cst_72 = arith.constant 1.000000e+00 : f32
    %189 = vector.broadcast %cst_72 : f32 to vector<32x128xf32>
    %190 = arith.addf %189, %188 : vector<32x128xf32>
    %191 = arith.mulf %185, %190 : vector<32x128xf32>
    %192 = arith.truncf %191 : vector<32x128xf32> to vector<32x128xbf16>
    %c0_73 = arith.constant 0 : index
    %c0_74 = arith.constant 0 : index
    %c0_75 = arith.constant 0 : index
    %193 = vector.load %arg18[%c0_73, %c0_74, %c0_75] : memref<2x128x64xbf16, #tpu.memory_space<vmem>>, vector<1x128x64xbf16>
    %194 = vector.shape_cast %193 : vector<1x128x64xbf16> to vector<128x64xbf16>
    %cst_76 = arith.constant dense<0.000000e+00> : vector<32x64xf32>
    %195 = tpu.matmul %192, %194, %cst_76 {dimension_numbers = #tpu.dot_dimension_numbers<[1], [0], [0], [1], [0, 0, 1, 1], [], []>} : vector<32x128xbf16>, vector<128x64xbf16>, vector<32x64xf32> -> vector<32x64xf32>
    %c0_77 = arith.constant 0 : index
    %c0_78 = arith.constant 0 : index
    %c0_79 = arith.constant 0 : index
    %196 = vector.load %arg19[%c0_77, %c0_78, %c0_79] : memref<2x1x64xf32, #tpu.memory_space<vmem>>, vector<1x1x64xf32>
    %197 = vector.shape_cast %196 : vector<1x1x64xf32> to vector<1x64xf32>
    %198 = vector.broadcast %197 : vector<1x64xf32> to vector<32x64xf32>
    %199 = arith.addf %195, %198 : vector<32x64xf32>
    %200 = arith.addf %151, %199 : vector<32x64xf32>
    %c1_80 = arith.constant 1 : index
    %c0_81 = arith.constant 0 : index
    %c0_82 = arith.constant 0 : index
    %201 = vector.load %arg9[%c1_80, %c0_81, %c0_82] : memref<2x1x64xf32, #tpu.memory_space<vmem>>, vector<1x1x64xf32>
    %202 = vector.shape_cast %201 : vector<1x1x64xf32> to vector<1x64xf32>
    %c1_83 = arith.constant 1 : index
    %c0_84 = arith.constant 0 : index
    %c0_85 = arith.constant 0 : index
    %203 = vector.load %arg10[%c1_83, %c0_84, %c0_85] : memref<2x1x64xf32, #tpu.memory_space<vmem>>, vector<1x1x64xf32>
    %204 = vector.shape_cast %203 : vector<1x1x64xf32> to vector<1x64xf32>
    %cst_86 = arith.constant dense<0.000000e+00> : vector<32xf32>
    %205 = vector.multi_reduction <add>, %200, %cst_86 [1] : vector<32x64xf32> to vector<32xf32>
    %206 = vector.shape_cast %205 : vector<32xf32> to vector<32x1xf32>
    %cst_87 = arith.constant 6.400000e+01 : f32
    %207 = vector.broadcast %cst_87 : f32 to vector<32x1xf32>
    %208 = arith.divf %206, %207 : vector<32x1xf32>
    %209 = vector.broadcast %208 : vector<32x1xf32> to vector<32x64xf32>
    %210 = arith.subf %200, %209 : vector<32x64xf32>
    %211 = arith.mulf %210, %210 : vector<32x64xf32>
    %cst_88 = arith.constant dense<0.000000e+00> : vector<32xf32>
    %212 = vector.multi_reduction <add>, %211, %cst_88 [1] : vector<32x64xf32> to vector<32xf32>
    %213 = vector.shape_cast %212 : vector<32xf32> to vector<32x1xf32>
    %cst_89 = arith.constant 6.400000e+01 : f32
    %214 = vector.broadcast %cst_89 : f32 to vector<32x1xf32>
    %215 = arith.divf %213, %214 : vector<32x1xf32>
    %cst_90 = arith.constant 9.99999974E-6 : f32
    %216 = vector.broadcast %cst_90 : f32 to vector<32x1xf32>
    %217 = arith.addf %215, %216 : vector<32x1xf32>
    %218 = math.rsqrt %217 : vector<32x1xf32>
    %219 = vector.broadcast %218 : vector<32x1xf32> to vector<32x64xf32>
    %220 = arith.mulf %210, %219 : vector<32x64xf32>
    %221 = vector.broadcast %202 : vector<1x64xf32> to vector<32x64xf32>
    %222 = arith.mulf %220, %221 : vector<32x64xf32>
    %223 = vector.broadcast %204 : vector<1x64xf32> to vector<32x64xf32>
    %224 = arith.addf %222, %223 : vector<32x64xf32>
    %225 = arith.truncf %224 : vector<32x64xf32> to vector<32x64xbf16>
    %c1_91 = arith.constant 1 : index
    %c0_92 = arith.constant 0 : index
    %c0_93 = arith.constant 0 : index
    %226 = vector.load %arg11[%c1_91, %c0_92, %c0_93] : memref<2x64x192xbf16, #tpu.memory_space<vmem>>, vector<1x64x192xbf16>
    %227 = vector.shape_cast %226 : vector<1x64x192xbf16> to vector<64x192xbf16>
    %cst_94 = arith.constant dense<0.000000e+00> : vector<32x192xf32>
    %228 = tpu.matmul %225, %227, %cst_94 {dimension_numbers = #tpu.dot_dimension_numbers<[1], [0], [0], [1], [0, 0, 1, 1], [], []>} : vector<32x64xbf16>, vector<64x192xbf16>, vector<32x192xf32> -> vector<32x192xf32>
    %229 = vector.shape_cast %228 : vector<32x192xf32> to vector<2x16x192xf32>
    %230 = vector.extract_strided_slice %229 {offsets = [0, 0, 0], sizes = [2, 16, 16], strides = [1, 1, 1]} : vector<2x16x192xf32> to vector<2x16x16xf32>
    %231 = vector.extract_strided_slice %229 {offsets = [0, 0, 16], sizes = [2, 16, 16], strides = [1, 1, 1]} : vector<2x16x192xf32> to vector<2x16x16xf32>
    %232 = vector.extract_strided_slice %229 {offsets = [0, 0, 32], sizes = [2, 16, 16], strides = [1, 1, 1]} : vector<2x16x192xf32> to vector<2x16x16xf32>
    %233 = vector.extract_strided_slice %229 {offsets = [0, 0, 48], sizes = [2, 16, 16], strides = [1, 1, 1]} : vector<2x16x192xf32> to vector<2x16x16xf32>
    %234 = tpu.concatenate %230, %231, %232, %233 in 0 : vector<2x16x16xf32>, vector<2x16x16xf32>, vector<2x16x16xf32>, vector<2x16x16xf32> -> vector<8x16x16xf32>
    %235 = arith.truncf %234 : vector<8x16x16xf32> to vector<8x16x16xbf16>
    %236 = vector.extract_strided_slice %229 {offsets = [0, 0, 64], sizes = [2, 16, 16], strides = [1, 1, 1]} : vector<2x16x192xf32> to vector<2x16x16xf32>
    %237 = vector.extract_strided_slice %229 {offsets = [0, 0, 80], sizes = [2, 16, 16], strides = [1, 1, 1]} : vector<2x16x192xf32> to vector<2x16x16xf32>
    %238 = vector.extract_strided_slice %229 {offsets = [0, 0, 96], sizes = [2, 16, 16], strides = [1, 1, 1]} : vector<2x16x192xf32> to vector<2x16x16xf32>
    %239 = vector.extract_strided_slice %229 {offsets = [0, 0, 112], sizes = [2, 16, 16], strides = [1, 1, 1]} : vector<2x16x192xf32> to vector<2x16x16xf32>
    %240 = tpu.concatenate %236, %237, %238, %239 in 0 : vector<2x16x16xf32>, vector<2x16x16xf32>, vector<2x16x16xf32>, vector<2x16x16xf32> -> vector<8x16x16xf32>
    %241 = arith.truncf %240 : vector<8x16x16xf32> to vector<8x16x16xbf16>
    %242 = vector.extract_strided_slice %229 {offsets = [0, 0, 128], sizes = [2, 16, 16], strides = [1, 1, 1]} : vector<2x16x192xf32> to vector<2x16x16xf32>
    %243 = vector.extract_strided_slice %229 {offsets = [0, 0, 144], sizes = [2, 16, 16], strides = [1, 1, 1]} : vector<2x16x192xf32> to vector<2x16x16xf32>
    %244 = vector.extract_strided_slice %229 {offsets = [0, 0, 160], sizes = [2, 16, 16], strides = [1, 1, 1]} : vector<2x16x192xf32> to vector<2x16x16xf32>
    %245 = vector.extract_strided_slice %229 {offsets = [0, 0, 176], sizes = [2, 16, 16], strides = [1, 1, 1]} : vector<2x16x192xf32> to vector<2x16x16xf32>
    %246 = tpu.concatenate %242, %243, %244, %245 in 0 : vector<2x16x16xf32>, vector<2x16x16xf32>, vector<2x16x16xf32>, vector<2x16x16xf32> -> vector<8x16x16xf32>
    %247 = arith.truncf %246 : vector<8x16x16xf32> to vector<8x16x16xbf16>
    %cst_95 = arith.constant dense<0.000000e+00> : vector<8x16x16xf32>
    %248 = tpu.matmul %235, %241, %cst_95 {dimension_numbers = #tpu.dot_dimension_numbers<[2], [2], [1], [1], [0, 0, 0, 1, 1, 1], [0], [0]>} : vector<8x16x16xbf16>, vector<8x16x16xbf16>, vector<8x16x16xf32> -> vector<8x16x16xf32>
    %cst_96 = arith.constant 2.500000e-01 : f32
    %249 = vector.broadcast %cst_96 : f32 to vector<8x16x16xf32>
    %250 = arith.mulf %248, %249 : vector<8x16x16xf32>
    %251 = vector.broadcast %72 : vector<1x16x16xf32> to vector<8x16x16xf32>
    %252 = arith.addf %250, %251 : vector<8x16x16xf32>
    %cst_97 = arith.constant dense<0xFF800000> : vector<8x16xf32>
    %253 = vector.multi_reduction <maximumf>, %252, %cst_97 [2] : vector<8x16x16xf32> to vector<8x16xf32>
    %254 = vector.shape_cast %253 : vector<8x16xf32> to vector<8x16x1xf32>
    %255 = vector.broadcast %254 : vector<8x16x1xf32> to vector<8x16x16xf32>
    %256 = arith.subf %252, %255 : vector<8x16x16xf32>
    %257 = math.exp %256 : vector<8x16x16xf32>
    %cst_98 = arith.constant dense<0.000000e+00> : vector<8x16xf32>
    %258 = vector.multi_reduction <add>, %257, %cst_98 [2] : vector<8x16x16xf32> to vector<8x16xf32>
    %259 = vector.shape_cast %258 : vector<8x16xf32> to vector<8x16x1xf32>
    %260 = tpu.reciprocal %259 {approx = true} : vector<8x16x1xf32> -> vector<8x16x1xf32>
    %261 = vector.broadcast %260 : vector<8x16x1xf32> to vector<8x16x16xf32>
    %262 = arith.mulf %257, %261 : vector<8x16x16xf32>
    %263 = arith.truncf %262 : vector<8x16x16xf32> to vector<8x16x16xbf16>
    %cst_99 = arith.constant dense<0.000000e+00> : vector<8x16x16xf32>
    %264 = tpu.matmul %263, %247, %cst_99 {dimension_numbers = #tpu.dot_dimension_numbers<[2], [1], [1], [2], [0, 0, 0, 1, 1, 2], [0], [0]>} : vector<8x16x16xbf16>, vector<8x16x16xbf16>, vector<8x16x16xf32> -> vector<8x16x16xf32>
    %265 = vector.extract_strided_slice %264 {offsets = [0, 0, 0], sizes = [2, 16, 16], strides = [1, 1, 1]} : vector<8x16x16xf32> to vector<2x16x16xf32>
    %266 = vector.extract_strided_slice %264 {offsets = [2, 0, 0], sizes = [2, 16, 16], strides = [1, 1, 1]} : vector<8x16x16xf32> to vector<2x16x16xf32>
    %267 = vector.extract_strided_slice %264 {offsets = [4, 0, 0], sizes = [2, 16, 16], strides = [1, 1, 1]} : vector<8x16x16xf32> to vector<2x16x16xf32>
    %268 = vector.extract_strided_slice %264 {offsets = [6, 0, 0], sizes = [2, 16, 16], strides = [1, 1, 1]} : vector<8x16x16xf32> to vector<2x16x16xf32>
    %269 = tpu.concatenate %265, %266, %267, %268 in 2 : vector<2x16x16xf32>, vector<2x16x16xf32>, vector<2x16x16xf32>, vector<2x16x16xf32> -> vector<2x16x64xf32>
    %270 = vector.shape_cast %269 : vector<2x16x64xf32> to vector<32x64xf32>
    %271 = arith.truncf %270 : vector<32x64xf32> to vector<32x64xbf16>
    %c1_100 = arith.constant 1 : index
    %c0_101 = arith.constant 0 : index
    %c0_102 = arith.constant 0 : index
    %272 = vector.load %arg12[%c1_100, %c0_101, %c0_102] : memref<2x64x64xbf16, #tpu.memory_space<vmem>>, vector<1x64x64xbf16>
    %273 = vector.shape_cast %272 : vector<1x64x64xbf16> to vector<64x64xbf16>
    %cst_103 = arith.constant dense<0.000000e+00> : vector<32x64xf32>
    %274 = tpu.matmul %271, %273, %cst_103 {dimension_numbers = #tpu.dot_dimension_numbers<[1], [0], [0], [1], [0, 0, 1, 1], [], []>} : vector<32x64xbf16>, vector<64x64xbf16>, vector<32x64xf32> -> vector<32x64xf32>
    %275 = arith.addf %200, %274 : vector<32x64xf32>
    %c1_104 = arith.constant 1 : index
    %c0_105 = arith.constant 0 : index
    %c0_106 = arith.constant 0 : index
    %276 = vector.load %arg13[%c1_104, %c0_105, %c0_106] : memref<2x1x64xf32, #tpu.memory_space<vmem>>, vector<1x1x64xf32>
    %277 = vector.shape_cast %276 : vector<1x1x64xf32> to vector<1x64xf32>
    %278 = vector.broadcast %277 : vector<1x64xf32> to vector<32x64xf32>
    %279 = arith.addf %275, %278 : vector<32x64xf32>
    %c1_107 = arith.constant 1 : index
    %c0_108 = arith.constant 0 : index
    %c0_109 = arith.constant 0 : index
    %280 = vector.load %arg14[%c1_107, %c0_108, %c0_109] : memref<2x1x64xf32, #tpu.memory_space<vmem>>, vector<1x1x64xf32>
    %281 = vector.shape_cast %280 : vector<1x1x64xf32> to vector<1x64xf32>
    %c1_110 = arith.constant 1 : index
    %c0_111 = arith.constant 0 : index
    %c0_112 = arith.constant 0 : index
    %282 = vector.load %arg15[%c1_110, %c0_111, %c0_112] : memref<2x1x64xf32, #tpu.memory_space<vmem>>, vector<1x1x64xf32>
    %283 = vector.shape_cast %282 : vector<1x1x64xf32> to vector<1x64xf32>
    %cst_113 = arith.constant dense<0.000000e+00> : vector<32xf32>
    %284 = vector.multi_reduction <add>, %279, %cst_113 [1] : vector<32x64xf32> to vector<32xf32>
    %285 = vector.shape_cast %284 : vector<32xf32> to vector<32x1xf32>
    %cst_114 = arith.constant 6.400000e+01 : f32
    %286 = vector.broadcast %cst_114 : f32 to vector<32x1xf32>
    %287 = arith.divf %285, %286 : vector<32x1xf32>
    %288 = vector.broadcast %287 : vector<32x1xf32> to vector<32x64xf32>
    %289 = arith.subf %279, %288 : vector<32x64xf32>
    %290 = arith.mulf %289, %289 : vector<32x64xf32>
    %cst_115 = arith.constant dense<0.000000e+00> : vector<32xf32>
    %291 = vector.multi_reduction <add>, %290, %cst_115 [1] : vector<32x64xf32> to vector<32xf32>
    %292 = vector.shape_cast %291 : vector<32xf32> to vector<32x1xf32>
    %cst_116 = arith.constant 6.400000e+01 : f32
    %293 = vector.broadcast %cst_116 : f32 to vector<32x1xf32>
    %294 = arith.divf %292, %293 : vector<32x1xf32>
    %cst_117 = arith.constant 9.99999974E-6 : f32
    %295 = vector.broadcast %cst_117 : f32 to vector<32x1xf32>
    %296 = arith.addf %294, %295 : vector<32x1xf32>
    %297 = math.rsqrt %296 : vector<32x1xf32>
    %298 = vector.broadcast %297 : vector<32x1xf32> to vector<32x64xf32>
    %299 = arith.mulf %289, %298 : vector<32x64xf32>
    %300 = vector.broadcast %281 : vector<1x64xf32> to vector<32x64xf32>
    %301 = arith.mulf %299, %300 : vector<32x64xf32>
    %302 = vector.broadcast %283 : vector<1x64xf32> to vector<32x64xf32>
    %303 = arith.addf %301, %302 : vector<32x64xf32>
    %304 = arith.truncf %303 : vector<32x64xf32> to vector<32x64xbf16>
    %c1_118 = arith.constant 1 : index
    %c0_119 = arith.constant 0 : index
    %c0_120 = arith.constant 0 : index
    %305 = vector.load %arg16[%c1_118, %c0_119, %c0_120] : memref<2x64x128xbf16, #tpu.memory_space<vmem>>, vector<1x64x128xbf16>
    %306 = vector.shape_cast %305 : vector<1x64x128xbf16> to vector<64x128xbf16>
    %cst_121 = arith.constant dense<0.000000e+00> : vector<32x128xf32>
    %307 = tpu.matmul %304, %306, %cst_121 {dimension_numbers = #tpu.dot_dimension_numbers<[1], [0], [0], [1], [0, 0, 1, 1], [], []>} : vector<32x64xbf16>, vector<64x128xbf16>, vector<32x128xf32> -> vector<32x128xf32>
    %c1_122 = arith.constant 1 : index
    %c0_123 = arith.constant 0 : index
    %c0_124 = arith.constant 0 : index
    %308 = vector.load %arg17[%c1_122, %c0_123, %c0_124] : memref<2x1x128xf32, #tpu.memory_space<vmem>>, vector<1x1x128xf32>
    %309 = vector.shape_cast %308 : vector<1x1x128xf32> to vector<1x128xf32>
    %310 = vector.broadcast %309 : vector<1x128xf32> to vector<32x128xf32>
    %311 = arith.addf %307, %310 : vector<32x128xf32>
    %cst_125 = arith.constant 5.000000e-01 : f32
    %312 = vector.broadcast %cst_125 : f32 to vector<32x128xf32>
    %313 = arith.mulf %312, %311 : vector<32x128xf32>
    %cst_126 = arith.constant 0.707106769 : f32
    %314 = vector.broadcast %cst_126 : f32 to vector<32x128xf32>
    %315 = arith.mulf %311, %314 : vector<32x128xf32>
    %316 = math.erf %315 : vector<32x128xf32>
    %cst_127 = arith.constant 1.000000e+00 : f32
    %317 = vector.broadcast %cst_127 : f32 to vector<32x128xf32>
    %318 = arith.addf %317, %316 : vector<32x128xf32>
    %319 = arith.mulf %313, %318 : vector<32x128xf32>
    %320 = arith.truncf %319 : vector<32x128xf32> to vector<32x128xbf16>
    %c1_128 = arith.constant 1 : index
    %c0_129 = arith.constant 0 : index
    %c0_130 = arith.constant 0 : index
    %321 = vector.load %arg18[%c1_128, %c0_129, %c0_130] : memref<2x128x64xbf16, #tpu.memory_space<vmem>>, vector<1x128x64xbf16>
    %322 = vector.shape_cast %321 : vector<1x128x64xbf16> to vector<128x64xbf16>
    %cst_131 = arith.constant dense<0.000000e+00> : vector<32x64xf32>
    %323 = tpu.matmul %320, %322, %cst_131 {dimension_numbers = #tpu.dot_dimension_numbers<[1], [0], [0], [1], [0, 0, 1, 1], [], []>} : vector<32x128xbf16>, vector<128x64xbf16>, vector<32x64xf32> -> vector<32x64xf32>
    %c1_132 = arith.constant 1 : index
    %c0_133 = arith.constant 0 : index
    %c0_134 = arith.constant 0 : index
    %324 = vector.load %arg19[%c1_132, %c0_133, %c0_134] : memref<2x1x64xf32, #tpu.memory_space<vmem>>, vector<1x1x64xf32>
    %325 = vector.shape_cast %324 : vector<1x1x64xf32> to vector<1x64xf32>
    %326 = vector.broadcast %325 : vector<1x64xf32> to vector<32x64xf32>
    %327 = arith.addf %323, %326 : vector<32x64xf32>
    %328 = arith.addf %279, %327 : vector<32x64xf32>
    %329 = vector.shape_cast %328 : vector<32x64xf32> to vector<2x16x64xf32>
    %330 = tpu.iota {dimensions = array<i32: 1>} : vector<1x16x1xi32>
    %c0_i32 = arith.constant 0 : i32
    %331 = vector.broadcast %c0_i32 : i32 to vector<1x16x1xi32>
    %332 = arith.cmpi eq, %330, %331 : vector<1x16x1xi32>
    %333 = arith.extui %332 : vector<1x16x1xi1> to vector<1x16x1xi32>
    %334 = arith.sitofp %333 : vector<1x16x1xi32> to vector<1x16x1xf32>
    %335 = vector.broadcast %334 : vector<1x16x1xf32> to vector<2x16x64xf32>
    %336 = arith.mulf %329, %335 : vector<2x16x64xf32>
    %cst_135 = arith.constant dense<0.000000e+00> : vector<2x64xf32>
    %337 = vector.multi_reduction <add>, %336, %cst_135 [1] : vector<2x16x64xf32> to vector<2x64xf32>
    %338 = vector.extract_strided_slice %0 {offsets = [0, 0, 0, 0], sizes = [2, 1, 16, 50], strides = [1, 1, 1, 1]} : vector<2x2x16x50xf32> to vector<2x1x16x50xf32>
    %339 = vector.shape_cast %338 : vector<2x1x16x50xf32> to vector<2x16x50xf32>
    %340 = vector.extract_strided_slice %0 {offsets = [0, 1, 0, 0], sizes = [2, 1, 16, 50], strides = [1, 1, 1, 1]} : vector<2x2x16x50xf32> to vector<2x1x16x50xf32>
    %341 = vector.shape_cast %340 : vector<2x1x16x50xf32> to vector<2x16x50xf32>
    %342 = tpu.concatenate %339, %341 in 2 : vector<2x16x50xf32>, vector<2x16x50xf32> -> vector<2x16x100xf32>
    %343 = vector.shape_cast %342 : vector<2x16x100xf32> to vector<32x100xf32>
    %c0_136 = arith.constant 0 : index
    %c0_137 = arith.constant 0 : index
    %344 = vector.load %arg20[%c0_136, %c0_137] : memref<100x64xf32, #tpu.memory_space<vmem>>, vector<100x64xf32>
    %cst_138 = arith.constant dense<0.000000e+00> : vector<32x64xf32>
    %345 = tpu.matmul %343, %344, %cst_138 {dimension_numbers = #tpu.dot_dimension_numbers<[1], [0], [0], [1], [0, 0, 1, 1], [], []>} : vector<32x100xf32>, vector<100x64xf32>, vector<32x64xf32> -> vector<32x64xf32>
    %c0_139 = arith.constant 0 : index
    %c0_140 = arith.constant 0 : index
    %346 = vector.load %arg21[%c0_139, %c0_140] : memref<1x64xf32, #tpu.memory_space<vmem>>, vector<1x64xf32>
    %347 = vector.broadcast %346 : vector<1x64xf32> to vector<32x64xf32>
    %348 = arith.addf %345, %347 : vector<32x64xf32>
    %c0_141 = arith.constant 0 : index
    %c0_142 = arith.constant 0 : index
    %349 = vector.load %arg22[%c0_141, %c0_142] : memref<1x64xf32, #tpu.memory_space<vmem>>, vector<1x64xf32>
    %c0_143 = arith.constant 0 : index
    %c0_144 = arith.constant 0 : index
    %350 = vector.load %arg23[%c0_143, %c0_144] : memref<1x64xf32, #tpu.memory_space<vmem>>, vector<1x64xf32>
    %cst_145 = arith.constant dense<0.000000e+00> : vector<32xf32>
    %351 = vector.multi_reduction <add>, %348, %cst_145 [1] : vector<32x64xf32> to vector<32xf32>
    %352 = vector.shape_cast %351 : vector<32xf32> to vector<32x1xf32>
    %cst_146 = arith.constant 6.400000e+01 : f32
    %353 = vector.broadcast %cst_146 : f32 to vector<32x1xf32>
    %354 = arith.divf %352, %353 : vector<32x1xf32>
    %355 = vector.broadcast %354 : vector<32x1xf32> to vector<32x64xf32>
    %356 = arith.subf %348, %355 : vector<32x64xf32>
    %357 = arith.mulf %356, %356 : vector<32x64xf32>
    %cst_147 = arith.constant dense<0.000000e+00> : vector<32xf32>
    %358 = vector.multi_reduction <add>, %357, %cst_147 [1] : vector<32x64xf32> to vector<32xf32>
    %359 = vector.shape_cast %358 : vector<32xf32> to vector<32x1xf32>
    %cst_148 = arith.constant 6.400000e+01 : f32
    %360 = vector.broadcast %cst_148 : f32 to vector<32x1xf32>
    %361 = arith.divf %359, %360 : vector<32x1xf32>
    %cst_149 = arith.constant 9.99999974E-6 : f32
    %362 = vector.broadcast %cst_149 : f32 to vector<32x1xf32>
    %363 = arith.addf %361, %362 : vector<32x1xf32>
    %364 = math.rsqrt %363 : vector<32x1xf32>
    %365 = vector.broadcast %364 : vector<32x1xf32> to vector<32x64xf32>
    %366 = arith.mulf %356, %365 : vector<32x64xf32>
    %367 = vector.broadcast %349 : vector<1x64xf32> to vector<32x64xf32>
    %368 = arith.mulf %366, %367 : vector<32x64xf32>
    %369 = vector.broadcast %350 : vector<1x64xf32> to vector<32x64xf32>
    %370 = arith.addf %368, %369 : vector<32x64xf32>
    %371 = vector.shape_cast %370 : vector<32x64xf32> to vector<2x16x64xf32>
    %c0_150 = arith.constant 0 : index
    %c0_151 = arith.constant 0 : index
    %372 = vector.load %arg24[%c0_150, %c0_151] : memref<1x64xf32, #tpu.memory_space<vmem>>, vector<1x64xf32>
    %c0_152 = arith.constant 0 : index
    %c0_153 = arith.constant 0 : index
    %373 = vector.load %arg25[%c0_152, %c0_153] : memref<17x64xf32, #tpu.memory_space<vmem>>, vector<1x64xf32>
    %374 = arith.addf %372, %373 : vector<1x64xf32>
    %375 = vector.shape_cast %374 : vector<1x64xf32> to vector<1x1x64xf32>
    %376 = vector.shape_cast %375 : vector<1x1x64xf32> to vector<1x1x64xf32>
    %377 = vector.broadcast %376 : vector<1x1x64xf32> to vector<2x1x64xf32>
    %c1_154 = arith.constant 1 : index
    %c0_155 = arith.constant 0 : index
    %378 = vector.load %arg25[%c1_154, %c0_155] : memref<17x64xf32, #tpu.memory_space<vmem>>, vector<16x64xf32>
    %379 = vector.shape_cast %378 : vector<16x64xf32> to vector<1x16x64xf32>
    %380 = vector.broadcast %379 : vector<1x16x64xf32> to vector<2x16x64xf32>
    %381 = arith.addf %371, %380 : vector<2x16x64xf32>
    %cst_156 = arith.constant 0.000000e+00 : f32
    %382 = vector.broadcast %cst_156 : f32 to vector<2x7x64xf32>
    %383 = tpu.concatenate %377, %381, %382 in 1 : vector<2x1x64xf32>, vector<2x16x64xf32>, vector<2x7x64xf32> -> vector<2x24x64xf32>
    %384 = vector.shape_cast %383 : vector<2x24x64xf32> to vector<48x64xf32>
    %385 = tpu.iota {dimensions = array<i32: 2>} : vector<1x24x24xi32>
    %c17_i32 = arith.constant 17 : i32
    %386 = vector.broadcast %c17_i32 : i32 to vector<1x24x24xi32>
    %387 = arith.cmpi slt, %385, %386 : vector<1x24x24xi32>
    %cst_157 = arith.constant 0.000000e+00 : f32
    %cst_158 = arith.constant -1.000000e+30 : f32
    %388 = vector.broadcast %cst_157 : f32 to vector<1x24x24xf32>
    %389 = vector.broadcast %cst_158 : f32 to vector<1x24x24xf32>
    %390 = arith.select %387, %388, %389 : vector<1x24x24xi1>, vector<1x24x24xf32>
    %c0_159 = arith.constant 0 : index
    %c0_160 = arith.constant 0 : index
    %c0_161 = arith.constant 0 : index
    %391 = vector.load %arg26[%c0_159, %c0_160, %c0_161] : memref<2x1x64xf32, #tpu.memory_space<vmem>>, vector<1x1x64xf32>
    %392 = vector.shape_cast %391 : vector<1x1x64xf32> to vector<1x64xf32>
    %c0_162 = arith.constant 0 : index
    %c0_163 = arith.constant 0 : index
    %c0_164 = arith.constant 0 : index
    %393 = vector.load %arg27[%c0_162, %c0_163, %c0_164] : memref<2x1x64xf32, #tpu.memory_space<vmem>>, vector<1x1x64xf32>
    %394 = vector.shape_cast %393 : vector<1x1x64xf32> to vector<1x64xf32>
    %cst_165 = arith.constant dense<0.000000e+00> : vector<48xf32>
    %395 = vector.multi_reduction <add>, %384, %cst_165 [1] : vector<48x64xf32> to vector<48xf32>
    %396 = vector.shape_cast %395 : vector<48xf32> to vector<48x1xf32>
    %cst_166 = arith.constant 6.400000e+01 : f32
    %397 = vector.broadcast %cst_166 : f32 to vector<48x1xf32>
    %398 = arith.divf %396, %397 : vector<48x1xf32>
    %399 = vector.broadcast %398 : vector<48x1xf32> to vector<48x64xf32>
    %400 = arith.subf %384, %399 : vector<48x64xf32>
    %401 = arith.mulf %400, %400 : vector<48x64xf32>
    %cst_167 = arith.constant dense<0.000000e+00> : vector<48xf32>
    %402 = vector.multi_reduction <add>, %401, %cst_167 [1] : vector<48x64xf32> to vector<48xf32>
    %403 = vector.shape_cast %402 : vector<48xf32> to vector<48x1xf32>
    %cst_168 = arith.constant 6.400000e+01 : f32
    %404 = vector.broadcast %cst_168 : f32 to vector<48x1xf32>
    %405 = arith.divf %403, %404 : vector<48x1xf32>
    %cst_169 = arith.constant 9.99999974E-6 : f32
    %406 = vector.broadcast %cst_169 : f32 to vector<48x1xf32>
    %407 = arith.addf %405, %406 : vector<48x1xf32>
    %408 = math.rsqrt %407 : vector<48x1xf32>
    %409 = vector.broadcast %408 : vector<48x1xf32> to vector<48x64xf32>
    %410 = arith.mulf %400, %409 : vector<48x64xf32>
    %411 = vector.broadcast %392 : vector<1x64xf32> to vector<48x64xf32>
    %412 = arith.mulf %410, %411 : vector<48x64xf32>
    %413 = vector.broadcast %394 : vector<1x64xf32> to vector<48x64xf32>
    %414 = arith.addf %412, %413 : vector<48x64xf32>
    %415 = arith.truncf %414 : vector<48x64xf32> to vector<48x64xbf16>
    %c0_170 = arith.constant 0 : index
    %c0_171 = arith.constant 0 : index
    %c0_172 = arith.constant 0 : index
    %416 = vector.load %arg28[%c0_170, %c0_171, %c0_172] : memref<2x64x192xbf16, #tpu.memory_space<vmem>>, vector<1x64x192xbf16>
    %417 = vector.shape_cast %416 : vector<1x64x192xbf16> to vector<64x192xbf16>
    %cst_173 = arith.constant dense<0.000000e+00> : vector<48x192xf32>
    %418 = tpu.matmul %415, %417, %cst_173 {dimension_numbers = #tpu.dot_dimension_numbers<[1], [0], [0], [1], [0, 0, 1, 1], [], []>} : vector<48x64xbf16>, vector<64x192xbf16>, vector<48x192xf32> -> vector<48x192xf32>
    %419 = vector.shape_cast %418 : vector<48x192xf32> to vector<2x24x192xf32>
    %420 = vector.extract_strided_slice %419 {offsets = [0, 0, 0], sizes = [2, 24, 16], strides = [1, 1, 1]} : vector<2x24x192xf32> to vector<2x24x16xf32>
    %421 = vector.extract_strided_slice %419 {offsets = [0, 0, 16], sizes = [2, 24, 16], strides = [1, 1, 1]} : vector<2x24x192xf32> to vector<2x24x16xf32>
    %422 = vector.extract_strided_slice %419 {offsets = [0, 0, 32], sizes = [2, 24, 16], strides = [1, 1, 1]} : vector<2x24x192xf32> to vector<2x24x16xf32>
    %423 = vector.extract_strided_slice %419 {offsets = [0, 0, 48], sizes = [2, 24, 16], strides = [1, 1, 1]} : vector<2x24x192xf32> to vector<2x24x16xf32>
    %424 = tpu.concatenate %420, %421, %422, %423 in 0 : vector<2x24x16xf32>, vector<2x24x16xf32>, vector<2x24x16xf32>, vector<2x24x16xf32> -> vector<8x24x16xf32>
    %425 = arith.truncf %424 : vector<8x24x16xf32> to vector<8x24x16xbf16>
    %426 = vector.extract_strided_slice %419 {offsets = [0, 0, 64], sizes = [2, 24, 16], strides = [1, 1, 1]} : vector<2x24x192xf32> to vector<2x24x16xf32>
    %427 = vector.extract_strided_slice %419 {offsets = [0, 0, 80], sizes = [2, 24, 16], strides = [1, 1, 1]} : vector<2x24x192xf32> to vector<2x24x16xf32>
    %428 = vector.extract_strided_slice %419 {offsets = [0, 0, 96], sizes = [2, 24, 16], strides = [1, 1, 1]} : vector<2x24x192xf32> to vector<2x24x16xf32>
    %429 = vector.extract_strided_slice %419 {offsets = [0, 0, 112], sizes = [2, 24, 16], strides = [1, 1, 1]} : vector<2x24x192xf32> to vector<2x24x16xf32>
    %430 = tpu.concatenate %426, %427, %428, %429 in 0 : vector<2x24x16xf32>, vector<2x24x16xf32>, vector<2x24x16xf32>, vector<2x24x16xf32> -> vector<8x24x16xf32>
    %431 = arith.truncf %430 : vector<8x24x16xf32> to vector<8x24x16xbf16>
    %432 = vector.extract_strided_slice %419 {offsets = [0, 0, 128], sizes = [2, 24, 16], strides = [1, 1, 1]} : vector<2x24x192xf32> to vector<2x24x16xf32>
    %433 = vector.extract_strided_slice %419 {offsets = [0, 0, 144], sizes = [2, 24, 16], strides = [1, 1, 1]} : vector<2x24x192xf32> to vector<2x24x16xf32>
    %434 = vector.extract_strided_slice %419 {offsets = [0, 0, 160], sizes = [2, 24, 16], strides = [1, 1, 1]} : vector<2x24x192xf32> to vector<2x24x16xf32>
    %435 = vector.extract_strided_slice %419 {offsets = [0, 0, 176], sizes = [2, 24, 16], strides = [1, 1, 1]} : vector<2x24x192xf32> to vector<2x24x16xf32>
    %436 = tpu.concatenate %432, %433, %434, %435 in 0 : vector<2x24x16xf32>, vector<2x24x16xf32>, vector<2x24x16xf32>, vector<2x24x16xf32> -> vector<8x24x16xf32>
    %437 = arith.truncf %436 : vector<8x24x16xf32> to vector<8x24x16xbf16>
    %cst_174 = arith.constant dense<0.000000e+00> : vector<8x24x24xf32>
    %438 = tpu.matmul %425, %431, %cst_174 {dimension_numbers = #tpu.dot_dimension_numbers<[2], [2], [1], [1], [0, 0, 0, 1, 1, 1], [0], [0]>} : vector<8x24x16xbf16>, vector<8x24x16xbf16>, vector<8x24x24xf32> -> vector<8x24x24xf32>
    %cst_175 = arith.constant 2.500000e-01 : f32
    %439 = vector.broadcast %cst_175 : f32 to vector<8x24x24xf32>
    %440 = arith.mulf %438, %439 : vector<8x24x24xf32>
    %441 = vector.broadcast %390 : vector<1x24x24xf32> to vector<8x24x24xf32>
    %442 = arith.addf %440, %441 : vector<8x24x24xf32>
    %cst_176 = arith.constant dense<0xFF800000> : vector<8x24xf32>
    %443 = vector.multi_reduction <maximumf>, %442, %cst_176 [2] : vector<8x24x24xf32> to vector<8x24xf32>
    %444 = vector.shape_cast %443 : vector<8x24xf32> to vector<8x24x1xf32>
    %445 = vector.broadcast %444 : vector<8x24x1xf32> to vector<8x24x24xf32>
    %446 = arith.subf %442, %445 : vector<8x24x24xf32>
    %447 = math.exp %446 : vector<8x24x24xf32>
    %cst_177 = arith.constant dense<0.000000e+00> : vector<8x24xf32>
    %448 = vector.multi_reduction <add>, %447, %cst_177 [2] : vector<8x24x24xf32> to vector<8x24xf32>
    %449 = vector.shape_cast %448 : vector<8x24xf32> to vector<8x24x1xf32>
    %450 = tpu.reciprocal %449 {approx = true} : vector<8x24x1xf32> -> vector<8x24x1xf32>
    %451 = vector.broadcast %450 : vector<8x24x1xf32> to vector<8x24x24xf32>
    %452 = arith.mulf %447, %451 : vector<8x24x24xf32>
    %453 = arith.truncf %452 : vector<8x24x24xf32> to vector<8x24x24xbf16>
    %cst_178 = arith.constant dense<0.000000e+00> : vector<8x24x16xf32>
    %454 = tpu.matmul %453, %437, %cst_178 {dimension_numbers = #tpu.dot_dimension_numbers<[2], [1], [1], [2], [0, 0, 0, 1, 1, 2], [0], [0]>} : vector<8x24x24xbf16>, vector<8x24x16xbf16>, vector<8x24x16xf32> -> vector<8x24x16xf32>
    %455 = vector.extract_strided_slice %454 {offsets = [0, 0, 0], sizes = [2, 24, 16], strides = [1, 1, 1]} : vector<8x24x16xf32> to vector<2x24x16xf32>
    %456 = vector.extract_strided_slice %454 {offsets = [2, 0, 0], sizes = [2, 24, 16], strides = [1, 1, 1]} : vector<8x24x16xf32> to vector<2x24x16xf32>
    %457 = vector.extract_strided_slice %454 {offsets = [4, 0, 0], sizes = [2, 24, 16], strides = [1, 1, 1]} : vector<8x24x16xf32> to vector<2x24x16xf32>
    %458 = vector.extract_strided_slice %454 {offsets = [6, 0, 0], sizes = [2, 24, 16], strides = [1, 1, 1]} : vector<8x24x16xf32> to vector<2x24x16xf32>
    %459 = tpu.concatenate %455, %456, %457, %458 in 2 : vector<2x24x16xf32>, vector<2x24x16xf32>, vector<2x24x16xf32>, vector<2x24x16xf32> -> vector<2x24x64xf32>
    %460 = vector.shape_cast %459 : vector<2x24x64xf32> to vector<48x64xf32>
    %461 = arith.truncf %460 : vector<48x64xf32> to vector<48x64xbf16>
    %c0_179 = arith.constant 0 : index
    %c0_180 = arith.constant 0 : index
    %c0_181 = arith.constant 0 : index
    %462 = vector.load %arg29[%c0_179, %c0_180, %c0_181] : memref<2x64x64xbf16, #tpu.memory_space<vmem>>, vector<1x64x64xbf16>
    %463 = vector.shape_cast %462 : vector<1x64x64xbf16> to vector<64x64xbf16>
    %cst_182 = arith.constant dense<0.000000e+00> : vector<48x64xf32>
    %464 = tpu.matmul %461, %463, %cst_182 {dimension_numbers = #tpu.dot_dimension_numbers<[1], [0], [0], [1], [0, 0, 1, 1], [], []>} : vector<48x64xbf16>, vector<64x64xbf16>, vector<48x64xf32> -> vector<48x64xf32>
    %465 = arith.addf %384, %464 : vector<48x64xf32>
    %c0_183 = arith.constant 0 : index
    %c0_184 = arith.constant 0 : index
    %c0_185 = arith.constant 0 : index
    %466 = vector.load %arg30[%c0_183, %c0_184, %c0_185] : memref<2x1x64xf32, #tpu.memory_space<vmem>>, vector<1x1x64xf32>
    %467 = vector.shape_cast %466 : vector<1x1x64xf32> to vector<1x64xf32>
    %468 = vector.broadcast %467 : vector<1x64xf32> to vector<48x64xf32>
    %469 = arith.addf %465, %468 : vector<48x64xf32>
    %c0_186 = arith.constant 0 : index
    %c0_187 = arith.constant 0 : index
    %c0_188 = arith.constant 0 : index
    %470 = vector.load %arg31[%c0_186, %c0_187, %c0_188] : memref<2x1x64xf32, #tpu.memory_space<vmem>>, vector<1x1x64xf32>
    %471 = vector.shape_cast %470 : vector<1x1x64xf32> to vector<1x64xf32>
    %c0_189 = arith.constant 0 : index
    %c0_190 = arith.constant 0 : index
    %c0_191 = arith.constant 0 : index
    %472 = vector.load %arg32[%c0_189, %c0_190, %c0_191] : memref<2x1x64xf32, #tpu.memory_space<vmem>>, vector<1x1x64xf32>
    %473 = vector.shape_cast %472 : vector<1x1x64xf32> to vector<1x64xf32>
    %cst_192 = arith.constant dense<0.000000e+00> : vector<48xf32>
    %474 = vector.multi_reduction <add>, %469, %cst_192 [1] : vector<48x64xf32> to vector<48xf32>
    %475 = vector.shape_cast %474 : vector<48xf32> to vector<48x1xf32>
    %cst_193 = arith.constant 6.400000e+01 : f32
    %476 = vector.broadcast %cst_193 : f32 to vector<48x1xf32>
    %477 = arith.divf %475, %476 : vector<48x1xf32>
    %478 = vector.broadcast %477 : vector<48x1xf32> to vector<48x64xf32>
    %479 = arith.subf %469, %478 : vector<48x64xf32>
    %480 = arith.mulf %479, %479 : vector<48x64xf32>
    %cst_194 = arith.constant dense<0.000000e+00> : vector<48xf32>
    %481 = vector.multi_reduction <add>, %480, %cst_194 [1] : vector<48x64xf32> to vector<48xf32>
    %482 = vector.shape_cast %481 : vector<48xf32> to vector<48x1xf32>
    %cst_195 = arith.constant 6.400000e+01 : f32
    %483 = vector.broadcast %cst_195 : f32 to vector<48x1xf32>
    %484 = arith.divf %482, %483 : vector<48x1xf32>
    %cst_196 = arith.constant 9.99999974E-6 : f32
    %485 = vector.broadcast %cst_196 : f32 to vector<48x1xf32>
    %486 = arith.addf %484, %485 : vector<48x1xf32>
    %487 = math.rsqrt %486 : vector<48x1xf32>
    %488 = vector.broadcast %487 : vector<48x1xf32> to vector<48x64xf32>
    %489 = arith.mulf %479, %488 : vector<48x64xf32>
    %490 = vector.broadcast %471 : vector<1x64xf32> to vector<48x64xf32>
    %491 = arith.mulf %489, %490 : vector<48x64xf32>
    %492 = vector.broadcast %473 : vector<1x64xf32> to vector<48x64xf32>
    %493 = arith.addf %491, %492 : vector<48x64xf32>
    %494 = arith.truncf %493 : vector<48x64xf32> to vector<48x64xbf16>
    %c0_197 = arith.constant 0 : index
    %c0_198 = arith.constant 0 : index
    %c0_199 = arith.constant 0 : index
    %495 = vector.load %arg33[%c0_197, %c0_198, %c0_199] : memref<2x64x128xbf16, #tpu.memory_space<vmem>>, vector<1x64x128xbf16>
    %496 = vector.shape_cast %495 : vector<1x64x128xbf16> to vector<64x128xbf16>
    %cst_200 = arith.constant dense<0.000000e+00> : vector<48x128xf32>
    %497 = tpu.matmul %494, %496, %cst_200 {dimension_numbers = #tpu.dot_dimension_numbers<[1], [0], [0], [1], [0, 0, 1, 1], [], []>} : vector<48x64xbf16>, vector<64x128xbf16>, vector<48x128xf32> -> vector<48x128xf32>
    %c0_201 = arith.constant 0 : index
    %c0_202 = arith.constant 0 : index
    %c0_203 = arith.constant 0 : index
    %498 = vector.load %arg34[%c0_201, %c0_202, %c0_203] : memref<2x1x128xf32, #tpu.memory_space<vmem>>, vector<1x1x128xf32>
    %499 = vector.shape_cast %498 : vector<1x1x128xf32> to vector<1x128xf32>
    %500 = vector.broadcast %499 : vector<1x128xf32> to vector<48x128xf32>
    %501 = arith.addf %497, %500 : vector<48x128xf32>
    %cst_204 = arith.constant 5.000000e-01 : f32
    %502 = vector.broadcast %cst_204 : f32 to vector<48x128xf32>
    %503 = arith.mulf %502, %501 : vector<48x128xf32>
    %cst_205 = arith.constant 0.707106769 : f32
    %504 = vector.broadcast %cst_205 : f32 to vector<48x128xf32>
    %505 = arith.mulf %501, %504 : vector<48x128xf32>
    %506 = math.erf %505 : vector<48x128xf32>
    %cst_206 = arith.constant 1.000000e+00 : f32
    %507 = vector.broadcast %cst_206 : f32 to vector<48x128xf32>
    %508 = arith.addf %507, %506 : vector<48x128xf32>
    %509 = arith.mulf %503, %508 : vector<48x128xf32>
    %510 = arith.truncf %509 : vector<48x128xf32> to vector<48x128xbf16>
    %c0_207 = arith.constant 0 : index
    %c0_208 = arith.constant 0 : index
    %c0_209 = arith.constant 0 : index
    %511 = vector.load %arg35[%c0_207, %c0_208, %c0_209] : memref<2x128x64xbf16, #tpu.memory_space<vmem>>, vector<1x128x64xbf16>
    %512 = vector.shape_cast %511 : vector<1x128x64xbf16> to vector<128x64xbf16>
    %cst_210 = arith.constant dense<0.000000e+00> : vector<48x64xf32>
    %513 = tpu.matmul %510, %512, %cst_210 {dimension_numbers = #tpu.dot_dimension_numbers<[1], [0], [0], [1], [0, 0, 1, 1], [], []>} : vector<48x128xbf16>, vector<128x64xbf16>, vector<48x64xf32> -> vector<48x64xf32>
    %c0_211 = arith.constant 0 : index
    %c0_212 = arith.constant 0 : index
    %c0_213 = arith.constant 0 : index
    %514 = vector.load %arg36[%c0_211, %c0_212, %c0_213] : memref<2x1x64xf32, #tpu.memory_space<vmem>>, vector<1x1x64xf32>
    %515 = vector.shape_cast %514 : vector<1x1x64xf32> to vector<1x64xf32>
    %516 = vector.broadcast %515 : vector<1x64xf32> to vector<48x64xf32>
    %517 = arith.addf %513, %516 : vector<48x64xf32>
    %518 = arith.addf %469, %517 : vector<48x64xf32>
    %c1_214 = arith.constant 1 : index
    %c0_215 = arith.constant 0 : index
    %c0_216 = arith.constant 0 : index
    %519 = vector.load %arg26[%c1_214, %c0_215, %c0_216] : memref<2x1x64xf32, #tpu.memory_space<vmem>>, vector<1x1x64xf32>
    %520 = vector.shape_cast %519 : vector<1x1x64xf32> to vector<1x64xf32>
    %c1_217 = arith.constant 1 : index
    %c0_218 = arith.constant 0 : index
    %c0_219 = arith.constant 0 : index
    %521 = vector.load %arg27[%c1_217, %c0_218, %c0_219] : memref<2x1x64xf32, #tpu.memory_space<vmem>>, vector<1x1x64xf32>
    %522 = vector.shape_cast %521 : vector<1x1x64xf32> to vector<1x64xf32>
    %cst_220 = arith.constant dense<0.000000e+00> : vector<48xf32>
    %523 = vector.multi_reduction <add>, %518, %cst_220 [1] : vector<48x64xf32> to vector<48xf32>
    %524 = vector.shape_cast %523 : vector<48xf32> to vector<48x1xf32>
    %cst_221 = arith.constant 6.400000e+01 : f32
    %525 = vector.broadcast %cst_221 : f32 to vector<48x1xf32>
    %526 = arith.divf %524, %525 : vector<48x1xf32>
    %527 = vector.broadcast %526 : vector<48x1xf32> to vector<48x64xf32>
    %528 = arith.subf %518, %527 : vector<48x64xf32>
    %529 = arith.mulf %528, %528 : vector<48x64xf32>
    %cst_222 = arith.constant dense<0.000000e+00> : vector<48xf32>
    %530 = vector.multi_reduction <add>, %529, %cst_222 [1] : vector<48x64xf32> to vector<48xf32>
    %531 = vector.shape_cast %530 : vector<48xf32> to vector<48x1xf32>
    %cst_223 = arith.constant 6.400000e+01 : f32
    %532 = vector.broadcast %cst_223 : f32 to vector<48x1xf32>
    %533 = arith.divf %531, %532 : vector<48x1xf32>
    %cst_224 = arith.constant 9.99999974E-6 : f32
    %534 = vector.broadcast %cst_224 : f32 to vector<48x1xf32>
    %535 = arith.addf %533, %534 : vector<48x1xf32>
    %536 = math.rsqrt %535 : vector<48x1xf32>
    %537 = vector.broadcast %536 : vector<48x1xf32> to vector<48x64xf32>
    %538 = arith.mulf %528, %537 : vector<48x64xf32>
    %539 = vector.broadcast %520 : vector<1x64xf32> to vector<48x64xf32>
    %540 = arith.mulf %538, %539 : vector<48x64xf32>
    %541 = vector.broadcast %522 : vector<1x64xf32> to vector<48x64xf32>
    %542 = arith.addf %540, %541 : vector<48x64xf32>
    %543 = arith.truncf %542 : vector<48x64xf32> to vector<48x64xbf16>
    %c1_225 = arith.constant 1 : index
    %c0_226 = arith.constant 0 : index
    %c0_227 = arith.constant 0 : index
    %544 = vector.load %arg28[%c1_225, %c0_226, %c0_227] : memref<2x64x192xbf16, #tpu.memory_space<vmem>>, vector<1x64x192xbf16>
    %545 = vector.shape_cast %544 : vector<1x64x192xbf16> to vector<64x192xbf16>
    %cst_228 = arith.constant dense<0.000000e+00> : vector<48x192xf32>
    %546 = tpu.matmul %543, %545, %cst_228 {dimension_numbers = #tpu.dot_dimension_numbers<[1], [0], [0], [1], [0, 0, 1, 1], [], []>} : vector<48x64xbf16>, vector<64x192xbf16>, vector<48x192xf32> -> vector<48x192xf32>
    %547 = vector.shape_cast %546 : vector<48x192xf32> to vector<2x24x192xf32>
    %548 = vector.extract_strided_slice %547 {offsets = [0, 0, 0], sizes = [2, 24, 16], strides = [1, 1, 1]} : vector<2x24x192xf32> to vector<2x24x16xf32>
    %549 = vector.extract_strided_slice %547 {offsets = [0, 0, 16], sizes = [2, 24, 16], strides = [1, 1, 1]} : vector<2x24x192xf32> to vector<2x24x16xf32>
    %550 = vector.extract_strided_slice %547 {offsets = [0, 0, 32], sizes = [2, 24, 16], strides = [1, 1, 1]} : vector<2x24x192xf32> to vector<2x24x16xf32>
    %551 = vector.extract_strided_slice %547 {offsets = [0, 0, 48], sizes = [2, 24, 16], strides = [1, 1, 1]} : vector<2x24x192xf32> to vector<2x24x16xf32>
    %552 = tpu.concatenate %548, %549, %550, %551 in 0 : vector<2x24x16xf32>, vector<2x24x16xf32>, vector<2x24x16xf32>, vector<2x24x16xf32> -> vector<8x24x16xf32>
    %553 = arith.truncf %552 : vector<8x24x16xf32> to vector<8x24x16xbf16>
    %554 = vector.extract_strided_slice %547 {offsets = [0, 0, 64], sizes = [2, 24, 16], strides = [1, 1, 1]} : vector<2x24x192xf32> to vector<2x24x16xf32>
    %555 = vector.extract_strided_slice %547 {offsets = [0, 0, 80], sizes = [2, 24, 16], strides = [1, 1, 1]} : vector<2x24x192xf32> to vector<2x24x16xf32>
    %556 = vector.extract_strided_slice %547 {offsets = [0, 0, 96], sizes = [2, 24, 16], strides = [1, 1, 1]} : vector<2x24x192xf32> to vector<2x24x16xf32>
    %557 = vector.extract_strided_slice %547 {offsets = [0, 0, 112], sizes = [2, 24, 16], strides = [1, 1, 1]} : vector<2x24x192xf32> to vector<2x24x16xf32>
    %558 = tpu.concatenate %554, %555, %556, %557 in 0 : vector<2x24x16xf32>, vector<2x24x16xf32>, vector<2x24x16xf32>, vector<2x24x16xf32> -> vector<8x24x16xf32>
    %559 = arith.truncf %558 : vector<8x24x16xf32> to vector<8x24x16xbf16>
    %560 = vector.extract_strided_slice %547 {offsets = [0, 0, 128], sizes = [2, 24, 16], strides = [1, 1, 1]} : vector<2x24x192xf32> to vector<2x24x16xf32>
    %561 = vector.extract_strided_slice %547 {offsets = [0, 0, 144], sizes = [2, 24, 16], strides = [1, 1, 1]} : vector<2x24x192xf32> to vector<2x24x16xf32>
    %562 = vector.extract_strided_slice %547 {offsets = [0, 0, 160], sizes = [2, 24, 16], strides = [1, 1, 1]} : vector<2x24x192xf32> to vector<2x24x16xf32>
    %563 = vector.extract_strided_slice %547 {offsets = [0, 0, 176], sizes = [2, 24, 16], strides = [1, 1, 1]} : vector<2x24x192xf32> to vector<2x24x16xf32>
    %564 = tpu.concatenate %560, %561, %562, %563 in 0 : vector<2x24x16xf32>, vector<2x24x16xf32>, vector<2x24x16xf32>, vector<2x24x16xf32> -> vector<8x24x16xf32>
    %565 = arith.truncf %564 : vector<8x24x16xf32> to vector<8x24x16xbf16>
    %cst_229 = arith.constant dense<0.000000e+00> : vector<8x24x24xf32>
    %566 = tpu.matmul %553, %559, %cst_229 {dimension_numbers = #tpu.dot_dimension_numbers<[2], [2], [1], [1], [0, 0, 0, 1, 1, 1], [0], [0]>} : vector<8x24x16xbf16>, vector<8x24x16xbf16>, vector<8x24x24xf32> -> vector<8x24x24xf32>
    %cst_230 = arith.constant 2.500000e-01 : f32
    %567 = vector.broadcast %cst_230 : f32 to vector<8x24x24xf32>
    %568 = arith.mulf %566, %567 : vector<8x24x24xf32>
    %569 = vector.broadcast %390 : vector<1x24x24xf32> to vector<8x24x24xf32>
    %570 = arith.addf %568, %569 : vector<8x24x24xf32>
    %cst_231 = arith.constant dense<0xFF800000> : vector<8x24xf32>
    %571 = vector.multi_reduction <maximumf>, %570, %cst_231 [2] : vector<8x24x24xf32> to vector<8x24xf32>
    %572 = vector.shape_cast %571 : vector<8x24xf32> to vector<8x24x1xf32>
    %573 = vector.broadcast %572 : vector<8x24x1xf32> to vector<8x24x24xf32>
    %574 = arith.subf %570, %573 : vector<8x24x24xf32>
    %575 = math.exp %574 : vector<8x24x24xf32>
    %cst_232 = arith.constant dense<0.000000e+00> : vector<8x24xf32>
    %576 = vector.multi_reduction <add>, %575, %cst_232 [2] : vector<8x24x24xf32> to vector<8x24xf32>
    %577 = vector.shape_cast %576 : vector<8x24xf32> to vector<8x24x1xf32>
    %578 = tpu.reciprocal %577 {approx = true} : vector<8x24x1xf32> -> vector<8x24x1xf32>
    %579 = vector.broadcast %578 : vector<8x24x1xf32> to vector<8x24x24xf32>
    %580 = arith.mulf %575, %579 : vector<8x24x24xf32>
    %581 = arith.truncf %580 : vector<8x24x24xf32> to vector<8x24x24xbf16>
    %cst_233 = arith.constant dense<0.000000e+00> : vector<8x24x16xf32>
    %582 = tpu.matmul %581, %565, %cst_233 {dimension_numbers = #tpu.dot_dimension_numbers<[2], [1], [1], [2], [0, 0, 0, 1, 1, 2], [0], [0]>} : vector<8x24x24xbf16>, vector<8x24x16xbf16>, vector<8x24x16xf32> -> vector<8x24x16xf32>
    %583 = vector.extract_strided_slice %582 {offsets = [0, 0, 0], sizes = [2, 24, 16], strides = [1, 1, 1]} : vector<8x24x16xf32> to vector<2x24x16xf32>
    %584 = vector.extract_strided_slice %582 {offsets = [2, 0, 0], sizes = [2, 24, 16], strides = [1, 1, 1]} : vector<8x24x16xf32> to vector<2x24x16xf32>
    %585 = vector.extract_strided_slice %582 {offsets = [4, 0, 0], sizes = [2, 24, 16], strides = [1, 1, 1]} : vector<8x24x16xf32> to vector<2x24x16xf32>
    %586 = vector.extract_strided_slice %582 {offsets = [6, 0, 0], sizes = [2, 24, 16], strides = [1, 1, 1]} : vector<8x24x16xf32> to vector<2x24x16xf32>
    %587 = tpu.concatenate %583, %584, %585, %586 in 2 : vector<2x24x16xf32>, vector<2x24x16xf32>, vector<2x24x16xf32>, vector<2x24x16xf32> -> vector<2x24x64xf32>
    %588 = vector.shape_cast %587 : vector<2x24x64xf32> to vector<48x64xf32>
    %589 = arith.truncf %588 : vector<48x64xf32> to vector<48x64xbf16>
    %c1_234 = arith.constant 1 : index
    %c0_235 = arith.constant 0 : index
    %c0_236 = arith.constant 0 : index
    %590 = vector.load %arg29[%c1_234, %c0_235, %c0_236] : memref<2x64x64xbf16, #tpu.memory_space<vmem>>, vector<1x64x64xbf16>
    %591 = vector.shape_cast %590 : vector<1x64x64xbf16> to vector<64x64xbf16>
    %cst_237 = arith.constant dense<0.000000e+00> : vector<48x64xf32>
    %592 = tpu.matmul %589, %591, %cst_237 {dimension_numbers = #tpu.dot_dimension_numbers<[1], [0], [0], [1], [0, 0, 1, 1], [], []>} : vector<48x64xbf16>, vector<64x64xbf16>, vector<48x64xf32> -> vector<48x64xf32>
    %593 = arith.addf %518, %592 : vector<48x64xf32>
    %c1_238 = arith.constant 1 : index
    %c0_239 = arith.constant 0 : index
    %c0_240 = arith.constant 0 : index
    %594 = vector.load %arg30[%c1_238, %c0_239, %c0_240] : memref<2x1x64xf32, #tpu.memory_space<vmem>>, vector<1x1x64xf32>
    %595 = vector.shape_cast %594 : vector<1x1x64xf32> to vector<1x64xf32>
    %596 = vector.broadcast %595 : vector<1x64xf32> to vector<48x64xf32>
    %597 = arith.addf %593, %596 : vector<48x64xf32>
    %c1_241 = arith.constant 1 : index
    %c0_242 = arith.constant 0 : index
    %c0_243 = arith.constant 0 : index
    %598 = vector.load %arg31[%c1_241, %c0_242, %c0_243] : memref<2x1x64xf32, #tpu.memory_space<vmem>>, vector<1x1x64xf32>
    %599 = vector.shape_cast %598 : vector<1x1x64xf32> to vector<1x64xf32>
    %c1_244 = arith.constant 1 : index
    %c0_245 = arith.constant 0 : index
    %c0_246 = arith.constant 0 : index
    %600 = vector.load %arg32[%c1_244, %c0_245, %c0_246] : memref<2x1x64xf32, #tpu.memory_space<vmem>>, vector<1x1x64xf32>
    %601 = vector.shape_cast %600 : vector<1x1x64xf32> to vector<1x64xf32>
    %cst_247 = arith.constant dense<0.000000e+00> : vector<48xf32>
    %602 = vector.multi_reduction <add>, %597, %cst_247 [1] : vector<48x64xf32> to vector<48xf32>
    %603 = vector.shape_cast %602 : vector<48xf32> to vector<48x1xf32>
    %cst_248 = arith.constant 6.400000e+01 : f32
    %604 = vector.broadcast %cst_248 : f32 to vector<48x1xf32>
    %605 = arith.divf %603, %604 : vector<48x1xf32>
    %606 = vector.broadcast %605 : vector<48x1xf32> to vector<48x64xf32>
    %607 = arith.subf %597, %606 : vector<48x64xf32>
    %608 = arith.mulf %607, %607 : vector<48x64xf32>
    %cst_249 = arith.constant dense<0.000000e+00> : vector<48xf32>
    %609 = vector.multi_reduction <add>, %608, %cst_249 [1] : vector<48x64xf32> to vector<48xf32>
    %610 = vector.shape_cast %609 : vector<48xf32> to vector<48x1xf32>
    %cst_250 = arith.constant 6.400000e+01 : f32
    %611 = vector.broadcast %cst_250 : f32 to vector<48x1xf32>
    %612 = arith.divf %610, %611 : vector<48x1xf32>
    %cst_251 = arith.constant 9.99999974E-6 : f32
    %613 = vector.broadcast %cst_251 : f32 to vector<48x1xf32>
    %614 = arith.addf %612, %613 : vector<48x1xf32>
    %615 = math.rsqrt %614 : vector<48x1xf32>
    %616 = vector.broadcast %615 : vector<48x1xf32> to vector<48x64xf32>
    %617 = arith.mulf %607, %616 : vector<48x64xf32>
    %618 = vector.broadcast %599 : vector<1x64xf32> to vector<48x64xf32>
    %619 = arith.mulf %617, %618 : vector<48x64xf32>
    %620 = vector.broadcast %601 : vector<1x64xf32> to vector<48x64xf32>
    %621 = arith.addf %619, %620 : vector<48x64xf32>
    %622 = arith.truncf %621 : vector<48x64xf32> to vector<48x64xbf16>
    %c1_252 = arith.constant 1 : index
    %c0_253 = arith.constant 0 : index
    %c0_254 = arith.constant 0 : index
    %623 = vector.load %arg33[%c1_252, %c0_253, %c0_254] : memref<2x64x128xbf16, #tpu.memory_space<vmem>>, vector<1x64x128xbf16>
    %624 = vector.shape_cast %623 : vector<1x64x128xbf16> to vector<64x128xbf16>
    %cst_255 = arith.constant dense<0.000000e+00> : vector<48x128xf32>
    %625 = tpu.matmul %622, %624, %cst_255 {dimension_numbers = #tpu.dot_dimension_numbers<[1], [0], [0], [1], [0, 0, 1, 1], [], []>} : vector<48x64xbf16>, vector<64x128xbf16>, vector<48x128xf32> -> vector<48x128xf32>
    %c1_256 = arith.constant 1 : index
    %c0_257 = arith.constant 0 : index
    %c0_258 = arith.constant 0 : index
    %626 = vector.load %arg34[%c1_256, %c0_257, %c0_258] : memref<2x1x128xf32, #tpu.memory_space<vmem>>, vector<1x1x128xf32>
    %627 = vector.shape_cast %626 : vector<1x1x128xf32> to vector<1x128xf32>
    %628 = vector.broadcast %627 : vector<1x128xf32> to vector<48x128xf32>
    %629 = arith.addf %625, %628 : vector<48x128xf32>
    %cst_259 = arith.constant 5.000000e-01 : f32
    %630 = vector.broadcast %cst_259 : f32 to vector<48x128xf32>
    %631 = arith.mulf %630, %629 : vector<48x128xf32>
    %cst_260 = arith.constant 0.707106769 : f32
    %632 = vector.broadcast %cst_260 : f32 to vector<48x128xf32>
    %633 = arith.mulf %629, %632 : vector<48x128xf32>
    %634 = math.erf %633 : vector<48x128xf32>
    %cst_261 = arith.constant 1.000000e+00 : f32
    %635 = vector.broadcast %cst_261 : f32 to vector<48x128xf32>
    %636 = arith.addf %635, %634 : vector<48x128xf32>
    %637 = arith.mulf %631, %636 : vector<48x128xf32>
    %638 = arith.truncf %637 : vector<48x128xf32> to vector<48x128xbf16>
    %c1_262 = arith.constant 1 : index
    %c0_263 = arith.constant 0 : index
    %c0_264 = arith.constant 0 : index
    %639 = vector.load %arg35[%c1_262, %c0_263, %c0_264] : memref<2x128x64xbf16, #tpu.memory_space<vmem>>, vector<1x128x64xbf16>
    %640 = vector.shape_cast %639 : vector<1x128x64xbf16> to vector<128x64xbf16>
    %cst_265 = arith.constant dense<0.000000e+00> : vector<48x64xf32>
    %641 = tpu.matmul %638, %640, %cst_265 {dimension_numbers = #tpu.dot_dimension_numbers<[1], [0], [0], [1], [0, 0, 1, 1], [], []>} : vector<48x128xbf16>, vector<128x64xbf16>, vector<48x64xf32> -> vector<48x64xf32>
    %c1_266 = arith.constant 1 : index
    %c0_267 = arith.constant 0 : index
    %c0_268 = arith.constant 0 : index
    %642 = vector.load %arg36[%c1_266, %c0_267, %c0_268] : memref<2x1x64xf32, #tpu.memory_space<vmem>>, vector<1x1x64xf32>
    %643 = vector.shape_cast %642 : vector<1x1x64xf32> to vector<1x64xf32>
    %644 = vector.broadcast %643 : vector<1x64xf32> to vector<48x64xf32>
    %645 = arith.addf %641, %644 : vector<48x64xf32>
    %646 = arith.addf %597, %645 : vector<48x64xf32>
    %647 = vector.shape_cast %646 : vector<48x64xf32> to vector<2x24x64xf32>
    %648 = tpu.iota {dimensions = array<i32: 1>} : vector<1x24x1xi32>
    %c0_i32_269 = arith.constant 0 : i32
    %649 = vector.broadcast %c0_i32_269 : i32 to vector<1x24x1xi32>
    %650 = arith.cmpi eq, %648, %649 : vector<1x24x1xi32>
    %651 = arith.extui %650 : vector<1x24x1xi1> to vector<1x24x1xi32>
    %652 = arith.sitofp %651 : vector<1x24x1xi32> to vector<1x24x1xf32>
    %653 = vector.broadcast %652 : vector<1x24x1xf32> to vector<2x24x64xf32>
    %654 = arith.mulf %647, %653 : vector<2x24x64xf32>
    %cst_270 = arith.constant dense<0.000000e+00> : vector<2x64xf32>
    %655 = vector.multi_reduction <add>, %654, %cst_270 [1] : vector<2x24x64xf32> to vector<2x64xf32>
    %c0_271 = arith.constant 0 : index
    %c0_272 = arith.constant 0 : index
    %656 = vector.load %arg2[%c0_271, %c0_272] : memref<2x7xf32, #tpu.memory_space<vmem>>, vector<2x7xf32>
    %657 = tpu.concatenate %337, %655, %656 in 1 : vector<2x64xf32>, vector<2x64xf32>, vector<2x7xf32> -> vector<2x135xf32>
    %c0_273 = arith.constant 0 : index
    %c0_274 = arith.constant 0 : index
    %658 = vector.load %arg37[%c0_273, %c0_274] : memref<1x135xf32, #tpu.memory_space<vmem>>, vector<1x135xf32>
    %c0_275 = arith.constant 0 : index
    %c0_276 = arith.constant 0 : index
    %659 = vector.load %arg38[%c0_275, %c0_276] : memref<1x135xf32, #tpu.memory_space<vmem>>, vector<1x135xf32>
    %cst_277 = arith.constant dense<0.000000e+00> : vector<2xf32>
    %660 = vector.multi_reduction <add>, %657, %cst_277 [1] : vector<2x135xf32> to vector<2xf32>
    %661 = vector.shape_cast %660 : vector<2xf32> to vector<2x1xf32>
    %cst_278 = arith.constant 1.350000e+02 : f32
    %662 = vector.broadcast %cst_278 : f32 to vector<2x1xf32>
    %663 = arith.divf %661, %662 : vector<2x1xf32>
    %664 = vector.broadcast %663 : vector<2x1xf32> to vector<2x135xf32>
    %665 = arith.subf %657, %664 : vector<2x135xf32>
    %666 = arith.mulf %665, %665 : vector<2x135xf32>
    %cst_279 = arith.constant dense<0.000000e+00> : vector<2xf32>
    %667 = vector.multi_reduction <add>, %666, %cst_279 [1] : vector<2x135xf32> to vector<2xf32>
    %668 = vector.shape_cast %667 : vector<2xf32> to vector<2x1xf32>
    %cst_280 = arith.constant 1.350000e+02 : f32
    %669 = vector.broadcast %cst_280 : f32 to vector<2x1xf32>
    %670 = arith.divf %668, %669 : vector<2x1xf32>
    %cst_281 = arith.constant 9.99999974E-6 : f32
    %671 = vector.broadcast %cst_281 : f32 to vector<2x1xf32>
    %672 = arith.addf %670, %671 : vector<2x1xf32>
    %673 = math.rsqrt %672 : vector<2x1xf32>
    %674 = vector.broadcast %673 : vector<2x1xf32> to vector<2x135xf32>
    %675 = arith.mulf %665, %674 : vector<2x135xf32>
    %676 = vector.broadcast %658 : vector<1x135xf32> to vector<2x135xf32>
    %677 = arith.mulf %675, %676 : vector<2x135xf32>
    %678 = vector.broadcast %659 : vector<1x135xf32> to vector<2x135xf32>
    %679 = arith.addf %677, %678 : vector<2x135xf32>
    %680 = arith.truncf %679 : vector<2x135xf32> to vector<2x135xbf16>
    %c0_282 = arith.constant 0 : index
    %c0_283 = arith.constant 0 : index
    %681 = vector.load %arg39[%c0_282, %c0_283] : memref<135x39xbf16, #tpu.memory_space<vmem>>, vector<135x39xbf16>
    %cst_284 = arith.constant dense<0.000000e+00> : vector<2x39xf32>
    %682 = tpu.matmul %680, %681, %cst_284 {dimension_numbers = #tpu.dot_dimension_numbers<[1], [0], [0], [1], [0, 0, 1, 1], [], []>} : vector<2x135xbf16>, vector<135x39xbf16>, vector<2x39xf32> -> vector<2x39xf32>
    %c0_285 = arith.constant 0 : index
    %c0_286 = arith.constant 0 : index
    %683 = vector.load %arg40[%c0_285, %c0_286] : memref<1x39xf32, #tpu.memory_space<vmem>>, vector<1x39xf32>
    %684 = vector.broadcast %683 : vector<1x39xf32> to vector<2x39xf32>
    %685 = arith.addf %682, %684 : vector<2x39xf32>
    %686 = arith.truncf %685 : vector<2x39xf32> to vector<2x39xbf16>
    %c0_287 = arith.constant 0 : index
    %c0_288 = arith.constant 0 : index
    %687 = vector.load %arg41[%c0_287, %c0_288] : memref<39x2xbf16, #tpu.memory_space<vmem>>, vector<39x2xbf16>
    %cst_289 = arith.constant dense<0.000000e+00> : vector<2x2xf32>
    %688 = tpu.matmul %686, %687, %cst_289 {dimension_numbers = #tpu.dot_dimension_numbers<[1], [0], [0], [1], [0, 0, 1, 1], [], []>} : vector<2x39xbf16>, vector<39x2xbf16>, vector<2x2xf32> -> vector<2x2xf32>
    %c0_290 = arith.constant 0 : index
    %c0_291 = arith.constant 0 : index
    %689 = vector.load %arg42[%c0_290, %c0_291] : memref<1x2xf32, #tpu.memory_space<vmem>>, vector<1x2xf32>
    %690 = vector.broadcast %689 : vector<1x2xf32> to vector<2x2xf32>
    %691 = arith.addf %688, %690 : vector<2x2xf32>
    %c0_292 = arith.constant 0 : index
    %c0_293 = arith.constant 0 : index
    %692 = vector.load %arg43[%c0_292, %c0_293] : memref<2x2xf32, #tpu.memory_space<vmem>>, vector<2x2xf32>
    tpu.vector_store %arg43[%c0_292, %c0_293], %691 {strides = array<i32>} : memref<2x2xf32, #tpu.memory_space<vmem>>, vector<2x2xf32>,
    return
  }
  func.func @transform_0(%arg0: i32) -> (i32, i32, i32, i32) {
    %c0_i32 = arith.constant 0 : i32
    %c0_i32_0 = arith.constant 0 : i32
    %c0_i32_1 = arith.constant 0 : i32
    %c0_i32_2 = arith.constant 0 : i32
    return %arg0, %c0_i32, %c0_i32_0, %c0_i32_1 : i32, i32, i32, i32
  }
  func.func @transform_1(%arg0: i32) -> (i32, i32) {
    %c0_i32 = arith.constant 0 : i32
    %c0_i32_0 = arith.constant 0 : i32
    return %arg0, %c0_i32 : i32, i32
  }
  func.func @transform_2(%arg0: i32) -> (i32, i32) {
    %c0_i32 = arith.constant 0 : i32
    %c0_i32_0 = arith.constant 0 : i32
    %c0_i32_1 = arith.constant 0 : i32
    return %c0_i32, %c0_i32_0 : i32, i32
  }
  func.func @transform_3(%arg0: i32) -> (i32, i32) {
    %c0_i32 = arith.constant 0 : i32
    %c0_i32_0 = arith.constant 0 : i32
    %c0_i32_1 = arith.constant 0 : i32
    return %c0_i32, %c0_i32_0 : i32, i32
  }
  func.func @transform_4(%arg0: i32) -> (i32, i32) {
    %c0_i32 = arith.constant 0 : i32
    %c0_i32_0 = arith.constant 0 : i32
    %c0_i32_1 = arith.constant 0 : i32
    return %c0_i32, %c0_i32_0 : i32, i32
  }
  func.func @transform_5(%arg0: i32) -> (i32, i32) {
    %c0_i32 = arith.constant 0 : i32
    %c0_i32_0 = arith.constant 0 : i32
    %c0_i32_1 = arith.constant 0 : i32
    return %c0_i32, %c0_i32_0 : i32, i32
  }
  func.func @transform_6(%arg0: i32) -> (i32, i32) {
    %c0_i32 = arith.constant 0 : i32
    %c0_i32_0 = arith.constant 0 : i32
    %c0_i32_1 = arith.constant 0 : i32
    return %c0_i32, %c0_i32_0 : i32, i32
  }
  func.func @transform_7(%arg0: i32) -> (i32, i32) {
    %c0_i32 = arith.constant 0 : i32
    %c0_i32_0 = arith.constant 0 : i32
    %c0_i32_1 = arith.constant 0 : i32
    return %c0_i32, %c0_i32_0 : i32, i32
  }
  func.func @transform_8(%arg0: i32) -> (i32, i32, i32) {
    %c0_i32 = arith.constant 0 : i32
    %c0_i32_0 = arith.constant 0 : i32
    %c0_i32_1 = arith.constant 0 : i32
    %c0_i32_2 = arith.constant 0 : i32
    return %c0_i32, %c0_i32_0, %c0_i32_1 : i32, i32, i32
  }
  func.func @transform_9(%arg0: i32) -> (i32, i32, i32) {
    %c0_i32 = arith.constant 0 : i32
    %c0_i32_0 = arith.constant 0 : i32
    %c0_i32_1 = arith.constant 0 : i32
    %c0_i32_2 = arith.constant 0 : i32
    return %c0_i32, %c0_i32_0, %c0_i32_1 : i32, i32, i32
  }
  func.func @transform_10(%arg0: i32) -> (i32, i32, i32) {
    %c0_i32 = arith.constant 0 : i32
    %c0_i32_0 = arith.constant 0 : i32
    %c0_i32_1 = arith.constant 0 : i32
    %c0_i32_2 = arith.constant 0 : i32
    return %c0_i32, %c0_i32_0, %c0_i32_1 : i32, i32, i32
  }
  func.func @transform_11(%arg0: i32) -> (i32, i32, i32) {
    %c0_i32 = arith.constant 0 : i32
    %c0_i32_0 = arith.constant 0 : i32
    %c0_i32_1 = arith.constant 0 : i32
    %c0_i32_2 = arith.constant 0 : i32
    return %c0_i32, %c0_i32_0, %c0_i32_1 : i32, i32, i32
  }
  func.func @transform_12(%arg0: i32) -> (i32, i32, i32) {
    %c0_i32 = arith.constant 0 : i32
    %c0_i32_0 = arith.constant 0 : i32
    %c0_i32_1 = arith.constant 0 : i32
    %c0_i32_2 = arith.constant 0 : i32
    return %c0_i32, %c0_i32_0, %c0_i32_1 : i32, i32, i32
  }
  func.func @transform_13(%arg0: i32) -> (i32, i32, i32) {
    %c0_i32 = arith.constant 0 : i32
    %c0_i32_0 = arith.constant 0 : i32
    %c0_i32_1 = arith.constant 0 : i32
    %c0_i32_2 = arith.constant 0 : i32
    return %c0_i32, %c0_i32_0, %c0_i32_1 : i32, i32, i32
  }
  func.func @transform_14(%arg0: i32) -> (i32, i32, i32) {
    %c0_i32 = arith.constant 0 : i32
    %c0_i32_0 = arith.constant 0 : i32
    %c0_i32_1 = arith.constant 0 : i32
    %c0_i32_2 = arith.constant 0 : i32
    return %c0_i32, %c0_i32_0, %c0_i32_1 : i32, i32, i32
  }
  func.func @transform_15(%arg0: i32) -> (i32, i32, i32) {
    %c0_i32 = arith.constant 0 : i32
    %c0_i32_0 = arith.constant 0 : i32
    %c0_i32_1 = arith.constant 0 : i32
    %c0_i32_2 = arith.constant 0 : i32
    return %c0_i32, %c0_i32_0, %c0_i32_1 : i32, i32, i32
  }
  func.func @transform_16(%arg0: i32) -> (i32, i32, i32) {
    %c0_i32 = arith.constant 0 : i32
    %c0_i32_0 = arith.constant 0 : i32
    %c0_i32_1 = arith.constant 0 : i32
    %c0_i32_2 = arith.constant 0 : i32
    return %c0_i32, %c0_i32_0, %c0_i32_1 : i32, i32, i32
  }
  func.func @transform_17(%arg0: i32) -> (i32, i32, i32) {
    %c0_i32 = arith.constant 0 : i32
    %c0_i32_0 = arith.constant 0 : i32
    %c0_i32_1 = arith.constant 0 : i32
    %c0_i32_2 = arith.constant 0 : i32
    return %c0_i32, %c0_i32_0, %c0_i32_1 : i32, i32, i32
  }
  func.func @transform_18(%arg0: i32) -> (i32, i32, i32) {
    %c0_i32 = arith.constant 0 : i32
    %c0_i32_0 = arith.constant 0 : i32
    %c0_i32_1 = arith.constant 0 : i32
    %c0_i32_2 = arith.constant 0 : i32
    return %c0_i32, %c0_i32_0, %c0_i32_1 : i32, i32, i32
  }
  func.func @transform_19(%arg0: i32) -> (i32, i32) {
    %c0_i32 = arith.constant 0 : i32
    %c0_i32_0 = arith.constant 0 : i32
    %c0_i32_1 = arith.constant 0 : i32
    return %c0_i32, %c0_i32_0 : i32, i32
  }
  func.func @transform_20(%arg0: i32) -> (i32, i32) {
    %c0_i32 = arith.constant 0 : i32
    %c0_i32_0 = arith.constant 0 : i32
    %c0_i32_1 = arith.constant 0 : i32
    return %c0_i32, %c0_i32_0 : i32, i32
  }
  func.func @transform_21(%arg0: i32) -> (i32, i32) {
    %c0_i32 = arith.constant 0 : i32
    %c0_i32_0 = arith.constant 0 : i32
    %c0_i32_1 = arith.constant 0 : i32
    return %c0_i32, %c0_i32_0 : i32, i32
  }
  func.func @transform_22(%arg0: i32) -> (i32, i32) {
    %c0_i32 = arith.constant 0 : i32
    %c0_i32_0 = arith.constant 0 : i32
    %c0_i32_1 = arith.constant 0 : i32
    return %c0_i32, %c0_i32_0 : i32, i32
  }
  func.func @transform_23(%arg0: i32) -> (i32, i32) {
    %c0_i32 = arith.constant 0 : i32
    %c0_i32_0 = arith.constant 0 : i32
    %c0_i32_1 = arith.constant 0 : i32
    return %c0_i32, %c0_i32_0 : i32, i32
  }
  func.func @transform_24(%arg0: i32) -> (i32, i32) {
    %c0_i32 = arith.constant 0 : i32
    %c0_i32_0 = arith.constant 0 : i32
    %c0_i32_1 = arith.constant 0 : i32
    return %c0_i32, %c0_i32_0 : i32, i32
  }
  func.func @transform_25(%arg0: i32) -> (i32, i32, i32) {
    %c0_i32 = arith.constant 0 : i32
    %c0_i32_0 = arith.constant 0 : i32
    %c0_i32_1 = arith.constant 0 : i32
    %c0_i32_2 = arith.constant 0 : i32
    return %c0_i32, %c0_i32_0, %c0_i32_1 : i32, i32, i32
  }
  func.func @transform_26(%arg0: i32) -> (i32, i32, i32) {
    %c0_i32 = arith.constant 0 : i32
    %c0_i32_0 = arith.constant 0 : i32
    %c0_i32_1 = arith.constant 0 : i32
    %c0_i32_2 = arith.constant 0 : i32
    return %c0_i32, %c0_i32_0, %c0_i32_1 : i32, i32, i32
  }
  func.func @transform_27(%arg0: i32) -> (i32, i32, i32) {
    %c0_i32 = arith.constant 0 : i32
    %c0_i32_0 = arith.constant 0 : i32
    %c0_i32_1 = arith.constant 0 : i32
    %c0_i32_2 = arith.constant 0 : i32
    return %c0_i32, %c0_i32_0, %c0_i32_1 : i32, i32, i32
  }
  func.func @transform_28(%arg0: i32) -> (i32, i32, i32) {
    %c0_i32 = arith.constant 0 : i32
    %c0_i32_0 = arith.constant 0 : i32
    %c0_i32_1 = arith.constant 0 : i32
    %c0_i32_2 = arith.constant 0 : i32
    return %c0_i32, %c0_i32_0, %c0_i32_1 : i32, i32, i32
  }
  func.func @transform_29(%arg0: i32) -> (i32, i32, i32) {
    %c0_i32 = arith.constant 0 : i32
    %c0_i32_0 = arith.constant 0 : i32
    %c0_i32_1 = arith.constant 0 : i32
    %c0_i32_2 = arith.constant 0 : i32
    return %c0_i32, %c0_i32_0, %c0_i32_1 : i32, i32, i32
  }
  func.func @transform_30(%arg0: i32) -> (i32, i32, i32) {
    %c0_i32 = arith.constant 0 : i32
    %c0_i32_0 = arith.constant 0 : i32
    %c0_i32_1 = arith.constant 0 : i32
    %c0_i32_2 = arith.constant 0 : i32
    return %c0_i32, %c0_i32_0, %c0_i32_1 : i32, i32, i32
  }
  func.func @transform_31(%arg0: i32) -> (i32, i32, i32) {
    %c0_i32 = arith.constant 0 : i32
    %c0_i32_0 = arith.constant 0 : i32
    %c0_i32_1 = arith.constant 0 : i32
    %c0_i32_2 = arith.constant 0 : i32
    return %c0_i32, %c0_i32_0, %c0_i32_1 : i32, i32, i32
  }
  func.func @transform_32(%arg0: i32) -> (i32, i32, i32) {
    %c0_i32 = arith.constant 0 : i32
    %c0_i32_0 = arith.constant 0 : i32
    %c0_i32_1 = arith.constant 0 : i32
    %c0_i32_2 = arith.constant 0 : i32
    return %c0_i32, %c0_i32_0, %c0_i32_1 : i32, i32, i32
  }
  func.func @transform_33(%arg0: i32) -> (i32, i32, i32) {
    %c0_i32 = arith.constant 0 : i32
    %c0_i32_0 = arith.constant 0 : i32
    %c0_i32_1 = arith.constant 0 : i32
    %c0_i32_2 = arith.constant 0 : i32
    return %c0_i32, %c0_i32_0, %c0_i32_1 : i32, i32, i32
  }
  func.func @transform_34(%arg0: i32) -> (i32, i32, i32) {
    %c0_i32 = arith.constant 0 : i32
    %c0_i32_0 = arith.constant 0 : i32
    %c0_i32_1 = arith.constant 0 : i32
    %c0_i32_2 = arith.constant 0 : i32
    return %c0_i32, %c0_i32_0, %c0_i32_1 : i32, i32, i32
  }
  func.func @transform_35(%arg0: i32) -> (i32, i32, i32) {
    %c0_i32 = arith.constant 0 : i32
    %c0_i32_0 = arith.constant 0 : i32
    %c0_i32_1 = arith.constant 0 : i32
    %c0_i32_2 = arith.constant 0 : i32
    return %c0_i32, %c0_i32_0, %c0_i32_1 : i32, i32, i32
  }
  func.func @transform_36(%arg0: i32) -> (i32, i32) {
    %c0_i32 = arith.constant 0 : i32
    %c0_i32_0 = arith.constant 0 : i32
    %c0_i32_1 = arith.constant 0 : i32
    return %c0_i32, %c0_i32_0 : i32, i32
  }
  func.func @transform_37(%arg0: i32) -> (i32, i32) {
    %c0_i32 = arith.constant 0 : i32
    %c0_i32_0 = arith.constant 0 : i32
    %c0_i32_1 = arith.constant 0 : i32
    return %c0_i32, %c0_i32_0 : i32, i32
  }
  func.func @transform_38(%arg0: i32) -> (i32, i32) {
    %c0_i32 = arith.constant 0 : i32
    %c0_i32_0 = arith.constant 0 : i32
    %c0_i32_1 = arith.constant 0 : i32
    return %c0_i32, %c0_i32_0 : i32, i32
  }
  func.func @transform_39(%arg0: i32) -> (i32, i32) {
    %c0_i32 = arith.constant 0 : i32
    %c0_i32_0 = arith.constant 0 : i32
    %c0_i32_1 = arith.constant 0 : i32
    return %c0_i32, %c0_i32_0 : i32, i32
  }
  func.func @transform_40(%arg0: i32) -> (i32, i32) {
    %c0_i32 = arith.constant 0 : i32
    %c0_i32_0 = arith.constant 0 : i32
    %c0_i32_1 = arith.constant 0 : i32
    return %c0_i32, %c0_i32_0 : i32, i32
  }
  func.func @transform_41(%arg0: i32) -> (i32, i32) {
    %c0_i32 = arith.constant 0 : i32
    %c0_i32_0 = arith.constant 0 : i32
    %c0_i32_1 = arith.constant 0 : i32
    return %c0_i32, %c0_i32_0 : i32, i32
  }
  func.func @transform_42(%arg0: i32) -> (i32, i32) {
    %c0_i32 = arith.constant 0 : i32
    %c0_i32_0 = arith.constant 0 : i32
    return %arg0, %c0_i32 : i32, i32
  }
}

</mosaic_0001>

<bundles_post_ra>
// kernel: fnirs_t_forward.1
= control target key start
LH: loop header
LB: loop body
LE: loop exit
PB: predicated region body
PF: predicated region fallthrough
CT: control target
= control target key end

     0   :  { %s12033_s6 = smov 1   ;;  %s12034_s10 = smov 2   ;;  %s15143_s0 = inlined_call_operand.smem [shape: u32[43], index: -1, kind: input, shape index: {}] }
   0x1   :  { %s12104_s5 = sld [smem:[%s15143_s0]]   ;;  %s12035_s14 = smov 3  }
   0x2   :  { %s12109_s9 = sld [smem:[%s15143_s0 + %s12033_s6]]   ;;  %s12036_s18 = smov 4  }
   0x3   :  { %s12114_s13 = sld [smem:[%s15143_s0 + %s12034_s10]]   ;;  %s12037_s22 = smov 5  }
   0x4   :  { %s12119_s17 = sld [smem:[%s15143_s0 + %s12035_s14]]   ;;  %s12038_s26 = smov 6  }
   0x5   :  { %s12124_s21 = sld [smem:[%s15143_s0 + %s12036_s18]]   ;;  %s12039_s30 = smov 7  }
   0x6   :  { %s12129_s25 = sld [smem:[%s15143_s0 + %s12037_s22]]   ;;  %s12040_s4 = smov 8  }
   0x7   :  { %s12134_s29 = sld [smem:[%s15143_s0 + %s12038_s26]]   ;;  %s12041_s10 = smov 9  }
   0x8   :  { %15162 = sst [smem:[#allocation5_spill]] %s12109_s9  ;;  %s12042_s15 = smov 10  }
   0x9   :  { %s12139_s3 = sld [smem:[%s15143_s0 + %s12039_s30]]   ;;  %s12043_s20 = smov 11  }
   0xa   :  { %s12144_s8 = sld [smem:[%s15143_s0 + %s12040_s4]]   ;;  %s12044_s26 = smov 12  }
   0xb   :  { %s12149_s14 = sld [smem:[%s15143_s0 + %s12041_s10]]   ;;  %s12045_s1 = smov 13  }
   0xc   :  { %s12154_s19 = sld [smem:[%s15143_s0 + %s12042_s15]]   ;;  %s12046_s7 = smov 14  }
   0xd   :  { %s12159_s24 = sld [smem:[%s15143_s0 + %s12043_s20]]   ;;  %s12047_s15 = smov 15  }
   0xe   :  { %s12164_s30 = sld [smem:[%s15143_s0 + %s12044_s26]]   ;;  %s12048_s22 = smov 16  }
   0xf   :  { %s12169_s6 = sld [smem:[%s15143_s0 + %s12045_s1]]   ;;  %s12049_s28 = smov 17  }
  0x10   :  { %s12174_s12 = sld [smem:[%s15143_s0 + %s12046_s7]]   ;;  %s12050_s7 = smov 18  }
  0x11   :  { %s12179_s20 = sld [smem:[%s15143_s0 + %s12047_s15]]   ;;  %s12051_s15 = smov 19  }
  0x12   :  { %s12184_s27 = sld [smem:[%s15143_s0 + %s12048_s22]]   ;;  %s12052_s22 = smov 20  }
  0x13   :  { %s12189_s4 = sld [smem:[%s15143_s0 + %s12049_s28]]   ;;  %s12053_s28 = smov 21  }
  0x14   :  { %s12194_s9 = sld [smem:[%s15143_s0 + %s12050_s7]]   ;;  %s12054_s7 = smov 22  }
  0x16   :  { %15163 = sst [smem:[#allocation6_spill]] %s12174_s12 }
  0x17   :  { %s12199_s12 = sld [smem:[%s15143_s0 + %s12051_s15]]   ;;  %s12055_s15 = smov 23  }
  0x18   :  { %15164 = sst [smem:[#allocation7_spill]] %s12184_s27 }
  0x19   :  { %15165 = sst [smem:[#allocation8_spill]] %s12189_s4 }
  0x1a   :  { %15166 = sst [smem:[#allocation9_spill]] %s12194_s9 }
  0x1b   :  { %s12204_s27 = sld [smem:[%s15143_s0 + %s12052_s22]]   ;;  %s12056_s22 = smov 24  }
  0x1c   :  { %s12209_s4 = sld [smem:[%s15143_s0 + %s12053_s28]]   ;;  %s12057_s28 = smov 25  }
  0x1d   :  { %15167 = sst [smem:[#allocation10_spill]] %s12199_s12 }
  0x1e   :  { %s12214_s9 = sld [smem:[%s15143_s0 + %s12054_s7]]   ;;  %s12058_s7 = smov 26  }
  0x1f   :  { %s12219_s12 = sld [smem:[%s15143_s0 + %s12055_s15]]   ;;  %s12059_s15 = smov 27  }
  0x21   :  { %15168 = sst [smem:[#allocation11_spill]] %s12204_s27 }
  0x22   :  { %15169 = sst [smem:[#allocation12_spill]] %s12209_s4 }
  0x23   :  { %s12224_s27 = sld [smem:[%s15143_s0 + %s12056_s22]]   ;;  %s12060_s22 = smov 28  }
  0x24   :  { %15170 = sst [smem:[#allocation13_spill]] %s12214_s9 }
  0x25   :  { %15171 = sst [smem:[#allocation14_spill]] %s12219_s12 }
  0x26   :  { %s12229_s4 = sld [smem:[%s15143_s0 + %s12057_s28]]   ;;  %s12061_s28 = smov 29  }
  0x27   :  { %s12234_s9 = sld [smem:[%s15143_s0 + %s12058_s7]]   ;;  %s12062_s7 = smov 30  }
  0x28   :  { %s12239_s12 = sld [smem:[%s15143_s0 + %s12059_s15]]   ;;  %s12063_s15 = smov 31  }
  0x29   :  { %15172 = sst [smem:[#allocation15_spill]] %s12224_s27 }
  0x2a   :  { %s12244_s27 = sld [smem:[%s15143_s0 + %s12060_s22]]   ;;  %s12064_s22 = smov 32  }
  0x2c   :  { %15173 = sst [smem:[#allocation16_spill]] %s12229_s4 }
  0x2d   :  { %15174 = sst [smem:[#allocation17_spill]] %s12234_s9 }
  0x2e   :  { %15175 = sst [smem:[#allocation18_spill]] %s12239_s12 }
  0x2f   :  { %s12249_s4 = sld [smem:[%s15143_s0 + %s12061_s28]]   ;;  %s12065_s28 = smov 33  }
  0x30   :  { %15176 = sst [smem:[#allocation19_spill]] %s12244_s27 }
  0x31   :  { %s12254_s9 = sld [smem:[%s15143_s0 + %s12062_s7]]   ;;  %s12066_s7 = smov 34  }
  0x32   :  { %s12259_s12 = sld [smem:[%s15143_s0 + %s12063_s15]]   ;;  %s12067_s15 = smov 35  }
  0x33   :  { %s12264_s27 = sld [smem:[%s15143_s0 + %s12064_s22]]   ;;  %s12068_s22 = smov 36  }
  0x35   :  { %15177 = sst [smem:[#allocation20_spill]] %s12249_s4 }
  0x36   :  { %s12269_s4 = sld [smem:[%s15143_s0 + %s12065_s28]]   ;;  %s12069_s28 = smov 37  }
  0x37   :  { %15178 = sst [smem:[#allocation21_spill]] %s12254_s9 }
  0x38   :  { %15179 = sst [smem:[#allocation22_spill]] %s12259_s12 }
  0x39   :  { %15180 = sst [smem:[#allocation23_spill]] %s12264_s27 }
  0x3a   :  { %s12274_s9 = sld [smem:[%s15143_s0 + %s12066_s7]]   ;;  %s12070_s7 = smov 38  }
  0x3b   :  { %s12279_s12 = sld [smem:[%s15143_s0 + %s12067_s15]]   ;;  %s12071_s15 = smov 39  }
  0x3c   :  { %15181 = sst [smem:[#allocation24_spill]] %s12269_s4 }
  0x3d   :  { %s12284_s27 = sld [smem:[%s15143_s0 + %s12068_s22]]   ;;  %s12072_s22 = smov 40  }
  0x3e   :  { %s12289_s4 = sld [smem:[%s15143_s0 + %s12069_s28]]   ;;  %s12073_s28 = smov 41  }
  0x40   :  { %15182 = sst [smem:[#allocation25_spill]] %s12274_s9 }
  0x41   :  { %15183 = sst [smem:[#allocation26_spill]] %s12279_s12 }
  0x42   :  { %s12294_s9 = sld [smem:[%s15143_s0 + %s12070_s7]]   ;;  %s12074_s7 = smov 42  }
  0x43   :  { %15184 = sst [smem:[#allocation27_spill]] %s12284_s27 }
  0x44   :  { %15185 = sst [smem:[#allocation28_spill]] %s12289_s4 }
  0x45   :  { %s12299_s12 = sld [smem:[%s15143_s0 + %s12071_s15]]  }
  0x46   :  { %s12304_s27 = sld [smem:[%s15143_s0 + %s12072_s22]]  }
  0x47   :  { %s12309_s4 = sld [smem:[%s15143_s0 + %s12073_s28]]  }
  0x48   :  { %15186 = sst [smem:[#allocation29_spill]] %s12294_s9 }
  0x49   :  { %s12314_s9 = sld [smem:[%s15143_s0 + %s12074_s7]]  }
  0x4a   :  { %v12317_v0 = vld [vmem:[%s12104_s5] sm:$0xff]  ;;  %v12320_v1 = vld [vmem:[%s12104_s5 + $0x8] sm:$0xff]  ;;  %vm245_vm0 = vcmask 1043456   ;;  %vm207_vm1 = vcmask 1045504   ;;  %vm226_vm2 = vcmask 1044480   ;;  %vm188_vm3 = vcmask 1046528  }
  0x4b   :  { %v12323_v2 = vld [vmem:[%s12104_s5 + $0x20] sm:$0xff]  ;;  %v12326_v3 = vld [vmem:[%s12104_s5 + $0x28] sm:$0xff]  ;;  %v246_v4 = vrot.slane %v12317_v0, 4  ;;  %v247_v5 = vrot.slane %v12320_v1, 4  ;;  %v208_v7 = vrot.slane %v12317_v0, 2  ;;  %v209_v9 = vrot.slane %v12320_v1, 2 }
  0x4c   :  { %v249_v6 = vrot.slane %v12323_v2, 4  ;;  %v250_v8 = vrot.slane %v12326_v3, 4  ;;  %v211_v10 = vrot.slane %v12323_v2, 2  ;;  %v212_v11 = vrot.slane %v12326_v3, 2  ;;  %s12075_s0 = smov 72   ;;  %s12076_s15 = smov 100  }
  0x4d   :  { %v248_v12 = vsel %vm245_vm0, %v246_v4, %v247_v5  ;;  %v227_v13 = vrot.slane %v12317_v0, 3  ;;  %v228_v14 = vrot.slane %v12320_v1, 3  ;;  %v210_v16 = vsel %vm207_vm1, %v208_v7, %v209_v9  ;;  %v12361_v28 = vld [vmem:[%s12104_s5 + $0x10] sm:$0xff]  ;;  %v436_v32 = vld [vmem:[%s12114_s13 + $0xf8] sm:$0xff]  ;;  %v434_v38 = vld [vmem:[%s12114_s13 + $0xe8] sm:$0xff]  ;;  %s12077_s16 = smov 22  }
  0x4e   :  { %v251_v15 = vsel %vm245_vm0, %v249_v6, %v250_v8  ;;  %v213_v17 = vsel %vm207_vm1, %v211_v10, %v212_v11  ;;  %v230_v18 = vrot.slane %v12323_v2, 3  ;;  %v231_v22 = vrot.slane %v12326_v3, 3  ;;  %v12367_v31 = vld [vmem:[%s12104_s5 + $0x30] sm:$0xff]  ;;  %v420_v33 = vld [vmem:[%s12114_s13 + $0x78] sm:$0xff]  ;;  %9819 = vmatprep.subr.mxu0 %v436_v32  ;;  %v418_v40 = vld [vmem:[%s12114_s13 + $0x68] sm:$0xff]  ;;  %s12078_s18 = smov 50  }
  0x4f   :  { %v11010_v19 = vpack.i.bf16 %v251_v15, %v248_v12  ;;  %v10995_v20 = vpack.i.bf16 %v213_v17, %v210_v16  ;;  %v229_v21 = vsel %vm226_vm2, %v227_v13, %v228_v14  ;;  %v189_v23 = vrot.slane %v12317_v0, 1  ;;  %v435_v35 = vld [vmem:[%s12114_s13 + $0xf0] sm:$0xff]  ;;  %9820 = vmatpush3.msra.mxu0 %v420_v33  ;;  %v452_v41 = vld [vmem:[%s12114_s13 + $0x178] sm:$0xff]  ;;  %v433_v42 = vld [vmem:[%s12114_s13 + $0xe0] sm:$0xff]  ;;  %s12079_s22 = smov 122   ;;  %s12081_s23 = smov 94  }
  0x50   :  { %v190_v24 = vrot.slane %v12320_v1, 1  ;;  %v192_v25 = vrot.slane %v12323_v2, 1  ;;  %v232_v26 = vsel %vm226_vm2, %v230_v18, %v231_v22  ;;  %v193_v27 = vrot.slane %v12326_v3, 1  ;;  %v419_v36 = vld [vmem:[%s12114_s13 + $0x70] sm:$0xff]  ;;  %9821 = vmatprep.subr.mxu0 %v435_v35  ;;  %v417_v45 = vld [vmem:[%s12114_s13 + $0x60] sm:$0xff]  ;;  %v12390_v46 = vld [vmem:[%s12104_s5 + $0x18] sm:$0xff] }
  0x51   :  { %11011 = vrot.lane.b32.xlu1 %v11010_v19, %s12075_s0  ;;  %10996 = vrot.lane.b32.xlu0 %v10995_v20, %s12076_s15  ;;  %v11000_v29 = vpack.i.bf16 %v232_v26, %v229_v21  ;;  %v11005_v39 = vpack.i.bf16 %v12367_v31, %v12361_v28  ;;  %v12080_v43 = vmov 0.0   ;;  %v451_v44 = vld [vmem:[%s12114_s13 + $0x170] sm:$0xff]  ;;  %v450_v47 = vld [vmem:[%s12114_s13 + $0x168] sm:$0xff]  ;;  %v298_v51 = vrot.slane %v12361_v28, 2  ;;  %s12082_s26 = smov 16   ;;  %s12083_s28 = smov 44  }
  0x52   :  { %v191_v30 = vsel %vm188_vm3, %v189_v23, %v190_v24  ;;  %v194_v34 = vsel %vm188_vm3, %v192_v25, %v193_v27  ;;  %9822 = vmatpush3.msra.mxu0 %v419_v36  ;;  %576 = vmatprep.subr.mxu1 %v12080_v43  ;;  %v432_v48 = vld [vmem:[%s12114_s13 + $0xd8] sm:$0xff]  ;;  %v449_v49 = vld [vmem:[%s12114_s13 + $0x160] sm:$0xff]  ;;  %v299_v52 = vrot.slane %v12390_v46, 2  ;;  %v316_v53 = vrot.slane %v12361_v28, 3  ;;  %v431_v56 = vld [vmem:[%s12114_s13 + $0xd0] sm:$0xff]  ;;  %s12084_s1 = smov 66  }
  0x53   :  { %v11015_v37 = vpack.i.bf16 %v194_v34, %v191_v30  ;;  %9823 = vmatprep.subr.mxu0 %v434_v38  ;;  %577 = vmatpush1.msra.mxu1 %v452_v41  ;;  %v416_v50 = vld [vmem:[%s12114_s13 + $0x58] sm:$0xff]  ;;  %v317_v54 = vrot.slane %v12390_v46, 3  ;;  %v447_v57 = vld [vmem:[%s12114_s13 + $0x150] sm:$0xff]  ;;  %v280_v60 = vrot.slane %v12361_v28, 1  ;;  %v281_v61 = vrot.slane %v12390_v46, 1  ;;  %v445_v6 = vld [vmem:[%s12114_s13 + $0x140] sm:$0xff] }
  0x54   :  { %9824 = vmatpush3.msra.mxu0 %v418_v40  ;;  %578 = vmatprep.subr.mxu1 %v12080_v43  ;;  %v448_v55 = vld [vmem:[%s12114_s13 + $0x158] sm:$0xff]  ;;  %v415_v58 = vld [vmem:[%s12114_s13 + $0x50] sm:$0xff]  ;;  %v300_v59 = vsel %vm207_vm1, %v298_v51, %v299_v52  ;;  %v334_v63 = vrot.slane %v12361_v28, 4  ;;  %v335_v4 = vrot.slane %v12390_v46, 4  ;;  %v430_v7 = vld [vmem:[%s12114_s13 + $0xc8] sm:$0xff]  ;;  %v301_v28 = vrot.slane %v12367_v31, 2 }
  0x55   :  { %11001 = vrot.lane.b32.xlu0 %v11000_v29, %s12077_s16  ;;  %11016 = vrot.lane.b32.xlu1 %v11015_v37, %s12078_s18  ;;  %v318_v62 = vsel %vm226_vm2, %v316_v53, %v317_v54  ;;  %v444_v10 = vld [vmem:[%s12114_s13 + $0x138] sm:$0xff]  ;;  %v282_v12 = vsel %vm188_vm3, %v280_v60, %v281_v61  ;;  %v429_v13 = vld [vmem:[%s12114_s13 + $0xc0] sm:$0xff]  ;;  %v319_v32 = vrot.slane %v12367_v31, 3  ;;  %v283_v35 = vrot.slane %v12367_v31, 1 }
  0x56   :  { %9825 = vmatprep.subr.mxu0 %v433_v42  ;;  %579 = vmatpush1.msra.mxu1 %v451_v44  ;;  %v443_v15 = vld [vmem:[%s12114_s13 + $0x130] sm:$0xff]  ;;  %v413_v16 = vld [vmem:[%s12114_s13 + $0x40] sm:$0xff]  ;;  %v442_v17 = vld [vmem:[%s12114_s13 + $0x128] sm:$0xff]  ;;  %v337_v37 = vrot.slane %v12367_v31, 4 }
  0x57   :  { %9826 = vmatpush3.msra.mxu0 %v417_v45  ;;  %580 = vmatprep.subr.mxu1 %v12080_v43  ;;  %v428_v18 = vld [vmem:[%s12114_s13 + $0xb8] sm:$0xff]  ;;  %v441_v19 = vld [vmem:[%s12114_s13 + $0x120] sm:$0xff]  ;;  %v439_v25 = vld [vmem:[%s12114_s13 + $0x110] sm:$0xff] }
  0x58   :  { %581 = vmatpush1.msra.mxu1 %v450_v47  ;;  %9827 = vmatprep.subr.mxu0 %v432_v48  ;;  %v412_v20 = vld [vmem:[%s12114_s13 + $0x38] sm:$0xff]  ;;  %v411_v26 = vld [vmem:[%s12114_s13 + $0x30] sm:$0xff]  ;;  %v438_v29 = vld [vmem:[%s12114_s13 + $0x108] sm:$0xff] }
  0x59   :  { %11006 = vrot.lane.b32.xlu0 %v11005_v39, %s12079_s22  ;;  %216 = vrot.lane.b32.xlu1 %v209_v9, %s12076_s15  ;;  %v414_v9 = vld [vmem:[%s12114_s13 + $0x48] sm:$0xff]  ;;  %v12450_v21 = vld [vmem:[%s12104_s5 + $0x38] sm:$0xff] }
  0x5a   :  { %582 = vmatprep.subr.mxu1 %v12080_v43  ;;  %9828 = vmatpush3.msra.mxu0 %v416_v50  ;;  %v440_v23 = vld [vmem:[%s12114_s13 + $0x118] sm:$0xff]  ;;  %v302_v30 = vrot.slane %v12450_v21, 2  ;;  %v320_v33 = vrot.slane %v12450_v21, 3  ;;  %v426_v34 = vld [vmem:[%s12114_s13 + $0xa8] sm:$0xff]  ;;  %v284_v36 = vrot.slane %v12450_v21, 1  ;;  %v338_v39 = vrot.slane %v12450_v21, 4 }
  0x5b   :  { %583 = vmatpush1.msra.mxu1 %v449_v49  ;;  %9829 = vmatprep.subr.mxu0 %v431_v56  ;;  %v410_v38 = vld [vmem:[%s12114_s13 + $0x28] sm:$0xff]  ;;  %v467_v40 = vld [vmem:[%s12114_s13 + $0x1f0] sm:$0xf]  ;;  %v425_v31 = vld [vmem:[%s12114_s13 + $0xa0] sm:$0xff] }
  0x5c   :  { %584 = vmatprep.subr.mxu1 %v12080_v43  ;;  %9830 = vmatpush3.msra.mxu0 %v415_v58  ;;  %v466_v41 = vld [vmem:[%s12114_s13 + $0x1e8] sm:$0xff]  ;;  %v409_v42 = vld [vmem:[%s12114_s13 + $0x20] sm:$0xff]  ;;  %v424_v44 = vld [vmem:[%s12114_s13 + $0x98] sm:$0xff]  ;;  %v303_v45 = vsel %vm207_vm1, %v301_v28, %v302_v30  ;;  %v285_v48 = vsel %vm188_vm3, %v283_v35, %v284_v36 }
  0x5d   :  { %235 = vrot.lane.b32.xlu0 %v228_v14, %s12077_s16  ;;  %254 = vrot.lane.b32.xlu1 %v247_v5, %s12075_s0  ;;  %v446_v5 = vld [vmem:[%s12114_s13 + $0x148] sm:$0xff]  ;;  %v336_v14 = vsel %vm245_vm0, %v334_v63, %v335_v4  ;;  %v463_v3 = vld [vmem:[%s12114_s13 + $0x1d0] sm:$0xff] }
  0x5e   :  { %585 = vmatpush1.msra.mxu1 %v448_v55  ;;  %9831 = vmatprep.subr.mxu0 %v430_v7  ;;  %v423_v47 = vld [vmem:[%s12114_s13 + $0x90] sm:$0xff]  ;;  %v462_v50 = vld [vmem:[%s12114_s13 + $0x1c8] sm:$0xff]  ;;  %v421_v55 = vld [vmem:[%s12114_s13 + $0x80] sm:$0xff] }
  0x5f   :  { %586 = vmatprep.subr.mxu1 %v12080_v43  ;;  %9832 = vmatpush3.msra.mxu0 %v414_v9  ;;  %v407_v49 = vld [vmem:[%s12114_s13 + $0x10] sm:$0xff]  ;;  %v422_v51 = vld [vmem:[%s12114_s13 + $0x88] sm:$0xff]  ;;  %v405_v56 = vld [vmem:[%s12114_s13] sm:$0xff] }
  0x60   :  { %587 = vmatpush1.msra.mxu1 %v447_v57  ;;  %9833 = vmatprep.subr.mxu0 %v429_v13  ;;  %v406_v53 = vld [vmem:[%s12114_s13 + $0x8] sm:$0xff]  ;;  %v460_v57 = vld [vmem:[%s12114_s13 + $0x1b8] sm:$0xff]  ;;  %v459_v58 = vld [vmem:[%s12114_s13 + $0x1b0] sm:$0xff] }
  0x61   :  { %197 = vrot.lane.b32.xlu0 %v190_v24, %s12078_s18  ;;  %270 = vrot.lane.b32.xlu1 %v12390_v46, %s12079_s22  ;;  %v427_v24 = vld [vmem:[%s12114_s13 + $0xb0] sm:$0xff]  ;;  %v408_v46 = vld [vmem:[%s12114_s13 + $0x18] sm:$0xff] }
  0x62   :  { %588 = vmatprep.subr.mxu1 %v12080_v43  ;;  %9834 = vmatpush3.msra.mxu0 %v413_v16  ;;  %v457_v60 = vld [vmem:[%s12114_s13 + $0x1a0] sm:$0xff]  ;;  %v454_v63 = vld [vmem:[%s12114_s13 + $0x188] sm:$0xff] }
  0x63   :  { %589 = vmatpush1.msra.mxu1 %v446_v5  ;;  %9835 = vmatprep.subr.mxu0 %v428_v18 }
  0x64   :  { %590 = vmatprep.subr.mxu1 %v12080_v43  ;;  %9836 = vmatpush3.msra.mxu0 %v412_v20 }
  0x65   :  { %304 = vrot.lane.b32.xlu0 %v300_v59, %s12081_s23  ;;  %322 = vrot.lane.b32.xlu1 %v318_v62, %s12082_s26  ;;  %v458_v59 = vld [vmem:[%s12114_s13 + $0x1a8] sm:$0xff]  ;;  %v455_v62 = vld [vmem:[%s12114_s13 + $0x190] sm:$0xff] }
  0x66   :  { %591 = vmatpush1.msra.mxu1 %v445_v6  ;;  %9837 = vmatprep.subr.mxu0 %v427_v24 }
  0x67   :  { %592 = vmatprep.subr.mxu1 %v12080_v43  ;;  %9838 = vmatpush3.msra.mxu0 %v411_v26 }
  0x68   :  { %593 = vmatpush1.msra.mxu1 %v444_v10  ;;  %9839 = vmatprep.subr.mxu0 %v426_v34 }
  0x69   :  { %286 = vrot.lane.b32.xlu0 %v282_v12, %s12083_s28  ;;  %340 = vrot.lane.b32.xlu1 %v336_v14, %s12084_s1 }
  0x6a   :  { %594 = vmatprep.subr.mxu1 %v12080_v43  ;;  %9840 = vmatpush3.msra.mxu0 %v410_v38 }
  0x6b   :  { %595 = vmatpush1.msra.mxu1 %v443_v15  ;;  %9841 = vmatprep.subr.mxu0 %v425_v31 }
  0x6c   :  { %596 = vmatprep.subr.mxu1 %v12080_v43  ;;  %9842 = vmatpush3.msra.mxu0 %v409_v42 }
  0x6d   :  { %306 = vrot.lane.b32.xlu0 %v299_v52, %s12081_s23  ;;  %324 = vrot.lane.b32.xlu1 %v317_v54, %s12082_s26  ;;  %v339_v52 = vsel %vm245_vm0, %v337_v37, %v338_v39  ;;  %v461_v54 = vld [vmem:[%s12114_s13 + $0x1c0] sm:$0xff] }
  0x6e   :  { %597 = vmatpush1.msra.mxu1 %v442_v17  ;;  %9843 = vmatprep.subr.mxu0 %v424_v44 }
  0x6f   :  { %598 = vmatprep.subr.mxu1 %v12080_v43  ;;  %9844 = vmatpush3.msra.mxu0 %v408_v46 }
  0x70   :  { %599 = vmatpush1.msra.mxu1 %v441_v19  ;;  %9845 = vmatprep.subr.mxu0 %v423_v47 }
  0x71   :  { %342 = vrot.lane.b32.xlu0 %v335_v4, %s12084_s1  ;;  %600 = vmatprep.subr.mxu1 %v12080_v43  ;;  %v453_v4 = vld [vmem:[%s12114_s13 + $0x180] sm:$0xff] }
  0x72   :  { %220 = vrot.lane.b32.xlu1 %v212_v11, %s12076_s15  ;;  %601 = vmatpush1.msra.mxu1 %v440_v23  ;;  %v437_v11 = vld [vmem:[%s12114_s13 + $0x100] sm:$0xff] }
  0x73   :  { %602 = vmatprep.subr.mxu1 %v12080_v43  ;;  %9846 = vmatpush3.msra.mxu0 %v407_v49 }
  0x74   :  { %603 = vmatpush1.msra.mxu1 %v439_v25  ;;  %9847 = vmatprep.subr.mxu0 %v422_v51 }
  0x75   :  { %239 = vrot.lane.b32.xlu0 %v231_v22, %s12077_s16  ;;  %604 = vmatprep.subr.mxu1 %v12080_v43  ;;  %v465_v22 = vld [vmem:[%s12114_s13 + $0x1e0] sm:$0xff] }
  0x76   :  { %288 = vrot.lane.b32.xlu1 %v281_v61, %s12083_s28  ;;  %605 = vmatpush1.msra.mxu1 %v438_v29  ;;  %v456_v61 = vld [vmem:[%s12114_s13 + $0x198] sm:$0xff] }
  0x77   :  { %606 = vmatprep.subr.mxu1 %v12080_v43  ;;  %9848 = vmatpush3.msra.mxu0 %v406_v53 }
  0x78   :  { %607 = vmatpush1.msra.mxu1 %v437_v11  ;;  %9849 = vmatprep.subr.mxu0 %v421_v55 }
  0x79   :  { %258 = vrot.lane.b32.xlu0 %v250_v8, %s12075_s0  ;;  %610 = vmatprep.subr.mxu1 %v12080_v43  ;;  %v464_v8 = vld [vmem:[%s12114_s13 + $0x1d8] sm:$0xff] }
  0x7a   :  { %201 = vrot.lane.b32.xlu1 %v193_v27, %s12078_s18  ;;  %9441 = vmatpush2.msk.msra.mxu1 %vm245_vm0, %v467_v40  ;;  %v321_v27 = vsel %vm226_vm2, %v319_v32, %v320_v33 }
  0x7b   :  { %612 = vmatprep.subr.mxu1 %v12080_v43  ;;  %9850 = vmatpush3.msra.mxu0 %v405_v56 }
  0x7c   :  { %613 = vmatpush2.msra.mxu1 %v466_v41 }
  0x7d   :  { %274 = vrot.lane.b32.xlu0 %v12450_v21, %s12079_s22  ;;  %614 = vmatprep.subr.mxu1 %v12080_v43 }
  0x7e   :  { %308 = vrot.lane.b32.xlu1 %v303_v45, %s12081_s23  ;;  %615 = vmatpush2.msra.mxu1 %v465_v22 }
  0x7f   :  { %616 = vmatprep.subr.mxu1 %v12080_v43 }
  0x80   :  { %617 = vmatpush2.msra.mxu1 %v464_v8 }
  0x81   :  { %326 = vrot.lane.b32.xlu0 %v321_v27, %s12082_s26  ;;  %618 = vmatprep.subr.mxu1 %v12080_v43 }
  0x82   :  { %290 = vrot.lane.b32.xlu1 %v285_v48, %s12083_s28  ;;  %619 = vmatpush2.msra.mxu1 %v463_v3 }
  0x83   :  { %620 = vmatprep.subr.mxu1 %v12080_v43 }
  0x84   :  { %621 = vmatpush2.msra.mxu1 %v462_v50 }
  0x85   :  { %344 = vrot.lane.b32.xlu0 %v339_v52, %s12084_s1  ;;  %622 = vmatprep.subr.mxu1 %v12080_v43 }
  0x86   :  { %310 = vrot.lane.b32.xlu1 %v302_v30, %s12081_s23  ;;  %623 = vmatpush2.msra.mxu1 %v461_v54 }
  0x87   :  { %624 = vmatprep.subr.mxu1 %v12080_v43 }
  0x88   :  { %625 = vmatpush2.msra.mxu1 %v460_v57 }
  0x89   :  { %328 = vrot.lane.b32.xlu0 %v320_v33, %s12082_s26  ;;  %626 = vmatprep.subr.mxu1 %v12080_v43 }
  0x8a   :  { %346 = vrot.lane.b32.xlu1 %v338_v39, %s12084_s1  ;;  %627 = vmatpush2.msra.mxu1 %v459_v58 }
  0x8b   :  { %628 = vmatprep.subr.mxu1 %v12080_v43 }
  0x8c   :  { %629 = vmatpush2.msra.mxu1 %v458_v59 }
  0x8d   :  { %292 = vrot.lane.b32.xlu0 %v284_v36, %s12083_s28  ;;  %630 = vmatprep.subr.mxu1 %v12080_v43 }
  0x8e   :  { %631 = vmatpush2.msra.mxu1 %v457_v60 }
  0x8f   :  { %632 = vmatprep.subr.mxu1 %v12080_v43 }
  0x90   :  { %633 = vmatpush2.msra.mxu1 %v456_v61 }
  0x91   :  { %634 = vmatprep.subr.mxu1 %v12080_v43 }
  0x92   :  { %635 = vmatpush2.msra.mxu1 %v455_v62 }
  0x93   :  { %636 = vmatprep.subr.mxu1 %v12080_v43 }
  0x94   :  { %637 = vmatpush2.msra.mxu1 %v454_v63 }
  0x95   :  { %638 = vmatprep.subr.mxu1 %v12080_v43 }
  0x96   :  { %639 = vmatpush2.msra.mxu1 %v453_v4 }
  0x97   :  { %10182 = vmatprep.subr.bf16.mxu1 %v12080_v43 }
  0x98   :  { %90 = vsyncpa [#allocation3], 0  ;;  %vm362_vm4 = vcmask 179200   ;;  %vm352_vm5 = vcmask 408576   ;;  %vm367_vm6 = vcmask 588800   ;;  %vm372_vm7 = vcmask 998400  }
  0x99   :  { %vm357_vm8 = vcmask 818176   ;;  %vm387_vm9 = vcmask 130048   ;;  %vm377_vm10 = vcmask 359424   ;;  %vm392_vm11 = vcmask 539648   ;;  %v12002_v59 = vld [vmem:[%s12104_s5 + $0x28] sm:$0xff]  ;;  %s12086_s13 = smov 112  }
  0x9a   :  { %vm382_vm12 = vcmask 769024   ;;  %vm475_vm13 = vcmask 949248   ;;  %vm663_vm14 = vcmask 523264   ;;  %vm750_vm15 = vcmask 1040384   ;;  %s15187_s2 = sld [smem:[#allocation6_spill]] }
  0x9b   :  { %vm12088_vm1 = vmmov 0   ;;  %s15188_s7 = sld [smem:[#allocation8_spill]] }
  0x9c   :  { %s15189_s10 = sld [smem:[#allocation7_spill]] }
  0x9d   :  { %s15190_s11 = sld [smem:[#allocation9_spill]] }
  0x9e   :  { %s15199_s0 = sld [smem:[#allocation17_spill]] }
  0x9f   :  { %s15200_s15 = sld [smem:[#allocation19_spill]] }
  0xa0   :  { %s15201_s16 = sld [smem:[#allocation20_spill]] }
  0xa1   :  { %s15203_s22 = sld [smem:[#allocation25_spill]] }
  0xa2   :  { %s15204_s23 = sld [smem:[#allocation21_spill]] }
  0xa3   :  { %s15205_s28 = sld [smem:[#allocation22_spill]] }
  0xa4   :  { %s15206_s1 = sld [smem:[#allocation24_spill]] }
  0xc3   :  { %v11012_v5 = vpop.permute.xlu1 %11011  ;;  %v10997_v6 = vpop.permute.xlu0 %10996 }
  0xc4   :  { %v10998_v9 = vunpack.i.l.bf16 %v10997_v6  ;;  %v11013_v15 = vunpack.i.l.bf16 %v11012_v5  ;;  %v10999_v28 = vunpack.i.h.bf16 %v10997_v6  ;;  %v11014_v34 = vunpack.i.h.bf16 %v11012_v5 }
  0xc7   :  { %v11002_v7 = vpop.permute.xlu0 %11001  ;;  %v11017_v12 = vpop.permute.xlu1 %11016 }
  0xc8   :  { %v11003_v10 = vunpack.i.l.bf16 %v11002_v7  ;;  %v11018_v13 = vunpack.i.l.bf16 %v11017_v12  ;;  %v11004_v23 = vunpack.i.h.bf16 %v11002_v7  ;;  %v11019_v30 = vunpack.i.h.bf16 %v11017_v12 }
  0xca   :  { %v363_v14 = vsel %vm362_vm4, %v10998_v9, %v11003_v10  ;;  %v353_v19 = vsel %vm352_vm5, %v12317_v0, %v11018_v13  ;;  %v365_v0 = vsel %vm362_vm4, %v10999_v28, %v11004_v23  ;;  %v355_v41 = vsel %vm352_vm5, %v12323_v2, %v11019_v30 }
  0xcb   :  { %v12564_v16 = vpop.permute.xlu0 %11006  ;;  %v217_v18 = vpop.permute.xlu1 %216  ;;  %v368_v20 = vsel %vm367_vm6, %v363_v14, %v11013_v15  ;;  %v358_v25 = vsel %vm357_vm8, %v353_v19, %v10998_v9  ;;  %v370_v39 = vsel %vm367_vm6, %v365_v0, %v11014_v34 }
  0xcc   :  { %v11008_v17 = vunpack.i.l.bf16 %v12564_v16  ;;  %v11009_v32 = vunpack.i.h.bf16 %v12564_v16 }
  0xce   :  { %v373_v21 = vsel %vm372_vm7, %v368_v20, %v11008_v17  ;;  %v375_v31 = vsel %vm372_vm7, %v370_v39, %v11009_v32 }
  0xcf   :  { %v236_v24 = vpop.permute.xlu0 %235  ;;  %555 = vmatprep.mubr.f32.mxu0 %v373_v21  ;;  %v255_v26 = vpop.permute.xlu1 %254 }
  0xd0   :  { %556 = vmatmul.mubr.f32.vlgmr.msra.gmra.mxu0 %v358_v25  ;;  %v364_v29 = vsel %vm362_vm4, %v217_v18, %v236_v24 }
  0xd1   :  { %v369_v35 = vsel %vm367_vm6, %v364_v29, %v255_v26  ;;  %v9436_v29 = vld [vmem:[%s12119_s17] ss:$0 sm:$0xff]  ;;  %s12087_s17 = smov 96  }
  0xd3   :  { %v198_v33 = vpop.permute.xlu0 %197  ;;  %v271_v37 = vpop.permute.xlu1 %270 }
  0xd4   :  { %v354_v36 = vsel %vm352_vm5, %v12320_v1, %v198_v33  ;;  %v374_v11 = vsel %vm372_vm7, %v369_v35, %v271_v37  ;;  %v360_v1 = vsel %vm357_vm8, %v355_v41, %v10999_v28 }
  0xd5   :  { %v359_v38 = vsel %vm357_vm8, %v354_v36, %v217_v18  ;;  %9437 = vmatprep.mubr.msk.f32.mxu0 %vm245_vm0, %v374_v11 }
  0xd6   :  { %9438 = vmatmul.mubr.msk.f32.gmra.mxu0 %vm245_vm0, %v359_v38 }
  0xd7   :  { %v305_v40 = vpop.permute.xlu0 %304  ;;  %v323_v42 = vpop.permute.xlu1 %322  ;;  %565 = vmatprep.mubr.f32.mxu0 %v375_v31 }
  0xd8   :  { %v388_v44 = vsel %vm387_vm9, %v305_v40, %v323_v42 }
  0xda   :  { %566 = vmatmul.mubr.f32.gmra.mxu0 %v360_v1 }
  0xdb   :  { %v287_v22 = vpop.permute.xlu0 %286  ;;  %v341_v8 = vpop.permute.xlu1 %340 }
  0xdc   :  { %v378_v45 = vsel %vm377_vm10, %v11008_v17, %v287_v22  ;;  %v393_v46 = vsel %vm392_vm11, %v388_v44, %v341_v8 }
  0xdd   :  { %v383_v2 = vsel %vm382_vm12, %v378_v45, %v305_v40  ;;  %9442 = vmatprep.mubr.msk.f32.mxu1 %vm475_vm13, %v393_v46 }
  0xde   :  { %641 = vmatmul.mubr.f32.vlgmr.msra.gmra.mxu1 %v383_v2 }
  0xdf   :  { %v307_v3 = vpop.permute.xlu0 %306  ;;  %v325_v27 = vpop.permute.xlu1 %324 }
  0xe0   :  { %v389_v47 = vsel %vm387_vm9, %v307_v3, %v325_v27 }
  0xe3   :  { %v343_v48 = vpop.permute.xlu0 %342 }
  0xe4   :  { %v394_v49 = vsel %vm392_vm11, %v389_v47, %v343_v48  ;;  %v221_v50 = vpop.permute.xlu1 %220 }
  0xe5   :  { %v400_v51 = vsel %vm245_vm0, %v394_v49, 0.0 }
  0xe6   :  { %9443 = vmatprep.mubr.msk.f32.mxu1 %vm475_vm13, %v400_v51 }
  0xe7   :  { %v240_v52 = vpop.permute.xlu0 %239 }
  0xe8   :  { %v289_v53 = vpop.permute.xlu1 %288  ;;  %v366_v58 = vsel %vm362_vm4, %v221_v50, %v240_v52  ;;  %vm2068_vm4 = vcmask 261120  }
  0xe9   :  { %v379_v54 = vsel %vm377_vm10, %v271_v37, %v289_v53 }
  0xea   :  { %v384_v55 = vsel %vm382_vm12, %v379_v54, %v307_v3 }
  0xeb   :  { %9444 = vmatmul.mubr.msk.f32.gmra.mxu1 %vm245_vm0, %v384_v55  ;;  %v259_v56 = vpop.permute.xlu0 %258 }
  0xec   :  { %v202_v57 = vpop.permute.xlu1 %201  ;;  %v371_v61 = vsel %vm367_vm6, %v366_v58, %v259_v56  ;;  %vm2073_vm6 = vcmask 392192  }
  0xed   :  { %v356_v60 = vsel %vm352_vm5, %v12002_v59, %v202_v57 }
  0xee   :  { %v361_v5 = vsel %vm357_vm8, %v356_v60, %v221_v50 }
  0xef   :  { %v275_v62 = vpop.permute.xlu0 %274 }
  0xf0   :  { %v309_v63 = vpop.permute.xlu1 %308  ;;  %v376_v4 = vsel %vm372_vm7, %v371_v61, %v275_v62  ;;  %vm9115_vm7 = vcmask 1041409  }
  0xf1   :  { %9439 = vmatprep.mubr.msk.f32.mxu0 %vm245_vm0, %v376_v4 }
  0xf2   :  { %9440 = vmatmul.mubr.msk.f32.gmra.mxu0 %vm245_vm0, %v361_v5 }
  0xf3   :  { %v327_v6 = vpop.permute.xlu0 %326 }
  0xf4   :  { %v291_v7 = vpop.permute.xlu1 %290  ;;  %v390_v10 = vsel %vm387_vm9, %v309_v63, %v327_v6 }
  0xf5   :  { %v380_v9 = vsel %vm377_vm10, %v11009_v32, %v291_v7 }
  0xf6   :  { %v385_v15 = vsel %vm382_vm12, %v380_v9, %v309_v63 }
  0xf7   :  { %v345_v12 = vpop.permute.xlu0 %344 }
  0xf8   :  { %v395_v13 = vsel %vm392_vm11, %v390_v10, %v345_v12  ;;  %v311_v14 = vpop.permute.xlu1 %310 }
  0xf9   :  { %9445 = vmatprep.mubr.msk.f32.mxu1 %vm475_vm13, %v395_v13 }
  0xfa   :  { %651 = vmatmul.mubr.f32.gmra.mxu1 %v385_v15 }
  0xfb   :  { %v329_v16 = vpop.permute.xlu0 %328 }
  0xfc   :  { %v391_v17 = vsel %vm387_vm9, %v311_v14, %v329_v16  ;;  %v347_v18 = vpop.permute.xlu1 %346 }
  0xfd   :  { %v396_v19 = vsel %vm392_vm11, %v391_v17, %v347_v18  ;;  %vm9257_vm11 = vcmask 1042432  }
  0xfe   :  { %v404_v20 = vsel %vm245_vm0, %v396_v19, 0.0 }
  0xff   :  { %v293_v21 = vpop.permute.xlu0 %292  ;;  %9446 = vmatprep.mubr.msk.f32.mxu1 %vm475_vm13, %v404_v20  ;;  %vm9378_vm13 = vcmask 9216  }
 0x100   :  { %v381_v23 = vsel %vm377_vm10, %v275_v62, %v293_v21  ;;  %v9448_v21 = vld [vmem:[%s12124_s21] ss:$0 sm:$0xff]  ;;  %s12089_s21 = smov 80   ;;  %vm9127_vm10 = vcmask 1041408  }
 0x101   :  { %v386_v24 = vsel %vm382_vm12, %v381_v23, %v311_v14  ;;  %vm9331_vm12 = vcmask 318464  }
 0x102   :  { %9447 = vmatmul.mubr.msk.f32.gmra.mxu1 %vm245_vm0, %v386_v24  ;;  %v9449_v24 = vld [vmem:[%s12129_s25] ss:$0 sm:$0xff]  ;;  %s12090_s25 = smov 64  }
 0x103   :  { %10184 = vmatprep.mubr.msk.bf16.mxu1 %vm12088_vm1, %v12080_v43 }
 0x190   :  { %v9851_v25 = vpop.f32.mrf.mxu0 }
 0x192   :  { %v9852_v26 = vpop.f32.mrf.mxu0 }
 0x193   :  { %v9853_v28 = vadd.f32 %v9852_v26, %v9851_v25  ;;  %v737_v26 = vld [vmem:[%s12134_s29] sm:$0x1]  ;;  %s12092_s29 = smov 32  }
 0x195   :  { %v558_v30 = vadd.f32 %v9853_v28, %v9436_v29  ;;  %v738_v28 = vld [vmem:[%s12139_s3] sm:$0x1] }
 0x196   :  { %v9854_v32 = vpop.f32.mrf.mxu0 }
 0x198   :  { %v9855_v36 = vpop.f32.mrf.mxu0 }
 0x199   :  { %v9856_v37 = vadd.f32 %v9855_v36, %v9854_v32  ;;  %v739_v32 = vadd.f32 %v738_v28, %v737_v26  ;;  %v11425_v28 = vld [vmem:[%s12154_s19 + $0x24] ss:$8 sps:$4 sm:$0xff]  }
 0x19a   :  { %v9857_v31 = vpop.f32.mrf.mxu0 }
 0x19b   :  { %v563_v11 = vadd.f32 %v9856_v37, %v9436_v29 }
 0x19c   :  { %v9858_v42 = vpop.f32.mrf.mxu0 }
 0x19d   :  { %v9859_v1 = vadd.f32 %v9858_v42, %v9857_v31  ;;  %v741_v31 = vld [vmem:[%s12139_s3 + $0x9] sm:$0xf] }
 0x19e   :  { %v642_v33 = vpop.f32.mrf.mxu1 }
 0x19f   :  { %v643_v0 = vadd.f32 %v642_v33, %v558_v30  ;;  %v568_v44 = vadd.f32 %v9859_v1, %v9436_v29 }
 0x1a0   :  { %v644_v34 = vpop.f32.mrf.mxu1 }
 0x1a1   :  { %v664_v35 = vsel %vm663_vm14, %v643_v0, 0.0 }
 0x1a2   :  { %665 = vadd.xlane.f32.xlu1 %v664_v35 }
 0x1ab   :  { %v647_v38 = vpop.f32.mrf.mxu1 }
 0x1ac   :  { %v648_v39 = vadd.f32 %v647_v38, %v563_v11 }
 0x1ad   :  { %v649_v40 = vpop.f32.mrf.mxu1 }
 0x1ae   :  { %v667_v41 = vsel %vm663_vm14, %v648_v39, 0.0 }
 0x1af   :  { %668 = vadd.xlane.f32.xlu0 %v667_v41 }
 0x1b2   :  { %v9860_v22 = vpop.f32.mrf.mxu0 }
 0x1b4   :  { %v9861_v45 = vpop.f32.mrf.mxu0 }
 0x1b5   :  { %v9862_v3 = vadd.f32 %v9861_v45, %v9860_v22 }
 0x1b7   :  { %v573_v47 = vadd.f32 %v9862_v3, %v9436_v29  ;;  %v740_v29 = vld [vmem:[%s12139_s3 + $0x1] sm:$0xff]  ;;  %s12093_s3 = smov 48  }
 0x1ba   :  { %v652_v8 = vpop.f32.mrf.mxu1 }
 0x1bb   :  { %v653_v46 = vadd.f32 %v652_v8, %v568_v44 }
 0x1bc   :  { %v654_v2 = vpop.f32.mrf.mxu1 }
 0x1bd   :  { %v670_v27 = vsel %vm663_vm14, %v653_v46, 0.0 }
 0x1be   :  { %671 = vadd.xlane.f32.xlu0 %v670_v27 }
 0x1c2   :  { %v657_v48 = vpop.f32.mrf.mxu1 }
 0x1c3   :  { %v658_v49 = vadd.f32 %v657_v48, %v573_v47 }
 0x1c4   :  { %v659_v50 = vpop.f32.mrf.mxu1 }
 0x1c5   :  { %v673_v51 = vsel %vm663_vm14, %v658_v49, 0.0 }
 0x1c6   :  { %674 = vadd.xlane.f32.xlu1 %v673_v51 }
 0x22b   :  { %v666_v52 = vpop.xlane.xlu1 %665 }
 0x22c   :  { %v677_v53 = vmul.f32 0.015625, %v666_v52 }
 0x22e   :  { %v681_v54 = vsub.f32 %v643_v0, %v677_v53 }
 0x230   :  { %v685_v55 = vmul.f32 %v681_v54, %v681_v54 }
 0x232   :  { %v689_v56 = vsel %vm663_vm14, %v685_v55, 0.0 }
 0x233   :  { %690 = vadd.xlane.f32.xlu0 %v689_v56 }
 0x238   :  { %v669_v57 = vpop.xlane.xlu0 %668 }
 0x239   :  { %v678_v58 = vmul.f32 0.015625, %v669_v57 }
 0x23b   :  { %v682_v59 = vsub.f32 %v648_v39, %v678_v58 }
 0x23d   :  { %v686_v60 = vmul.f32 %v682_v59, %v682_v59 }
 0x23f   :  { %v692_v61 = vsel %vm663_vm14, %v686_v60, 0.0 }
 0x240   :  { %693 = vadd.xlane.f32.xlu1 %v692_v61 }
 0x247   :  { %v672_v62 = vpop.xlane.xlu0 %671 }
 0x248   :  { %v679_v63 = vmul.f32 0.015625, %v672_v62 }
 0x24a   :  { %v683_v4 = vsub.f32 %v653_v46, %v679_v63 }
 0x24c   :  { %v687_v5 = vmul.f32 %v683_v4, %v683_v4 }
 0x24e   :  { %v695_v6 = vsel %vm663_vm14, %v687_v5, 0.0 }
 0x24f   :  { %696 = vadd.xlane.f32.xlu0 %v695_v6  ;;  %v675_v7 = vpop.xlane.xlu1 %674 }
 0x250   :  { %v680_v9 = vmul.f32 0.015625, %v675_v7 }
 0x252   :  { %v684_v10 = vsub.f32 %v658_v49, %v680_v9 }
 0x254   :  { %v688_v12 = vmul.f32 %v684_v10, %v684_v10 }
 0x256   :  { %v698_v13 = vsel %vm663_vm14, %v688_v12, 0.0 }
 0x257   :  { %699 = vadd.xlane.f32.xlu1 %v698_v13 }
 0x2bc   :  { %v691_v14 = vpop.xlane.xlu0 %690 }
 0x2bd   :  { %v701_v15 = vmul.f32 0.015625, %v691_v14 }
 0x2bf   :  { %v705_v16 = vadd.f32 1e-05, %v701_v15 }
 0x2c1   :  { %11544 = vrsqrt.f32 %v705_v16 }
 0x2c9   :  { %v694_v17 = vpop.xlane.xlu1 %693 }
 0x2ca   :  { %v702_v18 = vmul.f32 0.015625, %v694_v17 }
 0x2cc   :  { %v706_v19 = vadd.f32 1e-05, %v702_v18 }
 0x2ce   :  { %11546 = vrsqrt.f32 %v706_v19  ;;  %v11545_v20 = vpop.eup %11544 }
 0x2cf   :  { %v713_v23 = vmul.f32 %v11545_v20, %v681_v54 }
 0x2d1   :  { %v723_v25 = vmul.f32 %v9448_v21, %v713_v23  ;;  %v11422_v23 = vld [vmem:[%s12154_s19 + $0x34] ss:$8 sps:$4 sm:$0xff]  }
 0x2d2   :  { %907 = vmatprep.subr.bf16.mxu0 %v11422_v23 }
 0x2d3   :  { %v733_v30 = vadd.f32 %v9449_v24, %v723_v25 }
 0x2d5   :  { %v742_v33 = vadd.f32 %v740_v29, %v733_v30  ;;  %v11428_v30 = vld [vmem:[%s12154_s19 + $0x14] ss:$8 sps:$4 sm:$0xff]  }
 0x2d7   :  { %v751_v34 = vrot.slane %v742_v33, 7  ;;  %v11429_v33 = vld [vmem:[%s12154_s19] ss:$8 sps:$4 sm:$0xff]  }
 0x2d8   :  { %v697_v0 = vpop.xlane.xlu0 %696 }
 0x2d9   :  { %v703_v35 = vmul.f32 0.015625, %v697_v0  ;;  %v12634_v36 = vsel %vm750_vm15, %v739_v32, %v751_v34  ;;  %v11431_v0 = vld [vmem:[%s12154_s19 + $0x4] ss:$8 sps:$4 sm:$0xff]  }
 0x2da   :  { %v771_v38 = vsel %vm663_vm14, %v12634_v36, 0.0 }
 0x2db   :  { %v11547_v37 = vpop.eup %11546  ;;  %v707_v11 = vadd.f32 1e-05, %v703_v35  ;;  %772 = vadd.xlane.f32.xlu0 %v771_v38 }
 0x2dc   :  { %v714_v39 = vmul.f32 %v11547_v37, %v682_v59 }
 0x2dd   :  { %11548 = vrsqrt.f32 %v707_v11 }
 0x2de   :  { %v724_v40 = vmul.f32 %v9448_v21, %v714_v39 }
 0x2e0   :  { %v700_v41 = vpop.xlane.xlu1 %699  ;;  %v734_v42 = vadd.f32 %v9449_v24, %v724_v40 }
 0x2e1   :  { %v704_v1 = vmul.f32 0.015625, %v700_v41 }
 0x2e2   :  { %v743_v22 = vadd.f32 %v741_v31, %v734_v42 }
 0x2e3   :  { %v708_v44 = vadd.f32 1e-05, %v704_v1 }
 0x2e4   :  { %v752_v45 = vrot.slane %v743_v22, 7  ;;  %v9450_v22 = vld [vmem:[%s12144_s8] ss:$0 sm:$0xff] }
 0x2e5   :  { %11550 = vrsqrt.f32 %v708_v44 }
 0x2e6   :  { %v753_v8 = vsel %vm750_vm15, %v751_v34, %v752_v45  ;;  %v12085_v34 = vmov 0  }
 0x2e7   :  { %v12641_v46 = vsel %vm226_vm2, %v753_v8, 0.0  ;;  %931 = vmatprep.mubr.bf16.mxu0 %v12085_v34 }
 0x2e8   :  { %v774_v2 = vsel %vm663_vm14, %v12641_v46, 0.0 }
 0x2e9   :  { %775 = vadd.xlane.f32.xlu1 %v774_v2 }
 0x2ea   :  { %v11549_v3 = vpop.eup %11548 }
 0x2eb   :  { %v715_v27 = vmul.f32 %v11549_v3, %v683_v4  ;;  %v9451_v3 = vld [vmem:[%s12149_s14] ss:$0 sm:$0xff] }
 0x2ed   :  { %v725_v47 = vmul.f32 %v9448_v21, %v715_v27 }
 0x2ef   :  { %v735_v48 = vadd.f32 %v9449_v24, %v725_v47 }
 0x2f1   :  { %v744_v49 = vadd.f32 %v740_v29, %v735_v48  ;;  %v11423_v29 = vld [vmem:[%s12154_s19 + $0x20] ss:$8 sps:$4 sm:$0xff]  }
 0x2f2   :  { %v11551_v50 = vpop.eup %11550 }
 0x2f3   :  { %v754_v51 = vrot.slane %v744_v49, 7  ;;  %v716_v52 = vmul.f32 %v11551_v50, %v684_v10 }
 0x2f5   :  { %v12646_v53 = vsel %vm750_vm15, %v739_v32, %v754_v51  ;;  %v726_v54 = vmul.f32 %v9448_v21, %v716_v52  ;;  %v11426_v32 = vld [vmem:[%s12154_s19 + $0x10] ss:$8 sps:$4 sm:$0xff]  }
 0x2f6   :  { %v777_v55 = vsel %vm663_vm14, %v12646_v53, 0.0 }
 0x2f7   :  { %778 = vadd.xlane.f32.xlu0 %v777_v55  ;;  %v736_v56 = vadd.f32 %v9449_v24, %v726_v54  ;;  %v11420_v24 = vld [vmem:[%s12154_s19 + $0x30] ss:$8 sps:$4 sm:$0xff]  }
 0x2f8   :  { %908 = vmatpush1.bf16.msra.mxu0 %v11420_v24 }
 0x2f9   :  { %v745_v57 = vadd.f32 %v741_v31, %v736_v56  ;;  %909 = vmatprep.subr.bf16.mxu0 %v11425_v28 }
 0x2fb   :  { %v755_v58 = vrot.slane %v745_v57, 7 }
 0x2fc   :  { %910 = vmatpush1.bf16.msra.mxu0 %v11423_v29 }
 0x2fd   :  { %v756_v59 = vsel %vm750_vm15, %v754_v51, %v755_v58  ;;  %911 = vmatprep.subr.bf16.mxu0 %v11428_v30 }
 0x2fe   :  { %v12652_v60 = vsel %vm226_vm2, %v756_v59, 0.0 }
 0x2ff   :  { %v780_v61 = vsel %vm663_vm14, %v12652_v60, 0.0 }
 0x300   :  { %781 = vadd.xlane.f32.xlu1 %v780_v61  ;;  %912 = vmatpush1.bf16.msra.mxu0 %v11426_v32 }
 0x301   :  { %913 = vmatprep.subr.bf16.mxu0 %v11431_v0 }
 0x304   :  { %914 = vmatpush1.bf16.msra.mxu0 %v11429_v33 }
 0x305   :  { %10170 = vmatprep.subr.bf16.mxu0 %v12080_v43 }
 0x364   :  { %v773_v62 = vpop.xlane.xlu0 %772 }
 0x365   :  { %v783_v63 = vmul.f32 0.015625, %v773_v62 }
 0x367   :  { %v787_v4 = vsub.f32 %v12634_v36, %v783_v63 }
 0x369   :  { %v791_v5 = vmul.f32 %v787_v4, %v787_v4 }
 0x36b   :  { %v795_v6 = vsel %vm663_vm14, %v791_v5, 0.0 }
 0x36c   :  { %796 = vadd.xlane.f32.xlu0 %v795_v6 }
 0x372   :  { %v776_v7 = vpop.xlane.xlu1 %775 }
 0x373   :  { %v784_v9 = vmul.f32 0.015625, %v776_v7 }
 0x375   :  { %v788_v10 = vsub.f32 %v12641_v46, %v784_v9 }
 0x377   :  { %v792_v12 = vmul.f32 %v788_v10, %v788_v10 }
 0x379   :  { %v798_v13 = vsel %vm663_vm14, %v792_v12, 0.0 }
 0x37a   :  { %799 = vadd.xlane.f32.xlu1 %v798_v13 }
 0x380   :  { %v779_v14 = vpop.xlane.xlu0 %778 }
 0x381   :  { %v785_v15 = vmul.f32 0.015625, %v779_v14 }
 0x383   :  { %v789_v16 = vsub.f32 %v12646_v53, %v785_v15 }
 0x385   :  { %v793_v17 = vmul.f32 %v789_v16, %v789_v16 }
 0x387   :  { %v801_v18 = vsel %vm663_vm14, %v793_v17, 0.0 }
 0x388   :  { %802 = vadd.xlane.f32.xlu0 %v801_v18 }
 0x389   :  { %v782_v19 = vpop.xlane.xlu1 %781 }
 0x38a   :  { %v786_v20 = vmul.f32 0.015625, %v782_v19 }
 0x38c   :  { %v790_v21 = vsub.f32 %v12652_v60, %v786_v20 }
 0x38e   :  { %v794_v25 = vmul.f32 %v790_v21, %v790_v21 }
 0x390   :  { %v804_v26 = vsel %vm663_vm14, %v794_v25, 0.0 }
 0x391   :  { %805 = vadd.xlane.f32.xlu1 %v804_v26 }
 0x3f5   :  { %v797_v35 = vpop.xlane.xlu0 %796 }
 0x3f6   :  { %v807_v37 = vmul.f32 0.015625, %v797_v35 }
 0x3f8   :  { %v811_v11 = vadd.f32 1e-05, %v807_v37 }
 0x3fa   :  { %11552 = vrsqrt.f32 %v811_v11 }
 0x403   :  { %v800_v38 = vpop.xlane.xlu1 %799 }
 0x404   :  { %v808_v39 = vmul.f32 0.015625, %v800_v38 }
 0x406   :  { %v812_v40 = vadd.f32 1e-05, %v808_v39 }
 0x407   :  { %v11553_v31 = vpop.eup %11552 }
 0x408   :  { %11554 = vrsqrt.f32 %v812_v40  ;;  %v819_v42 = vmul.f32 %v11553_v31, %v787_v4 }
 0x40a   :  { %v829_v8 = vmul.f32 %v9450_v22, %v819_v42 }
 0x40c   :  { %v839_v48 = vadd.f32 %v9451_v3, %v829_v8  ;;  %v765_v8 = vlaneseq }
 0x411   :  { %v803_v41 = vpop.xlane.xlu0 %802 }
 0x412   :  { %v809_v1 = vmul.f32 0.015625, %v803_v41 }
 0x414   :  { %v813_v45 = vadd.f32 1e-05, %v809_v1 }
 0x415   :  { %v11555_v44 = vpop.eup %11554 }
 0x416   :  { %v820_v2 = vmul.f32 %v11555_v44, %v788_v10  ;;  %11556 = vrsqrt.f32 %v813_v45 }
 0x418   :  { %v830_v27 = vmul.f32 %v9450_v22, %v820_v2  ;;  %v766_v2 = vand.u32 127, %v765_v8 }
 0x41a   :  { %v806_v47 = vpop.xlane.xlu1 %805  ;;  %v840_v49 = vadd.f32 %v9451_v3, %v830_v27  ;;  %vm4506_vm2 = vcmp.lt.s32.totalorder %v766_v2, 17  ;;  %vm767_vm3 = vcmp.lt.s32.totalorder %v766_v2, 13 }
 0x41b   :  { %v810_v50 = vmul.f32 0.015625, %v806_v47 }
 0x41c   :  { %v843_v51 = vpack.c.bf16 %v840_v49, %v839_v48 }
 0x41d   :  { %v814_v52 = vadd.f32 1e-05, %v810_v50 }
 0x41e   :  { %9460 = vmatmul.mubr.msk.bf16.vlgmr.msra.gmra.mxu0 %vm663_vm14, %v843_v51 }
 0x41f   :  { %11558 = vrsqrt.f32 %v814_v52  ;;  %941 = vmatprep.mubr.bf16.mxu0 %v12085_v34 }
 0x423   :  { %v11557_v54 = vpop.eup %11556 }
 0x424   :  { %v821_v55 = vmul.f32 %v11557_v54, %v789_v16 }
 0x426   :  { %v831_v58 = vmul.f32 %v9450_v22, %v821_v55 }
 0x428   :  { %v841_v61 = vadd.f32 %v9451_v3, %v831_v58 }
 0x42c   :  { %v11559_v56 = vpop.eup %11558 }
 0x42d   :  { %v822_v57 = vmul.f32 %v11559_v56, %v790_v21 }
 0x42f   :  { %v832_v59 = vmul.f32 %v9450_v22, %v822_v57 }
 0x431   :  { %v842_v62 = vadd.f32 %v9451_v3, %v832_v59  ;;  %v12091_v3 = vmov -1e+30  }
 0x432   :  { %v12714_v27 = vsel %vm4506_vm2, 0.0, %v12091_v3 }
 0x433   :  { %v844_v63 = vpack.c.bf16 %v842_v62, %v841_v61 }
 0x435   :  { %9461 = vmatmul.mubr.msk.bf16.gmra.mxu0 %vm663_vm14, %v844_v63 }
 0x436   :  { %10172 = vmatprep.mubr.msk.bf16.mxu0 %vm12088_vm1, %v12080_v43 }
 0x4de   :  { %v933_v4 = vpop.f32.mrf.mxu0 }
 0x4e0   :  { %v12679_v5 = vpop.f32.mrf.mxu0 }
 0x4e2   :  { %v937_v6 = vpop.f32.mrf.mxu0 }
 0x4e3   :  { %v11020_v7 = vpack.i.bf16 %v937_v6, %v933_v4  ;;  %v992_v16 = vpack.c.bf16 %v937_v6, %v933_v4  ;;  %v12754_v6 = vsel %vm767_vm3, 0.0, %v12091_v3 }
 0x4e4   :  { %v12682_v9 = vpop.f32.mrf.mxu0 }
 0x4e5   :  { %11021 = vrot.lane.b32.xlu0 %v11020_v7, %s12086_s13  ;;  %v1040_v61 = vpack.c.bf16 %v12682_v9, %v12679_v5 }
 0x4f5   :  { %v943_v10 = vpop.f32.mrf.mxu0 }
 0x4f7   :  { %v12684_v12 = vpop.f32.mrf.mxu0 }
 0x4f9   :  { %v947_v13 = vpop.f32.mrf.mxu0 }
 0x4fa   :  { %v11035_v14 = vpack.i.bf16 %v947_v13, %v943_v10  ;;  %v993_v15 = vpack.c.bf16 %v947_v13, %v943_v10 }
 0x4fb   :  { %v12742_v62 = vpop.f32.mrf.mxu0 }
 0x4fc   :  { %11036 = vrot.lane.b32.xlu0 %v11035_v14, %s12087_s17  ;;  %11026 = vrot.lane.b32.xlu1 %v11035_v14, %s12086_s13  ;;  %v1041_v63 = vpack.c.bf16 %v12742_v62, %v12684_v12 }
 0x500   :  { %11046 = vrot.lane.b32.xlu0 %v11035_v14, %s12089_s21  ;;  %11031 = vrot.lane.b32.xlu1 %v11020_v7, %s12087_s17 }
 0x504   :  { %11041 = vrot.lane.b32.xlu1 %v11020_v7, %s12089_s21  ;;  %1099 = vrot.lane.b32.xlu0 %v993_v15, %s12090_s25 }
 0x508   :  { %1049 = vrot.lane.b32.xlu1 %v992_v16, %s12090_s25 }
 0x557   :  { %v11022_v17 = vpop.permute.xlu0 %11021 }
 0x558   :  { %v11024_v18 = vunpack.i.h.bf16 %v11022_v17  ;;  %v11023_v19 = vunpack.i.l.bf16 %v11022_v17 }
 0x55a   :  { %v994_v20 = vpack.c.bf16 %v11024_v18, %v11023_v19 }
 0x55c   :  { %1149 = vrot.lane.b32.xlu1 %v994_v20, %s12090_s25 }
 0x56e   :  { %v11037_v21 = vpop.permute.xlu0 %11036  ;;  %v11027_v23 = vpop.permute.xlu1 %11026 }
 0x56f   :  { %v11029_v24 = vunpack.i.h.bf16 %v11027_v23  ;;  %v11028_v25 = vunpack.i.l.bf16 %v11027_v23  ;;  %v11039_v26 = vunpack.i.h.bf16 %v11037_v21  ;;  %v11038_v28 = vunpack.i.l.bf16 %v11037_v21 }
 0x571   :  { %v995_v29 = vpack.c.bf16 %v11029_v24, %v11028_v25  ;;  %v997_v38 = vpack.c.bf16 %v11039_v26, %v11038_v28 }
 0x572   :  { %v11047_v30 = vpop.permute.xlu0 %11046  ;;  %v11032_v32 = vpop.permute.xlu1 %11031 }
 0x573   :  { %v11034_v33 = vunpack.i.h.bf16 %v11032_v32  ;;  %v11033_v0 = vunpack.i.l.bf16 %v11032_v32  ;;  %1199 = vrot.lane.b32.xlu0 %v995_v29, %s12090_s25  ;;  %v11049_v35 = vunpack.i.h.bf16 %v11047_v30  ;;  %v11048_v37 = vunpack.i.l.bf16 %v11047_v30 }
 0x575   :  { %v996_v11 = vpack.c.bf16 %v11034_v33, %v11033_v0  ;;  %v999_v42 = vpack.c.bf16 %v11049_v35, %v11048_v37 }
 0x576   :  { %v11042_v39 = vpop.permute.xlu1 %11041  ;;  %v1100_v44 = vpop.permute.xlu0 %1099 }
 0x577   :  { %v11044_v40 = vunpack.i.h.bf16 %v11042_v39  ;;  %v11043_v31 = vunpack.i.l.bf16 %v11042_v39  ;;  %1249 = vrot.lane.b32.xlu1 %v996_v11, %s12090_s25  ;;  %1299 = vrot.lane.b32.xlu0 %v997_v38, %s12090_s25  ;;  %v1105_v45 = vsel %vm387_vm9, %v1100_v44, 0 }
 0x579   :  { %v998_v41 = vpack.c.bf16 %v11044_v40, %v11043_v31 }
 0x57a   :  { %v1050_v1 = vpop.permute.xlu1 %1049 }
 0x57b   :  { %v1055_v22 = vsel %vm387_vm9, %v1050_v1, 0  ;;  %1349 = vrot.lane.b32.xlu1 %v998_v41, %s12090_s25  ;;  %1399 = vrot.lane.b32.xlu0 %v999_v42, %s12090_s25 }
 0x57c   :  { %10171 = vmatpush3.bf16.xpose.msra.mxu0 %v1055_v22 }
 0x57d   :  { %10176 = vmatprep.subr.bf16.mxu0 %v12080_v43 }
 0x583   :  { %10173 = vmatmul.mubr.msk.bf16.vlgmr.msra.gmra.mxu0 %vm387_vm9, %v992_v16 }
 0x584   :  { %10177 = vmatpush3.bf16.xpose.msra.mxu0 %v1105_v45  ;;  %10178 = vmatprep.mubr.msk.bf16.mxu0 %vm12088_vm1, %v12080_v43 }
 0x585   :  { %10188 = vmatprep.subr.bf16.mxu0 %v12080_v43 }
 0x58b   :  { %10179 = vmatmul.mubr.msk.bf16.vlgmr.msra.gmra.mxu0 %vm387_vm9, %v993_v15 }
 0x58c   :  { %10190 = vmatprep.mubr.msk.bf16.mxu0 %vm12088_vm1, %v12080_v43 }
 0x5ce   :  { %v1150_v47 = vpop.permute.xlu1 %1149 }
 0x5cf   :  { %v1155_v48 = vsel %vm387_vm9, %v1150_v47, 0 }
 0x5d0   :  { %10183 = vmatpush3.bf16.xpose.msra.mxu1 %v1155_v48 }
 0x5d1   :  { %10194 = vmatprep.subr.bf16.mxu1 %v12080_v43 }
 0x5d7   :  { %10185 = vmatmul.mubr.msk.bf16.vlgmr.msra.gmra.mxu1 %vm387_vm9, %v994_v20 }
 0x5d8   :  { %10196 = vmatprep.mubr.msk.bf16.mxu1 %vm12088_vm1, %v12080_v43 }
 0x5e5   :  { %v1200_v49 = vpop.permute.xlu0 %1199 }
 0x5e6   :  { %v1205_v50 = vsel %vm387_vm9, %v1200_v49, 0 }
 0x5e7   :  { %10189 = vmatpush3.bf16.xpose.msra.mxu0 %v1205_v50 }
 0x5e8   :  { %10200 = vmatprep.subr.bf16.mxu0 %v12080_v43 }
 0x5e9   :  { %v1250_v51 = vpop.permute.xlu1 %1249  ;;  %v1300_v54 = vpop.permute.xlu0 %1299 }
 0x5ea   :  { %v1255_v52 = vsel %vm387_vm9, %v1250_v51, 0  ;;  %v1305_v55 = vsel %vm387_vm9, %v1300_v54, 0 }
 0x5eb   :  { %10195 = vmatpush3.bf16.xpose.msra.mxu1 %v1255_v52 }
 0x5ec   :  { %10206 = vmatprep.subr.bf16.mxu1 %v12080_v43 }
 0x5ed   :  { %v1350_v56 = vpop.permute.xlu1 %1349  ;;  %v1400_v58 = vpop.permute.xlu0 %1399 }
 0x5ee   :  { %10191 = vmatmul.mubr.msk.bf16.vlgmr.msra.gmra.mxu0 %vm387_vm9, %v995_v29  ;;  %v1355_v57 = vsel %vm387_vm9, %v1350_v56, 0  ;;  %v1405_v59 = vsel %vm387_vm9, %v1400_v58, 0 }
 0x5ef   :  { %10201 = vmatpush3.bf16.xpose.msra.mxu0 %v1305_v55  ;;  %10202 = vmatprep.mubr.msk.bf16.mxu0 %vm12088_vm1, %v12080_v43 }
 0x5f0   :  { %10212 = vmatprep.subr.bf16.mxu0 %v12080_v43 }
 0x5f2   :  { %10197 = vmatmul.mubr.msk.bf16.vlgmr.msra.gmra.mxu1 %vm387_vm9, %v996_v11 }
 0x5f3   :  { %10207 = vmatpush3.bf16.xpose.msra.mxu1 %v1355_v57  ;;  %10208 = vmatprep.mubr.msk.bf16.mxu1 %vm12088_vm1, %v12080_v43 }
 0x5f4   :  { %10218 = vmatprep.subr.bf16.mxu1 %v12080_v43 }
 0x5f6   :  { %10203 = vmatmul.mubr.msk.bf16.vlgmr.msra.gmra.mxu0 %vm387_vm9, %v997_v38 }
 0x5f7   :  { %10213 = vmatpush3.bf16.xpose.msra.mxu0 %v1405_v59  ;;  %10214 = vmatprep.mubr.msk.bf16.mxu0 %vm12088_vm1, %v12080_v43 }
 0x5f8   :  { %10224 = vmatprep.subr.bf16.mxu0 %v12080_v43 }
 0x5fa   :  { %10209 = vmatmul.mubr.msk.bf16.vlgmr.msra.gmra.mxu1 %vm387_vm9, %v998_v41 }
 0x5fb   :  { %10219 = vmatpush3.bf16.msra.mxu1 %v1040_v61  ;;  %10220 = vmatprep.mubr.msk.bf16.mxu1 %vm12088_vm1, %v12080_v43 }
 0x5fc   :  { %10230 = vmatprep.subr.bf16.mxu1 %v12080_v43 }
 0x5fe   :  { %10215 = vmatmul.mubr.msk.bf16.vlgmr.msra.gmra.mxu0 %vm387_vm9, %v999_v42 }
 0x5ff   :  { %10225 = vmatpush3.bf16.msra.mxu0 %v1041_v63  ;;  %10226 = vmatprep.mubr.msk.bf16.mxu0 %vm12088_vm1, %v12080_v43 }
 0x600   :  { %10236 = vmatprep.subr.bf16.mxu0 %v12080_v43 }
 0x643   :  { %v1091_v4 = vpop.f32.mrf.mxu0 }
 0x644   :  { %v1448_v7 = vmul.f32 0.25, %v1091_v4 }
 0x645   :  { %v10174_v10 = vpop.f32.mrf.mxu0 }
 0x646   :  { %v12757_v13 = vadd.f32 %v1448_v7, %v12754_v6 }
 0x647   :  { %v1094_v14 = vpop.f32.mrf.mxu0 }
 0x648   :  { %v1449_v15 = vmul.f32 0.25, %v1094_v14  ;;  %v1480_v16 = vsel %vm387_vm9, %v12757_v13, -inf }
 0x649   :  { %1481 = vmax.xlane.f32.xlu1 %v1480_v16  ;;  %v10175_v17 = vpop.f32.mrf.mxu0 }
 0x64a   :  { %v12762_v18 = vadd.f32 %v1449_v15, %v12754_v6 }
 0x64b   :  { %v1141_v19 = vpop.f32.mrf.mxu0 }
 0x64c   :  { %v1450_v20 = vmul.f32 0.25, %v1141_v19  ;;  %v1483_v21 = vsel %vm387_vm9, %v12762_v18, -inf }
 0x64d   :  { %1484 = vmax.xlane.f32.xlu0 %v1483_v21  ;;  %v10180_v23 = vpop.f32.mrf.mxu0 }
 0x64e   :  { %v12767_v24 = vadd.f32 %v1450_v20, %v12754_v6 }
 0x64f   :  { %v1144_v25 = vpop.f32.mrf.mxu0 }
 0x650   :  { %v1451_v26 = vmul.f32 0.25, %v1144_v25  ;;  %v1486_v28 = vsel %vm387_vm9, %v12767_v24, -inf }
 0x651   :  { %1487 = vmax.xlane.f32.xlu0 %v1486_v28  ;;  %v10181_v29 = vpop.f32.mrf.mxu0 }
 0x652   :  { %v12772_v30 = vadd.f32 %v1451_v26, %v12754_v6 }
 0x654   :  { %v1489_v32 = vsel %vm387_vm9, %v12772_v30, -inf }
 0x655   :  { %1490 = vmax.xlane.f32.xlu1 %v1489_v32 }
 0x697   :  { %v1191_v33 = vpop.f32.mrf.mxu1 }
 0x698   :  { %v1452_v0 = vmul.f32 0.25, %v1191_v33 }
 0x699   :  { %v10186_v35 = vpop.f32.mrf.mxu1 }
 0x69a   :  { %v12777_v37 = vadd.f32 %v1452_v0, %v12754_v6 }
 0x69b   :  { %v1194_v11 = vpop.f32.mrf.mxu1 }
 0x69c   :  { %v1453_v38 = vmul.f32 0.25, %v1194_v11  ;;  %v1492_v39 = vsel %vm387_vm9, %v12777_v37, -inf }
 0x69d   :  { %v10187_v40 = vpop.f32.mrf.mxu1  ;;  %1493 = vmax.xlane.f32.xlu0 %v1492_v39 }
 0x69e   :  { %v12782_v31 = vadd.f32 %v1453_v38, %v12754_v6 }
 0x6a0   :  { %v1495_v41 = vsel %vm387_vm9, %v12782_v31, -inf }
 0x6a1   :  { %1496 = vmax.xlane.f32.xlu1 %v1495_v41 }
 0x6ae   :  { %v1241_v42 = vpop.f32.mrf.mxu0 }
 0x6af   :  { %v1454_v1 = vmul.f32 0.25, %v1241_v42 }
 0x6b0   :  { %v10192_v22 = vpop.f32.mrf.mxu0 }
 0x6b1   :  { %v12787_v44 = vadd.f32 %v1454_v1, %v12754_v6  ;;  %v12833_v22 = vpack.i.bf16 %v12742_v62, %v12684_v12 }
 0x6b2   :  { %v1244_v45 = vpop.f32.mrf.mxu0  ;;  %v1291_v2 = vpop.f32.mrf.mxu1 }
 0x6b3   :  { %v1455_v3 = vmul.f32 0.25, %v1244_v45  ;;  %v1456_v47 = vmul.f32 0.25, %v1291_v2  ;;  %v1498_v48 = vsel %vm387_vm9, %v12787_v44, -inf  ;;  %v12839_v45 = vpack.i.bf16 %v12682_v9, %v12679_v5 }
 0x6b4   :  { %v10198_v49 = vpop.f32.mrf.mxu1  ;;  %1499 = vmax.xlane.f32.xlu0 %v1498_v48  ;;  %v10193_v50 = vpop.f32.mrf.mxu0 }
 0x6b5   :  { %v12792_v51 = vadd.f32 %v1456_v47, %v12754_v6  ;;  %v12795_v52 = vadd.f32 %v1455_v3, %v12754_v6 }
 0x6b6   :  { %v1294_v54 = vpop.f32.mrf.mxu1  ;;  %v1341_v55 = vpop.f32.mrf.mxu0 }
 0x6b7   :  { %v1457_v56 = vmul.f32 0.25, %v1294_v54  ;;  %v1458_v57 = vmul.f32 0.25, %v1341_v55  ;;  %v1504_v58 = vsel %vm387_vm9, %v12792_v51, -inf  ;;  %v1501_v59 = vsel %vm387_vm9, %v12795_v52, -inf }
 0x6b8   :  { %v10199_v61 = vpop.f32.mrf.mxu1  ;;  %1505 = vmax.xlane.f32.xlu0 %v1504_v58  ;;  %1502 = vmax.xlane.f32.xlu1 %v1501_v59  ;;  %v10204_v63 = vpop.f32.mrf.mxu0 }
 0x6b9   :  { %v12802_v4 = vadd.f32 %v1457_v56, %v12754_v6  ;;  %v12805_v7 = vadd.f32 %v1458_v57, %v12754_v6 }
 0x6ba   :  { %v1344_v10 = vpop.f32.mrf.mxu0  ;;  %v1391_v14 = vpop.f32.mrf.mxu1 }
 0x6bb   :  { %v1459_v15 = vmul.f32 0.25, %v1344_v10  ;;  %v1460_v16 = vmul.f32 0.25, %v1391_v14  ;;  %v1507_v17 = vsel %vm387_vm9, %v12802_v4, -inf  ;;  %v1510_v19 = vsel %vm387_vm9, %v12805_v7, -inf }
 0x6bc   :  { %v10210_v20 = vpop.f32.mrf.mxu1  ;;  %1508 = vmax.xlane.f32.xlu1 %v1507_v17  ;;  %1511 = vmax.xlane.f32.xlu0 %v1510_v19  ;;  %v10205_v21 = vpop.f32.mrf.mxu0 }
 0x6bd   :  { %v12812_v23 = vadd.f32 %v1460_v16, %v12754_v6  ;;  %v12815_v25 = vadd.f32 %v1459_v15, %v12754_v6 }
 0x6be   :  { %v1394_v26 = vpop.f32.mrf.mxu1  ;;  %v1441_v28 = vpop.f32.mrf.mxu0 }
 0x6bf   :  { %v1461_v29 = vmul.f32 0.25, %v1394_v26  ;;  %v1462_v32 = vmul.f32 0.25, %v1441_v28  ;;  %v1516_v33 = vsel %vm387_vm9, %v12812_v23, -inf  ;;  %v1513_v0 = vsel %vm387_vm9, %v12815_v25, -inf }
 0x6c0   :  { %v10211_v35 = vpop.f32.mrf.mxu1  ;;  %1517 = vmax.xlane.f32.xlu0 %v1516_v33  ;;  %1514 = vmax.xlane.f32.xlu1 %v1513_v0  ;;  %v10216_v11 = vpop.f32.mrf.mxu0 }
 0x6c1   :  { %v12822_v38 = vadd.f32 %v1461_v29, %v12754_v6  ;;  %v12825_v39 = vadd.f32 %v1462_v32, %v12754_v6 }
 0x6c2   :  { %v1444_v40 = vpop.f32.mrf.mxu0 }
 0x6c3   :  { %v1519_v41 = vsel %vm387_vm9, %v12822_v38, -inf  ;;  %v1522_v42 = vsel %vm387_vm9, %v12825_v39, -inf  ;;  %v1463_v50 = vmul.f32 0.25, %v1444_v40 }
 0x6c4   :  { %1520 = vmax.xlane.f32.xlu1 %v1519_v41  ;;  %1523 = vmax.xlane.f32.xlu0 %v1522_v42  ;;  %v10217_v1 = vpop.f32.mrf.mxu0 }
 0x6c5   :  { %v12848_v5 = vadd.f32 %v1463_v50, %v12754_v6 }
 0x6c7   :  { %v1525_v9 = vsel %vm387_vm9, %v12848_v5, -inf }
 0x6d2   :  { %v1482_v3 = vpop.xlane.xlu1 %1481 }
 0x6d3   :  { %v1528_v47 = vsub.f32 %v12757_v13, %v1482_v3 }
 0x6d5   :  { %11056 = vrot.lane.b32.xlu1 %v12833_v22, %s12086_s13  ;;  %v1544_v12 = vmul.f32 1.442695, %v1528_v47 }
 0x6d6   :  { %v1485_v2 = vpop.xlane.xlu0 %1484 }
 0x6d7   :  { %11560 = vpow2.f32 %v1544_v12  ;;  %v1529_v56 = vsub.f32 %v12762_v18, %v1485_v2 }
 0x6d9   :  { %v1546_v58 = vmul.f32 1.442695, %v1529_v56 }
 0x6da   :  { %11051 = vrot.lane.b32.xlu0 %v12839_v45, %s12086_s13  ;;  %v1488_v48 = vpop.xlane.xlu0 %1487 }
 0x6db   :  { %v1530_v62 = vsub.f32 %v12767_v24, %v1488_v48 }
 0x6dd   :  { %v1548_v49 = vmul.f32 1.442695, %v1530_v62 }
 0x6de   :  { %11066 = vrot.lane.b32.xlu0 %v12833_v22, %s12087_s17  ;;  %v1491_v57 = vpop.xlane.xlu1 %1490 }
 0x6df   :  { %11562 = vpow2.f32 %v1548_v49  ;;  %v1531_v59 = vsub.f32 %v12772_v30, %v1491_v57 }
 0x6e0   :  { %11564 = vpow2.f32 %v1546_v58 }
 0x6e1   :  { %v1550_v61 = vmul.f32 1.442695, %v1531_v59 }
 0x6e3   :  { %11566 = vpow2.f32 %v1550_v61 }
 0x6e4   :  { %v12852_v54 = vpop.eup %11560 }
 0x6e5   :  { %v1576_v13 = vsel %vm387_vm9, %v12852_v54, 0.0 }
 0x6ec   :  { %v12856_v55 = vpop.eup %11562 }
 0x6ed   :  { %v1582_v24 = vsel %vm387_vm9, %v12856_v55, 0.0  ;;  %v12865_v15 = vpop.eup %11564 }
 0x6ee   :  { %v1579_v18 = vsel %vm387_vm9, %v12865_v15, 0.0 }
 0x6f0   :  { %v12870_v20 = vpop.eup %11566 }
 0x6f1   :  { %v1585_v30 = vsel %vm387_vm9, %v12870_v20, 0.0 }
 0x6f9   :  { %1526 = vmax.xlane.f32.xlu1 %v1525_v9 }
 0x6fd   :  { %1577 = vadd.xlane.f32.xlu0 %v1576_v13 }
 0x701   :  { %1583 = vadd.xlane.f32.xlu0 %v1582_v24 }
 0x70a   :  { %11061 = vrot.lane.b32.xlu1 %v12839_v45, %s12087_s17 }
 0x726   :  { %v1494_v63 = vpop.xlane.xlu0 %1493 }
 0x727   :  { %v1532_v10 = vsub.f32 %v12777_v37, %v1494_v63 }
 0x729   :  { %v1552_v14 = vmul.f32 1.442695, %v1532_v10 }
 0x72a   :  { %v1497_v16 = vpop.xlane.xlu1 %1496 }
 0x72b   :  { %11568 = vpow2.f32 %v1552_v14  ;;  %v1533_v17 = vsub.f32 %v12782_v31, %v1497_v16 }
 0x72d   :  { %v1554_v19 = vmul.f32 1.442695, %v1533_v17 }
 0x72e   :  { %1580 = vadd.xlane.f32.xlu1 %v1579_v18 }
 0x72f   :  { %11570 = vpow2.f32 %v1554_v19 }
 0x732   :  { %1586 = vadd.xlane.f32.xlu1 %v1585_v30 }
 0x738   :  { %v12874_v37 = vpop.eup %11568 }
 0x739   :  { %v1588_v21 = vsel %vm387_vm9, %v12874_v37, 0.0 }
 0x73a   :  { %1589 = vadd.xlane.f32.xlu0 %v1588_v21 }
 0x73c   :  { %v12878_v26 = vpop.eup %11570 }
 0x73d   :  { %v1500_v31 = vpop.xlane.xlu0 %1499  ;;  %v1591_v28 = vsel %vm387_vm9, %v12878_v26, 0.0 }
 0x73e   :  { %v1534_v29 = vsub.f32 %v12787_v44, %v1500_v31  ;;  %1592 = vadd.xlane.f32.xlu1 %v1591_v28 }
 0x740   :  { %v1556_v32 = vmul.f32 1.442695, %v1534_v29 }
 0x741   :  { %v1506_v33 = vpop.xlane.xlu0 %1505  ;;  %v1503_v0 = vpop.xlane.xlu1 %1502 }
 0x742   :  { %11572 = vpow2.f32 %v1556_v32  ;;  %v1536_v35 = vsub.f32 %v12792_v51, %v1506_v33  ;;  %v1535_v11 = vsub.f32 %v12795_v52, %v1503_v0 }
 0x744   :  { %v1560_v40 = vmul.f32 1.442695, %v1536_v35  ;;  %v1558_v41 = vmul.f32 1.442695, %v1535_v11 }
 0x745   :  { %v1509_v42 = vpop.xlane.xlu1 %1508  ;;  %v1512_v1 = vpop.xlane.xlu0 %1511 }
 0x746   :  { %11574 = vpow2.f32 %v1560_v40  ;;  %v1537_v2 = vsub.f32 %v12802_v4, %v1509_v42  ;;  %v1538_v3 = vsub.f32 %v12805_v7, %v1512_v1 }
 0x747   :  { %11576 = vpow2.f32 %v1558_v41 }
 0x748   :  { %v1562_v44 = vmul.f32 1.442695, %v1537_v2  ;;  %v1564_v47 = vmul.f32 1.442695, %v1538_v3 }
 0x749   :  { %v1518_v48 = vpop.xlane.xlu0 %1517  ;;  %v1515_v12 = vpop.xlane.xlu1 %1514 }
 0x74a   :  { %11578 = vpow2.f32 %v1562_v44  ;;  %v1540_v62 = vsub.f32 %v12812_v23, %v1518_v48  ;;  %v1539_v51 = vsub.f32 %v12815_v25, %v1515_v12 }
 0x74b   :  { %11580 = vpow2.f32 %v1564_v47 }
 0x74c   :  { %v1568_v52 = vmul.f32 1.442695, %v1540_v62  ;;  %v1566_v49 = vmul.f32 1.442695, %v1539_v51 }
 0x74d   :  { %v1521_v50 = vpop.xlane.xlu1 %1520  ;;  %v1524_v9 = vpop.xlane.xlu0 %1523 }
 0x74e   :  { %11582 = vpow2.f32 %v1568_v52  ;;  %v1541_v4 = vsub.f32 %v12822_v38, %v1521_v50  ;;  %v1542_v7 = vsub.f32 %v12825_v39, %v1524_v9 }
 0x74f   :  { %v12891_v13 = vpop.eup %11572  ;;  %11584 = vpow2.f32 %v1566_v49 }
 0x750   :  { %v1570_v24 = vmul.f32 1.442695, %v1541_v4  ;;  %v1572_v56 = vmul.f32 1.442695, %v1542_v7  ;;  %v1594_v23 = vsel %vm387_vm9, %v12891_v13, 0.0 }
 0x751   :  { %1595 = vadd.xlane.f32.xlu0 %v1594_v23  ;;  %v11057_v31 = vpop.permute.xlu1 %11056  ;;  %v11052_v35 = vpop.permute.xlu0 %11051 }
 0x752   :  { %11586 = vpow2.f32 %v1570_v24  ;;  %v11054_v44 = vunpack.i.h.bf16 %v11052_v35  ;;  %v11053_v47 = vunpack.i.l.bf16 %v11052_v35  ;;  %v11059_v49 = vunpack.i.h.bf16 %v11057_v31 }
 0x753   :  { %v12895_v25 = vpop.eup %11574  ;;  %11588 = vpow2.f32 %v1572_v56  ;;  %v11058_v50 = vunpack.i.l.bf16 %v11057_v31 }
 0x754   :  { %v12897_v57 = vpop.eup %11576  ;;  %v1600_v38 = vsel %vm387_vm9, %v12895_v25, 0.0  ;;  %v1042_v9 = vpack.c.bf16 %v11054_v44, %v11053_v47 }
 0x755   :  { %1601 = vadd.xlane.f32.xlu0 %v1600_v38  ;;  %v1597_v39 = vsel %vm387_vm9, %v12897_v57, 0.0  ;;  %v12936_v11 = vpop.permute.xlu0 %11066 }
 0x756   :  { %1598 = vadd.xlane.f32.xlu1 %v1597_v39 }
 0x757   :  { %v12903_v58 = vpop.eup %11578 }
 0x758   :  { %v12905_v59 = vpop.eup %11580  ;;  %v1603_v61 = vsel %vm387_vm9, %v12903_v58, 0.0 }
 0x759   :  { %v1606_v63 = vsel %vm387_vm9, %v12905_v59, 0.0 }
 0x75a   :  { %1607 = vadd.xlane.f32.xlu0 %v1606_v63  ;;  %1604 = vadd.xlane.f32.xlu1 %v1603_v61 }
 0x75b   :  { %v12911_v10 = vpop.eup %11582 }
 0x75c   :  { %v12913_v14 = vpop.eup %11584  ;;  %v1612_v16 = vsel %vm387_vm9, %v12911_v10, 0.0 }
 0x75d   :  { %v1609_v17 = vsel %vm387_vm9, %v12913_v14, 0.0 }
 0x75e   :  { %1613 = vadd.xlane.f32.xlu0 %v1612_v16  ;;  %1610 = vadd.xlane.f32.xlu1 %v1609_v17 }
 0x75f   :  { %v12919_v19 = vpop.eup %11586 }
 0x760   :  { %v12921_v18 = vpop.eup %11588  ;;  %v1615_v30 = vsel %vm387_vm9, %v12919_v19, 0.0 }
 0x761   :  { %v1618_v21 = vsel %vm387_vm9, %v12921_v18, 0.0 }
 0x762   :  { %1619 = vadd.xlane.f32.xlu0 %v1618_v21  ;;  %1616 = vadd.xlane.f32.xlu1 %v1615_v30 }
 0x778   :  { %11076 = vrot.lane.b32.xlu0 %v12833_v22, %s12089_s21 }
 0x782   :  { %v1527_v28 = vpop.xlane.xlu1 %1526 }
 0x783   :  { %v1543_v29 = vsub.f32 %v12848_v5, %v1527_v28 }
 0x785   :  { %v1574_v32 = vmul.f32 1.442695, %v1543_v29  ;;  %v11069_v29 = vunpack.i.h.bf16 %v12936_v11 }
 0x786   :  { %v1578_v40 = vpop.xlane.xlu0 %1577  ;;  %v11062_v22 = vpop.permute.xlu1 %11061 }
 0x787   :  { %11590 = vpow2.f32 %v1574_v32  ;;  %v11064_v56 = vunpack.i.h.bf16 %v11062_v22  ;;  %v11068_v32 = vunpack.i.l.bf16 %v12936_v11 }
 0x788   :  { %11592 = vrcp.f32 %v1578_v40 }
 0x78a   :  { %v1584_v41 = vpop.xlane.xlu0 %1583 }
 0x794   :  { %v12930_v33 = vpop.eup %11590 }
 0x795   :  { %v1621_v0 = vsel %vm387_vm9, %v12930_v33, 0.0  ;;  %v11593_v1 = vpop.eup %11592 }
 0x796   :  { %1622 = vadd.xlane.f32.xlu1 %v1621_v0  ;;  %v1640_v48 = vmul.f32 %v11593_v1, %v12852_v54 }
 0x7a7   :  { %11071 = vrot.lane.b32.xlu1 %v12839_v45, %s12089_s21 }
 0x7b7   :  { %v1581_v42 = vpop.xlane.xlu1 %1580 }
 0x7b8   :  { %11594 = vrcp.f32 %v1581_v42  ;;  %v1045_v42 = vpack.c.bf16 %v11069_v29, %v11068_v32  ;;  %v11432_v29 = vld [vmem:[%s12159_s24 + $0x18] sm:$0xff]  }
 0x7b9   :  { %11596 = vrcp.f32 %v1584_v41 }
 0x7bb   :  { %v1587_v5 = vpop.xlane.xlu1 %1586 }
 0x7bc   :  { %11598 = vrcp.f32 %v1587_v5 }
 0x7c3   :  { %v1590_v2 = vpop.xlane.xlu0 %1589 }
 0x7c4   :  { %11600 = vrcp.f32 %v1590_v2 }
 0x7c5   :  { %v11595_v3 = vpop.eup %11594 }
 0x7c6   :  { %v1641_v45 = vmul.f32 %v11595_v3, %v12865_v15  ;;  %v11597_v12 = vpop.eup %11596  ;;  %v1043_v15 = vpack.c.bf16 %v11059_v49, %v11058_v50 }
 0x7c7   :  { %v1593_v62 = vpop.xlane.xlu1 %1592  ;;  %v1642_v4 = vmul.f32 %v11597_v12, %v12856_v55 }
 0x7c8   :  { %11602 = vrcp.f32 %v1593_v62  ;;  %v1656_v51 = vpack.c.bf16 %v1641_v45, %v1640_v48 }
 0x7c9   :  { %v11599_v52 = vpop.eup %11598 }
 0x7ca   :  { %10221 = vmatmul.mubr.msk.bf16.vlgmr.msra.gmra.mxu1 %vm387_vm9, %v1656_v51  ;;  %v1643_v7 = vmul.f32 %v11599_v52, %v12870_v20  ;;  %v11063_v20 = vunpack.i.l.bf16 %v11062_v22 }
 0x7cb   :  { %10231 = vmatpush3.bf16.msra.mxu1 %v1042_v9  ;;  %10232 = vmatprep.mubr.msk.bf16.mxu1 %vm12088_vm1, %v12080_v43 }
 0x7cc   :  { %v1657_v54 = vpack.c.bf16 %v1643_v7, %v1642_v4  ;;  %10242 = vmatprep.subr.bf16.mxu1 %v12080_v43  ;;  %v1044_v61 = vpack.c.bf16 %v11064_v56, %v11063_v20 }
 0x7ce   :  { %10227 = vmatmul.mubr.msk.bf16.vlgmr.msra.gmra.mxu0 %vm387_vm9, %v1657_v54 }
 0x7cf   :  { %10237 = vmatpush3.bf16.msra.mxu0 %v1043_v15  ;;  %10238 = vmatprep.mubr.msk.bf16.mxu0 %vm12088_vm1, %v12080_v43 }
 0x7d0   :  { %10248 = vmatprep.subr.bf16.mxu0 %v12080_v43 }
 0x7d1   :  { %v11601_v24 = vpop.eup %11600 }
 0x7d2   :  { %v1644_v23 = vmul.f32 %v11601_v24, %v12874_v37 }
 0x7d5   :  { %v11603_v55 = vpop.eup %11602 }
 0x7d6   :  { %v1645_v38 = vmul.f32 %v11603_v55, %v12878_v26 }
 0x7d8   :  { %v1658_v39 = vpack.c.bf16 %v1645_v38, %v1644_v23 }
 0x7da   :  { %10233 = vmatmul.mubr.msk.bf16.vlgmr.msra.gmra.mxu1 %vm387_vm9, %v1658_v39  ;;  %v1596_v63 = vpop.xlane.xlu0 %1595 }
 0x7db   :  { %10243 = vmatpush3.bf16.msra.mxu1 %v1044_v61  ;;  %10244 = vmatprep.mubr.msk.bf16.mxu1 %vm12088_vm1, %v12080_v43  ;;  %11604 = vrcp.f32 %v1596_v63 }
 0x7dc   :  { %10254 = vmatprep.subr.bf16.mxu1 %v12080_v43 }
 0x7de   :  { %v1602_v16 = vpop.xlane.xlu0 %1601 }
 0x7df   :  { %v1599_v17 = vpop.xlane.xlu1 %1598 }
 0x7e0   :  { %11606 = vrcp.f32 %v1599_v17 }
 0x7e1   :  { %11608 = vrcp.f32 %v1602_v16 }
 0x7e3   :  { %v1608_v30 = vpop.xlane.xlu0 %1607  ;;  %v1605_v37 = vpop.xlane.xlu1 %1604 }
 0x7e4   :  { %11610 = vrcp.f32 %v1605_v37 }
 0x7e5   :  { %11612 = vrcp.f32 %v1608_v30 }
 0x7e7   :  { %v1614_v26 = vpop.xlane.xlu0 %1613  ;;  %v1611_v21 = vpop.xlane.xlu1 %1610 }
 0x7e8   :  { %11614 = vrcp.f32 %v1611_v21  ;;  %v11605_v31 = vpop.eup %11604 }
 0x7e9   :  { %v1646_v35 = vmul.f32 %v11605_v31, %v12891_v13 }
 0x7eb   :  { %v1620_v0 = vpop.xlane.xlu0 %1619  ;;  %v1617_v12 = vpop.xlane.xlu1 %1616 }
 0x7ec   :  { %11616 = vrcp.f32 %v1617_v12 }
 0x7ed   :  { %v11607_v28 = vpop.eup %11606  ;;  %11618 = vrcp.f32 %v1614_v26 }
 0x7ee   :  { %v1647_v40 = vmul.f32 %v11607_v28, %v12897_v57  ;;  %v11609_v22 = vpop.eup %11608  ;;  %11620 = vrcp.f32 %v1620_v0 }
 0x7ef   :  { %v11077_v1 = vpop.permute.xlu0 %11076  ;;  %v1648_v2 = vmul.f32 %v11609_v22, %v12895_v25 }
 0x7f0   :  { %v1659_v41 = vpack.c.bf16 %v1647_v40, %v1646_v35  ;;  %v11079_v44 = vunpack.i.h.bf16 %v11077_v1  ;;  %v11078_v47 = vunpack.i.l.bf16 %v11077_v1 }
 0x7f1   :  { %v11611_v5 = vpop.eup %11610 }
 0x7f2   :  { %10239 = vmatmul.mubr.msk.bf16.vlgmr.msra.gmra.mxu0 %vm387_vm9, %v1659_v41  ;;  %v1649_v3 = vmul.f32 %v11611_v5, %v12903_v58  ;;  %v11613_v11 = vpop.eup %11612  ;;  %v1047_v58 = vpack.c.bf16 %v11079_v44, %v11078_v47  ;;  %v11435_v44 = vld [vmem:[%s12159_s24] sm:$0xff]  }
 0x7f3   :  { %10249 = vmatpush3.bf16.msra.mxu0 %v1045_v42  ;;  %10250 = vmatprep.mubr.msk.bf16.mxu0 %vm12088_vm1, %v12080_v43  ;;  %v1650_v48 = vmul.f32 %v11613_v11, %v12905_v59  ;;  %v11434_v11 = vld [vmem:[%s12159_s24 + $0x8] sm:$0xff]  }
 0x7f4   :  { %10260 = vmatprep.subr.bf16.mxu0 %v12080_v43  ;;  %v1660_v13 = vpack.c.bf16 %v1649_v3, %v1648_v2  ;;  %v11433_v3 = vld [vmem:[%s12159_s24 + $0x10] sm:$0xff]  }
 0x7f5   :  { %v11615_v57 = vpop.eup %11614 }
 0x7f6   :  { %10245 = vmatmul.mubr.msk.bf16.vlgmr.msra.gmra.mxu1 %vm387_vm9, %v1660_v13  ;;  %v1651_v45 = vmul.f32 %v11615_v57, %v12913_v14 }
 0x7f7   :  { %10256 = vmatprep.mubr.msk.bf16.mxu1 %vm12088_vm1, %v12080_v43 }
 0x7f8   :  { %v1661_v25 = vpack.c.bf16 %v1651_v45, %v1650_v48 }
 0x7f9   :  { %v11617_v59 = vpop.eup %11616 }
 0x7fa   :  { %10251 = vmatmul.mubr.msk.bf16.vlgmr.msra.gmra.mxu0 %vm387_vm9, %v1661_v25  ;;  %v11619_v14 = vpop.eup %11618  ;;  %v1653_v50 = vmul.f32 %v11617_v59, %v12919_v19 }
 0x7fb   :  { %10261 = vmatpush3.bf16.msra.mxu0 %v1047_v58  ;;  %10262 = vmatprep.mubr.msk.bf16.mxu0 %vm12088_vm1, %v12080_v43  ;;  %v1652_v4 = vmul.f32 %v11619_v14, %v12911_v10  ;;  %v11621_v54 = vpop.eup %11620 }
 0x7fc   :  { %v1654_v24 = vmul.f32 %v11621_v54, %v12921_v18 }
 0x7fd   :  { %v1662_v7 = vpack.c.bf16 %v1653_v50, %v1652_v4 }
 0x81f   :  { %v1623_v62 = vpop.xlane.xlu1 %1622 }
 0x820   :  { %11622 = vrcp.f32 %v1623_v62 }
 0x823   :  { %v11072_v51 = vpop.permute.xlu1 %11071 }
 0x824   :  { %v11074_v52 = vunpack.i.h.bf16 %v11072_v51  ;;  %v11073_v49 = vunpack.i.l.bf16 %v11072_v51 }
 0x826   :  { %v1046_v9 = vpack.c.bf16 %v11074_v52, %v11073_v49 }
 0x828   :  { %10255 = vmatpush3.bf16.msra.mxu1 %v1046_v9 }
 0x829   :  { %10266 = vmatprep.subr.bf16.mxu1 %v11432_v29 }
 0x82b   :  { %10257 = vmatmul.mubr.msk.bf16.vlgmr.msra.gmra.mxu1 %vm387_vm9, %v1662_v7 }
 0x82c   :  { %10267 = vmatpush3.bf16.msra.mxu1 %v11432_v29 }
 0x82d   :  { %v11623_v15 = vpop.eup %11622  ;;  %10268 = vmatprep.subr.bf16.mxu1 %v11433_v3 }
 0x82e   :  { %v1655_v55 = vmul.f32 %v11623_v15, %v12930_v33 }
 0x830   :  { %v1663_v56 = vpack.c.bf16 %v1655_v55, %v1654_v24  ;;  %10269 = vmatpush3.bf16.msra.mxu1 %v11433_v3 }
 0x831   :  { %10270 = vmatprep.subr.bf16.mxu1 %v11434_v11 }
 0x832   :  { %10263 = vmatmul.mubr.msk.bf16.vlgmr.msra.gmra.mxu0 %vm387_vm9, %v1663_v56 }
 0x834   :  { %10271 = vmatpush3.bf16.msra.mxu1 %v11434_v11 }
 0x835   :  { %10272 = vmatprep.subr.bf16.mxu1 %v11435_v44 }
 0x838   :  { %10273 = vmatpush3.bf16.msra.mxu1 %v11435_v44 }
 0x88a   :  { %v12980_v20 = vpop.f32.mrf.mxu1 }
 0x88c   :  { %v10222_v23 = vpop.f32.mrf.mxu1 }
 0x88e   :  { %v12982_v19 = vpop.f32.mrf.mxu1  ;;  %v12984_v38 = vpop.f32.mrf.mxu0 }
 0x890   :  { %v10223_v10 = vpop.f32.mrf.mxu1  ;;  %v10228_v39 = vpop.f32.mrf.mxu0 }
 0x892   :  { %v12986_v61 = vpop.f32.mrf.mxu0 }
 0x894   :  { %v10229_v63 = vpop.f32.mrf.mxu0 }
 0x89a   :  { %v1789_v16 = vpop.f32.mrf.mxu1 }
 0x89c   :  { %v10234_v18 = vpop.f32.mrf.mxu1 }
 0x89e   :  { %v1792_v17 = vpop.f32.mrf.mxu1 }
 0x89f   :  { %v11080_v33 = vpack.i.bf16 %v1792_v17, %v1789_v16 }
 0x8a0   :  { %v10235_v30 = vpop.f32.mrf.mxu1 }
 0x8a1   :  { %11081 = vrot.lane.b32.xlu1 %v11080_v33, %s12082_s26 }
 0x8b2   :  { %v1833_v37 = vpop.f32.mrf.mxu0 }
 0x8b4   :  { %v10240_v26 = vpop.f32.mrf.mxu0 }
 0x8b6   :  { %v1836_v21 = vpop.f32.mrf.mxu0  ;;  %v1877_v28 = vpop.f32.mrf.mxu1 }
 0x8b7   :  { %v11085_v31 = vpack.i.bf16 %v1836_v21, %v1833_v37 }
 0x8b8   :  { %v10241_v32 = vpop.f32.mrf.mxu0  ;;  %v10246_v0 = vpop.f32.mrf.mxu1 }
 0x8b9   :  { %11086 = vrot.lane.b32.xlu0 %v11085_v31, %s12082_s26 }
 0x8ba   :  { %v1880_v35 = vpop.f32.mrf.mxu1  ;;  %v1921_v40 = vpop.f32.mrf.mxu0 }
 0x8bb   :  { %v11090_v22 = vpack.i.bf16 %v1880_v35, %v1877_v28 }
 0x8bc   :  { %v10247_v41 = vpop.f32.mrf.mxu1  ;;  %v10252_v42 = vpop.f32.mrf.mxu0 }
 0x8bd   :  { %11091 = vrot.lane.b32.xlu1 %v11090_v22, %s12092_s29  ;;  %v9484_v22 = vld [vmem:[%s12164_s30] ss:$0 sm:$0xff] }
 0x8be   :  { %v1924_v5 = vpop.f32.mrf.mxu0 }
 0x8bf   :  { %v11095_v1 = vpack.i.bf16 %v1924_v5, %v1921_v40 }
 0x8c0   :  { %v10253_v2 = vpop.f32.mrf.mxu0 }
 0x8c1   :  { %11096 = vrot.lane.b32.xlu0 %v11095_v1, %s12092_s29 }
 0x8eb   :  { %v1965_v13 = vpop.f32.mrf.mxu1 }
 0x8ed   :  { %v10258_v57 = vpop.f32.mrf.mxu1 }
 0x8ef   :  { %v1968_v47 = vpop.f32.mrf.mxu1 }
 0x8f0   :  { %v11100_v48 = vpack.i.bf16 %v1968_v47, %v1965_v13 }
 0x8f1   :  { %v10259_v45 = vpop.f32.mrf.mxu1 }
 0x8f2   :  { %11101 = vrot.lane.b32.xlu1 %v11100_v48, %s12093_s3  ;;  %v2009_v25 = vpop.f32.mrf.mxu0 }
 0x8f4   :  { %v10264_v58 = vpop.f32.mrf.mxu0 }
 0x8f6   :  { %v2012_v12 = vpop.f32.mrf.mxu0 }
 0x8f7   :  { %v11105_v62 = vpack.i.bf16 %v2012_v12, %v2009_v25 }
 0x8f8   :  { %v10265_v59 = vpop.f32.mrf.mxu0 }
 0x8f9   :  { %11106 = vrot.lane.b32.xlu0 %v11105_v62, %s12093_s3 }
 0x913   :  { %v11082_v51 = vpop.permute.xlu1 %11081 }
 0x914   :  { %v11084_v52 = vunpack.i.h.bf16 %v11082_v51  ;;  %v11083_v49 = vunpack.i.l.bf16 %v11082_v51 }
 0x916   :  { %v2065_v54 = vsel %vm387_vm9, %v12982_v19, %v11084_v52  ;;  %v2064_v15 = vsel %vm387_vm9, %v12980_v20, %v11083_v49 }
 0x92b   :  { %v11087_v50 = vpop.permute.xlu0 %11086 }
 0x92c   :  { %v11089_v16 = vunpack.i.h.bf16 %v11087_v50  ;;  %v11088_v18 = vunpack.i.l.bf16 %v11087_v50 }
 0x92e   :  { %v2067_v19 = vsel %vm387_vm9, %v12986_v61, %v11089_v16  ;;  %v2066_v37 = vsel %vm387_vm9, %v12984_v38, %v11088_v18 }
 0x92f   :  { %v11092_v14 = vpop.permute.xlu1 %11091 }
 0x930   :  { %v11094_v9 = vunpack.i.h.bf16 %v11092_v14  ;;  %v11093_v4 = vunpack.i.l.bf16 %v11092_v14 }
 0x932   :  { %v2070_v56 = vsel %vm2068_vm4, %v2065_v54, %v11094_v9  ;;  %v2069_v23 = vsel %vm2068_vm4, %v2064_v15, %v11093_v4 }
 0x933   :  { %v11097_v10 = vpop.permute.xlu0 %11096 }
 0x934   :  { %v11099_v33 = vunpack.i.h.bf16 %v11097_v10  ;;  %v11098_v30 = vunpack.i.l.bf16 %v11097_v10 }
 0x936   :  { %v2072_v31 = vsel %vm2068_vm4, %v2067_v19, %v11099_v33  ;;  %v2071_v28 = vsel %vm2068_vm4, %v2066_v37, %v11098_v30 }
 0x964   :  { %v11102_v7 = vpop.permute.xlu1 %11101 }
 0x965   :  { %v11104_v24 = vunpack.i.h.bf16 %v11102_v7  ;;  %v11103_v55 = vunpack.i.l.bf16 %v11102_v7 }
 0x967   :  { %v2075_v39 = vsel %vm2073_vm6, %v2070_v56, %v11104_v24  ;;  %v2074_v63 = vsel %vm2073_vm6, %v2069_v23, %v11103_v55  ;;  %v11436_v24 = vld [vmem:[%s12179_s20 + $0x18] sm:$0xff]   ;;  %v11437_v55 = vld [vmem:[%s12179_s20 + $0x10] sm:$0xff]   ;;  %v11438_v56 = vld [vmem:[%s12179_s20 + $0x8] sm:$0xff]  }
 0x968   :  { %v2078_v17 = vpack.c.bf16 %v2075_v39, %v2074_v63  ;;  %10278 = vmatprep.subr.bf16.mxu0 %v11436_v24  ;;  %v11439_v23 = vld [vmem:[%s12179_s20] sm:$0xff]  }
 0x969   :  { %10279 = vmatpush3.bf16.msra.mxu0 %v11436_v24 }
 0x96a   :  { %10274 = vmatprep.mubr.msk.bf16.mxu1 %vm663_vm14, %v2078_v17  ;;  %10280 = vmatprep.subr.bf16.mxu0 %v11437_v55 }
 0x96b   :  { %v11107_v20 = vpop.permute.xlu0 %11106 }
 0x96c   :  { %v11109_v26 = vunpack.i.h.bf16 %v11107_v20  ;;  %v11108_v21 = vunpack.i.l.bf16 %v11107_v20 }
 0x96d   :  { %10281 = vmatpush3.bf16.msra.mxu0 %v11437_v55 }
 0x96e   :  { %v2077_v29 = vsel %vm2073_vm6, %v2072_v31, %v11109_v26  ;;  %v2076_v32 = vsel %vm2073_vm6, %v2071_v28, %v11108_v21  ;;  %10282 = vmatprep.subr.bf16.mxu0 %v11438_v56  ;;  %v9485_v28 = vld [vmem:[%s12169_s6] ss:$0 sm:$0xff] }
 0x96f   :  { %v2079_v0 = vpack.c.bf16 %v2077_v29, %v2076_v32 }
 0x971   :  { %10275 = vmatmul.mubr.msk.bf16.vlgmr.msra.gmra.mxu1 %vm663_vm14, %v2079_v0  ;;  %10283 = vmatpush3.bf16.msra.mxu0 %v11438_v56 }
 0x972   :  { %10284 = vmatprep.subr.bf16.mxu0 %v11439_v23 }
 0x975   :  { %10285 = vmatpush3.bf16.msra.mxu0 %v11439_v23 }
 0xa31   :  { %v10276_v35 = vpop.f32.mrf.mxu1 }
 0xa32   :  { %v2169_v1 = vadd.f32 %v10276_v35, %v12646_v53  ;;  %v9486_v35 = vld [vmem:[%s15187_s2] ss:$0 sm:$0xff] }
 0xa33   :  { %v2152_v40 = vpop.f32.mrf.mxu1 }
 0xa34   :  { %v2167_v61 = vadd.f32 %v2152_v40, %v12634_v36  ;;  %v13029_v36 = vadd.f32 %v9484_v22, %v2169_v1 }
 0xa35   :  { %v10277_v41 = vpop.f32.mrf.mxu1 }
 0xa36   :  { %v13018_v38 = vadd.f32 %v9484_v22, %v2167_v61  ;;  %v2170_v42 = vadd.f32 %v10277_v41, %v12652_v60  ;;  %v2190_v53 = vsel %vm663_vm14, %v13029_v36, 0.0 }
 0xa37   :  { %v2155_v5 = vpop.f32.mrf.mxu1 }
 0xa38   :  { %v13022_v2 = vadd.f32 %v9484_v22, %v2170_v42  ;;  %v2168_v3 = vadd.f32 %v2155_v5, %v12641_v46  ;;  %v2184_v11 = vsel %vm663_vm14, %v13018_v38, 0.0 }
 0xa39   :  { %2185 = vadd.xlane.f32.xlu1 %v2184_v11 }
 0xa3a   :  { %v13027_v13 = vadd.f32 %v9484_v22, %v2168_v3  ;;  %v2193_v57 = vsel %vm663_vm14, %v13022_v2, 0.0 }
 0xa3c   :  { %v2187_v60 = vsel %vm663_vm14, %v13027_v13, 0.0 }
 0xa3d   :  { %2194 = vadd.xlane.f32.xlu1 %v2193_v57  ;;  %2188 = vadd.xlane.f32.xlu0 %v2187_v60 }
 0xa41   :  { %2191 = vadd.xlane.f32.xlu0 %v2190_v53 }
 0xac2   :  { %v2186_v46 = vpop.xlane.xlu1 %2185 }
 0xac3   :  { %v2196_v44 = vmul.f32 0.015625, %v2186_v46 }
 0xac5   :  { %v2200_v47 = vsub.f32 %v13018_v38, %v2196_v44  ;;  %v11440_v44 = vld [vmem:[%s15188_s7 + $0x38] sm:$0xff]  }
 0xac6   :  { %v2195_v48 = vpop.xlane.xlu1 %2194  ;;  %v2189_v45 = vpop.xlane.xlu0 %2188  ;;  %10290 = vmatprep.subr.bf16.mxu1 %v11440_v44 }
 0xac7   :  { %v2199_v25 = vmul.f32 0.015625, %v2195_v48  ;;  %v2197_v58 = vmul.f32 0.015625, %v2189_v45  ;;  %v2204_v12 = vmul.f32 %v2200_v47, %v2200_v47  ;;  %10291 = vmatpush3.bf16.msra.mxu1 %v11440_v44  ;;  %v11442_v48 = vld [vmem:[%s15188_s7 + $0x28] sm:$0xff]   ;;  %v11443_v45 = vld [vmem:[%s15188_s7 + $0x20] sm:$0xff]  }
 0xac9   :  { %v2203_v62 = vsub.f32 %v13022_v2, %v2199_v25  ;;  %v2201_v59 = vsub.f32 %v13027_v13, %v2197_v58  ;;  %v2208_v51 = vsel %vm663_vm14, %v2204_v12, 0.0  ;;  %v11444_v25 = vld [vmem:[%s15188_s7 + $0x18] sm:$0xff]   ;;  %v11445_v58 = vld [vmem:[%s15188_s7 + $0x10] sm:$0xff]   ;;  %v11446_v12 = vld [vmem:[%s15188_s7 + $0x8] sm:$0xff]  }
 0xaca   :  { %2209 = vadd.xlane.f32.xlu0 %v2208_v51  ;;  %v2192_v14 = vpop.xlane.xlu0 %2191 }
 0xacb   :  { %v2198_v52 = vmul.f32 0.015625, %v2192_v14  ;;  %v2205_v49 = vmul.f32 %v2201_v59, %v2201_v59  ;;  %v2207_v4 = vmul.f32 %v2203_v62, %v2203_v62 }
 0xacd   :  { %v2202_v50 = vsub.f32 %v13029_v36, %v2198_v52  ;;  %v2211_v9 = vsel %vm663_vm14, %v2205_v49, 0.0  ;;  %v2217_v54 = vsel %vm663_vm14, %v2207_v4, 0.0 }
 0xace   :  { %2212 = vadd.xlane.f32.xlu1 %v2211_v9 }
 0xacf   :  { %v2206_v7 = vmul.f32 %v2202_v50, %v2202_v50 }
 0xad1   :  { %v2214_v15 = vsel %vm663_vm14, %v2206_v7, 0.0 }
 0xad2   :  { %2218 = vadd.xlane.f32.xlu1 %v2217_v54  ;;  %2215 = vadd.xlane.f32.xlu0 %v2214_v15 }
 0xb53   :  { %v2210_v10 = vpop.xlane.xlu0 %2209 }
 0xb54   :  { %v2220_v39 = vmul.f32 0.015625, %v2210_v10 }
 0xb56   :  { %v2224_v63 = vadd.f32 1e-05, %v2220_v39 }
 0xb57   :  { %v2213_v16 = vpop.xlane.xlu1 %2212 }
 0xb58   :  { %11624 = vrsqrt.f32 %v2224_v63  ;;  %v2221_v18 = vmul.f32 0.015625, %v2213_v16 }
 0xb5a   :  { %v2225_v17 = vadd.f32 1e-05, %v2221_v18 }
 0xb5b   :  { %v2219_v33 = vpop.xlane.xlu1 %2218  ;;  %v2216_v30 = vpop.xlane.xlu0 %2215 }
 0xb5c   :  { %11626 = vrsqrt.f32 %v2225_v17  ;;  %v2223_v20 = vmul.f32 0.015625, %v2219_v33  ;;  %v2222_v19 = vmul.f32 0.015625, %v2216_v30 }
 0xb5e   :  { %v2227_v37 = vadd.f32 1e-05, %v2223_v20  ;;  %v2226_v26 = vadd.f32 1e-05, %v2222_v19 }
 0xb60   :  { %11628 = vrsqrt.f32 %v2227_v37 }
 0xb61   :  { %11630 = vrsqrt.f32 %v2226_v26 }
 0xb65   :  { %v11625_v21 = vpop.eup %11624 }
 0xb66   :  { %v2232_v31 = vmul.f32 %v11625_v21, %v2200_v47  ;;  %v11441_v47 = vld [vmem:[%s15188_s7 + $0x30] sm:$0xff]  }
 0xb67   :  { %10292 = vmatprep.subr.bf16.mxu1 %v11441_v47 }
 0xb68   :  { %v2242_v0 = vmul.f32 %v9485_v28, %v2232_v31  ;;  %10293 = vmatpush3.bf16.msra.mxu1 %v11441_v47 }
 0xb69   :  { %v11627_v29 = vpop.eup %11626  ;;  %10294 = vmatprep.subr.bf16.mxu1 %v11442_v48 }
 0xb6a   :  { %v2233_v32 = vmul.f32 %v11627_v29, %v2201_v59  ;;  %v2252_v42 = vadd.f32 %v9486_v35, %v2242_v0  ;;  %v9487_v59 = vld [vmem:[%s15189_s10] ss:$0 sm:$0xff] }
 0xb6b   :  { %v9494_v0 = vld [vmem:[%s15190_s11] ss:$0 sm:$0xff] }
 0xb6c   :  { %v2243_v40 = vmul.f32 %v9485_v28, %v2233_v32  ;;  %10295 = vmatpush3.bf16.msra.mxu1 %v11442_v48 }
 0xb6d   :  { %v11629_v61 = vpop.eup %11628  ;;  %10296 = vmatprep.subr.bf16.mxu1 %v11443_v45 }
 0xb6e   :  { %v11631_v22 = vpop.eup %11630  ;;  %v2235_v41 = vmul.f32 %v11629_v61, %v2203_v62  ;;  %v2253_v5 = vadd.f32 %v9486_v35, %v2243_v40  ;;  %v11447_v62 = vld [vmem:[%s15188_s7] sm:$0xff]  }
 0xb6f   :  { %v2234_v1 = vmul.f32 %v11631_v22, %v2202_v50 }
 0xb70   :  { %v2256_v3 = vpack.c.bf16 %v2253_v5, %v2252_v42  ;;  %v2245_v11 = vmul.f32 %v9485_v28, %v2235_v41  ;;  %10297 = vmatpush3.bf16.msra.mxu1 %v11443_v45 }
 0xb71   :  { %v2244_v57 = vmul.f32 %v9485_v28, %v2234_v1  ;;  %10298 = vmatprep.subr.bf16.mxu1 %v11444_v25 }
 0xb72   :  { %10286 = vmatprep.mubr.msk.bf16.mxu0 %vm663_vm14, %v2256_v3  ;;  %v2255_v60 = vadd.f32 %v9486_v35, %v2245_v11 }
 0xb73   :  { %v2254_v53 = vadd.f32 %v9486_v35, %v2244_v57 }
 0xb74   :  { %10299 = vmatpush3.bf16.msra.mxu1 %v11444_v25 }
 0xb75   :  { %v2257_v46 = vpack.c.bf16 %v2255_v60, %v2254_v53  ;;  %10300 = vmatprep.subr.bf16.mxu1 %v11445_v58 }
 0xb77   :  { %10287 = vmatmul.mubr.msk.bf16.vlgmr.msra.gmra.mxu0 %vm663_vm14, %v2257_v46 }
 0xb78   :  { %2663 = vmatprep.mubr.bf16.mxu0 %v12085_v34  ;;  %10301 = vmatpush3.bf16.msra.mxu1 %v11445_v58 }
 0xb79   :  { %10302 = vmatprep.subr.bf16.mxu1 %v11446_v12 }
 0xb7c   :  { %10303 = vmatpush3.bf16.msra.mxu1 %v11446_v12 }
 0xb7d   :  { %10304 = vmatprep.subr.bf16.mxu1 %v11447_v62 }
 0xb80   :  { %10305 = vmatpush3.bf16.msra.mxu1 %v11447_v62 }
 0xb81   :  { %10316 = vmatprep.subr.bf16.mxu1 %v12080_v43 }
 0xc37   :  { %v10288_v51 = vpop.f32.mrf.mxu0 }
 0xc38   :  { %v2346_v14 = vadd.f32 %v10288_v51, %v9487_v59 }
 0xc39   :  { %v2337_v52 = vpop.f32.mrf.mxu0 }
 0xc3a   :  { %v2338_v49 = vadd.f32 %v9487_v59, %v2337_v52  ;;  %v2358_v50 = vmul.f32 0.70710677, %v2346_v14  ;;  %v2354_v19 = vmul.f32 0.5, %v2346_v14 }
 0xc3b   :  { %v10289_v9 = vpop.f32.mrf.mxu0 }
 0xc3c   :  { %v2356_v4 = vmul.f32 0.70710677, %v2338_v49  ;;  %v2349_v7 = vadd.f32 %v10289_v9, %v9487_v59  ;;  %v2352_v33 = vmul.f32 0.5, %v2338_v49 }
 0xc3d   :  { %v2340_v54 = vpop.f32.mrf.mxu0 }
 0xc3e   :  { %11632 = verf.f32 %v2356_v4  ;;  %v2359_v15 = vmul.f32 0.70710677, %v2349_v7  ;;  %v2341_v24 = vadd.f32 %v9487_v59, %v2340_v54  ;;  %v2355_v17 = vmul.f32 0.5, %v2349_v7  ;;  %v11450_v54 = vld [vmem:[%s12154_s19 + $0x74] ss:$8 sps:$4 sm:$0xff]  }
 0xc3f   :  { %11634 = verf.f32 %v2358_v50  ;;  %2639 = vmatprep.subr.bf16.mxu0 %v11450_v54 }
 0xc40   :  { %11636 = verf.f32 %v2359_v15  ;;  %v2357_v55 = vmul.f32 0.70710677, %v2341_v24  ;;  %v2353_v30 = vmul.f32 0.5, %v2341_v24  ;;  %v11448_v15 = vld [vmem:[%s12154_s19 + $0x70] ss:$8 sps:$4 sm:$0xff]  }
 0xc41   :  { %2640 = vmatpush1.bf16.msra.mxu0 %v11448_v15  ;;  %v11453_v24 = vld [vmem:[%s12154_s19 + $0x64] ss:$8 sps:$4 sm:$0xff]  }
 0xc42   :  { %11638 = verf.f32 %v2357_v55  ;;  %v11451_v55 = vld [vmem:[%s12154_s19 + $0x60] ss:$8 sps:$4 sm:$0xff]   ;;  %2641 = vmatprep.subr.bf16.mxu0 %v11453_v24 }
 0xc45   :  { %2642 = vmatpush1.bf16.msra.mxu0 %v11451_v55 }
 0xc4b   :  { %v11633_v56 = vpop.eup %11632 }
 0xc4c   :  { %v11635_v23 = vpop.eup %11634  ;;  %v2364_v39 = vadd.f32 1.0, %v11633_v56  ;;  %v11454_v56 = vld [vmem:[%s12154_s19 + $0x50] ss:$8 sps:$4 sm:$0xff]  }
 0xc4d   :  { %v11637_v10 = vpop.eup %11636  ;;  %v2366_v18 = vadd.f32 1.0, %v11635_v23  ;;  %v11456_v23 = vld [vmem:[%s12154_s19 + $0x54] ss:$8 sps:$4 sm:$0xff]  }
 0xc4e   :  { %v2367_v63 = vadd.f32 1.0, %v11637_v10  ;;  %v2368_v26 = vmul.f32 %v2364_v39, %v2352_v33  ;;  %v11459_v10 = vld [vmem:[%s12154_s19 + $0x44] ss:$8 sps:$4 sm:$0xff]   ;;  %2643 = vmatprep.subr.bf16.mxu0 %v11456_v23  ;;  %v11457_v39 = vld [vmem:[%s12154_s19 + $0x40] ss:$8 sps:$4 sm:$0xff]   ;;  %s15194_s19 = sld [smem:[#allocation13_spill]] }
 0xc4f   :  { %v11639_v16 = vpop.eup %11638  ;;  %v2370_v31 = vmul.f32 %v2366_v18, %v2354_v19  ;;  %2644 = vmatpush1.bf16.msra.mxu0 %v11454_v56 }
 0xc50   :  { %v2365_v20 = vadd.f32 1.0, %v11639_v16  ;;  %v2371_v37 = vmul.f32 %v2367_v63, %v2355_v17  ;;  %2645 = vmatprep.subr.bf16.mxu0 %v11459_v10 }
 0xc52   :  { %v2369_v21 = vmul.f32 %v2365_v20, %v2353_v30  ;;  %v2373_v29 = vpack.c.bf16 %v2371_v37, %v2370_v31 }
 0xc53   :  { %2646 = vmatpush1.bf16.msra.mxu0 %v11457_v39 }
 0xc54   :  { %v2372_v28 = vpack.c.bf16 %v2369_v21, %v2368_v26  ;;  %10310 = vmatprep.subr.bf16.mxu0 %v12080_v43 }
 0xc56   :  { %10306 = vmatprep.mubr.bf16.mxu1 %v2372_v28 }
 0xc57   :  { %10307 = vmatmul.mubr.bf16.vlgmr.msra.gmra.mxu1 %v2373_v29 }
 0xc58   :  { %10318 = vmatprep.mubr.msk.bf16.mxu1 %vm12088_vm1, %v12080_v43 }
 0xd17   :  { %v10308_v32 = vpop.f32.mrf.mxu1 }
 0xd18   :  { %v2488_v40 = vadd.f32 %v10308_v32, %v9494_v0  ;;  %v9505_v32 = vld [vmem:[%s12144_s8 + $0x1] ss:$0 sm:$0xff]  ;;  %s15191_s8 = sld [smem:[#allocation10_spill]] }
 0xd19   :  { %v2479_v35 = vpop.f32.mrf.mxu1 }
 0xd1a   :  { %v2480_v61 = vadd.f32 %v9494_v0, %v2479_v35  ;;  %v13071_v5 = vadd.f32 %v2488_v40, %v13029_v36 }
 0xd1b   :  { %v10309_v22 = vpop.f32.mrf.mxu1 }
 0xd1c   :  { %v13068_v41 = vadd.f32 %v2480_v61, %v13018_v38  ;;  %v2491_v1 = vadd.f32 %v10309_v22, %v9494_v0  ;;  %v2508_v53 = vsel %vm663_vm14, %v13071_v5, 0.0  ;;  %v9506_v22 = vld [vmem:[%s12149_s14 + $0x1] ss:$0 sm:$0xff]  ;;  %s15193_s14 = sld [smem:[#allocation12_spill]] }
 0xd1d   :  { %v2482_v42 = vpop.f32.mrf.mxu1 }
 0xd1e   :  { %v2483_v3 = vadd.f32 %v9494_v0, %v2482_v42  ;;  %v2502_v11 = vsel %vm663_vm14, %v13068_v41, 0.0  ;;  %v13079_v60 = vadd.f32 %v2491_v1, %v13022_v2 }
 0xd1f   :  { %2503 = vadd.xlane.f32.xlu0 %v2502_v11 }
 0xd20   :  { %v13076_v57 = vadd.f32 %v2483_v3, %v13027_v13  ;;  %v2511_v36 = vsel %vm663_vm14, %v13079_v60, 0.0 }
 0xd22   :  { %v2505_v38 = vsel %vm663_vm14, %v13076_v57, 0.0 }
 0xd23   :  { %2506 = vadd.xlane.f32.xlu1 %v2505_v38  ;;  %2509 = vadd.xlane.f32.xlu0 %v2508_v53 }
 0xd27   :  { %2512 = vadd.xlane.f32.xlu1 %v2511_v36 }
 0xda8   :  { %v2504_v46 = vpop.xlane.xlu0 %2503 }
 0xda9   :  { %v2514_v44 = vmul.f32 0.015625, %v2504_v46 }
 0xdab   :  { %v2518_v13 = vsub.f32 %v13068_v41, %v2514_v44 }
 0xdac   :  { %v2507_v47 = vpop.xlane.xlu1 %2506  ;;  %v2510_v48 = vpop.xlane.xlu0 %2509 }
 0xdad   :  { %v2515_v2 = vmul.f32 0.015625, %v2507_v47  ;;  %v2516_v45 = vmul.f32 0.015625, %v2510_v48  ;;  %v2522_v25 = vmul.f32 %v2518_v13, %v2518_v13 }
 0xdaf   :  { %v2519_v58 = vsub.f32 %v13076_v57, %v2515_v2  ;;  %v2520_v12 = vsub.f32 %v13071_v5, %v2516_v45  ;;  %v2526_v62 = vsel %vm663_vm14, %v2522_v25, 0.0 }
 0xdb0   :  { %v2513_v59 = vpop.xlane.xlu1 %2512  ;;  %2527 = vadd.xlane.f32.xlu0 %v2526_v62 }
 0xdb1   :  { %v2517_v51 = vmul.f32 0.015625, %v2513_v59  ;;  %v2523_v14 = vmul.f32 %v2519_v58, %v2519_v58  ;;  %v2524_v52 = vmul.f32 %v2520_v12, %v2520_v12 }
 0xdb3   :  { %v2521_v49 = vsub.f32 %v13079_v60, %v2517_v51  ;;  %v2529_v50 = vsel %vm663_vm14, %v2523_v14, 0.0  ;;  %v2532_v9 = vsel %vm663_vm14, %v2524_v52, 0.0 }
 0xdb4   :  { %2530 = vadd.xlane.f32.xlu1 %v2529_v50  ;;  %2533 = vadd.xlane.f32.xlu0 %v2532_v9 }
 0xdb5   :  { %v2525_v4 = vmul.f32 %v2521_v49, %v2521_v49 }
 0xdb7   :  { %v2535_v7 = vsel %vm663_vm14, %v2525_v4, 0.0 }
 0xdb8   :  { %2536 = vadd.xlane.f32.xlu1 %v2535_v7 }
 0xe39   :  { %v2528_v63 = vpop.xlane.xlu0 %2527 }
 0xe3a   :  { %v2538_v16 = vmul.f32 0.015625, %v2528_v63 }
 0xe3c   :  { %v2542_v18 = vadd.f32 1e-05, %v2538_v16 }
 0xe3d   :  { %v2531_v17 = vpop.xlane.xlu1 %2530  ;;  %v2534_v33 = vpop.xlane.xlu0 %2533 }
 0xe3e   :  { %11640 = vrsqrt.f32 %v2542_v18  ;;  %v2539_v30 = vmul.f32 0.015625, %v2531_v17  ;;  %v2540_v20 = vmul.f32 0.015625, %v2534_v33 }
 0xe40   :  { %v2543_v19 = vadd.f32 1e-05, %v2539_v30  ;;  %v2544_v37 = vadd.f32 1e-05, %v2540_v20 }
 0xe41   :  { %v2537_v26 = vpop.xlane.xlu1 %2536 }
 0xe42   :  { %11642 = vrsqrt.f32 %v2543_v19  ;;  %v2541_v21 = vmul.f32 0.015625, %v2537_v26 }
 0xe43   :  { %11644 = vrsqrt.f32 %v2544_v37 }
 0xe44   :  { %v2545_v31 = vadd.f32 1e-05, %v2541_v21 }
 0xe46   :  { %11646 = vrsqrt.f32 %v2545_v31 }
 0xe4b   :  { %v11641_v28 = vpop.eup %11640 }
 0xe4c   :  { %v2550_v29 = vmul.f32 %v11641_v28, %v2518_v13 }
 0xe4e   :  { %v2560_v40 = vmul.f32 %v9505_v32, %v2550_v29 }
 0xe4f   :  { %v11643_v0 = vpop.eup %11642 }
 0xe50   :  { %v2551_v35 = vmul.f32 %v11643_v0, %v2519_v58  ;;  %v11645_v61 = vpop.eup %11644  ;;  %v2570_v3 = vadd.f32 %v9506_v22, %v2560_v40 }
 0xe51   :  { %v2552_v38 = vmul.f32 %v11645_v61, %v2520_v12 }
 0xe52   :  { %v2561_v42 = vmul.f32 %v9505_v32, %v2551_v35 }
 0xe53   :  { %v11647_v1 = vpop.eup %11646  ;;  %v2562_v44 = vmul.f32 %v9505_v32, %v2552_v38 }
 0xe54   :  { %v2571_v11 = vadd.f32 %v9506_v22, %v2561_v42  ;;  %v2553_v53 = vmul.f32 %v11647_v1, %v2521_v49 }
 0xe55   :  { %v2572_v47 = vadd.f32 %v9506_v22, %v2562_v44 }
 0xe56   :  { %v2574_v36 = vpack.c.bf16 %v2571_v11, %v2570_v3  ;;  %v2563_v46 = vmul.f32 %v9505_v32, %v2553_v53 }
 0xe58   :  { %9523 = vmatmul.mubr.msk.bf16.vlgmr.msra.gmra.mxu0 %vm663_vm14, %v2574_v36  ;;  %v2573_v13 = vadd.f32 %v9506_v22, %v2563_v46 }
 0xe59   :  { %2673 = vmatprep.mubr.bf16.mxu0 %v12085_v34 }
 0xe5a   :  { %v2575_v48 = vpack.c.bf16 %v2573_v13, %v2572_v47 }
 0xe60   :  { %9524 = vmatmul.mubr.msk.bf16.gmra.mxu0 %vm663_vm14, %v2575_v48 }
 0xe61   :  { %10312 = vmatprep.mubr.msk.bf16.mxu0 %vm12088_vm1, %v12080_v43 }
 0xf18   :  { %v2665_v2 = vpop.f32.mrf.mxu0 }
 0xf1a   :  { %v13111_v45 = vpop.f32.mrf.mxu0 }
 0xf1c   :  { %v2669_v25 = vpop.f32.mrf.mxu0 }
 0xf1d   :  { %v11110_v58 = vpack.i.bf16 %v2669_v25, %v2665_v2  ;;  %v2724_v49 = vpack.c.bf16 %v2669_v25, %v2665_v2 }
 0xf1e   :  { %v13113_v12 = vpop.f32.mrf.mxu0 }
 0xf1f   :  { %11111 = vrot.lane.b32.xlu0 %v11110_v58, %s12086_s13  ;;  %v2772_v44 = vpack.c.bf16 %v13113_v12, %v13111_v45 }
 0xf20   :  { %v2675_v62 = vpop.f32.mrf.mxu0 }
 0xf22   :  { %v13116_v59 = vpop.f32.mrf.mxu0 }
 0xf24   :  { %v2679_v51 = vpop.f32.mrf.mxu0 }
 0xf25   :  { %v11125_v14 = vpack.i.bf16 %v2679_v51, %v2675_v62  ;;  %v2725_v52 = vpack.c.bf16 %v2679_v51, %v2675_v62 }
 0xf26   :  { %v13167_v13 = vpop.f32.mrf.mxu0 }
 0xf27   :  { %11126 = vrot.lane.b32.xlu0 %v11125_v14, %s12087_s17  ;;  %11116 = vrot.lane.b32.xlu1 %v11125_v14, %s12086_s13  ;;  %v2773_v47 = vpack.c.bf16 %v13167_v13, %v13116_v59 }
 0xf2b   :  { %11136 = vrot.lane.b32.xlu0 %v11125_v14, %s12089_s21  ;;  %11121 = vrot.lane.b32.xlu1 %v11110_v58, %s12087_s17 }
 0xf2f   :  { %11131 = vrot.lane.b32.xlu1 %v11110_v58, %s12089_s21  ;;  %2831 = vrot.lane.b32.xlu0 %v2725_v52, %s12090_s25 }
 0xf33   :  { %2781 = vrot.lane.b32.xlu1 %v2724_v49, %s12090_s25 }
 0xf91   :  { %v11112_v50 = vpop.permute.xlu0 %11111 }
 0xf92   :  { %v11114_v9 = vunpack.i.h.bf16 %v11112_v50  ;;  %v11113_v4 = vunpack.i.l.bf16 %v11112_v50 }
 0xf94   :  { %v2726_v7 = vpack.c.bf16 %v11114_v9, %v11113_v4 }
 0xf96   :  { %2881 = vrot.lane.b32.xlu1 %v2726_v7, %s12090_s25 }
 0xf99   :  { %v11117_v54 = vpop.permute.xlu1 %11116  ;;  %v11127_v15 = vpop.permute.xlu0 %11126 }
 0xf9a   :  { %v11119_v24 = vunpack.i.h.bf16 %v11117_v54  ;;  %v11118_v55 = vunpack.i.l.bf16 %v11117_v54  ;;  %v11129_v23 = vunpack.i.h.bf16 %v11127_v15  ;;  %v11128_v10 = vunpack.i.l.bf16 %v11127_v15 }
 0xf9c   :  { %v2727_v56 = vpack.c.bf16 %v11119_v24, %v11118_v55  ;;  %v2729_v17 = vpack.c.bf16 %v11129_v23, %v11128_v10 }
 0xf9d   :  { %v11122_v39 = vpop.permute.xlu1 %11121  ;;  %v11137_v63 = vpop.permute.xlu0 %11136 }
 0xf9e   :  { %v11124_v16 = vunpack.i.h.bf16 %v11122_v39  ;;  %v11123_v18 = vunpack.i.l.bf16 %v11122_v39  ;;  %2931 = vrot.lane.b32.xlu0 %v2727_v56, %s12090_s25  ;;  %v11139_v30 = vunpack.i.h.bf16 %v11137_v63  ;;  %v11138_v20 = vunpack.i.l.bf16 %v11137_v63 }
 0xfa0   :  { %v2728_v33 = vpack.c.bf16 %v11124_v16, %v11123_v18  ;;  %v2731_v28 = vpack.c.bf16 %v11139_v30, %v11138_v20 }
 0xfa1   :  { %v11132_v19 = vpop.permute.xlu1 %11131  ;;  %v2832_v37 = vpop.permute.xlu0 %2831 }
 0xfa2   :  { %v11134_v26 = vunpack.i.h.bf16 %v11132_v19  ;;  %v11133_v21 = vunpack.i.l.bf16 %v11132_v19  ;;  %v2837_v31 = vsel %vm387_vm9, %v2832_v37, 0  ;;  %3031 = vrot.lane.b32.xlu0 %v2729_v17, %s12090_s25  ;;  %2981 = vrot.lane.b32.xlu1 %v2728_v33, %s12090_s25 }
 0xfa3   :  { %10317 = vmatpush3.bf16.xpose.msra.mxu1 %v2837_v31 }
 0xfa4   :  { %v2730_v29 = vpack.c.bf16 %v11134_v26, %v11133_v21  ;;  %10328 = vmatprep.subr.bf16.mxu1 %v12080_v43 }
 0xfa5   :  { %v2782_v32 = vpop.permute.xlu1 %2781 }
 0xfa6   :  { %v2787_v0 = vsel %vm387_vm9, %v2782_v32, 0  ;;  %3131 = vrot.lane.b32.xlu0 %v2731_v28, %s12090_s25  ;;  %3081 = vrot.lane.b32.xlu1 %v2730_v29, %s12090_s25 }
 0xfa7   :  { %10311 = vmatpush3.bf16.xpose.msra.mxu0 %v2787_v0 }
 0xfa8   :  { %10322 = vmatprep.subr.bf16.mxu0 %v12080_v43 }
 0xfaa   :  { %10319 = vmatmul.mubr.msk.bf16.vlgmr.msra.gmra.mxu1 %vm387_vm9, %v2725_v52 }
 0xfab   :  { %10330 = vmatprep.mubr.msk.bf16.mxu1 %vm12088_vm1, %v12080_v43 }
 0xfae   :  { %10313 = vmatmul.mubr.msk.bf16.vlgmr.msra.gmra.mxu0 %vm387_vm9, %v2724_v49 }
 0xfaf   :  { %10324 = vmatprep.mubr.msk.bf16.mxu0 %vm12088_vm1, %v12080_v43 }
0x1008   :  { %v2882_v35 = vpop.permute.xlu1 %2881 }
0x1009   :  { %v2887_v40 = vsel %vm387_vm9, %v2882_v35, 0 }
0x100a   :  { %10323 = vmatpush3.bf16.xpose.msra.mxu0 %v2887_v40 }
0x100b   :  { %10334 = vmatprep.subr.bf16.mxu0 %v12080_v43 }
0x1010   :  { %v2932_v61 = vpop.permute.xlu0 %2931 }
0x1011   :  { %v2937_v22 = vsel %vm387_vm9, %v2932_v61, 0  ;;  %10325 = vmatmul.mubr.msk.bf16.vlgmr.msra.gmra.mxu0 %vm387_vm9, %v2726_v7 }
0x1012   :  { %10329 = vmatpush3.bf16.xpose.msra.mxu1 %v2937_v22  ;;  %10336 = vmatprep.mubr.msk.bf16.mxu0 %vm12088_vm1, %v12080_v43 }
0x1013   :  { %10340 = vmatprep.subr.bf16.mxu1 %v12080_v43 }
0x1014   :  { %v2982_v42 = vpop.permute.xlu1 %2981  ;;  %v3032_v3 = vpop.permute.xlu0 %3031 }
0x1015   :  { %v2987_v1 = vsel %vm387_vm9, %v2982_v42, 0  ;;  %v3037_v11 = vsel %vm387_vm9, %v3032_v3, 0 }
0x1016   :  { %10335 = vmatpush3.bf16.xpose.msra.mxu0 %v2987_v1 }
0x1017   :  { %10346 = vmatprep.subr.bf16.mxu0 %v12080_v43 }
0x1018   :  { %v3082_v38 = vpop.permute.xlu1 %3081  ;;  %v3132_v36 = vpop.permute.xlu0 %3131 }
0x1019   :  { %10331 = vmatmul.mubr.msk.bf16.vlgmr.msra.gmra.mxu1 %vm387_vm9, %v2727_v56  ;;  %v3087_v53 = vsel %vm387_vm9, %v3082_v38, 0  ;;  %v3137_v46 = vsel %vm387_vm9, %v3132_v36, 0 }
0x101a   :  { %10341 = vmatpush3.bf16.xpose.msra.mxu1 %v3037_v11  ;;  %10342 = vmatprep.mubr.msk.bf16.mxu1 %vm12088_vm1, %v12080_v43 }
0x101b   :  { %10352 = vmatprep.subr.bf16.mxu1 %v12080_v43 }
0x101d   :  { %10337 = vmatmul.mubr.msk.bf16.vlgmr.msra.gmra.mxu0 %vm387_vm9, %v2728_v33 }
0x101e   :  { %10347 = vmatpush3.bf16.xpose.msra.mxu0 %v3087_v53  ;;  %10348 = vmatprep.mubr.msk.bf16.mxu0 %vm12088_vm1, %v12080_v43 }
0x101f   :  { %10358 = vmatprep.subr.bf16.mxu0 %v12080_v43 }
0x1021   :  { %10343 = vmatmul.mubr.msk.bf16.vlgmr.msra.gmra.mxu1 %vm387_vm9, %v2729_v17 }
0x1022   :  { %10353 = vmatpush3.bf16.xpose.msra.mxu1 %v3137_v46  ;;  %10354 = vmatprep.mubr.msk.bf16.mxu1 %vm12088_vm1, %v12080_v43 }
0x1023   :  { %10364 = vmatprep.subr.bf16.mxu1 %v12080_v43 }
0x1025   :  { %10349 = vmatmul.mubr.msk.bf16.vlgmr.msra.gmra.mxu0 %vm387_vm9, %v2730_v29 }
0x1026   :  { %10359 = vmatpush3.bf16.msra.mxu0 %v2772_v44  ;;  %10360 = vmatprep.mubr.msk.bf16.mxu0 %vm12088_vm1, %v12080_v43 }
0x1027   :  { %10370 = vmatprep.subr.bf16.mxu0 %v12080_v43 }
0x1029   :  { %10355 = vmatmul.mubr.msk.bf16.vlgmr.msra.gmra.mxu1 %vm387_vm9, %v2731_v28 }
0x102a   :  { %10365 = vmatpush3.bf16.msra.mxu1 %v2773_v47  ;;  %10366 = vmatprep.mubr.msk.bf16.mxu1 %vm12088_vm1, %v12080_v43 }
0x102b   :  { %10376 = vmatprep.subr.bf16.mxu1 %v12080_v43 }
0x106a   :  { %v2873_v48 = vpop.f32.mrf.mxu1 }
0x106b   :  { %v3182_v9 = vmul.f32 0.25, %v2873_v48 }
0x106c   :  { %v10320_v2 = vpop.f32.mrf.mxu1 }
0x106d   :  { %v13191_v55 = vadd.f32 %v3182_v9, %v12754_v6 }
0x106e   :  { %v2823_v25 = vpop.f32.mrf.mxu0  ;;  %v2876_v58 = vpop.f32.mrf.mxu1 }
0x106f   :  { %v3180_v62 = vmul.f32 0.25, %v2823_v25  ;;  %v3183_v51 = vmul.f32 0.25, %v2876_v58  ;;  %v3218_v10 = vsel %vm387_vm9, %v13191_v55, -inf }
0x1070   :  { %v10314_v14 = vpop.f32.mrf.mxu0  ;;  %v10321_v52 = vpop.f32.mrf.mxu1 }
0x1071   :  { %v13180_v49 = vadd.f32 %v3180_v62, %v12754_v6  ;;  %v13183_v4 = vadd.f32 %v3183_v51, %v12754_v6 }
0x1072   :  { %v2826_v50 = vpop.f32.mrf.mxu0 }
0x1073   :  { %v3181_v7 = vmul.f32 0.25, %v2826_v50  ;;  %v3212_v54 = vsel %vm387_vm9, %v13180_v49, -inf  ;;  %v3221_v23 = vsel %vm387_vm9, %v13183_v4, -inf }
0x1074   :  { %v10315_v15 = vpop.f32.mrf.mxu0  ;;  %3213 = vmax.xlane.f32.xlu1 %v3212_v54 }
0x1075   :  { %v13188_v24 = vadd.f32 %v3181_v7, %v12754_v6 }
0x1077   :  { %v3215_v56 = vsel %vm387_vm9, %v13188_v24, -inf }
0x1078   :  { %3216 = vmax.xlane.f32.xlu0 %v3215_v56  ;;  %3222 = vmax.xlane.f32.xlu1 %v3221_v23 }
0x107c   :  { %3219 = vmax.xlane.f32.xlu0 %v3218_v10 }
0x10d1   :  { %v2923_v39 = vpop.f32.mrf.mxu0 }
0x10d2   :  { %v3184_v63 = vmul.f32 0.25, %v2923_v39 }
0x10d3   :  { %v10326_v16 = vpop.f32.mrf.mxu0 }
0x10d4   :  { %v13200_v18 = vadd.f32 %v3184_v63, %v12754_v6 }
0x10d5   :  { %v2926_v17 = vpop.f32.mrf.mxu0 }
0x10d6   :  { %v3185_v33 = vmul.f32 0.25, %v2926_v17  ;;  %v3224_v30 = vsel %vm387_vm9, %v13200_v18, -inf }
0x10d7   :  { %3225 = vmax.xlane.f32.xlu0 %v3224_v30  ;;  %v10327_v20 = vpop.f32.mrf.mxu0 }
0x10d8   :  { %v13205_v19 = vadd.f32 %v3185_v33, %v12754_v6 }
0x10d9   :  { %v2973_v37 = vpop.f32.mrf.mxu1 }
0x10da   :  { %v3186_v26 = vmul.f32 0.25, %v2973_v37  ;;  %v3227_v21 = vsel %vm387_vm9, %v13205_v19, -inf }
0x10db   :  { %v10332_v31 = vpop.f32.mrf.mxu1  ;;  %3228 = vmax.xlane.f32.xlu1 %v3227_v21 }
0x10dc   :  { %v13210_v28 = vadd.f32 %v3186_v26, %v12754_v6  ;;  %v13256_v31 = vpack.i.bf16 %v13167_v13, %v13116_v59 }
0x10dd   :  { %v2976_v29 = vpop.f32.mrf.mxu1  ;;  %v3023_v32 = vpop.f32.mrf.mxu0 }
0x10de   :  { %v3187_v0 = vmul.f32 0.25, %v2976_v29  ;;  %v3188_v35 = vmul.f32 0.25, %v3023_v32  ;;  %v3230_v40 = vsel %vm387_vm9, %v13210_v28, -inf  ;;  %v13262_v29 = vpack.i.bf16 %v13113_v12, %v13111_v45 }
0x10df   :  { %v10333_v61 = vpop.f32.mrf.mxu1  ;;  %3231 = vmax.xlane.f32.xlu0 %v3230_v40  ;;  %v10338_v22 = vpop.f32.mrf.mxu0 }
0x10e0   :  { %v13215_v42 = vadd.f32 %v3187_v0, %v12754_v6  ;;  %v13218_v1 = vadd.f32 %v3188_v35, %v12754_v6 }
0x10e1   :  { %v3026_v3 = vpop.f32.mrf.mxu0  ;;  %v3073_v11 = vpop.f32.mrf.mxu1 }
0x10e2   :  { %v3189_v38 = vmul.f32 0.25, %v3026_v3  ;;  %v3190_v53 = vmul.f32 0.25, %v3073_v11  ;;  %v3233_v36 = vsel %vm387_vm9, %v13215_v42, -inf  ;;  %v3236_v46 = vsel %vm387_vm9, %v13218_v1, -inf }
0x10e3   :  { %v10344_v44 = vpop.f32.mrf.mxu1  ;;  %3234 = vmax.xlane.f32.xlu1 %v3233_v36  ;;  %3237 = vmax.xlane.f32.xlu0 %v3236_v46  ;;  %v10339_v47 = vpop.f32.mrf.mxu0 }
0x10e4   :  { %v13225_v48 = vadd.f32 %v3189_v38, %v12754_v6  ;;  %v13228_v2 = vadd.f32 %v3190_v53, %v12754_v6 }
0x10e5   :  { %v3076_v25 = vpop.f32.mrf.mxu1  ;;  %v3123_v58 = vpop.f32.mrf.mxu0 }
0x10e6   :  { %v3191_v62 = vmul.f32 0.25, %v3076_v25  ;;  %v3192_v51 = vmul.f32 0.25, %v3123_v58  ;;  %v3242_v14 = vsel %vm387_vm9, %v13228_v2, -inf  ;;  %v3239_v52 = vsel %vm387_vm9, %v13225_v48, -inf }
0x10e7   :  { %v10345_v50 = vpop.f32.mrf.mxu1  ;;  %3243 = vmax.xlane.f32.xlu0 %v3242_v14  ;;  %3240 = vmax.xlane.f32.xlu1 %v3239_v52  ;;  %v10350_v9 = vpop.f32.mrf.mxu0 }
0x10e8   :  { %v13235_v7 = vadd.f32 %v3191_v62, %v12754_v6  ;;  %v13238_v54 = vadd.f32 %v3192_v51, %v12754_v6 }
0x10e9   :  { %v3126_v15 = vpop.f32.mrf.mxu0  ;;  %v3173_v56 = vpop.f32.mrf.mxu1 }
0x10ea   :  { %v3193_v23 = vmul.f32 0.25, %v3126_v15  ;;  %v3194_v10 = vmul.f32 0.25, %v3173_v56  ;;  %v3245_v39 = vsel %vm387_vm9, %v13235_v7, -inf  ;;  %v3248_v63 = vsel %vm387_vm9, %v13238_v54, -inf }
0x10eb   :  { %v10356_v16 = vpop.f32.mrf.mxu1  ;;  %3246 = vmax.xlane.f32.xlu1 %v3245_v39  ;;  %3249 = vmax.xlane.f32.xlu0 %v3248_v63  ;;  %v10351_v17 = vpop.f32.mrf.mxu0 }
0x10ec   :  { %v13245_v33 = vadd.f32 %v3193_v23, %v12754_v6  ;;  %v13248_v30 = vadd.f32 %v3194_v10, %v12754_v6 }
0x10ed   :  { %v3176_v20 = vpop.f32.mrf.mxu1 }
0x10ee   :  { %v3254_v37 = vsel %vm387_vm9, %v13248_v30, -inf  ;;  %v3251_v26 = vsel %vm387_vm9, %v13245_v33, -inf  ;;  %v3195_v22 = vmul.f32 0.25, %v3176_v20 }
0x10ef   :  { %v10357_v21 = vpop.f32.mrf.mxu1  ;;  %3255 = vmax.xlane.f32.xlu0 %v3254_v37  ;;  %3252 = vmax.xlane.f32.xlu1 %v3251_v26 }
0x10f0   :  { %v13271_v45 = vadd.f32 %v3195_v22, %v12754_v6 }
0x10f2   :  { %v3257_v12 = vsel %vm387_vm9, %v13271_v45, -inf }
0x10fd   :  { %v3214_v0 = vpop.xlane.xlu1 %3213 }
0x10fe   :  { %v3260_v35 = vsub.f32 %v13180_v49, %v3214_v0 }
0x1100   :  { %11146 = vrot.lane.b32.xlu1 %v13256_v31, %s12086_s13  ;;  %v3276_v59 = vmul.f32 1.442695, %v3260_v35 }
0x1101   :  { %v3217_v32 = vpop.xlane.xlu0 %3216  ;;  %v3223_v38 = vpop.xlane.xlu1 %3222 }
0x1102   :  { %11648 = vpow2.f32 %v3276_v59  ;;  %v3261_v6 = vsub.f32 %v13188_v24, %v3217_v32  ;;  %v3263_v36 = vsub.f32 %v13183_v4, %v3223_v38 }
0x1104   :  { %v3278_v53 = vmul.f32 1.442695, %v3261_v6  ;;  %v3282_v46 = vmul.f32 1.442695, %v3263_v36 }
0x1105   :  { %11141 = vrot.lane.b32.xlu0 %v13262_v29, %s12086_s13  ;;  %v3220_v40 = vpop.xlane.xlu0 %3219 }
0x1106   :  { %v3262_v13 = vsub.f32 %v13191_v55, %v3220_v40 }
0x1108   :  { %v3280_v61 = vmul.f32 1.442695, %v3262_v13 }
0x1109   :  { %11156 = vrot.lane.b32.xlu0 %v13256_v31, %s12087_s17 }
0x110a   :  { %11650 = vpow2.f32 %v3280_v61 }
0x110b   :  { %11652 = vpow2.f32 %v3278_v53 }
0x110c   :  { %11654 = vpow2.f32 %v3282_v46 }
0x110f   :  { %v13275_v3 = vpop.eup %11648 }
0x1110   :  { %v3308_v49 = vsel %vm387_vm9, %v13275_v3, 0.0 }
0x1117   :  { %v13279_v11 = vpop.eup %11650 }
0x1118   :  { %v3314_v55 = vsel %vm387_vm9, %v13279_v11, 0.0  ;;  %v13287_v44 = vpop.eup %11652 }
0x1119   :  { %v3311_v47 = vsel %vm387_vm9, %v13287_v44, 0.0  ;;  %v13291_v25 = vpop.eup %11654 }
0x111a   :  { %v3317_v58 = vsel %vm387_vm9, %v13291_v25, 0.0 }
0x1124   :  { %3258 = vmax.xlane.f32.xlu1 %v3257_v12 }
0x1128   :  { %3309 = vadd.xlane.f32.xlu0 %v3308_v49 }
0x112c   :  { %3315 = vadd.xlane.f32.xlu0 %v3314_v55 }
0x1135   :  { %11151 = vrot.lane.b32.xlu1 %v13262_v29, %s12087_s17 }
0x1159   :  { %3312 = vadd.xlane.f32.xlu1 %v3311_v47 }
0x115d   :  { %3318 = vadd.xlane.f32.xlu1 %v3317_v58 }
0x1160   :  { %v3226_v24 = vpop.xlane.xlu0 %3225 }
0x1161   :  { %v3264_v62 = vsub.f32 %v13200_v18, %v3226_v24 }
0x1163   :  { %v3284_v51 = vmul.f32 1.442695, %v3264_v62 }
0x1164   :  { %v3229_v4 = vpop.xlane.xlu1 %3228 }
0x1165   :  { %11656 = vpow2.f32 %v3284_v51  ;;  %v3265_v14 = vsub.f32 %v13205_v19, %v3229_v4 }
0x1167   :  { %v3286_v52 = vmul.f32 1.442695, %v3265_v14 }
0x1168   :  { %v3232_v50 = vpop.xlane.xlu0 %3231 }
0x1169   :  { %11658 = vpow2.f32 %v3286_v52  ;;  %v3266_v9 = vsub.f32 %v13210_v28, %v3232_v50 }
0x116b   :  { %v3288_v15 = vmul.f32 1.442695, %v3266_v9 }
0x116c   :  { %v3238_v56 = vpop.xlane.xlu0 %3237  ;;  %v3235_v23 = vpop.xlane.xlu1 %3234 }
0x116d   :  { %11660 = vpow2.f32 %v3288_v15  ;;  %v3268_v10 = vsub.f32 %v13218_v1, %v3238_v56  ;;  %v3267_v39 = vsub.f32 %v13215_v42, %v3235_v23 }
0x116f   :  { %v3292_v63 = vmul.f32 1.442695, %v3268_v10  ;;  %v3290_v18 = vmul.f32 1.442695, %v3267_v39 }
0x1170   :  { %v3244_v16 = vpop.xlane.xlu0 %3243  ;;  %v3241_v17 = vpop.xlane.xlu1 %3240 }
0x1171   :  { %11662 = vpow2.f32 %v3292_v63  ;;  %v3270_v19 = vsub.f32 %v13228_v2, %v3244_v16  ;;  %v3269_v20 = vsub.f32 %v13225_v48, %v3241_v17 }
0x1172   :  { %v13302_v37 = vpop.eup %11656  ;;  %11664 = vpow2.f32 %v3290_v18 }
0x1173   :  { %v3296_v28 = vmul.f32 1.442695, %v3270_v19  ;;  %v3294_v26 = vmul.f32 1.442695, %v3269_v20  ;;  %v3320_v21 = vsel %vm387_vm9, %v13302_v37, 0.0 }
0x1174   :  { %v3250_v1 = vpop.xlane.xlu0 %3249  ;;  %3321 = vadd.xlane.f32.xlu0 %v3320_v21  ;;  %v3247_v42 = vpop.xlane.xlu1 %3246 }
0x1175   :  { %11666 = vpow2.f32 %v3296_v28  ;;  %v3272_v32 = vsub.f32 %v13238_v54, %v3250_v1  ;;  %v3271_v0 = vsub.f32 %v13235_v7, %v3247_v42 }
0x1176   :  { %v13308_v35 = vpop.eup %11658  ;;  %11668 = vpow2.f32 %v3294_v26 }
0x1177   :  { %v3300_v48 = vmul.f32 1.442695, %v3272_v32  ;;  %v3298_v2 = vmul.f32 1.442695, %v3271_v0  ;;  %v3323_v40 = vsel %vm387_vm9, %v13308_v35, 0.0 }
0x1178   :  { %v3256_v59 = vpop.xlane.xlu0 %3255  ;;  %3324 = vadd.xlane.f32.xlu1 %v3323_v40  ;;  %v3253_v13 = vpop.xlane.xlu1 %3252 }
0x1179   :  { %11670 = vpow2.f32 %v3300_v48  ;;  %v3274_v61 = vsub.f32 %v13248_v30, %v3256_v59  ;;  %v3273_v22 = vsub.f32 %v13245_v33, %v3253_v13 }
0x117a   :  { %v13314_v12 = vpop.eup %11660  ;;  %11672 = vpow2.f32 %v3298_v2 }
0x117b   :  { %v3304_v7 = vmul.f32 1.442695, %v3274_v61  ;;  %v3302_v54 = vmul.f32 1.442695, %v3273_v22  ;;  %v3326_v49 = vsel %vm387_vm9, %v13314_v12, 0.0 }
0x117c   :  { %3327 = vadd.xlane.f32.xlu0 %v3326_v49  ;;  %v11147_v50 = vpop.permute.xlu1 %11146  ;;  %v11142_v39 = vpop.permute.xlu0 %11141 }
0x117d   :  { %11674 = vpow2.f32 %v3304_v7  ;;  %v11144_v28 = vunpack.i.h.bf16 %v11142_v39  ;;  %v11143_v26 = vunpack.i.l.bf16 %v11142_v39  ;;  %v11149_v48 = vunpack.i.h.bf16 %v11147_v50 }
0x117e   :  { %v13318_v55 = vpop.eup %11662  ;;  %11676 = vpow2.f32 %v3302_v54  ;;  %v11148_v2 = vunpack.i.l.bf16 %v11147_v50 }
0x117f   :  { %v13320_v6 = vpop.eup %11664  ;;  %v3332_v30 = vsel %vm387_vm9, %v13318_v55, 0.0  ;;  %v2774_v0 = vpack.c.bf16 %v11144_v28, %v11143_v26 }
0x1180   :  { %3333 = vadd.xlane.f32.xlu0 %v3332_v30  ;;  %v3329_v33 = vsel %vm387_vm9, %v13320_v6, 0.0  ;;  %v13359_v63 = vpop.permute.xlu0 %11156 }
0x1181   :  { %3330 = vadd.xlane.f32.xlu1 %v3329_v33 }
0x1182   :  { %v13326_v38 = vpop.eup %11666 }
0x1183   :  { %v13328_v53 = vpop.eup %11668  ;;  %v3338_v36 = vsel %vm387_vm9, %v13326_v38, 0.0 }
0x1184   :  { %3339 = vadd.xlane.f32.xlu0 %v3338_v36  ;;  %v3335_v46 = vsel %vm387_vm9, %v13328_v53, 0.0 }
0x1185   :  { %3336 = vadd.xlane.f32.xlu1 %v3335_v46 }
0x1186   :  { %v13334_v47 = vpop.eup %11670 }
0x1187   :  { %v13336_v58 = vpop.eup %11672  ;;  %v3344_v24 = vsel %vm387_vm9, %v13334_v47, 0.0 }
0x1188   :  { %3345 = vadd.xlane.f32.xlu0 %v3344_v24  ;;  %v3341_v62 = vsel %vm387_vm9, %v13336_v58, 0.0 }
0x1189   :  { %3342 = vadd.xlane.f32.xlu1 %v3341_v62 }
0x118a   :  { %v13342_v51 = vpop.eup %11674 }
0x118b   :  { %v13344_v4 = vpop.eup %11676  ;;  %v3350_v14 = vsel %vm387_vm9, %v13342_v51, 0.0 }
0x118c   :  { %3351 = vadd.xlane.f32.xlu0 %v3350_v14  ;;  %v3347_v52 = vsel %vm387_vm9, %v13344_v4, 0.0 }
0x118d   :  { %3348 = vadd.xlane.f32.xlu1 %v3347_v52 }
0x11a2   :  { %11166 = vrot.lane.b32.xlu0 %v13256_v31, %s12089_s21 }
0x11ad   :  { %v3259_v9 = vpop.xlane.xlu1 %3258 }
0x11ae   :  { %v3275_v15 = vsub.f32 %v13271_v45, %v3259_v9 }
0x11b0   :  { %v3306_v56 = vmul.f32 1.442695, %v3275_v15 }
0x11b1   :  { %v3310_v18 = vpop.xlane.xlu0 %3309  ;;  %v11152_v31 = vpop.permute.xlu1 %11151 }
0x11b2   :  { %11678 = vpow2.f32 %v3306_v56  ;;  %v11154_v33 = vunpack.i.h.bf16 %v11152_v31  ;;  %v11153_v36 = vunpack.i.l.bf16 %v11152_v31 }
0x11b3   :  { %11680 = vrcp.f32 %v3310_v18 }
0x11b4   :  { %v2776_v50 = vpack.c.bf16 %v11154_v33, %v11153_v36 }
0x11b5   :  { %v3316_v16 = vpop.xlane.xlu0 %3315 }
0x11bf   :  { %v13353_v23 = vpop.eup %11678 }
0x11c0   :  { %v3353_v10 = vsel %vm387_vm9, %v13353_v23, 0.0  ;;  %v11681_v19 = vpop.eup %11680 }
0x11c1   :  { %3354 = vadd.xlane.f32.xlu1 %v3353_v10  ;;  %v3372_v21 = vmul.f32 %v11681_v19, %v13275_v3  ;;  %v2775_v3 = vpack.c.bf16 %v11149_v48, %v11148_v2 }
0x11d2   :  { %11161 = vrot.lane.b32.xlu1 %v13262_v29, %s12089_s21 }
0x11e2   :  { %v3313_v17 = vpop.xlane.xlu1 %3312 }
0x11e3   :  { %11682 = vrcp.f32 %v3313_v17 }
0x11e4   :  { %11684 = vrcp.f32 %v3316_v16 }
0x11e6   :  { %v3319_v45 = vpop.xlane.xlu1 %3318 }
0x11e7   :  { %11686 = vrcp.f32 %v3319_v45 }
0x11f0   :  { %v11683_v20 = vpop.eup %11682 }
0x11f1   :  { %v3373_v1 = vmul.f32 %v11683_v20, %v13287_v44  ;;  %v11685_v29 = vpop.eup %11684 }
0x11f2   :  { %v3374_v40 = vmul.f32 %v11685_v29, %v13279_v11 }
0x11f3   :  { %v3388_v42 = vpack.c.bf16 %v3373_v1, %v3372_v21 }
0x11f4   :  { %v11687_v32 = vpop.eup %11686 }
0x11f5   :  { %10361 = vmatmul.mubr.msk.bf16.vlgmr.msra.gmra.mxu0 %vm387_vm9, %v3388_v42  ;;  %v3375_v59 = vmul.f32 %v11687_v32, %v13291_v25 }
0x11f6   :  { %10371 = vmatpush3.bf16.msra.mxu0 %v2774_v0  ;;  %10372 = vmatprep.mubr.msk.bf16.mxu0 %vm12088_vm1, %v12080_v43 }
0x11f7   :  { %v3389_v13 = vpack.c.bf16 %v3375_v59, %v3374_v40  ;;  %10382 = vmatprep.subr.bf16.mxu0 %v12080_v43 }
0x11f9   :  { %10367 = vmatmul.mubr.msk.bf16.vlgmr.msra.gmra.mxu1 %vm387_vm9, %v3389_v13 }
0x11fa   :  { %10377 = vmatpush3.bf16.msra.mxu1 %v2775_v3  ;;  %10378 = vmatprep.mubr.msk.bf16.mxu1 %vm12088_vm1, %v12080_v43 }
0x11fb   :  { %10388 = vmatprep.subr.bf16.mxu1 %v12080_v43 }
0x11fd   :  { %v3322_v44 = vpop.xlane.xlu0 %3321 }
0x11fe   :  { %11688 = vrcp.f32 %v3322_v44 }
0x1201   :  { %v3325_v11 = vpop.xlane.xlu1 %3324 }
0x1202   :  { %11690 = vrcp.f32 %v3325_v11 }
0x1205   :  { %v3328_v25 = vpop.xlane.xlu0 %3327 }
0x1206   :  { %11692 = vrcp.f32 %v3328_v25 }
0x1209   :  { %v3334_v61 = vpop.xlane.xlu0 %3333 }
0x120a   :  { %v3331_v22 = vpop.xlane.xlu1 %3330 }
0x120b   :  { %11694 = vrcp.f32 %v3331_v22  ;;  %v11689_v7 = vpop.eup %11688 }
0x120c   :  { %11696 = vrcp.f32 %v3334_v61  ;;  %v3376_v46 = vmul.f32 %v11689_v7, %v13302_v37  ;;  %v11159_v37 = vunpack.i.h.bf16 %v13359_v63 }
0x120d   :  { %v3340_v54 = vpop.xlane.xlu0 %3339 }
0x120e   :  { %v3337_v49 = vpop.xlane.xlu1 %3336 }
0x120f   :  { %v11691_v30 = vpop.eup %11690  ;;  %11698 = vrcp.f32 %v3337_v49 }
0x1210   :  { %v3377_v24 = vmul.f32 %v11691_v30, %v13308_v35  ;;  %11700 = vrcp.f32 %v3340_v54  ;;  %v11158_v35 = vunpack.i.l.bf16 %v13359_v63 }
0x1211   :  { %v3346_v62 = vpop.xlane.xlu0 %3345 }
0x1212   :  { %v3343_v14 = vpop.xlane.xlu1 %3342  ;;  %v3390_v52 = vpack.c.bf16 %v3377_v24, %v3376_v46  ;;  %v2777_v17 = vpack.c.bf16 %v11159_v37, %v11158_v35 }
0x1213   :  { %11702 = vrcp.f32 %v3343_v14  ;;  %v11693_v9 = vpop.eup %11692 }
0x1214   :  { %10373 = vmatmul.mubr.msk.bf16.vlgmr.msra.gmra.mxu0 %vm387_vm9, %v3390_v52  ;;  %v3378_v10 = vmul.f32 %v11693_v9, %v13314_v12  ;;  %v11460_v9 = vld [vmem:[%s12159_s24 + $0x38] sm:$0xff]  }
0x1215   :  { %10383 = vmatpush3.bf16.msra.mxu0 %v2776_v50  ;;  %10384 = vmatprep.mubr.msk.bf16.mxu0 %vm12088_vm1, %v12080_v43  ;;  %v3352_v15 = vpop.xlane.xlu0 %3351 }
0x1216   :  { %10394 = vmatprep.subr.bf16.mxu0 %v12080_v43  ;;  %v3349_v29 = vpop.xlane.xlu1 %3348 }
0x1217   :  { %11704 = vrcp.f32 %v3349_v29 }
0x1218   :  { %v11695_v56 = vpop.eup %11694  ;;  %11706 = vrcp.f32 %v3346_v62 }
0x1219   :  { %v3379_v39 = vmul.f32 %v11695_v56, %v13320_v6  ;;  %v11697_v18 = vpop.eup %11696  ;;  %v11167_v45 = vpop.permute.xlu0 %11166  ;;  %11708 = vrcp.f32 %v3352_v15 }
0x121a   :  { %v3380_v19 = vmul.f32 %v11697_v18, %v13318_v55  ;;  %v11169_v6 = vunpack.i.h.bf16 %v11167_v45  ;;  %v11168_v26 = vunpack.i.l.bf16 %v11167_v45 }
0x121b   :  { %v3391_v31 = vpack.c.bf16 %v3379_v39, %v3378_v10 }
0x121c   :  { %v11699_v16 = vpop.eup %11698 }
0x121d   :  { %10379 = vmatmul.mubr.msk.bf16.vlgmr.msra.gmra.mxu1 %vm387_vm9, %v3391_v31  ;;  %v3381_v20 = vmul.f32 %v11699_v16, %v13328_v53  ;;  %v11701_v28 = vpop.eup %11700  ;;  %v2779_v53 = vpack.c.bf16 %v11169_v6, %v11168_v26 }
0x121e   :  { %10389 = vmatpush3.bf16.msra.mxu1 %v2777_v17  ;;  %10390 = vmatprep.mubr.msk.bf16.mxu1 %vm12088_vm1, %v12080_v43  ;;  %v3382_v21 = vmul.f32 %v11701_v28, %v13326_v38 }
0x121f   :  { %v3392_v63 = vpack.c.bf16 %v3381_v20, %v3380_v19  ;;  %10400 = vmatprep.subr.bf16.mxu1 %v12080_v43  ;;  %v11461_v19 = vld [vmem:[%s12159_s24 + $0x30] sm:$0xff]   ;;  %v11462_v20 = vld [vmem:[%s12159_s24 + $0x28] sm:$0xff]  }
0x1220   :  { %v11703_v12 = vpop.eup %11702 }
0x1221   :  { %10385 = vmatmul.mubr.msk.bf16.vlgmr.msra.gmra.mxu0 %vm387_vm9, %v3392_v63  ;;  %v3383_v1 = vmul.f32 %v11703_v12, %v13336_v58  ;;  %v11463_v12 = vld [vmem:[%s12159_s24 + $0x20] sm:$0xff]   ;;  %s15195_s24 = sld [smem:[#allocation15_spill]] }
0x1222   :  { %10396 = vmatprep.mubr.msk.bf16.mxu0 %vm12088_vm1, %v12080_v43 }
0x1223   :  { %v3393_v55 = vpack.c.bf16 %v3383_v1, %v3382_v21 }
0x1224   :  { %v11705_v38 = vpop.eup %11704 }
0x1225   :  { %10391 = vmatmul.mubr.msk.bf16.vlgmr.msra.gmra.mxu1 %vm387_vm9, %v3393_v55  ;;  %v11707_v58 = vpop.eup %11706  ;;  %v3385_v2 = vmul.f32 %v11705_v38, %v13344_v4 }
0x1226   :  { %10401 = vmatpush3.bf16.msra.mxu1 %v2779_v53  ;;  %10402 = vmatprep.mubr.msk.bf16.mxu1 %vm12088_vm1, %v12080_v43  ;;  %v3384_v59 = vmul.f32 %v11707_v58, %v13334_v47  ;;  %v11709_v3 = vpop.eup %11708 }
0x1227   :  { %v3386_v11 = vmul.f32 %v11709_v3, %v13342_v51 }
0x1228   :  { %v3394_v13 = vpack.c.bf16 %v3385_v2, %v3384_v59 }
0x124a   :  { %v3355_v42 = vpop.xlane.xlu1 %3354 }
0x124b   :  { %11710 = vrcp.f32 %v3355_v42 }
0x124e   :  { %v11162_v32 = vpop.permute.xlu1 %11161 }
0x124f   :  { %v11164_v0 = vunpack.i.h.bf16 %v11162_v32  ;;  %v11163_v48 = vunpack.i.l.bf16 %v11162_v32 }
0x1251   :  { %v2778_v40 = vpack.c.bf16 %v11164_v0, %v11163_v48 }
0x1253   :  { %10395 = vmatpush3.bf16.msra.mxu0 %v2778_v40 }
0x1254   :  { %10406 = vmatprep.subr.bf16.mxu0 %v11460_v9 }
0x1256   :  { %10397 = vmatmul.mubr.msk.bf16.vlgmr.msra.gmra.mxu0 %vm387_vm9, %v3394_v13 }
0x1257   :  { %10407 = vmatpush3.bf16.msra.mxu0 %v11460_v9 }
0x1258   :  { %v11711_v44 = vpop.eup %11710  ;;  %10408 = vmatprep.subr.bf16.mxu0 %v11461_v19 }
0x1259   :  { %v3387_v25 = vmul.f32 %v11711_v44, %v13353_v23 }
0x125b   :  { %v3395_v61 = vpack.c.bf16 %v3387_v25, %v3386_v11  ;;  %10409 = vmatpush3.bf16.msra.mxu0 %v11461_v19 }
0x125c   :  { %10410 = vmatprep.subr.bf16.mxu0 %v11462_v20 }
0x125d   :  { %10403 = vmatmul.mubr.msk.bf16.vlgmr.msra.gmra.mxu1 %vm387_vm9, %v3395_v61 }
0x125f   :  { %10411 = vmatpush3.bf16.msra.mxu0 %v11462_v20 }
0x1260   :  { %10412 = vmatprep.subr.bf16.mxu0 %v11463_v12 }
0x1263   :  { %10413 = vmatpush3.bf16.msra.mxu0 %v11463_v12 }
0x12b5   :  { %v13403_v22 = vpop.f32.mrf.mxu0 }
0x12b7   :  { %v10362_v7 = vpop.f32.mrf.mxu0 }
0x12b9   :  { %v13405_v4 = vpop.f32.mrf.mxu0  ;;  %v13407_v47 = vpop.f32.mrf.mxu1 }
0x12bb   :  { %v10363_v54 = vpop.f32.mrf.mxu0  ;;  %v10368_v49 = vpop.f32.mrf.mxu1 }
0x12bd   :  { %v13409_v30 = vpop.f32.mrf.mxu1 }
0x12bf   :  { %v10369_v33 = vpop.f32.mrf.mxu1 }
0x12d4   :  { %v3521_v36 = vpop.f32.mrf.mxu0 }
0x12d6   :  { %v10374_v51 = vpop.f32.mrf.mxu0 }
0x12d8   :  { %v3524_v46 = vpop.f32.mrf.mxu0 }
0x12d9   :  { %v11170_v23 = vpack.i.bf16 %v3524_v46, %v3521_v36 }
0x12da   :  { %v10375_v24 = vpop.f32.mrf.mxu0 }
0x12db   :  { %11171 = vrot.lane.b32.xlu1 %v11170_v23, %s12082_s26 }
0x12dd   :  { %v3565_v62 = vpop.f32.mrf.mxu1 }
0x12df   :  { %v10380_v14 = vpop.f32.mrf.mxu1 }
0x12e1   :  { %v3568_v52 = vpop.f32.mrf.mxu1  ;;  %v3609_v50 = vpop.f32.mrf.mxu0 }
0x12e2   :  { %v11175_v15 = vpack.i.bf16 %v3568_v52, %v3565_v62 }
0x12e3   :  { %v10381_v56 = vpop.f32.mrf.mxu1  ;;  %v10386_v37 = vpop.f32.mrf.mxu0 }
0x12e4   :  { %11176 = vrot.lane.b32.xlu0 %v11175_v15, %s12082_s26 }
0x12e5   :  { %v3612_v35 = vpop.f32.mrf.mxu0  ;;  %v3653_v10 = vpop.f32.mrf.mxu1 }
0x12e6   :  { %v11180_v39 = vpack.i.bf16 %v3612_v35, %v3609_v50 }
0x12e7   :  { %v10387_v18 = vpop.f32.mrf.mxu0  ;;  %v10392_v31 = vpop.f32.mrf.mxu1 }
0x12e8   :  { %11181 = vrot.lane.b32.xlu1 %v11180_v39, %s12092_s29 }
0x12e9   :  { %v3656_v16 = vpop.f32.mrf.mxu1 }
0x12ea   :  { %v11185_v17 = vpack.i.bf16 %v3656_v16, %v3653_v10  ;;  %v9556_v10 = vld [vmem:[%s12164_s30 + $0x1] ss:$0 sm:$0xff]  ;;  %s15196_s30 = sld [smem:[#allocation14_spill]] }
0x12eb   :  { %v10393_v45 = vpop.f32.mrf.mxu1 }
0x12ec   :  { %11186 = vrot.lane.b32.xlu0 %v11185_v17, %s12092_s29 }
0x1316   :  { %v3697_v28 = vpop.f32.mrf.mxu0 }
0x1318   :  { %v10398_v63 = vpop.f32.mrf.mxu0 }
0x131a   :  { %v3700_v6 = vpop.f32.mrf.mxu0 }
0x131b   :  { %v11190_v26 = vpack.i.bf16 %v3700_v6, %v3697_v28 }
0x131c   :  { %v10399_v21 = vpop.f32.mrf.mxu0 }
0x131d   :  { %11191 = vrot.lane.b32.xlu1 %v11190_v26, %s12093_s3  ;;  %v3741_v1 = vpop.f32.mrf.mxu1 }
0x131f   :  { %v10404_v55 = vpop.f32.mrf.mxu1 }
0x1321   :  { %v3744_v53 = vpop.f32.mrf.mxu1 }
0x1322   :  { %v11195_v29 = vpack.i.bf16 %v3744_v53, %v3741_v1 }
0x1323   :  { %v10405_v42 = vpop.f32.mrf.mxu1 }
0x1324   :  { %11196 = vrot.lane.b32.xlu0 %v11195_v29, %s12093_s3 }
0x134d   :  { %v11172_v38 = vpop.permute.xlu1 %11171 }
0x134e   :  { %v11174_v58 = vunpack.i.h.bf16 %v11172_v38  ;;  %v11173_v0 = vunpack.i.l.bf16 %v11172_v38 }
0x1350   :  { %v3797_v13 = vsel %vm387_vm9, %v13405_v4, %v11174_v58  ;;  %v3796_v3 = vsel %vm387_vm9, %v13403_v22, %v11173_v0 }
0x1356   :  { %v11177_v48 = vpop.permute.xlu0 %11176 }
0x1357   :  { %v11179_v33 = vunpack.i.h.bf16 %v11177_v48  ;;  %v11178_v36 = vunpack.i.l.bf16 %v11177_v48 }
0x1359   :  { %v3799_v4 = vsel %vm387_vm9, %v13409_v30, %v11179_v33  ;;  %v3798_v24 = vsel %vm387_vm9, %v13407_v47, %v11178_v36  ;;  %v4295_v33 = vld [vmem:[%s15191_s8 + $0x60] sm:$0xf] }
0x135a   :  { %v11182_v32 = vpop.permute.xlu1 %11181 }
0x135b   :  { %v11184_v2 = vunpack.i.h.bf16 %v11182_v32  ;;  %v11183_v40 = vunpack.i.l.bf16 %v11182_v32 }
0x135d   :  { %v3801_v25 = vsel %vm2068_vm4, %v3797_v13, %v11184_v2  ;;  %v3800_v61 = vsel %vm2068_vm4, %v3796_v3, %v11183_v40  ;;  %v12003_v3 = vld [vmem:[%s12104_s5 + $0x18] sm:$0xff] }
0x135e   :  { %v11187_v7 = vpop.permute.xlu0 %11186 }
0x135f   :  { %v11189_v46 = vunpack.i.h.bf16 %v11187_v7  ;;  %v11188_v23 = vunpack.i.l.bf16 %v11187_v7  ;;  %v12006_v7 = vld [vmem:[%s12104_s5 + $0x38] sm:$0xff] }
0x1361   :  { %v3803_v52 = vsel %vm2068_vm4, %v3799_v4, %v11189_v46  ;;  %v3802_v50 = vsel %vm2068_vm4, %v3798_v24, %v11188_v23 }
0x138f   :  { %v11192_v59 = vpop.permute.xlu1 %11191 }
0x1390   :  { %v11194_v44 = vunpack.i.h.bf16 %v11192_v59  ;;  %v11193_v11 = vunpack.i.l.bf16 %v11192_v59 }
0x1392   :  { %v3805_v54 = vsel %vm2073_vm6, %v3801_v25, %v11194_v44  ;;  %v3804_v49 = vsel %vm2073_vm6, %v3800_v61, %v11193_v11  ;;  %v11464_v44 = vld [vmem:[%s12179_s20 + $0x38] sm:$0xff]   ;;  %v12004_v11 = vld [vmem:[%s12104_s5 + $0x30] sm:$0xff] }
0x1393   :  { %v3808_v51 = vpack.c.bf16 %v3805_v54, %v3804_v49  ;;  %10418 = vmatprep.subr.bf16.mxu1 %v11464_v44  ;;  %v12005_v25 = vld [vmem:[%s12104_s5 + $0x10] sm:$0xff]  ;;  %v11466_v54 = vld [vmem:[%s12179_s20 + $0x28] sm:$0xff]   ;;  %v11467_v49 = vld [vmem:[%s12179_s20 + $0x20] sm:$0xff]  }
0x1394   :  { %10419 = vmatpush3.bf16.msra.mxu1 %v11464_v44  ;;  %v11465_v61 = vld [vmem:[%s12179_s20 + $0x30] sm:$0xff]   ;;  %s15198_s20 = sld [smem:[#allocation16_spill]] }
0x1395   :  { %10414 = vmatprep.mubr.msk.bf16.mxu0 %vm663_vm14, %v3808_v51  ;;  %10420 = vmatprep.subr.bf16.mxu1 %v11465_v61 }
0x1396   :  { %v11197_v22 = vpop.permute.xlu0 %11196 }
0x1397   :  { %v11199_v62 = vunpack.i.h.bf16 %v11197_v22  ;;  %v11198_v14 = vunpack.i.l.bf16 %v11197_v22 }
0x1398   :  { %10421 = vmatpush3.bf16.msra.mxu1 %v11465_v61  ;;  %v12009_v61 = vld [vmem:[%s12104_s5 + $0x20] sm:$0xff] }
0x1399   :  { %v3807_v9 = vsel %vm2073_vm6, %v3803_v52, %v11199_v62  ;;  %v3806_v15 = vsel %vm2073_vm6, %v3802_v50, %v11198_v14  ;;  %10422 = vmatprep.subr.bf16.mxu1 %v11466_v54 }
0x139a   :  { %v3809_v56 = vpack.c.bf16 %v3807_v9, %v3806_v15 }
0x139c   :  { %10415 = vmatmul.mubr.msk.bf16.vlgmr.msra.gmra.mxu0 %vm663_vm14, %v3809_v56  ;;  %10423 = vmatpush3.bf16.msra.mxu1 %v11466_v54 }
0x139d   :  { %10424 = vmatprep.subr.bf16.mxu1 %v11467_v49 }
0x13a0   :  { %10425 = vmatpush3.bf16.msra.mxu1 %v11467_v49  ;;  %v12010_v49 = vld [vmem:[%s12104_s5 + $0x28] sm:$0xff] }
0x13a1   :  { %10450 = vmatprep.subr.msk.mxu1 %vm245_vm0, %v4295_v33 }
0x145c   :  { %v10416_v37 = vpop.f32.mrf.mxu0 }
0x145d   :  { %v3900_v16 = vadd.f32 %v10416_v37, %v13071_v5  ;;  %v9559_v37 = vld [vmem:[%s12169_s6 + $0x1] ss:$0 sm:$0xff]  ;;  %s15197_s6 = sld [smem:[#allocation18_spill]] }
0x145e   :  { %v3883_v35 = vpop.f32.mrf.mxu0 }
0x145f   :  { %v3898_v30 = vadd.f32 %v3883_v35, %v13068_v41  ;;  %v13452_v41 = vadd.f32 %v9556_v10, %v3900_v16 }
0x1460   :  { %v10417_v39 = vpop.f32.mrf.mxu0 }
0x1461   :  { %v13441_v47 = vadd.f32 %v9556_v10, %v3898_v30  ;;  %v3901_v18 = vadd.f32 %v10417_v39, %v13079_v60  ;;  %v3924_v5 = vsel %vm663_vm14, %v13452_v41, 0.0  ;;  %v9560_v39 = vld [vmem:[%s15187_s2 + $0x1] ss:$0 sm:$0xff]  ;;  %s15207_s2 = sld [smem:[#allocation26_spill]] }
0x1462   :  { %v3886_v31 = vpop.f32.mrf.mxu0 }
0x1463   :  { %v13445_v17 = vadd.f32 %v9556_v10, %v3901_v18  ;;  %v3899_v45 = vadd.f32 %v3886_v31, %v13076_v57  ;;  %v3918_v19 = vsel %vm663_vm14, %v13441_v47, 0.0 }
0x1464   :  { %3919 = vadd.xlane.f32.xlu1 %v3918_v19 }
0x1465   :  { %v13450_v20 = vadd.f32 %v9556_v10, %v3899_v45  ;;  %v3927_v28 = vsel %vm663_vm14, %v13445_v17, 0.0 }
0x1467   :  { %v3921_v60 = vsel %vm663_vm14, %v13450_v20, 0.0 }
0x1468   :  { %3928 = vadd.xlane.f32.xlu1 %v3927_v28  ;;  %3922 = vadd.xlane.f32.xlu0 %v3921_v60 }
0x146c   :  { %3925 = vadd.xlane.f32.xlu0 %v3924_v5 }
0x14ed   :  { %v3920_v57 = vpop.xlane.xlu1 %3919 }
0x14ee   :  { %v3930_v63 = vmul.f32 0.015625, %v3920_v57 }
0x14f0   :  { %v3934_v12 = vsub.f32 %v13441_v47, %v3930_v63 }
0x14f1   :  { %v3929_v6 = vpop.xlane.xlu1 %3928  ;;  %v3923_v26 = vpop.xlane.xlu0 %3922 }
0x14f2   :  { %v3933_v21 = vmul.f32 0.015625, %v3929_v6  ;;  %v3931_v1 = vmul.f32 0.015625, %v3923_v26  ;;  %v3938_v55 = vmul.f32 %v3934_v12, %v3934_v12 }
0x14f4   :  { %v13462_v53 = vsub.f32 %v13445_v17, %v3933_v21  ;;  %v3935_v29 = vsub.f32 %v13450_v20, %v3931_v1  ;;  %v3942_v42 = vsel %vm663_vm14, %v3938_v55, 0.0  ;;  %v12007_v1 = vld [vmem:[%s12104_s5] sm:$0xff] }
0x14f5   :  { %3943 = vadd.xlane.f32.xlu0 %v3942_v42  ;;  %v3926_v38 = vpop.xlane.xlu0 %3925  ;;  %v4292_v42 = vld [vmem:[%s15191_s8 + $0x48] sm:$0xff] }
0x14f6   :  { %v3932_v32 = vmul.f32 0.015625, %v3926_v38  ;;  %v3939_v58 = vmul.f32 %v3935_v29, %v3935_v29  ;;  %v3941_v2 = vmul.f32 %v13462_v53, %v13462_v53  ;;  %v4291_v38 = vld [vmem:[%s15191_s8 + $0x40] sm:$0xff] }
0x14f8   :  { %v3936_v0 = vsub.f32 %v13452_v41, %v3932_v32  ;;  %v3945_v48 = vsel %vm663_vm14, %v3939_v58, 0.0  ;;  %v3951_v59 = vsel %vm663_vm14, %v3941_v2, 0.0  ;;  %v4290_v32 = vld [vmem:[%s15191_s8 + $0x38] sm:$0xff]  ;;  %v4289_v58 = vld [vmem:[%s15191_s8 + $0x30] sm:$0xff] }
0x14f9   :  { %3946 = vadd.xlane.f32.xlu1 %v3945_v48  ;;  %v4287_v48 = vld [vmem:[%s15191_s8 + $0x20] sm:$0xff]  ;;  %v4286_v2 = vld [vmem:[%s15191_s8 + $0x18] sm:$0xff] }
0x14fa   :  { %v3940_v40 = vmul.f32 %v3936_v0, %v3936_v0 }
0x14fc   :  { %v3948_v13 = vsel %vm663_vm14, %v3940_v40, 0.0 }
0x14fd   :  { %3952 = vadd.xlane.f32.xlu1 %v3951_v59  ;;  %3949 = vadd.xlane.f32.xlu0 %v3948_v13  ;;  %v4285_v59 = vld [vmem:[%s15191_s8 + $0x10] sm:$0xff]  ;;  %v4284_v13 = vld [vmem:[%s15191_s8 + $0x8] sm:$0xff] }
0x150e   :  { %4269 = vrot.lane.b32.xlu1 %v12003_v3, %s12078_s18  ;;  %v4283_v3 = vld [vmem:[%s15191_s8] sm:$0xff] }
0x1512   :  { %4271 = vrot.lane.b32.xlu1 %v12004_v11, %s12078_s18  ;;  %v12008_v11 = vld [vmem:[%s12104_s5 + $0x8] sm:$0xff]  ;;  %s15192_s5 = sld [smem:[#allocation11_spill]] }
0x1513   :  { %4267 = vrot.lane.b32.xlu0 %v12005_v25, %s12078_s18 }
0x1517   :  { %4273 = vrot.lane.b32.xlu0 %v12006_v7, %s12078_s18  ;;  %s15202_s18 = sld [smem:[#allocation23_spill]] }
0x157e   :  { %v3944_v36 = vpop.xlane.xlu0 %3943 }
0x157f   :  { %v3954_v51 = vmul.f32 0.015625, %v3944_v36  ;;  %v11468_v36 = vld [vmem:[%s15188_s7 + $0x78] sm:$0xff]  }
0x1580   :  { %10430 = vmatprep.subr.bf16.mxu0 %v11468_v36 }
0x1581   :  { %v3958_v46 = vadd.f32 1e-05, %v3954_v51  ;;  %10431 = vmatpush3.bf16.msra.mxu0 %v11468_v36  ;;  %v11469_v51 = vld [vmem:[%s15188_s7 + $0x70] sm:$0xff]  }
0x1582   :  { %v3947_v23 = vpop.xlane.xlu1 %3946  ;;  %10432 = vmatprep.subr.bf16.mxu0 %v11469_v51 }
0x1583   :  { %11712 = vrsqrt.f32 %v3958_v46  ;;  %v3955_v22 = vmul.f32 0.015625, %v3947_v23  ;;  %v11470_v46 = vld [vmem:[%s15188_s7 + $0x68] sm:$0xff]   ;;  %v11471_v23 = vld [vmem:[%s15188_s7 + $0x60] sm:$0xff]  }
0x1585   :  { %v3959_v4 = vadd.f32 1e-05, %v3955_v22  ;;  %10433 = vmatpush3.bf16.msra.mxu0 %v11469_v51  ;;  %v11472_v22 = vld [vmem:[%s15188_s7 + $0x58] sm:$0xff]  }
0x1586   :  { %v3953_v24 = vpop.xlane.xlu1 %3952  ;;  %v3950_v62 = vpop.xlane.xlu0 %3949  ;;  %10434 = vmatprep.subr.bf16.mxu0 %v11470_v46 }
0x1587   :  { %11714 = vrsqrt.f32 %v3959_v4  ;;  %v3957_v14 = vmul.f32 0.015625, %v3953_v24  ;;  %v3956_v52 = vmul.f32 0.015625, %v3950_v62  ;;  %v11473_v4 = vld [vmem:[%s15188_s7 + $0x50] sm:$0xff]   ;;  %v11474_v24 = vld [vmem:[%s15188_s7 + $0x48] sm:$0xff]   ;;  %v11475_v62 = vld [vmem:[%s15188_s7 + $0x40] sm:$0xff]  }
0x1589   :  { %v3961_v50 = vadd.f32 1e-05, %v3957_v14  ;;  %v3960_v9 = vadd.f32 1e-05, %v3956_v52  ;;  %10435 = vmatpush3.bf16.msra.mxu0 %v11470_v46  ;;  %v9570_v14 = vld [vmem:[%s15189_s10 + $0x1] ss:$0 sm:$0xff] }
0x158a   :  { %v4268_v6 = vpop.permute.xlu0 %4267  ;;  %v4270_v40 = vpop.permute.xlu1 %4269  ;;  %10436 = vmatprep.subr.bf16.mxu0 %v11471_v23 }
0x158b   :  { %11716 = vrsqrt.f32 %v3961_v50  ;;  %v4279_v55 = vsel %vm352_vm5, %v12007_v1, %v4268_v6  ;;  %v4280_v25 = vsel %vm352_vm5, %v12008_v11, %v4270_v40 }
0x158c   :  { %11718 = vrsqrt.f32 %v3960_v9 }
0x158d   :  { %10437 = vmatpush3.bf16.msra.mxu0 %v11471_v23 }
0x158e   :  { %v4272_v44 = vpop.permute.xlu1 %4271  ;;  %v4274_v54 = vpop.permute.xlu0 %4273  ;;  %10438 = vmatprep.subr.bf16.mxu0 %v11472_v22 }
0x158f   :  { %v4281_v7 = vsel %vm352_vm5, %v12009_v61, %v4272_v44 }
0x1590   :  { %v11713_v15 = vpop.eup %11712 }
0x1591   :  { %v3966_v56 = vmul.f32 %v11713_v15, %v3934_v12  ;;  %10439 = vmatpush3.bf16.msra.mxu0 %v11472_v22 }
0x1592   :  { %10440 = vmatprep.subr.bf16.mxu0 %v11473_v4 }
0x1593   :  { %v3976_v10 = vmul.f32 %v9559_v37, %v3966_v56 }
0x1594   :  { %v11715_v35 = vpop.eup %11714 }
0x1595   :  { %v3967_v30 = vmul.f32 %v11715_v35, %v3935_v29  ;;  %v3986_v19 = vadd.f32 %v9560_v39, %v3976_v10  ;;  %v4293_v29 = vld [vmem:[%s15191_s8 + $0x50] sm:$0xff]  ;;  %10441 = vmatpush3.bf16.msra.mxu0 %v11473_v4 }
0x1596   :  { %10442 = vmatprep.subr.bf16.mxu0 %v11474_v24 }
0x1597   :  { %v3977_v18 = vmul.f32 %v9559_v37, %v3967_v30 }
0x1598   :  { %v11717_v31 = vpop.eup %11716 }
0x1599   :  { %v11719_v16 = vpop.eup %11718  ;;  %v3969_v45 = vmul.f32 %v11717_v31, %v13462_v53  ;;  %v3987_v28 = vadd.f32 %v9560_v39, %v3977_v18  ;;  %v4294_v53 = vld [vmem:[%s15191_s8 + $0x58] sm:$0xff]  ;;  %10443 = vmatpush3.bf16.msra.mxu0 %v11474_v24 }
0x159a   :  { %v3968_v60 = vmul.f32 %v11719_v16, %v3936_v0  ;;  %v4288_v0 = vld [vmem:[%s15191_s8 + $0x28] sm:$0xff]  ;;  %10444 = vmatprep.subr.bf16.mxu0 %v11475_v62 }
0x159b   :  { %v3990_v5 = vpack.c.bf16 %v3987_v28, %v3986_v19  ;;  %v3979_v57 = vmul.f32 %v9559_v37, %v3969_v45 }
0x159c   :  { %v3978_v63 = vmul.f32 %v9559_v37, %v3968_v60 }
0x159d   :  { %10426 = vmatprep.mubr.msk.bf16.mxu1 %vm663_vm14, %v3990_v5  ;;  %v3989_v12 = vadd.f32 %v9560_v39, %v3979_v57  ;;  %10445 = vmatpush3.bf16.msra.mxu0 %v11475_v62 }
0x159e   :  { %v3988_v26 = vadd.f32 %v9560_v39, %v3978_v63 }
0x15a0   :  { %v3991_v21 = vpack.c.bf16 %v3989_v12, %v3988_v26  ;;  %v9604_v12 = vld [vmem:[%s15192_s5] ss:$0 sm:$0xff] }
0x15a2   :  { %10427 = vmatmul.mubr.msk.bf16.vlgmr.msra.gmra.mxu1 %vm663_vm14, %v3991_v21 }
0x15a3   :  { %10451 = vmatpush3.msk.msra.mxu1 %vm245_vm0, %v4295_v33  ;;  %10476 = vmatprep.mubr.msk.f32.mxu1 %vm357_vm8, %v4279_v55  ;;  %v4282_v33 = vsel %vm352_vm5, %v12010_v49, %v4274_v54 }
0x15a4   :  { %10452 = vmatprep.subr.mxu1 %v4294_v53 }
0x15a5   :  { %10453 = vmatpush3.msra.mxu1 %v4294_v53 }
0x15a6   :  { %10454 = vmatprep.subr.mxu1 %v4293_v29 }
0x15a7   :  { %10455 = vmatpush3.msra.mxu1 %v4293_v29 }
0x15a8   :  { %10456 = vmatprep.subr.mxu1 %v4292_v42 }
0x15a9   :  { %10457 = vmatpush3.msra.mxu1 %v4292_v42 }
0x15aa   :  { %10458 = vmatprep.subr.mxu1 %v4291_v38 }
0x15ab   :  { %10459 = vmatpush3.msra.mxu1 %v4291_v38 }
0x15ac   :  { %10460 = vmatprep.subr.mxu1 %v4290_v32 }
0x15ad   :  { %10461 = vmatpush3.msra.mxu1 %v4290_v32 }
0x15ae   :  { %10462 = vmatprep.subr.mxu1 %v4289_v58 }
0x15af   :  { %10463 = vmatpush3.msra.mxu1 %v4289_v58 }
0x15b0   :  { %10464 = vmatprep.subr.mxu1 %v4288_v0 }
0x15b1   :  { %10465 = vmatpush3.msra.mxu1 %v4288_v0 }
0x15b2   :  { %10466 = vmatprep.subr.mxu1 %v4287_v48 }
0x15b3   :  { %10467 = vmatpush3.msra.mxu1 %v4287_v48 }
0x15b4   :  { %10468 = vmatprep.subr.mxu1 %v4286_v2 }
0x15b5   :  { %10469 = vmatpush3.msra.mxu1 %v4286_v2 }
0x15b6   :  { %10470 = vmatprep.subr.mxu1 %v4285_v59 }
0x15b7   :  { %10471 = vmatpush3.msra.mxu1 %v4285_v59 }
0x15b8   :  { %10472 = vmatprep.subr.mxu1 %v4284_v13 }
0x15b9   :  { %10473 = vmatpush3.msra.mxu1 %v4284_v13 }
0x15ba   :  { %10474 = vmatprep.subr.mxu1 %v4283_v3 }
0x15bb   :  { %10475 = vmatpush3.msra.mxu1 %v4283_v3 }
0x15bc   :  { %10477 = vmatmul.mubr.msk.f32.vlgmr.msra.gmra.mxu1 %vm357_vm8, %v4280_v25 }
0x15bd   :  { %10479 = vmatprep.mubr.msk.f32.mxu1 %vm357_vm8, %v4281_v7 }
0x15c0   :  { %10480 = vmatmul.mubr.msk.f32.gmra.mxu1 %vm357_vm8, %v4282_v33  ;;  %vm5463_vm8 = vcmask 195584  }
0x1662   :  { %v10428_v52 = vpop.f32.mrf.mxu1 }
0x1663   :  { %v4082_v50 = vadd.f32 %v10428_v52, %v9570_v14 }
0x1664   :  { %v4073_v9 = vpop.f32.mrf.mxu1 }
0x1665   :  { %v4074_v15 = vadd.f32 %v9570_v14, %v4073_v9  ;;  %v4094_v56 = vmul.f32 0.70710677, %v4082_v50  ;;  %v4090_v1 = vmul.f32 0.5, %v4082_v50 }
0x1666   :  { %v10429_v37 = vpop.f32.mrf.mxu1 }
0x1667   :  { %v4092_v35 = vmul.f32 0.70710677, %v4074_v15  ;;  %v4085_v30 = vadd.f32 %v10429_v37, %v9570_v14  ;;  %v4088_v6 = vmul.f32 0.5, %v4074_v15 }
0x1668   :  { %v4076_v10 = vpop.f32.mrf.mxu1 }
0x1669   :  { %11720 = verf.f32 %v4092_v35  ;;  %v4095_v39 = vmul.f32 0.70710677, %v4085_v30  ;;  %v4077_v18 = vadd.f32 %v9570_v14, %v4076_v10  ;;  %v4091_v63 = vmul.f32 0.5, %v4085_v30  ;;  %v9594_v10 = vld [vmem:[%s15190_s11 + $0x1] ss:$0 sm:$0xff] }
0x166a   :  { %11722 = verf.f32 %v4094_v56  ;;  %v13552_v30 = vshrl.u32 %v765_v8, 7 }
0x166b   :  { %11724 = verf.f32 %v4095_v39  ;;  %v4093_v31 = vmul.f32 0.70710677, %v4077_v18  ;;  %v4089_v26 = vmul.f32 0.5, %v4077_v18 }
0x166c   :  { %vm4239_vm5 = vcmp.eq.s32.totalorder %v13552_v30, 0 }
0x166d   :  { %11726 = verf.f32 %v4093_v31 }
0x1676   :  { %v11721_v16 = vpop.eup %11720 }
0x1677   :  { %v11723_v45 = vpop.eup %11722  ;;  %v4100_v28 = vadd.f32 1.0, %v11721_v16 }
0x1678   :  { %v11725_v19 = vpop.eup %11724  ;;  %v4102_v57 = vadd.f32 1.0, %v11723_v45 }
0x1679   :  { %v4103_v60 = vadd.f32 1.0, %v11725_v19  ;;  %v4104_v29 = vmul.f32 %v4100_v28, %v4088_v6  ;;  %v13558_v19 = vsel %vm4239_vm5, 1.0, %v12080_v43 }
0x167a   :  { %v11727_v5 = vpop.eup %11726  ;;  %v4106_v32 = vmul.f32 %v4102_v57, %v4090_v1 }
0x167b   :  { %v4101_v21 = vadd.f32 1.0, %v11727_v5  ;;  %v4107_v55 = vmul.f32 %v4103_v60, %v4091_v63 }
0x167c   :  { %v10478_v53 = vpop.f32.mrf.mxu1 }
0x167d   :  { %v4105_v42 = vmul.f32 %v4101_v21, %v4089_v26  ;;  %v4390_v38 = vadd.f32 %v10478_v53, %v9604_v12  ;;  %v4109_v40 = vpack.c.bf16 %v4107_v55, %v4106_v32 }
0x167e   :  { %v4384_v58 = vpop.f32.mrf.mxu1 }
0x167f   :  { %v4385_v0 = vadd.f32 %v9604_v12, %v4384_v58  ;;  %v4408_v48 = vsel %vm663_vm14, %v4390_v38, 0.0  ;;  %v4108_v2 = vpack.c.bf16 %v4105_v42, %v4104_v29 }
0x1680   :  { %4409 = vadd.xlane.f32.xlu0 %v4408_v48  ;;  %v10481_v59 = vpop.f32.mrf.mxu1 }
0x1681   :  { %v4400_v13 = vadd.f32 %v10481_v59, %v9604_v12  ;;  %v4405_v3 = vsel %vm663_vm14, %v4385_v0, 0.0  ;;  %10446 = vmatprep.mubr.bf16.mxu0 %v4108_v2 }
0x1682   :  { %v4394_v44 = vpop.f32.mrf.mxu1  ;;  %4406 = vadd.xlane.f32.xlu1 %v4405_v3  ;;  %10447 = vmatmul.mubr.bf16.vlgmr.msra.gmra.mxu0 %v4109_v40 }
0x1683   :  { %v4395_v11 = vadd.f32 %v9604_v12, %v4394_v44  ;;  %v4414_v25 = vsel %vm663_vm14, %v4400_v13, 0.0  ;;  %4704 = vmatprep.mubr.bf16.mxu0 %v12085_v34 }
0x1685   :  { %v4411_v61 = vsel %vm663_vm14, %v4395_v11, 0.0 }
0x1686   :  { %4412 = vadd.xlane.f32.xlu0 %v4411_v61  ;;  %4415 = vadd.xlane.f32.xlu1 %v4414_v25 }
0x1709   :  { %v4410_v7 = vpop.xlane.xlu0 %4409 }
0x170a   :  { %v4418_v54 = vmul.f32 0.015625, %v4410_v7 }
0x170b   :  { %v4407_v49 = vpop.xlane.xlu1 %4406 }
0x170c   :  { %v13531_v33 = vsub.f32 %v4390_v38, %v4418_v54  ;;  %v4417_v36 = vmul.f32 0.015625, %v4407_v49 }
0x170e   :  { %v13533_v51 = vsub.f32 %v4385_v0, %v4417_v36  ;;  %v4426_v46 = vmul.f32 %v13531_v33, %v13531_v33 }
0x170f   :  { %v4413_v23 = vpop.xlane.xlu0 %4412  ;;  %v4416_v22 = vpop.xlane.xlu1 %4415 }
0x1710   :  { %v4419_v4 = vmul.f32 0.015625, %v4413_v23  ;;  %v4420_v24 = vmul.f32 0.015625, %v4416_v22  ;;  %v4432_v62 = vsel %vm663_vm14, %v4426_v46, 0.0  ;;  %v4425_v14 = vmul.f32 %v13533_v51, %v13533_v51 }
0x1711   :  { %4433 = vadd.xlane.f32.xlu1 %v4432_v62 }
0x1712   :  { %v13540_v52 = vsub.f32 %v4395_v11, %v4419_v4  ;;  %v13542_v50 = vsub.f32 %v4400_v13, %v4420_v24  ;;  %v4429_v9 = vsel %vm663_vm14, %v4425_v14, 0.0  ;;  %v9610_v14 = vld [vmem:[%s15193_s14] ss:$0 sm:$0xff] }
0x1713   :  { %4430 = vadd.xlane.f32.xlu0 %v4429_v9 }
0x1714   :  { %v4427_v15 = vmul.f32 %v13540_v52, %v13540_v52  ;;  %v4428_v56 = vmul.f32 %v13542_v50, %v13542_v50 }
0x1716   :  { %v4435_v37 = vsel %vm663_vm14, %v4427_v15, 0.0  ;;  %v4438_v35 = vsel %vm663_vm14, %v4428_v56, 0.0  ;;  %v9611_v56 = vld [vmem:[%s15194_s19] ss:$0 sm:$0xff] }
0x1717   :  { %4436 = vadd.xlane.f32.xlu0 %v4435_v37  ;;  %4439 = vadd.xlane.f32.xlu1 %v4438_v35 }
0x1742   :  { %v10448_v39 = vpop.f32.mrf.mxu0 }
0x1743   :  { %v4226_v18 = vadd.f32 %v10448_v39, %v9594_v10 }
0x1744   :  { %v4217_v31 = vpop.f32.mrf.mxu0 }
0x1745   :  { %v4234_v16 = vadd.f32 %v4226_v18, %v13452_v41  ;;  %v4218_v45 = vadd.f32 %v9594_v10, %v4217_v31 }
0x1746   :  { %v10449_v28 = vpop.f32.mrf.mxu0 }
0x1747   :  { %v4232_v60 = vadd.f32 %v4218_v45, %v13441_v47  ;;  %v4229_v5 = vadd.f32 %v10449_v28, %v9594_v10  ;;  %v4247_v8 = vmul.f32 %v13558_v19, %v4234_v16  ;;  %v4477_v16 = vld [vmem:[%s15196_s30] sm:$0x1]  ;;  %v4480_v28 = vld [vmem:[%s15195_s24 + $0x1] sm:$0xff] }
0x1748   :  { %v4220_v57 = vpop.f32.mrf.mxu0  ;;  %v4478_v45 = vld [vmem:[%s15195_s24] sm:$0x1] }
0x1749   :  { %v4235_v63 = vadd.f32 %v4229_v5, %v13445_v17  ;;  %v4221_v12 = vadd.f32 %v9594_v10, %v4220_v57  ;;  %v4245_v6 = vmul.f32 %v13558_v19, %v4232_v60  ;;  %v4258_v41 = vsel %vm663_vm14, %v4247_v8, 0.0  ;;  %v4481_v10 = vld [vmem:[%s15195_s24 + $0x9] sm:$0xff] }
0x174b   :  { %v4248_v26 = vmul.f32 0.0, %v4235_v63  ;;  %v4233_v21 = vadd.f32 %v4221_v12, %v13450_v20  ;;  %v4249_v47 = vsel %vm663_vm14, %v4245_v6, 0.0 }
0x174d   :  { %v4259_v1 = vsel %vm663_vm14, %v4248_v26, 0.0  ;;  %v4246_v55 = vmul.f32 0.0, %v4233_v21 }
0x174e   :  { %v4260_v53 = vadd.f32 %v4259_v1, %v4258_v41 }
0x174f   :  { %v4250_v29 = vsel %vm663_vm14, %v4246_v55, 0.0 }
0x1750   :  { %v4261_v42 = vrot.slane %v4260_v53, 4  ;;  %v4251_v38 = vadd.f32 %v4250_v29, %v4249_v47 }
0x1752   :  { %v4262_v32 = vadd.f32 %v4261_v42, %v4260_v53  ;;  %v4252_v17 = vrot.slane %v4251_v38, 4 }
0x1754   :  { %v4263_v58 = vrot.slane %v4262_v32, 2  ;;  %v4253_v0 = vadd.f32 %v4252_v17, %v4251_v38 }
0x1756   :  { %v4264_v48 = vadd.f32 %v4263_v58, %v4262_v32  ;;  %v4254_v2 = vrot.slane %v4253_v0, 2 }
0x1758   :  { %v4265_v40 = vrot.slane %v4264_v48, 1  ;;  %v4255_v20 = vadd.f32 %v4254_v2, %v4253_v0 }
0x175a   :  { %v4256_v59 = vrot.slane %v4255_v20, 1  ;;  %v4266_v13 = vadd.f32 %v4265_v40, %v4264_v48 }
0x175c   :  { %v4257_v3 = vadd.f32 %v4256_v59, %v4255_v20 }
0x175e   :  { %v13570_v44 = vsel %vm9115_vm7, %v4266_v13, %v4257_v3 }
0x179a   :  { %v4434_v11 = vpop.xlane.xlu1 %4433 }
0x179b   :  { %v4442_v25 = vmul.f32 0.015625, %v4434_v11 }
0x179c   :  { %v4431_v61 = vpop.xlane.xlu0 %4430 }
0x179d   :  { %v4446_v7 = vadd.f32 1e-05, %v4442_v25  ;;  %v4441_v54 = vmul.f32 0.015625, %v4431_v61 }
0x179f   :  { %11728 = vrsqrt.f32 %v4446_v7  ;;  %v4445_v49 = vadd.f32 1e-05, %v4441_v54 }
0x17a0   :  { %v4437_v36 = vpop.xlane.xlu0 %4436  ;;  %v4440_v46 = vpop.xlane.xlu1 %4439 }
0x17a1   :  { %11730 = vrsqrt.f32 %v4445_v49  ;;  %v4443_v23 = vmul.f32 0.015625, %v4437_v36  ;;  %v4444_v22 = vmul.f32 0.015625, %v4440_v46 }
0x17a3   :  { %v4447_v4 = vadd.f32 1e-05, %v4443_v23  ;;  %v4448_v24 = vadd.f32 1e-05, %v4444_v22 }
0x17a5   :  { %11732 = vrsqrt.f32 %v4447_v4 }
0x17a6   :  { %11734 = vrsqrt.f32 %v4448_v24 }
0x17ac   :  { %v11729_v62 = vpop.eup %11728 }
0x17ad   :  { %v4454_v9 = vmul.f32 %v11729_v62, %v13531_v33  ;;  %v4479_v33 = vadd.f32 %v4478_v45, %v4477_v16 }
0x17ae   :  { %v11731_v15 = vpop.eup %11730 }
0x17af   :  { %v4453_v37 = vmul.f32 %v11731_v15, %v13533_v51  ;;  %v4464_v35 = vmul.f32 %v9610_v14, %v4454_v9 }
0x17b1   :  { %v4463_v39 = vmul.f32 %v9610_v14, %v4453_v37  ;;  %v4474_v18 = vadd.f32 %v9611_v56, %v4464_v35 }
0x17b2   :  { %v11733_v31 = vpop.eup %11732 }
0x17b3   :  { %v11735_v60 = vpop.eup %11734  ;;  %v4473_v5 = vadd.f32 %v9611_v56, %v4463_v39  ;;  %v4483_v57 = vadd.f32 %v4481_v10, %v4474_v18  ;;  %v4455_v8 = vmul.f32 %v11733_v31, %v13540_v52 }
0x17b4   :  { %v4456_v63 = vmul.f32 %v11735_v60, %v13542_v50 }
0x17b5   :  { %v4482_v12 = vadd.f32 %v4480_v28, %v4473_v5  ;;  %v4465_v6 = vmul.f32 %v9610_v14, %v4455_v8  ;;  %v4491_v21 = vrot.slane %v4483_v57, 7  ;;  %v11478_v5 = vld [vmem:[%s15197_s6 + $0x34] ss:$8 sps:$4 sm:$0xff]   ;;  %v11476_v57 = vld [vmem:[%s15197_s6 + $0x30] ss:$8 sps:$4 sm:$0xff]  }
0x17b6   :  { %v4466_v26 = vmul.f32 %v9610_v14, %v4456_v63  ;;  %4680 = vmatprep.subr.bf16.mxu0 %v11478_v5  ;;  %v11481_v8 = vld [vmem:[%s15197_s6 + $0x24] ss:$8 sps:$4 sm:$0xff]   ;;  %v11479_v63 = vld [vmem:[%s15197_s6 + $0x20] ss:$8 sps:$4 sm:$0xff]  }
0x17b7   :  { %v4490_v51 = vrot.slane %v4482_v12, 7  ;;  %v4475_v41 = vadd.f32 %v9611_v56, %v4465_v6  ;;  %v13593_v42 = vsel %vm750_vm15, %v4491_v21, 0.0  ;;  %4681 = vmatpush1.bf16.msra.mxu0 %v11476_v57  ;;  %v11482_v12 = vld [vmem:[%s15197_s6 + $0x10] ss:$8 sps:$4 sm:$0xff]   ;;  %v11487_v6 = vld [vmem:[%s15197_s6 + $0x4] ss:$8 sps:$4 sm:$0xff]  }
0x17b8   :  { %v4476_v1 = vadd.f32 %v9611_v56, %v4466_v26  ;;  %v4516_v58 = vsel %vm663_vm14, %v13593_v42, 0.0  ;;  %4682 = vmatprep.subr.bf16.mxu0 %v11481_v8  ;;  %v11485_v26 = vld [vmem:[%s15197_s6] ss:$8 sps:$4 sm:$0xff]  }
0x17b9   :  { %v13583_v55 = vsel %vm750_vm15, %v4479_v33, %v4490_v51  ;;  %v13586_v53 = vsel %vm750_vm15, %v4490_v51, %v4491_v21  ;;  %v4484_v47 = vadd.f32 %v4480_v28, %v4475_v41 }
0x17ba   :  { %v4510_v52 = vsel %vm663_vm14, %v13583_v55, 0.0  ;;  %v4513_v50 = vsel %vm663_vm14, %v13586_v53, 0.0  ;;  %v4485_v29 = vadd.f32 %v4481_v10, %v4476_v1 }
0x17bb   :  { %4511 = vadd.xlane.f32.xlu0 %v4510_v52  ;;  %4514 = vadd.xlane.f32.xlu1 %v4513_v50  ;;  %v4493_v38 = vrot.slane %v4484_v47, 7 }
0x17bc   :  { %v4494_v32 = vrot.slane %v4485_v29, 7  ;;  %4683 = vmatpush1.bf16.msra.mxu0 %v11479_v63 }
0x17bd   :  { %v13596_v17 = vsel %vm750_vm15, %v4479_v33, %v4493_v38  ;;  %v11484_v33 = vld [vmem:[%s15197_s6 + $0x14] ss:$8 sps:$4 sm:$0xff]  }
0x17be   :  { %v4519_v0 = vsel %vm663_vm14, %v13596_v17, 0.0  ;;  %v13603_v48 = vsel %vm750_vm15, %v4494_v32, 0.0  ;;  %v13606_v2 = vsel %vm750_vm15, %v4493_v38, %v4494_v32  ;;  %4684 = vmatprep.subr.bf16.mxu0 %v11484_v33 }
0x17bf   :  { %4517 = vadd.xlane.f32.xlu0 %v4516_v58  ;;  %4520 = vadd.xlane.f32.xlu1 %v4519_v0  ;;  %v4525_v40 = vsel %vm663_vm14, %v13603_v48, 0.0  ;;  %v4522_v20 = vsel %vm663_vm14, %v13606_v2, 0.0 }
0x17c0   :  { %4685 = vmatpush1.bf16.msra.mxu0 %v11482_v12 }
0x17c1   :  { %4686 = vmatprep.subr.bf16.mxu0 %v11487_v6 }
0x17c3   :  { %4526 = vadd.xlane.f32.xlu1 %v4525_v40  ;;  %4523 = vadd.xlane.f32.xlu0 %v4522_v20 }
0x17c4   :  { %4687 = vmatpush1.bf16.msra.mxu0 %v11485_v26 }
0x1844   :  { %v4512_v59 = vpop.xlane.xlu0 %4511  ;;  %v4515_v13 = vpop.xlane.xlu1 %4514 }
0x1845   :  { %v4528_v3 = vmul.f32 0.015625, %v4512_v59  ;;  %v4529_v11 = vmul.f32 0.015625, %v4515_v13 }
0x1847   :  { %v13613_v25 = vsub.f32 %v13583_v55, %v4528_v3  ;;  %v13616_v61 = vsub.f32 %v13586_v53, %v4529_v11 }
0x1848   :  { %v4518_v7 = vpop.xlane.xlu0 %4517  ;;  %v4521_v54 = vpop.xlane.xlu1 %4520 }
0x1849   :  { %v4530_v49 = vmul.f32 0.015625, %v4518_v7  ;;  %v4531_v36 = vmul.f32 0.015625, %v4521_v54  ;;  %v4540_v46 = vmul.f32 %v13613_v25, %v13613_v25  ;;  %v4541_v23 = vmul.f32 %v13616_v61, %v13616_v61  ;;  %v9612_v54 = vld [vmem:[%s15198_s20] ss:$0 sm:$0xff] }
0x184b   :  { %v13623_v22 = vsub.f32 %v13593_v42, %v4530_v49  ;;  %v13626_v4 = vsub.f32 %v13596_v17, %v4531_v36  ;;  %v4546_v24 = vsel %vm663_vm14, %v4540_v46, 0.0  ;;  %v4549_v62 = vsel %vm663_vm14, %v4541_v23, 0.0  ;;  %v9613_v23 = vld [vmem:[%s15199_s0] ss:$0 sm:$0xff] }
0x184c   :  { %4547 = vadd.xlane.f32.xlu0 %v4546_v24  ;;  %v4524_v14 = vpop.xlane.xlu0 %4523  ;;  %4550 = vadd.xlane.f32.xlu1 %v4549_v62  ;;  %v4527_v9 = vpop.xlane.xlu1 %4526 }
0x184d   :  { %v4532_v15 = vmul.f32 0.015625, %v4524_v14  ;;  %v4533_v56 = vmul.f32 0.015625, %v4527_v9  ;;  %v4542_v37 = vmul.f32 %v13623_v22, %v13623_v22  ;;  %v4543_v35 = vmul.f32 %v13626_v4, %v13626_v4 }
0x184f   :  { %v13635_v10 = vsub.f32 %v13606_v2, %v4532_v15  ;;  %v13638_v39 = vsub.f32 %v13603_v48, %v4533_v56  ;;  %v4552_v18 = vsel %vm663_vm14, %v4542_v37, 0.0  ;;  %v4555_v31 = vsel %vm663_vm14, %v4543_v35, 0.0 }
0x1850   :  { %4553 = vadd.xlane.f32.xlu0 %v4552_v18  ;;  %4556 = vadd.xlane.f32.xlu1 %v4555_v31 }
0x1851   :  { %v4544_v16 = vmul.f32 %v13635_v10, %v13635_v10  ;;  %v4545_v45 = vmul.f32 %v13638_v39, %v13638_v39 }
0x1853   :  { %v4558_v28 = vsel %vm663_vm14, %v4544_v16, 0.0  ;;  %v4561_v60 = vsel %vm663_vm14, %v4545_v45, 0.0 }
0x1854   :  { %4559 = vadd.xlane.f32.xlu0 %v4558_v28  ;;  %4562 = vadd.xlane.f32.xlu1 %v4561_v60 }
0x18d5   :  { %v4548_v51 = vpop.xlane.xlu0 %4547  ;;  %v4551_v21 = vpop.xlane.xlu1 %4550 }
0x18d6   :  { %v4564_v41 = vmul.f32 0.015625, %v4548_v51  ;;  %v4565_v1 = vmul.f32 0.015625, %v4551_v21 }
0x18d8   :  { %v4570_v47 = vadd.f32 1e-05, %v4564_v41  ;;  %v4571_v52 = vadd.f32 1e-05, %v4565_v1 }
0x18d9   :  { %v4554_v50 = vpop.xlane.xlu0 %4553  ;;  %v4557_v29 = vpop.xlane.xlu1 %4556 }
0x18da   :  { %11736 = vrsqrt.f32 %v4570_v47  ;;  %v4566_v38 = vmul.f32 0.015625, %v4554_v50  ;;  %v4567_v32 = vmul.f32 0.015625, %v4557_v29 }
0x18db   :  { %11738 = vrsqrt.f32 %v4571_v52 }
0x18dc   :  { %v4572_v58 = vadd.f32 1e-05, %v4566_v38  ;;  %v4573_v0 = vadd.f32 1e-05, %v4567_v32 }
0x18dd   :  { %v4560_v40 = vpop.xlane.xlu0 %4559  ;;  %v4563_v20 = vpop.xlane.xlu1 %4562 }
0x18de   :  { %11740 = vrsqrt.f32 %v4572_v58  ;;  %v4568_v59 = vmul.f32 0.015625, %v4560_v40  ;;  %v4569_v13 = vmul.f32 0.015625, %v4563_v20 }
0x18df   :  { %11742 = vrsqrt.f32 %v4573_v0 }
0x18e0   :  { %v4574_v3 = vadd.f32 1e-05, %v4568_v59  ;;  %v4575_v11 = vadd.f32 1e-05, %v4569_v13 }
0x18e2   :  { %11744 = vrsqrt.f32 %v4574_v3 }
0x18e3   :  { %11746 = vrsqrt.f32 %v4575_v11 }
0x18e7   :  { %v11737_v7 = vpop.eup %11736 }
0x18e8   :  { %v11739_v49 = vpop.eup %11738  ;;  %v4582_v36 = vmul.f32 %v11737_v7, %v13613_v25 }
0x18e9   :  { %v4583_v46 = vmul.f32 %v11739_v49, %v13616_v61 }
0x18ea   :  { %v4594_v24 = vmul.f32 %v9612_v54, %v4582_v36 }
0x18eb   :  { %v11741_v62 = vpop.eup %11740  ;;  %v4595_v14 = vmul.f32 %v9612_v54, %v4583_v46 }
0x18ec   :  { %v11743_v9 = vpop.eup %11742  ;;  %v4606_v15 = vadd.f32 %v9613_v23, %v4594_v24  ;;  %v4584_v56 = vmul.f32 %v11741_v62, %v13623_v22 }
0x18ed   :  { %v4607_v37 = vadd.f32 %v9613_v23, %v4595_v14  ;;  %v4585_v35 = vmul.f32 %v11743_v9, %v13626_v4 }
0x18ee   :  { %v4596_v16 = vmul.f32 %v9612_v54, %v4584_v56 }
0x18ef   :  { %v11745_v18 = vpop.eup %11744  ;;  %v4612_v31 = vpack.c.bf16 %v4607_v37, %v4606_v15  ;;  %v4597_v45 = vmul.f32 %v9612_v54, %v4585_v35 }
0x18f0   :  { %v11747_v28 = vpop.eup %11746  ;;  %v4586_v25 = vmul.f32 %v11745_v18, %v13635_v10  ;;  %v4608_v60 = vadd.f32 %v9613_v23, %v4596_v16 }
0x18f1   :  { %9622 = vmatmul.mubr.msk.bf16.vlgmr.msra.gmra.mxu0 %vm663_vm14, %v4612_v31  ;;  %v4587_v61 = vmul.f32 %v11747_v28, %v13638_v39  ;;  %v4609_v5 = vadd.f32 %v9613_v23, %v4597_v45 }
0x18f2   :  { %4714 = vmatprep.mubr.bf16.mxu0 %v12085_v34  ;;  %v4598_v22 = vmul.f32 %v9612_v54, %v4586_v25 }
0x18f3   :  { %v4613_v57 = vpack.c.bf16 %v4609_v5, %v4608_v60  ;;  %v4599_v8 = vmul.f32 %v9612_v54, %v4587_v61 }
0x18f4   :  { %v4610_v4 = vadd.f32 %v9613_v23, %v4598_v22 }
0x18f5   :  { %v4611_v63 = vadd.f32 %v9613_v23, %v4599_v8 }
0x18f7   :  { %v4614_v33 = vpack.c.bf16 %v4611_v63, %v4610_v4 }
0x18f9   :  { %9623 = vmatmul.mubr.msk.bf16.gmra.mxu0 %vm663_vm14, %v4613_v57 }
0x18fa   :  { %4724 = vmatprep.mubr.bf16.mxu0 %v12085_v34 }
0x1901   :  { %9624 = vmatmul.mubr.msk.bf16.gmra.mxu0 %vm663_vm14, %v4614_v33 }
0x19b1   :  { %v4706_v12 = vpop.f32.mrf.mxu0 }
0x19b3   :  { %v13669_v6 = vpop.f32.mrf.mxu0 }
0x19b5   :  { %v4710_v10 = vpop.f32.mrf.mxu0 }
0x19b6   :  { %v11200_v26 = vpack.i.bf16 %v4710_v10, %v4706_v12  ;;  %v4795_v39 = vpack.c.bf16 %v4710_v10, %v4706_v12 }
0x19b7   :  { %v13671_v51 = vpop.f32.mrf.mxu0 }
0x19b8   :  { %11201 = vrot.lane.b32.xlu1 %v11200_v26, %s12086_s13  ;;  %10486 = vmatprep.mubr.msk.bf16.mxu1 %vm387_vm9, %v4795_v39 }
0x19b9   :  { %v4716_v21 = vpop.f32.mrf.mxu0 }
0x19ba   :  { %4745 = vrot.lane.b32.xlu0 %v4716_v21, %s12086_s13  ;;  %v13692_v32 = vpack.c.bf16 %v4716_v21, %v4716_v21 }
0x19bb   :  { %v13676_v41 = vpop.f32.mrf.mxu0 }
0x19bd   :  { %v4720_v1 = vpop.f32.mrf.mxu0 }
0x19be   :  { %4763 = vrot.lane.b32.xlu0 %v4716_v21, %s12087_s17 }
0x19bf   :  { %v13679_v47 = vpop.f32.mrf.mxu0 }
0x19c1   :  { %v4726_v52 = vpop.f32.mrf.mxu0 }
0x19c2   :  { %11211 = vrot.lane.b32.xlu0 %v11200_v26, %s12087_s17  ;;  %v11205_v38 = vpack.i.bf16 %v4726_v52, %v4720_v1  ;;  %v13701_v0 = vpack.c.bf16 %v4726_v52, %v4720_v1 }
0x19c3   :  { %v13682_v50 = vpop.f32.mrf.mxu0 }
0x19c5   :  { %v4730_v29 = vpop.f32.mrf.mxu0 }
0x19c6   :  { %4781 = vrot.lane.b32.xlu0 %v4716_v21, %s12089_s21  ;;  %4751 = vrot.lane.b32.xlu1 %v4730_v29, %s12086_s13  ;;  %v13697_v58 = vpack.c.bf16 %v4730_v29, %v4730_v29 }
0x19c7   :  { %v13750_v1 = vpop.f32.mrf.mxu0 }
0x19c8   :  { %v11235_v52 = vpack.i.bf16 %v13750_v1, %v13671_v51 }
0x19ca   :  { %11221 = vrot.lane.b32.xlu0 %v11200_v26, %s12089_s21  ;;  %11206 = vrot.lane.b32.xlu1 %v11205_v38, %s12086_s13  ;;  %v11230_v26 = vpack.i.bf16 %v13669_v6, %v13676_v41 }
0x19ce   :  { %4787 = vrot.lane.b32.xlu0 %v4730_v29, %s12089_s21  ;;  %4769 = vrot.lane.b32.xlu1 %v4730_v29, %s12087_s17 }
0x19d2   :  { %11226 = vrot.lane.b32.xlu0 %v11205_v38, %s12089_s21  ;;  %11216 = vrot.lane.b32.xlu1 %v11205_v38, %s12087_s17 }
0x19d6   :  { %4891 = vrot.lane.b32.xlu1 %v13692_v32, %s12090_s25 }
0x19da   :  { %4889 = vrot.lane.b32.xlu1 %v4795_v39, %s12090_s25 }
0x19de   :  { %4957 = vrot.lane.b32.xlu1 %v13697_v58, %s12090_s25 }
0x19e2   :  { %4955 = vrot.lane.b32.xlu1 %v13701_v0, %s12090_s25 }
0x1a2a   :  { %v11202_v40 = vpop.permute.xlu1 %11201 }
0x1a2b   :  { %v11204_v20 = vunpack.i.h.bf16 %v11202_v40  ;;  %v11203_v59 = vunpack.i.l.bf16 %v11202_v40  ;;  %v13763_v40 = vpack.i.bf16 %v13682_v50, %v13679_v47 }
0x1a2c   :  { %v4746_v13 = vpop.permute.xlu0 %4745 }
0x1a2d   :  { %v4799_v3 = vpack.c.bf16 %v11204_v20, %v11203_v59  ;;  %v13705_v11 = vpack.c.bf16 %v4746_v13, %v4746_v13 }
0x1a2f   :  { %10502 = vmatprep.mubr.msk.bf16.mxu0 %vm387_vm9, %v4799_v3  ;;  %5023 = vrot.lane.b32.xlu0 %v13705_v11, %s12090_s25 }
0x1a30   :  { %v4764_v7 = vpop.permute.xlu0 %4763 }
0x1a31   :  { %v13711_v49 = vpack.c.bf16 %v4764_v7, %v4764_v7 }
0x1a33   :  { %5021 = vrot.lane.b32.xlu0 %v4799_v3, %s12090_s25 }
0x1a34   :  { %v11212_v54 = vpop.permute.xlu0 %11211 }
0x1a35   :  { %v11214_v36 = vunpack.i.h.bf16 %v11212_v54  ;;  %v11213_v46 = vunpack.i.l.bf16 %v11212_v54 }
0x1a37   :  { %5155 = vrot.lane.b32.xlu0 %v13711_v49, %s12090_s25  ;;  %v13715_v62 = vpack.c.bf16 %v11214_v36, %v11213_v46 }
0x1a38   :  { %v4782_v23 = vpop.permute.xlu0 %4781  ;;  %v4752_v24 = vpop.permute.xlu1 %4751 }
0x1a39   :  { %v13717_v14 = vpack.c.bf16 %v4752_v24, %v4752_v24  ;;  %v13723_v9 = vpack.c.bf16 %v4782_v23, %v4782_v23 }
0x1a3b   :  { %5153 = vrot.lane.b32.xlu0 %v13715_v62, %s12090_s25  ;;  %5089 = vrot.lane.b32.xlu1 %v13717_v14, %s12090_s25 }
0x1a3c   :  { %v11222_v15 = vpop.permute.xlu0 %11221  ;;  %v11207_v56 = vpop.permute.xlu1 %11206 }
0x1a3d   :  { %v11224_v37 = vunpack.i.h.bf16 %v11222_v15  ;;  %v11223_v35 = vunpack.i.l.bf16 %v11222_v15  ;;  %v11209_v18 = vunpack.i.h.bf16 %v11207_v56  ;;  %v11208_v31 = vunpack.i.l.bf16 %v11207_v56 }
0x1a3f   :  { %v4801_v16 = vpack.c.bf16 %v11209_v18, %v11208_v31  ;;  %5287 = vrot.lane.b32.xlu0 %v13723_v9, %s12090_s25  ;;  %v13727_v25 = vpack.c.bf16 %v11224_v37, %v11223_v35 }
0x1a40   :  { %v4788_v45 = vpop.permute.xlu0 %4787  ;;  %v4770_v28 = vpop.permute.xlu1 %4769 }
0x1a41   :  { %5087 = vrot.lane.b32.xlu1 %v4801_v16, %s12090_s25  ;;  %v13730_v61 = vpack.c.bf16 %v4770_v28, %v4770_v28  ;;  %v13748_v39 = vpack.c.bf16 %v4788_v45, %v4788_v45  ;;  %v4872_v28 = vpack.c.bf16 %v13676_v41, %v13676_v41 }
0x1a43   :  { %5285 = vrot.lane.b32.xlu0 %v13727_v25, %s12090_s25 }
0x1a44   :  { %v11227_v60 = vpop.permute.xlu0 %11226  ;;  %v11217_v5 = vpop.permute.xlu1 %11216 }
0x1a45   :  { %v11229_v57 = vunpack.i.h.bf16 %v11227_v60  ;;  %v11228_v22 = vunpack.i.l.bf16 %v11227_v60  ;;  %v11219_v8 = vunpack.i.h.bf16 %v11217_v5  ;;  %v11218_v4 = vunpack.i.l.bf16 %v11217_v5  ;;  %5221 = vrot.lane.b32.xlu1 %v13730_v61, %s12090_s25 }
0x1a47   :  { %v13736_v63 = vpack.c.bf16 %v11229_v57, %v11228_v22  ;;  %v13738_v33 = vpack.c.bf16 %v11219_v8, %v11218_v4  ;;  %v4871_v57 = vpack.c.bf16 %v13671_v51, %v13669_v6  ;;  %v13834_v8 = vpack.c.bf16 %v13750_v1, %v13750_v1 }
0x1a48   :  { %v4892_v12 = vpop.permute.xlu1 %4891 }
0x1a49   :  { %5351 = vrot.lane.b32.xlu0 %v13736_v63, %s12090_s25  ;;  %10884 = vmatprep.subr.msk.bf16.mxu1 %vm387_vm9, %v4892_v12  ;;  %v4903_v10 = vsel %vm387_vm9, %v4892_v12, 0 }
0x1a4a   :  { %5219 = vrot.lane.b32.xlu1 %v13738_v33, %s12090_s25  ;;  %10483 = vmatpush3.bf16.xpose.msra.mxu1 %v4903_v10 }
0x1a4c   :  { %v4890_v21 = vpop.permute.xlu1 %4889 }
0x1a4d   :  { %11231 = vrot.lane.b32.xlu0 %v11230_v26, %s12086_s13  ;;  %10885 = vmatprep.subr.msk.bf16.mxu1 %vm387_vm9, %v4890_v21  ;;  %v4900_v29 = vsel %vm387_vm9, %v4890_v21, 0 }
0x1a4e   :  { %5353 = vrot.lane.b32.xlu1 %v13748_v39, %s12090_s25 }
0x1a50   :  { %v4958_v38 = vpop.permute.xlu1 %4957 }
0x1a51   :  { %11241 = vrot.lane.b32.xlu0 %v11230_v26, %s12087_s17  ;;  %v4969_v20 = vsel %vm387_vm9, %v4958_v38, 0 }
0x1a52   :  { %11236 = vrot.lane.b32.xlu1 %v11235_v52, %s12086_s13  ;;  %10485 = vmatpush3.bf16.xpose.msra.mxu1 %v4900_v29 }
0x1a53   :  { %10886 = vmatprep.subr.msk.bf16.mxu1 %vm387_vm9, %v4958_v38 }
0x1a54   :  { %v4956_v59 = vpop.permute.xlu1 %4955 }
0x1a55   :  { %11246 = vrot.lane.b32.xlu0 %v13763_v40, %s12086_s13  ;;  %v4966_v13 = vsel %vm387_vm9, %v4956_v59, 0 }
0x1a56   :  { %4837 = vrot.lane.b32.xlu1 %v13671_v51, %s12087_s17 }
0x1a59   :  { %4857 = vrot.lane.b32.xlu0 %v13676_v41, %s12089_s21  ;;  %10487 = vmatmul.mubr.msk.bf16.vlgmr.msra.gmra.mxu1 %vm387_vm9, %v13692_v32  ;;  %v5751_v41 = vsel %vm245_vm0, %v4872_v28, 0 }
0x1a5a   :  { %4845 = vrot.lane.b32.xlu1 %v13750_v1, %s12087_s17  ;;  %10491 = vmatpush3.bf16.xpose.msra.mxu1 %v4969_v20 }
0x1a5b   :  { %10494 = vmatprep.mubr.msk.bf16.mxu1 %vm387_vm9, %v13701_v0  ;;  %10887 = vmatprep.subr.msk.bf16.mxu1 %vm387_vm9, %v4956_v59 }
0x1a62   :  { %10493 = vmatpush3.bf16.xpose.msra.mxu1 %v4966_v13 }
0x1a69   :  { %10495 = vmatmul.mubr.msk.bf16.vlgmr.msra.gmra.mxu1 %vm387_vm9, %v13697_v58 }
0x1a6a   :  { %10510 = vmatprep.mubr.msk.bf16.mxu1 %vm387_vm9, %v4801_v16 }
0x1aa1   :  { %v5024_v32 = vpop.permute.xlu0 %5023 }
0x1aa2   :  { %10888 = vmatprep.subr.msk.bf16.mxu0 %vm387_vm9, %v5024_v32  ;;  %v5035_v3 = vsel %vm387_vm9, %v5024_v32, 0 }
0x1aa3   :  { %10499 = vmatpush3.bf16.xpose.msra.mxu0 %v5035_v3 }
0x1aa5   :  { %v5022_v7 = vpop.permute.xlu0 %5021 }
0x1aa6   :  { %10889 = vmatprep.subr.msk.bf16.mxu0 %vm387_vm9, %v5022_v7  ;;  %v5032_v0 = vsel %vm387_vm9, %v5022_v7, 0 }
0x1aa9   :  { %v5156_v54 = vpop.permute.xlu0 %5155 }
0x1aaa   :  { %v5167_v46 = vsel %vm387_vm9, %v5156_v54, 0 }
0x1aab   :  { %10501 = vmatpush3.bf16.xpose.msra.mxu0 %v5032_v0 }
0x1aac   :  { %10892 = vmatprep.subr.msk.bf16.mxu0 %vm387_vm9, %v5156_v54 }
0x1aad   :  { %v5090_v36 = vpop.permute.xlu1 %5089  ;;  %v5154_v23 = vpop.permute.xlu0 %5153 }
0x1aae   :  { %10890 = vmatprep.subr.msk.bf16.mxu1 %vm387_vm9, %v5090_v36  ;;  %v5101_v58 = vsel %vm387_vm9, %v5090_v36, 0 }
0x1aaf   :  { %10507 = vmatpush3.bf16.xpose.msra.mxu1 %v5101_v58 }
0x1ab1   :  { %v5288_v37 = vpop.permute.xlu0 %5287 }
0x1ab2   :  { %10503 = vmatmul.mubr.msk.bf16.vlgmr.msra.gmra.mxu0 %vm387_vm9, %v13705_v11  ;;  %v5164_v11 = vsel %vm387_vm9, %v5154_v23, 0  ;;  %v5299_v18 = vsel %vm387_vm9, %v5288_v37, 0 }
0x1ab3   :  { %10515 = vmatpush3.bf16.xpose.msra.mxu0 %v5167_v46  ;;  %10518 = vmatprep.mubr.msk.bf16.mxu0 %vm387_vm9, %v13715_v62  ;;  %v5088_v24 = vpop.permute.xlu1 %5087 }
0x1ab4   :  { %10891 = vmatprep.subr.msk.bf16.mxu1 %vm387_vm9, %v5088_v24  ;;  %10893 = vmatprep.subr.msk.bf16.mxu0 %vm387_vm9, %v5154_v23  ;;  %v5098_v15 = vsel %vm387_vm9, %v5088_v24, 0 }
0x1ab5   :  { %v5286_v31 = vpop.permute.xlu0 %5285 }
0x1ab7   :  { %10509 = vmatpush3.bf16.xpose.msra.mxu1 %v5098_v15  ;;  %v5222_v56 = vpop.permute.xlu1 %5221 }
0x1ab8   :  { %10894 = vmatprep.subr.msk.bf16.mxu1 %vm387_vm9, %v5222_v56  ;;  %v5233_v62 = vsel %vm387_vm9, %v5222_v56, 0 }
0x1abb   :  { %10517 = vmatpush3.bf16.xpose.msra.mxu0 %v5164_v11  ;;  %v5352_v45 = vpop.permute.xlu0 %5351 }
0x1abc   :  { %10896 = vmatprep.subr.msk.bf16.mxu0 %vm387_vm9, %v5288_v37  ;;  %v5220_v35 = vpop.permute.xlu1 %5219  ;;  %v5362_v22 = vsel %vm387_vm9, %v5352_v45, 0 }
0x1abe   :  { %10511 = vmatmul.mubr.msk.bf16.vlgmr.msra.gmra.mxu1 %vm387_vm9, %v13717_v14  ;;  %v5230_v14 = vsel %vm387_vm9, %v5220_v35, 0 }
0x1abf   :  { %10523 = vmatpush3.bf16.xpose.msra.mxu1 %v5233_v62  ;;  %10526 = vmatprep.mubr.msk.bf16.mxu1 %vm387_vm9, %v13738_v33  ;;  %v11232_v60 = vpop.permute.xlu0 %11231 }
0x1ac0   :  { %10895 = vmatprep.subr.msk.bf16.mxu1 %vm387_vm9, %v5220_v35  ;;  %v5354_v16 = vpop.permute.xlu1 %5353  ;;  %v11233_v5 = vunpack.i.l.bf16 %v11232_v60  ;;  %v11234_v33 = vunpack.i.h.bf16 %v11232_v60 }
0x1ac2   :  { %10519 = vmatmul.mubr.msk.bf16.vlgmr.msra.gmra.mxu0 %vm387_vm9, %v13711_v49  ;;  %v5296_v49 = vsel %vm387_vm9, %v5286_v31, 0 }
0x1ac3   :  { %10531 = vmatpush3.bf16.xpose.msra.mxu0 %v5299_v18  ;;  %10534 = vmatprep.mubr.msk.bf16.mxu0 %vm387_vm9, %v13727_v25  ;;  %v5365_v25 = vsel %vm387_vm9, %v5354_v16, 0 }
0x1ac4   :  { %10897 = vmatprep.subr.msk.bf16.mxu0 %vm387_vm9, %v5286_v31  ;;  %v13836_v4 = vpop.permute.xlu1 %11236 }
0x1ac7   :  { %10525 = vmatpush3.bf16.xpose.msra.mxu1 %v5230_v14 }
0x1ac8   :  { %10898 = vmatprep.subr.msk.bf16.mxu1 %vm387_vm9, %v5354_v16 }
0x1acb   :  { %10533 = vmatpush3.bf16.xpose.msra.mxu0 %v5296_v49 }
0x1acc   :  { %10900 = vmatprep.subr.msk.bf16.mxu0 %vm245_vm0, %v4872_v28 }
0x1ace   :  { %10527 = vmatmul.mubr.msk.bf16.vlgmr.msra.gmra.mxu1 %vm387_vm9, %v13730_v61  ;;  %v4876_v61 = vpack.c.bf16 %v11233_v5, %v11233_v5 }
0x1acf   :  { %10539 = vmatpush3.bf16.xpose.msra.mxu1 %v5365_v25  ;;  %10542 = vmatprep.mubr.msk.bf16.mxu1 %vm387_vm9, %v13736_v63  ;;  %v13842_v63 = vpop.permute.xlu0 %11241 }
0x1ad0   :  { %10899 = vmatprep.subr.msk.bf16.mxu1 %vm387_vm9, %v5352_v45  ;;  %v11243_v12 = vunpack.i.l.bf16 %v13842_v63  ;;  %v5865_v10 = vsel %vm245_vm0, %v4876_v61, 0 }
0x1ad2   :  { %10535 = vmatmul.mubr.msk.bf16.vlgmr.msra.gmra.mxu0 %vm387_vm9, %v13723_v9  ;;  %v11238_v9 = vunpack.i.l.bf16 %v13836_v4  ;;  %v13848_v21 = vpack.c.bf16 %v11243_v12, %v11243_v12 }
0x1ad3   :  { %10547 = vmatpush3.bf16.msra.mxu0 %v5751_v41 }
0x1ad4   :  { %10548 = vmatprep.subr.bf16.mxu0 %v4871_v57  ;;  %v4875_v26 = vpack.c.bf16 %v11238_v9, %v11234_v33 }
0x1ad7   :  { %10541 = vmatpush3.bf16.xpose.msra.mxu1 %v5362_v22  ;;  %10549 = vmatpush3.bf16.msra.mxu0 %v4871_v57 }
0x1ad8   :  { %10901 = vmatprep.subr.msk.bf16.mxu0 %vm245_vm0, %v13834_v8  ;;  %10902 = vmatprep.subr.msk.bf16.mxu1 %vm245_vm0, %v4876_v61 }
0x1ade   :  { %10543 = vmatmul.mubr.msk.bf16.vlgmr.msra.gmra.mxu1 %vm387_vm9, %v13748_v39 }
0x1adf   :  { %10563 = vmatpush3.bf16.msra.mxu1 %v5865_v10 }
0x1ae0   :  { %10564 = vmatprep.subr.bf16.mxu1 %v4875_v26 }
0x1ae3   :  { %10565 = vmatpush3.bf16.msra.mxu1 %v4875_v26 }
0x1ae4   :  { %10904 = vmatprep.subr.msk.bf16.mxu1 %vm245_vm0, %v13848_v21 }
0x1b19   :  { %v10488_v52 = vpop.f32.mrf.mxu1 }
0x1b1a   :  { %v5417_v29 = vmul.f32 0.25, %v10488_v52 }
0x1b1b   :  { %v4939_v38 = vpop.f32.mrf.mxu1 }
0x1b1c   :  { %v13853_v20 = vadd.f32 %v5417_v29, %v12714_v27  ;;  %v5415_v59 = vmul.f32 0.25, %v4939_v38 }
0x1b1d   :  { %v10489_v39 = vpop.f32.mrf.mxu1 }
0x1b1e   :  { %v13856_v13 = vadd.f32 %v5415_v59, %v12714_v27  ;;  %v5470_v32 = vsel %vm5463_vm8, %v13853_v20, -inf }
0x1b1f   :  { %5471 = vmax.xlane.f32.xlu0 %v5470_v32  ;;  %v4942_v3 = vpop.f32.mrf.mxu1 }
0x1b20   :  { %v5416_v7 = vmul.f32 0.25, %v4942_v3  ;;  %v5464_v0 = vsel %vm5463_vm8, %v13856_v13, -inf }
0x1b21   :  { %5465 = vmax.xlane.f32.xlu1 %v5464_v0 }
0x1b22   :  { %v13863_v54 = vadd.f32 %v5416_v7, %v12714_v27 }
0x1b24   :  { %v5467_v36 = vsel %vm5463_vm8, %v13863_v54, -inf }
0x1b25   :  { %5468 = vmax.xlane.f32.xlu0 %v5467_v36 }
0x1b29   :  { %v10496_v58 = vpop.f32.mrf.mxu1 }
0x1b2a   :  { %v5420_v46 = vmul.f32 0.25, %v10496_v58 }
0x1b2b   :  { %v5005_v23 = vpop.f32.mrf.mxu1 }
0x1b2c   :  { %v13868_v24 = vadd.f32 %v5420_v46, %v12714_v27  ;;  %v5418_v15 = vmul.f32 0.25, %v5005_v23 }
0x1b2d   :  { %v10497_v56 = vpop.f32.mrf.mxu1 }
0x1b2e   :  { %v13871_v11 = vadd.f32 %v5418_v15, %v12714_v27  ;;  %v5479_v37 = vsel %vm5463_vm8, %v13868_v24, -inf }
0x1b2f   :  { %5480 = vmax.xlane.f32.xlu0 %v5479_v37  ;;  %v5008_v62 = vpop.f32.mrf.mxu1 }
0x1b30   :  { %v5419_v35 = vmul.f32 0.25, %v5008_v62  ;;  %v5473_v31 = vsel %vm5463_vm8, %v13871_v11, -inf }
0x1b32   :  { %v13876_v18 = vadd.f32 %v5419_v35, %v12714_v27 }
0x1b33   :  { %5474 = vmax.xlane.f32.xlu0 %v5473_v31 }
0x1b34   :  { %v5476_v14 = vsel %vm5463_vm8, %v13876_v18, -inf }
0x1b35   :  { %5477 = vmax.xlane.f32.xlu1 %v5476_v14 }
0x1b72   :  { %v10504_v16 = vpop.f32.mrf.mxu0 }
0x1b73   :  { %v5423_v45 = vmul.f32 0.25, %v10504_v16 }
0x1b74   :  { %v5071_v28 = vpop.f32.mrf.mxu0 }
0x1b75   :  { %v13883_v49 = vadd.f32 %v5423_v45, %v12714_v27  ;;  %v5421_v25 = vmul.f32 0.25, %v5071_v28 }
0x1b76   :  { %v10505_v60 = vpop.f32.mrf.mxu0 }
0x1b77   :  { %v13886_v5 = vadd.f32 %v5421_v25, %v12714_v27  ;;  %v5488_v41 = vsel %vm5463_vm8, %v13883_v49, -inf }
0x1b78   :  { %5489 = vmax.xlane.f32.xlu1 %v5488_v41  ;;  %v5074_v57 = vpop.f32.mrf.mxu0 }
0x1b79   :  { %v5422_v61 = vmul.f32 0.25, %v5074_v57  ;;  %v5482_v9 = vsel %vm5463_vm8, %v13886_v5, -inf }
0x1b7b   :  { %v13891_v22 = vadd.f32 %v5422_v61, %v12714_v27 }
0x1b7c   :  { %5483 = vmax.xlane.f32.xlu1 %v5482_v9 }
0x1b7d   :  { %v5485_v33 = vsel %vm5463_vm8, %v13891_v22, -inf }
0x1b7e   :  { %v10512_v12 = vpop.f32.mrf.mxu1  ;;  %5486 = vmax.xlane.f32.xlu0 %v5485_v33 }
0x1b7f   :  { %v5426_v10 = vmul.f32 0.25, %v10512_v12 }
0x1b80   :  { %v5137_v26 = vpop.f32.mrf.mxu1 }
0x1b81   :  { %v13898_v52 = vadd.f32 %v5426_v10, %v12714_v27  ;;  %v5424_v29 = vmul.f32 0.25, %v5137_v26 }
0x1b82   :  { %v10513_v38 = vpop.f32.mrf.mxu1  ;;  %v10520_v59 = vpop.f32.mrf.mxu0 }
0x1b83   :  { %v13901_v39 = vadd.f32 %v5424_v29, %v12714_v27  ;;  %v5429_v32 = vmul.f32 0.25, %v10520_v59  ;;  %v5497_v3 = vsel %vm5463_vm8, %v13898_v52, -inf }
0x1b84   :  { %v5140_v7 = vpop.f32.mrf.mxu1  ;;  %5498 = vmax.xlane.f32.xlu0 %v5497_v3  ;;  %v5203_v0 = vpop.f32.mrf.mxu0 }
0x1b85   :  { %v13906_v36 = vadd.f32 %v5429_v32, %v12714_v27  ;;  %v5427_v58 = vmul.f32 0.25, %v5203_v0  ;;  %v5425_v23 = vmul.f32 0.25, %v5140_v7  ;;  %v5491_v56 = vsel %vm5463_vm8, %v13901_v39, -inf }
0x1b86   :  { %v10521_v46 = vpop.f32.mrf.mxu0 }
0x1b87   :  { %v13909_v15 = vadd.f32 %v5427_v58, %v12714_v27  ;;  %v5506_v37 = vsel %vm5463_vm8, %v13906_v36, -inf  ;;  %v13916_v31 = vadd.f32 %v5425_v23, %v12714_v27 }
0x1b88   :  { %5492 = vmax.xlane.f32.xlu0 %v5491_v56  ;;  %5507 = vmax.xlane.f32.xlu1 %v5506_v37  ;;  %v5206_v62 = vpop.f32.mrf.mxu0 }
0x1b89   :  { %v5428_v35 = vmul.f32 0.25, %v5206_v62  ;;  %v5500_v16 = vsel %vm5463_vm8, %v13909_v15, -inf  ;;  %v5494_v60 = vsel %vm5463_vm8, %v13916_v31, -inf }
0x1b8b   :  { %v13919_v14 = vadd.f32 %v5428_v35, %v12714_v27 }
0x1b8c   :  { %5501 = vmax.xlane.f32.xlu1 %v5500_v16 }
0x1b8d   :  { %v5503_v45 = vsel %vm5463_vm8, %v13919_v14, -inf }
0x1b8e   :  { %v10528_v28 = vpop.f32.mrf.mxu1  ;;  %5504 = vmax.xlane.f32.xlu0 %v5503_v45  ;;  %v13955_v45 = vpop.permute.xlu0 %11246 }
0x1b8f   :  { %v5432_v25 = vmul.f32 0.25, %v10528_v28 }
0x1b90   :  { %v5269_v41 = vpop.f32.mrf.mxu1  ;;  %5495 = vmax.xlane.f32.xlu1 %v5494_v60 }
0x1b91   :  { %v13928_v57 = vadd.f32 %v5432_v25, %v12714_v27  ;;  %v5430_v61 = vmul.f32 0.25, %v5269_v41  ;;  %v13959_v41 = vpop.permute.xlu1 %4837 }
0x1b92   :  { %v10529_v9 = vpop.f32.mrf.mxu1  ;;  %v10536_v33 = vpop.f32.mrf.mxu0 }
0x1b93   :  { %v13931_v12 = vadd.f32 %v5430_v61, %v12714_v27  ;;  %v5435_v10 = vmul.f32 0.25, %v10536_v33  ;;  %v5515_v26 = vsel %vm5463_vm8, %v13928_v57, -inf }
0x1b94   :  { %v5272_v29 = vpop.f32.mrf.mxu1  ;;  %5516 = vmax.xlane.f32.xlu0 %v5515_v26  ;;  %v5335_v38 = vpop.f32.mrf.mxu0 }
0x1b95   :  { %v13936_v59 = vadd.f32 %v5435_v10, %v12714_v27  ;;  %v5433_v32 = vmul.f32 0.25, %v5335_v38  ;;  %v5431_v7 = vmul.f32 0.25, %v5272_v29  ;;  %v5509_v58 = vsel %vm5463_vm8, %v13931_v12, -inf  ;;  %v13969_v38 = vpop.permute.xlu0 %4857 }
0x1b96   :  { %v10537_v3 = vpop.f32.mrf.mxu0 }
0x1b97   :  { %v13939_v0 = vadd.f32 %v5433_v32, %v12714_v27  ;;  %v5524_v46 = vsel %vm5463_vm8, %v13936_v59, -inf  ;;  %v13946_v37 = vadd.f32 %v5431_v7, %v12714_v27  ;;  %v13971_v32 = vpop.permute.xlu1 %4845 }
0x1b98   :  { %5510 = vmax.xlane.f32.xlu0 %v5509_v58  ;;  %5525 = vmax.xlane.f32.xlu1 %v5524_v46  ;;  %v5338_v23 = vpop.f32.mrf.mxu0 }
0x1b99   :  { %v5434_v56 = vmul.f32 0.25, %v5338_v23  ;;  %v5518_v35 = vsel %vm5463_vm8, %v13939_v0, -inf  ;;  %v5512_v60 = vsel %vm5463_vm8, %v13946_v37, -inf }
0x1b9b   :  { %v13949_v62 = vadd.f32 %v5434_v56, %v12714_v27 }
0x1b9c   :  { %5519 = vmax.xlane.f32.xlu1 %v5518_v35 }
0x1b9d   :  { %v5521_v16 = vsel %vm5463_vm8, %v13949_v62, -inf }
0x1b9e   :  { %v10544_v28 = vpop.f32.mrf.mxu1  ;;  %5522 = vmax.xlane.f32.xlu0 %v5521_v16 }
0x1b9f   :  { %v5438_v25 = vmul.f32 0.25, %v10544_v28 }
0x1ba0   :  { %v5401_v61 = vpop.f32.mrf.mxu1  ;;  %5513 = vmax.xlane.f32.xlu1 %v5512_v60 }
0x1ba1   :  { %v13962_v9 = vadd.f32 %v5438_v25, %v12714_v27  ;;  %v5436_v33 = vmul.f32 0.25, %v5401_v61 }
0x1ba2   :  { %v10545_v10 = vpop.f32.mrf.mxu1 }
0x1ba3   :  { %v13965_v26 = vadd.f32 %v5436_v33, %v12714_v27  ;;  %v5533_v29 = vsel %vm5463_vm8, %v13962_v9, -inf }
0x1ba4   :  { %5534 = vmax.xlane.f32.xlu1 %v5533_v29  ;;  %v5404_v60 = vpop.f32.mrf.mxu1 }
0x1ba5   :  { %v5527_v3 = vsel %vm5463_vm8, %v13965_v26, -inf  ;;  %v5437_v33 = vmul.f32 0.25, %v5404_v60 }
0x1ba8   :  { %v5472_v7 = vpop.xlane.xlu0 %5471  ;;  %5528 = vmax.xlane.f32.xlu1 %v5527_v3 }
0x1ba9   :  { %v5538_v58 = vsub.f32 %v13853_v20, %v5472_v7 }
0x1baa   :  { %v5466_v46 = vpop.xlane.xlu1 %5465 }
0x1bab   :  { %v5564_v23 = vmul.f32 1.442695, %v5538_v58  ;;  %v5536_v56 = vsub.f32 %v13856_v13, %v5466_v46  ;;  %v13985_v13 = vadd.f32 %v5437_v33, %v12714_v27  ;;  %v11250_v58 = vpack.i.bf16 %v13671_v51, %v13669_v6 }
0x1bad   :  { %11748 = vpow2.f32 %v5564_v23  ;;  %v5560_v35 = vmul.f32 1.442695, %v5536_v56  ;;  %v5530_v7 = vsel %vm5463_vm8, %v13985_v13, -inf }
0x1bae   :  { %v5469_v16 = vpop.xlane.xlu0 %5468 }
0x1baf   :  { %11750 = vpow2.f32 %v5560_v35  ;;  %v5537_v28 = vsub.f32 %v13863_v54, %v5469_v16 }
0x1bb1   :  { %v5562_v25 = vmul.f32 1.442695, %v5537_v28 }
0x1bb3   :  { %11752 = vpow2.f32 %v5562_v25 }
0x1bb8   :  { %v5481_v46 = vpop.xlane.xlu0 %5480 }
0x1bb9   :  { %v5541_v35 = vsub.f32 %v13868_v24, %v5481_v46 }
0x1bba   :  { %v13978_v61 = vpop.eup %11748 }
0x1bbb   :  { %v5614_v10 = vsel %vm5463_vm8, %v13978_v61, 0.0  ;;  %v5570_v25 = vmul.f32 1.442695, %v5541_v35 }
0x1bbc   :  { %v13982_v20 = vpop.eup %11750  ;;  %5615 = vadd.xlane.f32.xlu0 %v5614_v10  ;;  %v5475_v16 = vpop.xlane.xlu0 %5474 }
0x1bbd   :  { %v5608_v29 = vsel %vm5463_vm8, %v13982_v20, 0.0  ;;  %v5539_v60 = vsub.f32 %v13871_v11, %v5475_v16 }
0x1bbe   :  { %v5478_v23 = vpop.xlane.xlu1 %5477 }
0x1bbf   :  { %v5540_v56 = vsub.f32 %v13876_v18, %v5478_v23  ;;  %v5566_v33 = vmul.f32 1.442695, %v5539_v60 }
0x1bc0   :  { %v13989_v3 = vpop.eup %11752  ;;  %5609 = vadd.xlane.f32.xlu0 %v5608_v29 }
0x1bc1   :  { %v5611_v54 = vsel %vm5463_vm8, %v13989_v3, 0.0  ;;  %v5568_v28 = vmul.f32 1.442695, %v5540_v56 }
0x1bc2   :  { %5612 = vadd.xlane.f32.xlu1 %v5611_v54 }
0x1bc3   :  { %11754 = vpow2.f32 %v5568_v28 }
0x1bc4   :  { %5531 = vmax.xlane.f32.xlu0 %v5530_v7  ;;  %11756 = vpow2.f32 %v5570_v25 }
0x1bc5   :  { %11758 = vpow2.f32 %v5566_v33 }
0x1bd0   :  { %v14003_v10 = vpop.eup %11754 }
0x1bd1   :  { %v14005_v6 = vpop.eup %11756  ;;  %v5620_v51 = vsel %vm5463_vm8, %v14003_v10, 0.0 }
0x1bd2   :  { %v5623_v24 = vsel %vm5463_vm8, %v14005_v6, 0.0  ;;  %v14011_v18 = vpop.eup %11758 }
0x1bd3   :  { %11256 = vrot.lane.b32.xlu1 %v13763_v40, %s12087_s17  ;;  %v5617_v11 = vsel %vm5463_vm8, %v14011_v18, 0.0 }
0x1bda   :  { %11251 = vrot.lane.b32.xlu0 %v11250_v58, %s12089_s21 }
0x1bf7   :  { %5621 = vadd.xlane.f32.xlu1 %v5620_v51 }
0x1bf9   :  { %5624 = vadd.xlane.f32.xlu0 %v5623_v24 }
0x1bfd   :  { %5618 = vadd.xlane.f32.xlu0 %v5617_v11 }
0x1c01   :  { %v5490_v29 = vpop.xlane.xlu1 %5489 }
0x1c02   :  { %v5544_v54 = vsub.f32 %v13883_v49, %v5490_v29 }
0x1c04   :  { %v5576_v7 = vmul.f32 1.442695, %v5544_v54 }
0x1c05   :  { %v5484_v58 = vpop.xlane.xlu1 %5483 }
0x1c06   :  { %11760 = vpow2.f32 %v5576_v7  ;;  %v5542_v46 = vsub.f32 %v13886_v5, %v5484_v58 }
0x1c07   :  { %v5487_v23 = vpop.xlane.xlu0 %5486 }
0x1c08   :  { %v5572_v56 = vmul.f32 1.442695, %v5542_v46  ;;  %v5543_v35 = vsub.f32 %v13891_v22, %v5487_v23 }
0x1c0a   :  { %11762 = vpow2.f32 %v5572_v56  ;;  %v5574_v16 = vmul.f32 1.442695, %v5543_v35 }
0x1c0c   :  { %11764 = vpow2.f32 %v5574_v16 }
0x1c0d   :  { %v5499_v28 = vpop.xlane.xlu0 %5498 }
0x1c0e   :  { %v5547_v25 = vsub.f32 %v13898_v52, %v5499_v28 }
0x1c10   :  { %v5582_v60 = vmul.f32 1.442695, %v5547_v25 }
0x1c11   :  { %v5493_v33 = vpop.xlane.xlu0 %5492  ;;  %v5508_v51 = vpop.xlane.xlu1 %5507 }
0x1c12   :  { %11766 = vpow2.f32 %v5582_v60  ;;  %v5545_v49 = vsub.f32 %v13901_v39, %v5493_v33  ;;  %v5550_v24 = vsub.f32 %v13906_v36, %v5508_v51 }
0x1c13   :  { %v14021_v11 = vpop.eup %11760 }
0x1c14   :  { %v5578_v5 = vmul.f32 1.442695, %v5545_v49  ;;  %v5588_v29 = vmul.f32 1.442695, %v5550_v24  ;;  %v5632_v22 = vsel %vm5463_vm8, %v14021_v11, 0.0 }
0x1c15   :  { %v5502_v54 = vpop.xlane.xlu1 %5501  ;;  %5633 = vadd.xlane.f32.xlu1 %v5632_v22 }
0x1c16   :  { %11768 = vpow2.f32 %v5578_v5  ;;  %v5548_v52 = vsub.f32 %v13909_v15, %v5502_v54 }
0x1c17   :  { %v14026_v7 = vpop.eup %11762  ;;  %11770 = vpow2.f32 %v5588_v29  ;;  %v5505_v58 = vpop.xlane.xlu0 %5504 }
0x1c18   :  { %v5584_v46 = vmul.f32 1.442695, %v5548_v52  ;;  %v5549_v39 = vsub.f32 %v13919_v14, %v5505_v58  ;;  %v5626_v36 = vsel %vm5463_vm8, %v14026_v7, 0.0 }
0x1c19   :  { %v14031_v23 = vpop.eup %11764  ;;  %v5496_v56 = vpop.xlane.xlu1 %5495  ;;  %5627 = vadd.xlane.f32.xlu1 %v5626_v36 }
0x1c1a   :  { %11772 = vpow2.f32 %v5584_v46  ;;  %v5586_v35 = vmul.f32 1.442695, %v5549_v39  ;;  %v5546_v16 = vsub.f32 %v13916_v31, %v5496_v56  ;;  %v5629_v15 = vsel %vm5463_vm8, %v14031_v23, 0.0 }
0x1c1b   :  { %5630 = vadd.xlane.f32.xlu0 %v5629_v15 }
0x1c1c   :  { %11774 = vpow2.f32 %v5586_v35  ;;  %v5580_v28 = vmul.f32 1.442695, %v5546_v16 }
0x1c1d   :  { %v5517_v25 = vpop.xlane.xlu0 %5516 }
0x1c1e   :  { %11776 = vpow2.f32 %v5580_v28  ;;  %v5553_v14 = vsub.f32 %v13928_v57, %v5517_v25 }
0x1c1f   :  { %v14037_v60 = vpop.eup %11766 }
0x1c20   :  { %v5594_v33 = vmul.f32 1.442695, %v5553_v14  ;;  %v5641_v51 = vsel %vm5463_vm8, %v14037_v60, 0.0 }
0x1c21   :  { %v5511_v49 = vpop.xlane.xlu0 %5510  ;;  %v5526_v24 = vpop.xlane.xlu1 %5525  ;;  %5642 = vadd.xlane.f32.xlu0 %v5641_v51 }
0x1c22   :  { %11778 = vpow2.f32 %v5594_v33  ;;  %v5551_v31 = vsub.f32 %v13931_v12, %v5511_v49  ;;  %v5556_v5 = vsub.f32 %v13936_v59, %v5526_v24 }
0x1c23   :  { %v14043_v29 = vpop.eup %11768 }
0x1c24   :  { %v14045_v22 = vpop.eup %11770  ;;  %v5590_v54 = vmul.f32 1.442695, %v5551_v31  ;;  %v5600_v57 = vmul.f32 1.442695, %v5556_v5  ;;  %v5635_v52 = vsel %vm5463_vm8, %v14043_v29, 0.0 }
0x1c25   :  { %v5650_v58 = vsel %vm5463_vm8, %v14045_v22, 0.0  ;;  %v5520_v46 = vpop.xlane.xlu1 %5519  ;;  %5636 = vadd.xlane.f32.xlu0 %v5635_v52 }
0x1c26   :  { %11780 = vpow2.f32 %v5590_v54  ;;  %5651 = vadd.xlane.f32.xlu1 %v5650_v58  ;;  %v5554_v12 = vsub.f32 %v13939_v0, %v5520_v46 }
0x1c27   :  { %v14052_v39 = vpop.eup %11772  ;;  %11782 = vpow2.f32 %v5600_v57  ;;  %v5523_v59 = vpop.xlane.xlu0 %5522 }
0x1c28   :  { %v5596_v36 = vmul.f32 1.442695, %v5554_v12  ;;  %v5555_v56 = vsub.f32 %v13949_v62, %v5523_v59  ;;  %v5644_v35 = vsel %vm5463_vm8, %v14052_v39, 0.0 }
0x1c29   :  { %v14057_v16 = vpop.eup %11774  ;;  %v5514_v15 = vpop.xlane.xlu1 %5513 }
0x1c2a   :  { %11784 = vpow2.f32 %v5596_v36  ;;  %v5598_v28 = vmul.f32 1.442695, %v5555_v56  ;;  %5645 = vadd.xlane.f32.xlu1 %v5644_v35  ;;  %v5552_v25 = vsub.f32 %v13946_v37, %v5514_v15  ;;  %v5647_v0 = vsel %vm5463_vm8, %v14057_v16, 0.0 }
0x1c2b   :  { %v14062_v14 = vpop.eup %11776  ;;  %5648 = vadd.xlane.f32.xlu0 %v5647_v0 }
0x1c2c   :  { %11786 = vpow2.f32 %v5598_v28  ;;  %v5592_v33 = vmul.f32 1.442695, %v5552_v25  ;;  %v5638_v62 = vsel %vm5463_vm8, %v14062_v14, 0.0 }
0x1c2d   :  { %v5535_v51 = vpop.xlane.xlu1 %5534 }
0x1c2e   :  { %11788 = vpow2.f32 %v5592_v33  ;;  %5639 = vadd.xlane.f32.xlu1 %v5638_v62  ;;  %v5559_v49 = vsub.f32 %v13962_v9, %v5535_v51 }
0x1c2f   :  { %v14067_v24 = vpop.eup %11778 }
0x1c30   :  { %v5606_v31 = vmul.f32 1.442695, %v5559_v49  ;;  %v5659_v37 = vsel %vm5463_vm8, %v14067_v24, 0.0 }
0x1c31   :  { %v5529_v5 = vpop.xlane.xlu1 %5528 }
0x1c32   :  { %11790 = vpow2.f32 %v5606_v31  ;;  %5660 = vadd.xlane.f32.xlu1 %v5659_v37  ;;  %v5557_v54 = vsub.f32 %v13965_v26, %v5529_v5 }
0x1c33   :  { %v14072_v57 = vpop.eup %11780 }
0x1c34   :  { %v14074_v52 = vpop.eup %11782  ;;  %v5602_v58 = vmul.f32 1.442695, %v5557_v54  ;;  %v5653_v46 = vsel %vm5463_vm8, %v14072_v57, 0.0 }
0x1c35   :  { %v5668_v9 = vsel %vm5463_vm8, %v14074_v52, 0.0  ;;  %5654 = vadd.xlane.f32.xlu0 %v5653_v46 }
0x1c36   :  { %11792 = vpow2.f32 %v5602_v58  ;;  %5669 = vadd.xlane.f32.xlu1 %v5668_v9 }
0x1c37   :  { %v14080_v12 = vpop.eup %11784 }
0x1c38   :  { %v5662_v59 = vsel %vm5463_vm8, %v14080_v12, 0.0 }
0x1c39   :  { %v14084_v26 = vpop.eup %11786 }
0x1c3a   :  { %5663 = vadd.xlane.f32.xlu1 %v5662_v59  ;;  %v5665_v36 = vsel %vm5463_vm8, %v14084_v26, 0.0 }
0x1c3b   :  { %v14088_v56 = vpop.eup %11788  ;;  %5666 = vadd.xlane.f32.xlu0 %v5665_v36 }
0x1c3c   :  { %v5656_v35 = vsel %vm5463_vm8, %v14088_v56, 0.0 }
0x1c3e   :  { %5657 = vadd.xlane.f32.xlu1 %v5656_v35 }
0x1c3f   :  { %v14092_v15 = vpop.eup %11790 }
0x1c40   :  { %v5677_v28 = vsel %vm5463_vm8, %v14092_v15, 0.0 }
0x1c42   :  { %5678 = vadd.xlane.f32.xlu1 %v5677_v28 }
0x1c43   :  { %v14096_v25 = vpop.eup %11792 }
0x1c44   :  { %v5671_v0 = vsel %vm5463_vm8, %v14096_v25, 0.0 }
0x1c45   :  { %5672 = vadd.xlane.f32.xlu0 %v5671_v0  ;;  %v5616_v33 = vpop.xlane.xlu0 %5615 }
0x1c46   :  { %11794 = vrcp.f32 %v5616_v33 }
0x1c49   :  { %v5610_v62 = vpop.xlane.xlu0 %5609 }
0x1c4a   :  { %11796 = vrcp.f32 %v5610_v62 }
0x1c4b   :  { %v5613_v51 = vpop.xlane.xlu1 %5612 }
0x1c4c   :  { %11798 = vrcp.f32 %v5613_v51 }
0x1c4d   :  { %v5532_v49 = vpop.xlane.xlu0 %5531 }
0x1c4e   :  { %v5558_v31 = vsub.f32 %v13985_v13, %v5532_v49  ;;  %v11239_v13 = vunpack.i.h.bf16 %v13836_v4 }
0x1c4f   :  { %v14120_v4 = vpop.permute.xlu1 %11256 }
0x1c50   :  { %v5604_v37 = vmul.f32 1.442695, %v5558_v31 }
0x1c51   :  { %v14122_v0 = vpop.permute.xlu0 %11251 }
0x1c52   :  { %11800 = vpow2.f32 %v5604_v37 }
0x1c53   :  { %v11795_v5 = vpop.eup %11794 }
0x1c54   :  { %v5706_v46 = vmul.f32 %v11795_v5, %v13978_v61  ;;  %v5808_v61 = vsel %vm245_vm0, %v13834_v8, 0  ;;  %v11248_v5 = vunpack.i.l.bf16 %v13955_v45 }
0x1c56   :  { %v5729_v35 = vpack.c.bf16 %v5706_v46, %v5706_v46 }
0x1c57   :  { %v11797_v54 = vpop.eup %11796 }
0x1c58   :  { %v5704_v9 = vmul.f32 %v11797_v54, %v13982_v20  ;;  %v4873_v20 = vpack.c.bf16 %v13682_v50, %v13679_v47 }
0x1c59   :  { %v11799_v58 = vpop.eup %11798 }
0x1c5a   :  { %v5705_v59 = vmul.f32 %v11799_v58, %v13989_v3  ;;  %v4878_v3 = vpack.c.bf16 %v11239_v13, %v11239_v13 }
0x1c5b   :  { %4863 = vrot.lane.b32.xlu0 %v13750_v1, %s12089_s21 }
0x1c5c   :  { %v5728_v36 = vpack.c.bf16 %v5705_v59, %v5704_v9  ;;  %v5922_v46 = vsel %vm245_vm0, %v4878_v3, 0 }
0x1c5e   :  { %10550 = vmatprep.mubr.msk.bf16.mxu0 %vm5463_vm8, %v5728_v36 }
0x1c5f   :  { %v14107_v28 = vpop.eup %11800  ;;  %10551 = vmatmul.mubr.msk.bf16.vlgmr.msra.gmra.mxu0 %vm5463_vm8, %v5729_v35 }
0x1c60   :  { %10555 = vmatpush3.bf16.msra.mxu0 %v5808_v61  ;;  %v5674_v1 = vsel %vm5463_vm8, %v14107_v28, 0.0 }
0x1c61   :  { %10556 = vmatprep.subr.bf16.mxu0 %v4873_v20  ;;  %5675 = vadd.xlane.f32.xlu1 %v5674_v1 }
0x1c64   :  { %10557 = vmatpush3.bf16.msra.mxu0 %v4873_v20 }
0x1c65   :  { %10903 = vmatprep.subr.msk.bf16.mxu0 %vm245_vm0, %v4878_v3 }
0x1c72   :  { %11261 = vrot.lane.b32.xlu1 %v13763_v40, %s12089_s21  ;;  %v11249_v40 = vunpack.i.h.bf16 %v13955_v45 }
0x1c74   :  { %v4877_v9 = vpack.c.bf16 %v11249_v40, %v11248_v5 }
0x1c80   :  { %v5622_v8 = vpop.xlane.xlu1 %5621 }
0x1c82   :  { %v5625_v33 = vpop.xlane.xlu0 %5624 }
0x1c83   :  { %11802 = vrcp.f32 %v5625_v33 }
0x1c84   :  { %11804 = vrcp.f32 %v5622_v8 }
0x1c86   :  { %v5619_v47 = vpop.xlane.xlu0 %5618 }
0x1c87   :  { %11806 = vrcp.f32 %v5619_v47 }
0x1c90   :  { %v11803_v50 = vpop.eup %11802 }
0x1c91   :  { %v11805_v62 = vpop.eup %11804  ;;  %v5709_v49 = vmul.f32 %v11803_v50, %v14005_v6  ;;  %v14134_v6 = vpack.c.bf16 %v13971_v32, %v13971_v32  ;;  %v11244_v50 = vunpack.i.h.bf16 %v13842_v63 }
0x1c92   :  { %v5708_v37 = vmul.f32 %v11805_v62, %v14003_v10 }
0x1c93   :  { %v5731_v58 = vpack.c.bf16 %v5709_v49, %v5709_v49  ;;  %v4879_v49 = vpack.c.bf16 %v13959_v41, %v11244_v50 }
0x1c94   :  { %v11807_v51 = vpop.eup %11806 }
0x1c95   :  { %v5707_v31 = vmul.f32 %v11807_v51, %v14011_v18 }
0x1c97   :  { %v5730_v54 = vpack.c.bf16 %v5708_v37, %v5707_v31 }
0x1c99   :  { %10558 = vmatprep.mubr.msk.bf16.mxu0 %vm5463_vm8, %v5730_v54 }
0x1c9a   :  { %10559 = vmatmul.mubr.msk.bf16.vlgmr.msra.gmra.mxu0 %vm5463_vm8, %v5731_v58 }
0x1c9b   :  { %10571 = vmatpush3.bf16.msra.mxu0 %v5922_v46 }
0x1c9c   :  { %10572 = vmatprep.subr.bf16.mxu0 %v4877_v9 }
0x1c9e   :  { %v5634_v10 = vpop.xlane.xlu1 %5633 }
0x1c9f   :  { %10573 = vmatpush3.bf16.msra.mxu0 %v4877_v9  ;;  %11808 = vrcp.f32 %v5634_v10  ;;  %v11253_v10 = vunpack.i.l.bf16 %v14122_v0 }
0x1ca0   :  { %10905 = vmatprep.subr.msk.bf16.mxu0 %vm245_vm0, %v14134_v6 }
0x1ca2   :  { %v5628_v45 = vpop.xlane.xlu1 %5627 }
0x1ca3   :  { %11810 = vrcp.f32 %v5628_v45 }
0x1ca4   :  { %v5631_v18 = vpop.xlane.xlu0 %5630 }
0x1ca5   :  { %11812 = vrcp.f32 %v5631_v18 }
0x1caa   :  { %v5643_v59 = vpop.xlane.xlu0 %5642 }
0x1cac   :  { %v11809_v36 = vpop.eup %11808 }
0x1cad   :  { %v5712_v32 = vmul.f32 %v11809_v36, %v14021_v11  ;;  %v5979_v11 = vsel %vm245_vm0, %v13848_v21, 0 }
0x1cae   :  { %v5637_v61 = vpop.xlane.xlu0 %5636 }
0x1caf   :  { %v5652_v35 = vpop.xlane.xlu1 %5651  ;;  %v5733_v62 = vpack.c.bf16 %v5712_v32, %v5712_v32 }
0x1cb0   :  { %v11811_v13 = vpop.eup %11810  ;;  %11814 = vrcp.f32 %v5652_v35 }
0x1cb1   :  { %11816 = vrcp.f32 %v5643_v59  ;;  %v5710_v3 = vmul.f32 %v11811_v13, %v14026_v7 }
0x1cb2   :  { %v11813_v20 = vpop.eup %11812 }
0x1cb3   :  { %v5646_v1 = vpop.xlane.xlu1 %5645  ;;  %v5711_v8 = vmul.f32 %v11813_v20, %v14031_v23  ;;  %v4884_v23 = vpack.c.bf16 %v13969_v38, %v13969_v38  ;;  %v11254_v38 = vunpack.i.h.bf16 %v14122_v0 }
0x1cb4   :  { %11818 = vrcp.f32 %v5646_v1  ;;  %v5649_v33 = vpop.xlane.xlu0 %5648 }
0x1cb5   :  { %11820 = vrcp.f32 %v5649_v33  ;;  %v5732_v47 = vpack.c.bf16 %v5711_v8, %v5710_v3  ;;  %v4883_v20 = vpack.c.bf16 %v11254_v38, %v11253_v10 }
0x1cb6   :  { %11822 = vrcp.f32 %v5637_v61 }
0x1cb7   :  { %v5640_v51 = vpop.xlane.xlu1 %5639  ;;  %10566 = vmatprep.mubr.msk.bf16.mxu1 %vm5463_vm8, %v5732_v47 }
0x1cb8   :  { %11824 = vrcp.f32 %v5640_v51  ;;  %10567 = vmatmul.mubr.msk.bf16.vlgmr.msra.gmra.mxu1 %vm5463_vm8, %v5733_v62 }
0x1cb9   :  { %10579 = vmatpush3.bf16.msra.mxu1 %v5979_v11 }
0x1cba   :  { %10580 = vmatprep.subr.bf16.mxu1 %v4879_v49 }
0x1cbb   :  { %v5661_v7 = vpop.xlane.xlu1 %5660 }
0x1cbd   :  { %10581 = vmatpush3.bf16.msra.mxu1 %v4879_v49  ;;  %v11815_v63 = vpop.eup %11814 }
0x1cbe   :  { %10906 = vmatprep.subr.msk.bf16.mxu1 %vm245_vm0, %v4884_v23  ;;  %v11817_v37 = vpop.eup %11816  ;;  %v5655_v40 = vpop.xlane.xlu0 %5654  ;;  %v5718_v54 = vmul.f32 %v11815_v63, %v14045_v22 }
0x1cbf   :  { %v5670_v31 = vpop.xlane.xlu1 %5669  ;;  %v5715_v59 = vmul.f32 %v11817_v37, %v14037_v60  ;;  %v6093_v60 = vsel %vm245_vm0, %v4884_v23, 0 }
0x1cc0   :  { %11826 = vrcp.f32 %v5670_v31  ;;  %v5737_v22 = vpack.c.bf16 %v5718_v54, %v5718_v54 }
0x1cc1   :  { %v11819_v41 = vpop.eup %11818  ;;  %11828 = vrcp.f32 %v5661_v7  ;;  %v5735_v32 = vpack.c.bf16 %v5715_v59, %v5715_v59 }
0x1cc2   :  { %v11821_v5 = vpop.eup %11820  ;;  %v5716_v46 = vmul.f32 %v11819_v41, %v14052_v39  ;;  %v11259_v39 = vunpack.i.h.bf16 %v14120_v4 }
0x1cc3   :  { %v11823_v58 = vpop.eup %11822  ;;  %v5664_v21 = vpop.xlane.xlu1 %5663  ;;  %v5717_v9 = vmul.f32 %v11821_v5, %v14057_v16  ;;  %v11258_v16 = vunpack.i.l.bf16 %v14120_v4 }
0x1cc4   :  { %11830 = vrcp.f32 %v5664_v21  ;;  %v5667_v45 = vpop.xlane.xlu0 %5666  ;;  %v5713_v35 = vmul.f32 %v11823_v58, %v14043_v29  ;;  %v6036_v29 = vsel %vm245_vm0, %v14134_v6, 0 }
0x1cc5   :  { %v11825_v18 = vpop.eup %11824  ;;  %11832 = vrcp.f32 %v5667_v45  ;;  %v5736_v36 = vpack.c.bf16 %v5717_v9, %v5716_v46 }
0x1cc6   :  { %11834 = vrcp.f32 %v5655_v40  ;;  %v5714_v13 = vmul.f32 %v11825_v18, %v14062_v14  ;;  %v4881_v14 = vpack.c.bf16 %v11259_v39, %v11258_v16 }
0x1cc7   :  { %v5658_v61 = vpop.xlane.xlu1 %5657  ;;  %10582 = vmatprep.mubr.msk.bf16.mxu1 %vm5463_vm8, %v5736_v36 }
0x1cc8   :  { %11836 = vrcp.f32 %v5658_v61  ;;  %10583 = vmatmul.mubr.msk.bf16.vlgmr.msra.gmra.mxu1 %vm5463_vm8, %v5737_v22  ;;  %v5734_v0 = vpack.c.bf16 %v5714_v13, %v5713_v35 }
0x1cc9   :  { %10595 = vmatpush3.bf16.msra.mxu1 %v6093_v60 }
0x1cca   :  { %10574 = vmatprep.mubr.msk.bf16.mxu0 %vm5463_vm8, %v5734_v0  ;;  %10596 = vmatprep.subr.bf16.mxu1 %v4883_v20 }
0x1ccb   :  { %10575 = vmatmul.mubr.msk.bf16.vlgmr.msra.gmra.mxu0 %vm5463_vm8, %v5735_v32  ;;  %v11488_v32 = vld [vmem:[%s15200_s15 + $0x18] sm:$0xff]  }
0x1ccc   :  { %10587 = vmatpush3.bf16.msra.mxu0 %v6036_v29 }
0x1ccd   :  { %10588 = vmatprep.subr.bf16.mxu0 %v4881_v14  ;;  %10597 = vmatpush3.bf16.msra.mxu1 %v4883_v20  ;;  %v11827_v1 = vpop.eup %11826 }
0x1cce   :  { %v5673_v4 = vpop.xlane.xlu0 %5672  ;;  %10610 = vmatprep.subr.bf16.mxu1 %v12080_v43  ;;  %v11829_v3 = vpop.eup %11828  ;;  %v5724_v47 = vmul.f32 %v11827_v1, %v14074_v52 }
0x1ccf   :  { %v5721_v7 = vmul.f32 %v11829_v3, %v14067_v24 }
0x1cd0   :  { %10589 = vmatpush3.bf16.msra.mxu0 %v4881_v14  ;;  %v5741_v63 = vpack.c.bf16 %v5724_v47, %v5724_v47  ;;  %v11490_v47 = vld [vmem:[%s15200_s15 + $0x8] sm:$0xff]  }
0x1cd1   :  { %v11831_v8 = vpop.eup %11830  ;;  %v5739_v40 = vpack.c.bf16 %v5721_v7, %v5721_v7 }
0x1cd2   :  { %v11833_v33 = vpop.eup %11832  ;;  %v4864_v50 = vpop.permute.xlu0 %4863  ;;  %v5722_v49 = vmul.f32 %v11831_v8, %v14080_v12 }
0x1cd3   :  { %v11835_v62 = vpop.eup %11834  ;;  %v4886_v51 = vpack.c.bf16 %v4864_v50, %v4864_v50  ;;  %v5723_v6 = vmul.f32 %v11833_v33, %v14084_v26  ;;  %v5679_v12 = vpop.xlane.xlu1 %5678 }
0x1cd4   :  { %v5719_v31 = vmul.f32 %v11835_v62, %v14072_v57  ;;  %11838 = vrcp.f32 %v5679_v12  ;;  %v11491_v62 = vld [vmem:[%s15200_s15] sm:$0xff]  }
0x1cd5   :  { %v11837_v11 = vpop.eup %11836  ;;  %10907 = vmatprep.subr.msk.bf16.mxu0 %vm245_vm0, %v4886_v51  ;;  %v5740_v23 = vpack.c.bf16 %v5723_v6, %v5722_v49  ;;  %v6150_v24 = vsel %vm245_vm0, %v4886_v51, 0  ;;  %11840 = vrcp.f32 %v5673_v4  ;;  %v11489_v4 = vld [vmem:[%s15200_s15 + $0x10] sm:$0xff]  }
0x1cd6   :  { %v5720_v37 = vmul.f32 %v11837_v11, %v14088_v56 }
0x1cd7   :  { %10598 = vmatprep.mubr.msk.bf16.mxu1 %vm5463_vm8, %v5740_v23 }
0x1cd8   :  { %10599 = vmatmul.mubr.msk.bf16.vlgmr.msra.gmra.mxu1 %vm5463_vm8, %v5741_v63  ;;  %v5738_v52 = vpack.c.bf16 %v5720_v37, %v5719_v31 }
0x1cd9   :  { %10618 = vmatprep.mubr.msk.bf16.mxu1 %vm12088_vm1, %v12080_v43  ;;  %10611 = vmatpush3.bf16.msra.mxu1 %v11488_v32 }
0x1cda   :  { %10590 = vmatprep.mubr.msk.bf16.mxu0 %vm5463_vm8, %v5738_v52  ;;  %10612 = vmatprep.subr.bf16.mxu1 %v12080_v43 }
0x1cdb   :  { %10591 = vmatmul.mubr.msk.bf16.vlgmr.msra.gmra.mxu0 %vm5463_vm8, %v5739_v40 }
0x1cdc   :  { %10603 = vmatpush3.bf16.msra.mxu0 %v6150_v24 }
0x1cdd   :  { %10613 = vmatpush3.bf16.msra.mxu1 %v11489_v4 }
0x1cde   :  { %10614 = vmatprep.subr.bf16.mxu1 %v12080_v43 }
0x1ce1   :  { %v11839_v54 = vpop.eup %11838  ;;  %10615 = vmatpush3.bf16.msra.mxu1 %v11490_v47 }
0x1ce2   :  { %v11841_v58 = vpop.eup %11840  ;;  %v5727_v46 = vmul.f32 %v11839_v54, %v14092_v15  ;;  %10616 = vmatprep.subr.bf16.mxu1 %v12080_v43 }
0x1ce3   :  { %v5725_v9 = vmul.f32 %v11841_v58, %v14096_v25 }
0x1ce4   :  { %v5743_v45 = vpack.c.bf16 %v5727_v46, %v5727_v46 }
0x1ce5   :  { %10617 = vmatpush3.bf16.msra.mxu1 %v11491_v62 }
0x1ce6   :  { %10650 = vmatprep.subr.bf16.mxu1 %v12080_v43 }
0x1cea   :  { %v5676_v57 = vpop.xlane.xlu1 %5675 }
0x1ceb   :  { %11842 = vrcp.f32 %v5676_v57 }
0x1cee   :  { %v11262_v26 = vpop.permute.xlu1 %11261 }
0x1cef   :  { %v11264_v56 = vunpack.i.h.bf16 %v11262_v26  ;;  %v11263_v41 = vunpack.i.l.bf16 %v11262_v26 }
0x1cf1   :  { %v4885_v5 = vpack.c.bf16 %v11264_v56, %v11263_v41 }
0x1cf3   :  { %10604 = vmatprep.subr.bf16.mxu0 %v4885_v5 }
0x1cf4   :  { %10605 = vmatpush3.bf16.msra.mxu0 %v4885_v5 }
0x1cf5   :  { %10630 = vmatprep.subr.bf16.mxu0 %v12080_v43 }
0x1cf8   :  { %v11843_v21 = vpop.eup %11842 }
0x1cf9   :  { %v5726_v38 = vmul.f32 %v11843_v21, %v14107_v28 }
0x1cfb   :  { %v5742_v10 = vpack.c.bf16 %v5726_v38, %v5725_v9 }
0x1cfd   :  { %10606 = vmatprep.mubr.msk.bf16.mxu0 %vm5463_vm8, %v5742_v10 }
0x1cfe   :  { %10607 = vmatmul.mubr.msk.bf16.vlgmr.msra.gmra.mxu0 %vm5463_vm8, %v5743_v45 }
0x1cff   :  { %10638 = vmatprep.mubr.msk.bf16.mxu0 %vm12088_vm1, %v12080_v43 }
0x1d1f   :  { %v14190_v18 = vpop.f32.mrf.mxu0 }
0x1d21   :  { %v14192_v59 = vpop.f32.mrf.mxu0 }
0x1d23   :  { %v10553_v36 = vpop.f32.mrf.mxu0 }
0x1d25   :  { %v14194_v15 = vpop.f32.mrf.mxu0 }
0x1d5a   :  { %v14196_v25 = vpop.f32.mrf.mxu0 }
0x1d5c   :  { %v14198_v28 = vpop.f32.mrf.mxu0 }
0x1d5e   :  { %v10561_v22 = vpop.f32.mrf.mxu0 }
0x1d60   :  { %v14201_v0 = vpop.f32.mrf.mxu0 }
0x1d78   :  { %v10568_v35 = vpop.f32.mrf.mxu1 }
0x1d7a   :  { %v5901_v13 = vpop.f32.mrf.mxu1 }
0x1d7c   :  { %v10569_v39 = vpop.f32.mrf.mxu1 }
0x1d7e   :  { %v5904_v16 = vpop.f32.mrf.mxu1 }
0x1d7f   :  { %v11265_v61 = vpack.i.bf16 %v5904_v16, %v5901_v13 }
0x1d81   :  { %11266 = vrot.lane.b32.xlu0 %v11265_v61, %s12082_s26 }
0x1d88   :  { %v10584_v60 = vpop.f32.mrf.mxu1 }
0x1d8a   :  { %v6015_v20 = vpop.f32.mrf.mxu1 }
0x1d8b   :  { %v10576_v29 = vpop.f32.mrf.mxu0 }
0x1d8c   :  { %v10585_v14 = vpop.f32.mrf.mxu1 }
0x1d8d   :  { %v5958_v1 = vpop.f32.mrf.mxu0 }
0x1d8e   :  { %v6018_v3 = vpop.f32.mrf.mxu1  ;;  %v11280_v50 = vpack.i.bf16 %v5958_v1, %v10568_v35 }
0x1d8f   :  { %v10577_v8 = vpop.f32.mrf.mxu0  ;;  %v11270_v33 = vpack.i.bf16 %v6018_v3, %v6015_v20 }
0x1d91   :  { %11271 = vrot.lane.b32.xlu1 %v11270_v33, %s12092_s29  ;;  %v5961_v49 = vpop.f32.mrf.mxu0 }
0x1d92   :  { %v11295_v40 = vpack.i.bf16 %v10576_v29, %v5961_v49 }
0x1d95   :  { %11281 = vrot.lane.b32.xlu1 %v11280_v50, %s12082_s26 }
0x1d98   :  { %v10600_v51 = vpop.f32.mrf.mxu1 }
0x1d9a   :  { %v6129_v6 = vpop.f32.mrf.mxu1 }
0x1d9b   :  { %v10592_v11 = vpop.f32.mrf.mxu0 }
0x1d9c   :  { %v10601_v7 = vpop.f32.mrf.mxu1 }
0x1d9d   :  { %v6072_v23 = vpop.f32.mrf.mxu0 }
0x1d9e   :  { %v6132_v63 = vpop.f32.mrf.mxu1  ;;  %v11285_v52 = vpack.i.bf16 %v6072_v23, %v10584_v60 }
0x1d9f   :  { %v10593_v31 = vpop.f32.mrf.mxu0  ;;  %v11275_v37 = vpack.i.bf16 %v6132_v63, %v6129_v6 }
0x1da1   :  { %11276 = vrot.lane.b32.xlu0 %v11275_v37, %s12093_s3  ;;  %v6075_v24 = vpop.f32.mrf.mxu0 }
0x1da2   :  { %v11300_v5 = vpack.i.bf16 %v10592_v11, %v6075_v24 }
0x1da5   :  { %11286 = vrot.lane.b32.xlu0 %v11285_v52, %s12092_s29 }
0x1da9   :  { %11296 = vrot.lane.b32.xlu0 %v11295_v40, %s12082_s26 }
0x1dbe   :  { %v10608_v12 = vpop.f32.mrf.mxu0 }
0x1dc0   :  { %v6186_v57 = vpop.f32.mrf.mxu0 }
0x1dc1   :  { %v11290_v26 = vpack.i.bf16 %v6186_v57, %v10600_v51 }
0x1dc2   :  { %v10609_v56 = vpop.f32.mrf.mxu0 }
0x1dc3   :  { %11291 = vrot.lane.b32.xlu1 %v11290_v26, %s12093_s3 }
0x1dc4   :  { %v6189_v41 = vpop.f32.mrf.mxu0 }
0x1dc5   :  { %v11305_v54 = vpack.i.bf16 %v10608_v12, %v6189_v41 }
0x1dc7   :  { %11301 = vrot.lane.b32.xlu1 %v11300_v5, %s12092_s29  ;;  %11306 = vrot.lane.b32.xlu0 %v11305_v54, %s12093_s3 }
0x1df3   :  { %v11267_v58 = vpop.permute.xlu0 %11266 }
0x1df4   :  { %v11269_v46 = vunpack.i.h.bf16 %v11267_v58  ;;  %v11268_v9 = vunpack.i.l.bf16 %v11267_v58 }
0x1df6   :  { %v6273_v36 = vsel %vm387_vm9, %v14194_v15, %v11269_v46  ;;  %v6272_v22 = vsel %vm387_vm9, %v14192_v59, %v11268_v9 }
0x1e03   :  { %v11272_v21 = vpop.permute.xlu1 %11271 }
0x1e04   :  { %v11274_v38 = vunpack.i.h.bf16 %v11272_v21  ;;  %v11273_v10 = vunpack.i.l.bf16 %v11272_v21 }
0x1e06   :  { %v6278_v39 = vsel %vm2068_vm4, %v6272_v22, %v11273_v10  ;;  %v6279_v16 = vsel %vm2068_vm4, %v6273_v36, %v11274_v38 }
0x1e07   :  { %v11282_v32 = vpop.permute.xlu1 %11281 }
0x1e08   :  { %v11284_v29 = vunpack.i.h.bf16 %v11282_v32  ;;  %v11283_v59 = vunpack.i.l.bf16 %v11282_v32 }
0x1e0a   :  { %v6275_v8 = vsel %vm387_vm9, %v14198_v28, %v11284_v29  ;;  %v6274_v33 = vsel %vm387_vm9, %v14190_v18, %v11283_v59 }
0x1e13   :  { %v11277_v45 = vpop.permute.xlu0 %11276 }
0x1e14   :  { %v11279_v35 = vunpack.i.h.bf16 %v11277_v45  ;;  %v11278_v13 = vunpack.i.l.bf16 %v11277_v45 }
0x1e16   :  { %v6285_v61 = vsel %vm2073_vm6, %v6279_v16, %v11279_v35  ;;  %v6284_v60 = vsel %vm2073_vm6, %v6278_v39, %v11278_v13 }
0x1e17   :  { %v6290_v20 = vpack.c.bf16 %v6285_v61, %v6284_v60  ;;  %v11287_v15 = vpop.permute.xlu0 %11286 }
0x1e18   :  { %v11289_v14 = vunpack.i.h.bf16 %v11287_v15  ;;  %v11288_v4 = vunpack.i.l.bf16 %v11287_v15 }
0x1e19   :  { %10619 = vmatmul.mubr.msk.bf16.vlgmr.msra.gmra.mxu1 %vm663_vm14, %v6290_v20 }
0x1e1a   :  { %10622 = vmatprep.mubr.msk.bf16.mxu1 %vm12088_vm1, %v12080_v43  ;;  %v6281_v62 = vsel %vm2068_vm4, %v6275_v8, %v11289_v14  ;;  %v6280_v51 = vsel %vm2068_vm4, %v6274_v33, %v11288_v4 }
0x1e1b   :  { %v11297_v1 = vpop.permute.xlu0 %11296 }
0x1e1c   :  { %v11299_v49 = vunpack.i.h.bf16 %v11297_v1  ;;  %v11298_v6 = vunpack.i.l.bf16 %v11297_v1 }
0x1e1e   :  { %v6277_v40 = vsel %vm387_vm9, %v14196_v25, %v11299_v49  ;;  %v6276_v24 = vsel %vm387_vm9, %v14201_v0, %v11298_v6  ;;  %v9664_v0 = vld [vmem:[%s15201_s16] ss:$0 sm:$0xff]  ;;  %v11492_v6 = vld [vmem:[%s15202_s18 + $0x18] sm:$0xff]  }
0x1e1f   :  { %10631 = vmatpush3.bf16.msra.mxu0 %v11492_v6 }
0x1e20   :  { %10632 = vmatprep.subr.bf16.mxu0 %v12080_v43 }
0x1e35   :  { %v11292_v3 = vpop.permute.xlu1 %11291 }
0x1e36   :  { %v11294_v47 = vunpack.i.h.bf16 %v11292_v3  ;;  %v11293_v50 = vunpack.i.l.bf16 %v11292_v3 }
0x1e38   :  { %v6287_v11 = vsel %vm2073_vm6, %v6281_v62, %v11294_v47  ;;  %v6286_v7 = vsel %vm2073_vm6, %v6280_v51, %v11293_v50 }
0x1e39   :  { %v6291_v23 = vpack.c.bf16 %v6287_v11, %v6286_v7  ;;  %v11302_v63 = vpop.permute.xlu1 %11301  ;;  %v11307_v31 = vpop.permute.xlu0 %11306 }
0x1e3a   :  { %v11304_v37 = vunpack.i.h.bf16 %v11302_v63  ;;  %v11303_v28 = vunpack.i.l.bf16 %v11302_v63  ;;  %v11309_v52 = vunpack.i.h.bf16 %v11307_v31  ;;  %v11308_v18 = vunpack.i.l.bf16 %v11307_v31  ;;  %v11493_v63 = vld [vmem:[%s15202_s18 + $0x10] sm:$0xff]  }
0x1e3b   :  { %10623 = vmatmul.mubr.msk.bf16.gmra.mxu1 %vm663_vm14, %v6291_v23  ;;  %10633 = vmatpush3.bf16.msra.mxu0 %v11493_v63 }
0x1e3c   :  { %v6283_v12 = vsel %vm2068_vm4, %v6277_v40, %v11304_v37  ;;  %v6282_v57 = vsel %vm2068_vm4, %v6276_v24, %v11303_v28  ;;  %10626 = vmatprep.mubr.msk.bf16.mxu1 %vm12088_vm1, %v12080_v43  ;;  %10634 = vmatprep.subr.bf16.mxu0 %v12080_v43  ;;  %v11494_v40 = vld [vmem:[%s15202_s18 + $0x8] sm:$0xff]  }
0x1e3d   :  { %v6289_v26 = vsel %vm2073_vm6, %v6283_v12, %v11309_v52  ;;  %v6288_v56 = vsel %vm2073_vm6, %v6282_v57, %v11308_v18 }
0x1e3e   :  { %v6292_v41 = vpack.c.bf16 %v6289_v26, %v6288_v56  ;;  %v11495_v26 = vld [vmem:[%s15202_s18] sm:$0xff]  }
0x1e3f   :  { %10635 = vmatpush3.bf16.msra.mxu0 %v11494_v40 }
0x1e40   :  { %10636 = vmatprep.subr.bf16.mxu0 %v12080_v43 }
0x1e43   :  { %10627 = vmatmul.mubr.msk.bf16.gmra.mxu1 %vm663_vm14, %v6292_v41  ;;  %10637 = vmatpush3.bf16.msra.mxu0 %v11495_v26 }
0x1e44   :  { %10666 = vmatprep.mubr.msk.bf16.mxu1 %vm12088_vm1, %v12080_v43 }
0x1ed9   :  { %v6368_v25 = vpop.f32.mrf.mxu1 }
0x1eda   :  { %v6391_v5 = vadd.f32 %v6368_v25, %v13583_v55 }
0x1edb   :  { %v10620_v54 = vpop.f32.mrf.mxu1 }
0x1edc   :  { %v14254_v58 = vadd.f32 %v9664_v0, %v6391_v5 }
0x1edd   :  { %v6371_v21 = vpop.f32.mrf.mxu1 }
0x1ede   :  { %v6392_v46 = vadd.f32 %v6371_v21, %v13586_v53  ;;  %v6412_v9 = vsel %vm663_vm14, %v14254_v58, 0.0 }
0x1edf   :  { %v10621_v38 = vpop.f32.mrf.mxu1  ;;  %6413 = vadd.xlane.f32.xlu1 %v6412_v9 }
0x1ee0   :  { %v14259_v10 = vadd.f32 %v9664_v0, %v6392_v46  ;;  %v11496_v38 = vld [vmem:[%s15203_s22 + $0x38] sm:$0xff]  }
0x1ee1   :  { %10651 = vmatpush3.bf16.msra.mxu1 %v11496_v38  ;;  %v11501_v38 = vld [vmem:[%s15203_s22 + $0x10] sm:$0xff]  }
0x1ee2   :  { %v6415_v45 = vsel %vm663_vm14, %v14259_v10, 0.0  ;;  %10652 = vmatprep.subr.bf16.mxu1 %v12080_v43 }
0x1ee3   :  { %6416 = vadd.xlane.f32.xlu0 %v6415_v45 }
0x1efb   :  { %v6376_v36 = vpop.f32.mrf.mxu1 }
0x1efc   :  { %v6393_v55 = vadd.f32 %v6376_v36, %v13593_v42 }
0x1efd   :  { %v10624_v22 = vpop.f32.mrf.mxu1 }
0x1efe   :  { %v14264_v35 = vadd.f32 %v9664_v0, %v6393_v55 }
0x1eff   :  { %v6379_v13 = vpop.f32.mrf.mxu1 }
0x1f00   :  { %v6394_v53 = vadd.f32 %v6379_v13, %v13596_v17  ;;  %v6418_v39 = vsel %vm663_vm14, %v14264_v35, 0.0 }
0x1f01   :  { %v10625_v16 = vpop.f32.mrf.mxu1  ;;  %6419 = vadd.xlane.f32.xlu0 %v6418_v39 }
0x1f02   :  { %v14269_v61 = vadd.f32 %v9664_v0, %v6394_v53 }
0x1f03   :  { %v6384_v60 = vpop.f32.mrf.mxu1 }
0x1f04   :  { %v6395_v20 = vadd.f32 %v6384_v60, %v13606_v2  ;;  %v6421_v15 = vsel %vm663_vm14, %v14269_v61, 0.0  ;;  %v9665_v60 = vld [vmem:[%s15204_s23] ss:$0 sm:$0xff] }
0x1f05   :  { %6422 = vadd.xlane.f32.xlu1 %v6421_v15  ;;  %v10628_v42 = vpop.f32.mrf.mxu1 }
0x1f06   :  { %v14274_v32 = vadd.f32 %v9664_v0, %v6395_v20 }
0x1f07   :  { %v6387_v29 = vpop.f32.mrf.mxu1 }
0x1f08   :  { %v6396_v17 = vadd.f32 %v6387_v29, %v13603_v48  ;;  %v6424_v59 = vsel %vm663_vm14, %v14274_v32, 0.0  ;;  %v9666_v29 = vld [vmem:[%s15205_s28] ss:$0 sm:$0xff] }
0x1f09   :  { %6425 = vadd.xlane.f32.xlu0 %v6424_v59  ;;  %v10629_v14 = vpop.f32.mrf.mxu1 }
0x1f0a   :  { %v14279_v4 = vadd.f32 %v9664_v0, %v6396_v17 }
0x1f0c   :  { %v6427_v2 = vsel %vm663_vm14, %v14279_v4, 0.0 }
0x1f0d   :  { %6428 = vadd.xlane.f32.xlu1 %v6427_v2 }
0x1f68   :  { %v6414_v1 = vpop.xlane.xlu1 %6413 }
0x1f69   :  { %v6430_v3 = vmul.f32 0.015625, %v6414_v1 }
0x1f6b   :  { %v6436_v8 = vsub.f32 %v14254_v58, %v6430_v3 }
0x1f6c   :  { %v6417_v33 = vpop.xlane.xlu0 %6416 }
0x1f6d   :  { %v6431_v47 = vmul.f32 0.015625, %v6417_v33  ;;  %v6442_v48 = vmul.f32 %v6436_v8, %v6436_v8 }
0x1f6f   :  { %v6437_v50 = vsub.f32 %v14259_v10, %v6431_v47  ;;  %v6448_v62 = vsel %vm663_vm14, %v6442_v48, 0.0 }
0x1f70   :  { %6449 = vadd.xlane.f32.xlu0 %v6448_v62 }
0x1f71   :  { %v6443_v51 = vmul.f32 %v6437_v50, %v6437_v50 }
0x1f73   :  { %v6451_v49 = vsel %vm663_vm14, %v6443_v51, 0.0 }
0x1f74   :  { %6452 = vadd.xlane.f32.xlu1 %v6451_v49 }
0x1f8a   :  { %v6420_v11 = vpop.xlane.xlu0 %6419 }
0x1f8b   :  { %v6432_v7 = vmul.f32 0.015625, %v6420_v11 }
0x1f8d   :  { %v14290_v23 = vsub.f32 %v14264_v35, %v6432_v7 }
0x1f8e   :  { %v6423_v31 = vpop.xlane.xlu1 %6422 }
0x1f8f   :  { %v6433_v37 = vmul.f32 0.015625, %v6423_v31  ;;  %v6444_v28 = vmul.f32 %v14290_v23, %v14290_v23 }
0x1f91   :  { %v14297_v52 = vsub.f32 %v14269_v61, %v6433_v37  ;;  %v6454_v18 = vsel %vm663_vm14, %v6444_v28, 0.0 }
0x1f92   :  { %6455 = vadd.xlane.f32.xlu0 %v6454_v18  ;;  %v6426_v24 = vpop.xlane.xlu0 %6425 }
0x1f93   :  { %v6434_v12 = vmul.f32 0.015625, %v6426_v24  ;;  %v6445_v57 = vmul.f32 %v14297_v52, %v14297_v52 }
0x1f95   :  { %v6440_v56 = vsub.f32 %v14274_v32, %v6434_v12  ;;  %v6457_v41 = vsel %vm663_vm14, %v6445_v57, 0.0 }
0x1f96   :  { %6458 = vadd.xlane.f32.xlu1 %v6457_v41  ;;  %v6429_v25 = vpop.xlane.xlu1 %6428 }
0x1f97   :  { %v6435_v0 = vmul.f32 0.015625, %v6429_v25  ;;  %v6446_v5 = vmul.f32 %v6440_v56, %v6440_v56 }
0x1f99   :  { %v6441_v54 = vsub.f32 %v14279_v4, %v6435_v0  ;;  %v6460_v21 = vsel %vm663_vm14, %v6446_v5, 0.0 }
0x1f9a   :  { %6461 = vadd.xlane.f32.xlu0 %v6460_v21 }
0x1f9b   :  { %v6447_v46 = vmul.f32 %v6441_v54, %v6441_v54 }
0x1f9d   :  { %v6463_v9 = vsel %vm663_vm14, %v6447_v46, 0.0  ;;  %v11499_v46 = vld [vmem:[%s15203_s22 + $0x20] sm:$0xff]  }
0x1f9e   :  { %6464 = vadd.xlane.f32.xlu1 %v6463_v9  ;;  %v11500_v9 = vld [vmem:[%s15203_s22 + $0x18] sm:$0xff]  }
0x1ff9   :  { %v6450_v45 = vpop.xlane.xlu0 %6449 }
0x1ffa   :  { %v6466_v36 = vmul.f32 0.015625, %v6450_v45  ;;  %v11502_v45 = vld [vmem:[%s15203_s22 + $0x8] sm:$0xff]  }
0x1ffc   :  { %v6472_v55 = vadd.f32 1e-05, %v6466_v36  ;;  %v11503_v36 = vld [vmem:[%s15203_s22] sm:$0xff]  }
0x1ffd   :  { %v6453_v22 = vpop.xlane.xlu1 %6452 }
0x1ffe   :  { %11844 = vrsqrt.f32 %v6472_v55  ;;  %v6467_v13 = vmul.f32 0.015625, %v6453_v22  ;;  %v9667_v55 = vld [vmem:[%s15206_s1] ss:$0 sm:$0xff] }
0x2000   :  { %v6473_v53 = vadd.f32 1e-05, %v6467_v13 }
0x2002   :  { %11846 = vrsqrt.f32 %v6473_v53 }
0x200b   :  { %v11845_v39 = vpop.eup %11844 }
0x200c   :  { %v6484_v16 = vmul.f32 %v11845_v39, %v6436_v8 }
0x200e   :  { %v6496_v15 = vmul.f32 %v9665_v60, %v6484_v16 }
0x200f   :  { %v11847_v20 = vpop.eup %11846 }
0x2010   :  { %v6485_v42 = vmul.f32 %v11847_v20, %v6437_v50  ;;  %v6508_v59 = vadd.f32 %v9666_v29, %v6496_v15 }
0x2012   :  { %v6497_v17 = vmul.f32 %v9665_v60, %v6485_v42 }
0x2014   :  { %v6509_v14 = vadd.f32 %v9666_v29, %v6497_v17 }
0x2016   :  { %v6514_v2 = vpack.c.bf16 %v6509_v14, %v6508_v59 }
0x2018   :  { %10639 = vmatmul.mubr.msk.bf16.vlgmr.msra.gmra.mxu0 %vm663_vm14, %v6514_v2 }
0x2019   :  { %10642 = vmatprep.mubr.msk.bf16.mxu0 %vm12088_vm1, %v12080_v43 }
0x201b   :  { %v6456_v1 = vpop.xlane.xlu0 %6455 }
0x201c   :  { %v6468_v3 = vmul.f32 0.015625, %v6456_v1 }
0x201e   :  { %v6474_v33 = vadd.f32 1e-05, %v6468_v3 }
0x201f   :  { %v6459_v47 = vpop.xlane.xlu1 %6458 }
0x2020   :  { %11848 = vrsqrt.f32 %v6474_v33  ;;  %v6469_v8 = vmul.f32 0.015625, %v6459_v47 }
0x2022   :  { %v6475_v48 = vadd.f32 1e-05, %v6469_v8 }
0x2023   :  { %v6462_v62 = vpop.xlane.xlu0 %6461 }
0x2024   :  { %11850 = vrsqrt.f32 %v6475_v48  ;;  %v6470_v50 = vmul.f32 0.015625, %v6462_v62 }
0x2026   :  { %v6476_v51 = vadd.f32 1e-05, %v6470_v50 }
0x2027   :  { %v6465_v49 = vpop.xlane.xlu1 %6464 }
0x2028   :  { %11852 = vrsqrt.f32 %v6476_v51  ;;  %v6471_v6 = vmul.f32 0.015625, %v6465_v49 }
0x202a   :  { %v6477_v11 = vadd.f32 1e-05, %v6471_v6 }
0x202c   :  { %11854 = vrsqrt.f32 %v6477_v11 }
0x202d   :  { %v11849_v7 = vpop.eup %11848 }
0x202e   :  { %v6486_v63 = vmul.f32 %v11849_v7, %v14290_v23 }
0x2030   :  { %v6498_v28 = vmul.f32 %v9665_v60, %v6486_v63 }
0x2031   :  { %v11851_v31 = vpop.eup %11850 }
0x2032   :  { %v6487_v37 = vmul.f32 %v11851_v31, %v14297_v52  ;;  %v6510_v12 = vadd.f32 %v9666_v29, %v6498_v28 }
0x2034   :  { %v6499_v18 = vmul.f32 %v9665_v60, %v6487_v37 }
0x2035   :  { %v11853_v40 = vpop.eup %11852 }
0x2036   :  { %v6488_v24 = vmul.f32 %v11853_v40, %v6440_v56  ;;  %v6511_v57 = vadd.f32 %v9666_v29, %v6499_v18  ;;  %v11497_v56 = vld [vmem:[%s15203_s22 + $0x30] sm:$0xff]  }
0x2037   :  { %10653 = vmatpush3.bf16.msra.mxu1 %v11497_v56 }
0x2038   :  { %v6515_v26 = vpack.c.bf16 %v6511_v57, %v6510_v12  ;;  %v6500_v0 = vmul.f32 %v9665_v60, %v6488_v24  ;;  %10654 = vmatprep.subr.bf16.mxu1 %v12080_v43 }
0x2039   :  { %v11855_v41 = vpop.eup %11854 }
0x203a   :  { %v6489_v25 = vmul.f32 %v11855_v41, %v6441_v54  ;;  %10643 = vmatmul.mubr.msk.bf16.gmra.mxu0 %vm663_vm14, %v6515_v26  ;;  %v6512_v52 = vadd.f32 %v9666_v29, %v6500_v0  ;;  %v11498_v54 = vld [vmem:[%s15203_s22 + $0x28] sm:$0xff]  }
0x203b   :  { %10646 = vmatprep.mubr.msk.bf16.mxu0 %vm12088_vm1, %v12080_v43  ;;  %10655 = vmatpush3.bf16.msra.mxu1 %v11498_v54 }
0x203c   :  { %v6501_v23 = vmul.f32 %v9665_v60, %v6489_v25  ;;  %10656 = vmatprep.subr.bf16.mxu1 %v12080_v43 }
0x203e   :  { %v6513_v5 = vadd.f32 %v9666_v29, %v6501_v23 }
0x203f   :  { %10657 = vmatpush3.bf16.msra.mxu1 %v11499_v46 }
0x2040   :  { %v6516_v21 = vpack.c.bf16 %v6513_v5, %v6512_v52  ;;  %10658 = vmatprep.subr.bf16.mxu1 %v12080_v43 }
0x2042   :  { %10647 = vmatmul.mubr.msk.bf16.gmra.mxu0 %vm663_vm14, %v6516_v21 }
0x2043   :  { %6988 = vmatprep.mubr.bf16.mxu0 %v12085_v34  ;;  %10659 = vmatpush3.bf16.msra.mxu1 %v11500_v9 }
0x2044   :  { %10660 = vmatprep.subr.bf16.mxu1 %v12080_v43 }
0x2047   :  { %10661 = vmatpush3.bf16.msra.mxu1 %v11501_v38 }
0x2048   :  { %10662 = vmatprep.subr.bf16.mxu1 %v12080_v43 }
0x204b   :  { %10663 = vmatpush3.bf16.msra.mxu1 %v11502_v45 }
0x204c   :  { %10664 = vmatprep.subr.bf16.mxu1 %v12080_v43 }
0x204f   :  { %10665 = vmatpush3.bf16.msra.mxu1 %v11503_v36 }
0x20d8   :  { %v6599_v22 = vpop.f32.mrf.mxu0 }
0x20d9   :  { %v6600_v13 = vadd.f32 %v9667_v55, %v6599_v22 }
0x20da   :  { %v10640_v53 = vpop.f32.mrf.mxu0 }
0x20db   :  { %v6628_v39 = vmul.f32 0.70710677, %v6600_v13  ;;  %v6622_v59 = vmul.f32 0.5, %v6600_v13 }
0x20dc   :  { %v6602_v16 = vpop.f32.mrf.mxu0 }
0x20dd   :  { %11856 = verf.f32 %v6628_v39  ;;  %v6603_v60 = vadd.f32 %v9667_v55, %v6602_v16 }
0x20de   :  { %v10641_v20 = vpop.f32.mrf.mxu0 }
0x20df   :  { %v6629_v15 = vmul.f32 0.70710677, %v6603_v60  ;;  %v6623_v14 = vmul.f32 0.5, %v6603_v60 }
0x20e1   :  { %11858 = verf.f32 %v6629_v15 }
0x20ea   :  { %v11857_v42 = vpop.eup %11856 }
0x20eb   :  { %v6640_v29 = vadd.f32 1.0, %v11857_v42 }
0x20ed   :  { %v6646_v1 = vmul.f32 %v6640_v29, %v6622_v59 }
0x20ee   :  { %v11859_v17 = vpop.eup %11858 }
0x20ef   :  { %v6641_v2 = vadd.f32 1.0, %v11859_v17 }
0x20f1   :  { %v6647_v3 = vmul.f32 %v6641_v2, %v6623_v14 }
0x20f3   :  { %v6652_v33 = vpack.c.bf16 %v6647_v3, %v6646_v1 }
0x20f5   :  { %10667 = vmatmul.mubr.bf16.vlgmr.msra.gmra.mxu1 %v6652_v33 }
0x20f6   :  { %10670 = vmatprep.mubr.msk.bf16.mxu1 %vm12088_vm1, %v12080_v43 }
0x20fa   :  { %v6607_v47 = vpop.f32.mrf.mxu0 }
0x20fb   :  { %v6608_v8 = vadd.f32 %v9667_v55, %v6607_v47 }
0x20fc   :  { %v10644_v48 = vpop.f32.mrf.mxu0 }
0x20fd   :  { %v6630_v62 = vmul.f32 0.70710677, %v6608_v8  ;;  %v6624_v26 = vmul.f32 0.5, %v6608_v8 }
0x20fe   :  { %v6610_v50 = vpop.f32.mrf.mxu0 }
0x20ff   :  { %11860 = verf.f32 %v6630_v62  ;;  %v6611_v51 = vadd.f32 %v9667_v55, %v6610_v50 }
0x2100   :  { %v10645_v49 = vpop.f32.mrf.mxu0 }
0x2101   :  { %v6631_v6 = vmul.f32 0.70710677, %v6611_v51  ;;  %v6625_v41 = vmul.f32 0.5, %v6611_v51 }
0x2102   :  { %v6615_v11 = vpop.f32.mrf.mxu0 }
0x2103   :  { %11862 = verf.f32 %v6631_v6  ;;  %v6616_v7 = vadd.f32 %v9667_v55, %v6615_v11 }
0x2104   :  { %v10648_v63 = vpop.f32.mrf.mxu0 }
0x2105   :  { %v6632_v31 = vmul.f32 0.70710677, %v6616_v7  ;;  %v6626_v54 = vmul.f32 0.5, %v6616_v7 }
0x2106   :  { %v6618_v37 = vpop.f32.mrf.mxu0 }
0x2107   :  { %11864 = verf.f32 %v6632_v31  ;;  %v6619_v28 = vadd.f32 %v9667_v55, %v6618_v37  ;;  %v9675_v55 = vld [vmem:[%s15207_s2] ss:$0 sm:$0xff] }
0x2108   :  { %v10649_v18 = vpop.f32.mrf.mxu0 }
0x2109   :  { %v6633_v40 = vmul.f32 0.70710677, %v6619_v28  ;;  %v6627_v46 = vmul.f32 0.5, %v6619_v28 }
0x210b   :  { %11866 = verf.f32 %v6633_v40 }
0x210c   :  { %v11861_v24 = vpop.eup %11860 }
0x210d   :  { %v6642_v12 = vadd.f32 1.0, %v11861_v24 }
0x210f   :  { %v6648_v0 = vmul.f32 %v6642_v12, %v6624_v26  ;;  %v11506_v12 = vld [vmem:[%s15197_s6 + $0x74] ss:$8 sps:$4 sm:$0xff]  }
0x2110   :  { %v11863_v57 = vpop.eup %11862  ;;  %6964 = vmatprep.subr.bf16.mxu0 %v11506_v12 }
0x2111   :  { %v6643_v25 = vadd.f32 1.0, %v11863_v57  ;;  %v11504_v57 = vld [vmem:[%s15197_s6 + $0x70] ss:$8 sps:$4 sm:$0xff]  }
0x2112   :  { %6965 = vmatpush1.bf16.msra.mxu0 %v11504_v57 }
0x2113   :  { %v6649_v23 = vmul.f32 %v6643_v25, %v6625_v41  ;;  %v11509_v25 = vld [vmem:[%s15197_s6 + $0x64] ss:$8 sps:$4 sm:$0xff]  }
0x2114   :  { %v11865_v52 = vpop.eup %11864  ;;  %6966 = vmatprep.subr.bf16.mxu0 %v11509_v25 }
0x2115   :  { %v6653_v5 = vpack.c.bf16 %v6649_v23, %v6648_v0  ;;  %v6644_v21 = vadd.f32 1.0, %v11865_v52  ;;  %v11507_v23 = vld [vmem:[%s15197_s6 + $0x60] ss:$8 sps:$4 sm:$0xff]  }
0x2116   :  { %6967 = vmatpush1.bf16.msra.mxu0 %v11507_v23 }
0x2117   :  { %10671 = vmatmul.mubr.bf16.gmra.mxu1 %v6653_v5  ;;  %v6650_v38 = vmul.f32 %v6644_v21, %v6626_v54 }
0x2118   :  { %v11867_v56 = vpop.eup %11866  ;;  %10674 = vmatprep.mubr.msk.bf16.mxu1 %vm12088_vm1, %v12080_v43 }
0x2119   :  { %v6645_v9 = vadd.f32 1.0, %v11867_v56  ;;  %v11512_v56 = vld [vmem:[%s15197_s6 + $0x54] ss:$8 sps:$4 sm:$0xff]  }
0x211a   :  { %6968 = vmatprep.subr.bf16.mxu0 %v11512_v56 }
0x211b   :  { %v6651_v45 = vmul.f32 %v6645_v9, %v6627_v46  ;;  %v11510_v9 = vld [vmem:[%s15197_s6 + $0x50] ss:$8 sps:$4 sm:$0xff]  }
0x211c   :  { %6969 = vmatpush1.bf16.msra.mxu0 %v11510_v9 }
0x211d   :  { %v6654_v36 = vpack.c.bf16 %v6651_v45, %v6650_v38 }
0x211f   :  { %10675 = vmatmul.mubr.bf16.gmra.mxu1 %v6654_v36 }
0x21b5   :  { %v6760_v22 = vpop.f32.mrf.mxu1 }
0x21b6   :  { %v6761_v13 = vadd.f32 %v9675_v55, %v6760_v22 }
0x21b7   :  { %v10668_v53 = vpop.f32.mrf.mxu1 }
0x21b8   :  { %v14344_v39 = vadd.f32 %v6761_v13, %v14254_v58  ;;  %v11513_v53 = vld [vmem:[%s15197_s6 + $0x40] ss:$8 sps:$4 sm:$0xff]  }
0x21b9   :  { %v6763_v16 = vpop.f32.mrf.mxu1 }
0x21ba   :  { %v6764_v60 = vadd.f32 %v9675_v55, %v6763_v16  ;;  %v6793_v20 = vsel %vm663_vm14, %v14344_v39, 0.0 }
0x21bb   :  { %6794 = vadd.xlane.f32.xlu0 %v6793_v20  ;;  %v10669_v15 = vpop.f32.mrf.mxu1 }
0x21bc   :  { %v14349_v42 = vadd.f32 %v6764_v60, %v14259_v10 }
0x21be   :  { %v6796_v29 = vsel %vm663_vm14, %v14349_v42, 0.0 }
0x21bf   :  { %6797 = vadd.xlane.f32.xlu1 %v6796_v29 }
0x21d7   :  { %v6768_v17 = vpop.f32.mrf.mxu1 }
0x21d8   :  { %v6769_v59 = vadd.f32 %v9675_v55, %v6768_v17 }
0x21d9   :  { %v10672_v14 = vpop.f32.mrf.mxu1 }
0x21da   :  { %v14354_v58 = vadd.f32 %v6769_v59, %v14264_v35 }
0x21db   :  { %v6771_v2 = vpop.f32.mrf.mxu1 }
0x21dc   :  { %v6772_v1 = vadd.f32 %v9675_v55, %v6771_v2  ;;  %v6799_v3 = vsel %vm663_vm14, %v14354_v58, 0.0 }
0x21dd   :  { %6800 = vadd.xlane.f32.xlu0 %v6799_v3  ;;  %v10673_v33 = vpop.f32.mrf.mxu1 }
0x21de   :  { %v14359_v10 = vadd.f32 %v6772_v1, %v14269_v61 }
0x21df   :  { %v6776_v47 = vpop.f32.mrf.mxu1 }
0x21e0   :  { %v6777_v8 = vadd.f32 %v9675_v55, %v6776_v47  ;;  %v6802_v48 = vsel %vm663_vm14, %v14359_v10, 0.0 }
0x21e1   :  { %6803 = vadd.xlane.f32.xlu1 %v6802_v48  ;;  %v10676_v62 = vpop.f32.mrf.mxu1 }
0x21e2   :  { %v14364_v35 = vadd.f32 %v6777_v8, %v14274_v32  ;;  %v9686_v62 = vld [vmem:[%s15198_s20 + $0x1] ss:$0 sm:$0xff] }
0x21e3   :  { %v6779_v50 = vpop.f32.mrf.mxu1 }
0x21e4   :  { %v6780_v51 = vadd.f32 %v9675_v55, %v6779_v50  ;;  %v6805_v49 = vsel %vm663_vm14, %v14364_v35, 0.0  ;;  %v11515_v55 = vld [vmem:[%s15197_s6 + $0x44] ss:$8 sps:$4 sm:$0xff]  }
0x21e5   :  { %6806 = vadd.xlane.f32.xlu0 %v6805_v49  ;;  %v10677_v6 = vpop.f32.mrf.mxu1  ;;  %6970 = vmatprep.subr.bf16.mxu0 %v11515_v55 }
0x21e6   :  { %v14369_v61 = vadd.f32 %v6780_v51, %v14279_v4  ;;  %6971 = vmatpush1.bf16.msra.mxu0 %v11513_v53  ;;  %v9687_v6 = vld [vmem:[%s15199_s0 + $0x1] ss:$0 sm:$0xff] }
0x21e8   :  { %v6808_v11 = vsel %vm663_vm14, %v14369_v61, 0.0 }
0x21e9   :  { %6809 = vadd.xlane.f32.xlu1 %v6808_v11 }
0x2244   :  { %v6795_v7 = vpop.xlane.xlu0 %6794 }
0x2245   :  { %v6811_v63 = vmul.f32 0.015625, %v6795_v7 }
0x2247   :  { %v6817_v32 = vsub.f32 %v14344_v39, %v6811_v63 }
0x2248   :  { %v6798_v31 = vpop.xlane.xlu1 %6797 }
0x2249   :  { %v6812_v37 = vmul.f32 0.015625, %v6798_v31  ;;  %v6823_v28 = vmul.f32 %v6817_v32, %v6817_v32 }
0x224b   :  { %v6818_v18 = vsub.f32 %v14349_v42, %v6812_v37  ;;  %v6829_v40 = vsel %vm663_vm14, %v6823_v28, 0.0 }
0x224c   :  { %6830 = vadd.xlane.f32.xlu0 %v6829_v40 }
0x224d   :  { %v6824_v4 = vmul.f32 %v6818_v18, %v6818_v18 }
0x224f   :  { %v6832_v24 = vsel %vm663_vm14, %v6824_v4, 0.0 }
0x2250   :  { %6833 = vadd.xlane.f32.xlu1 %v6832_v24 }
0x2266   :  { %v6801_v26 = vpop.xlane.xlu0 %6800 }
0x2267   :  { %v6813_v41 = vmul.f32 0.015625, %v6801_v26 }
0x2269   :  { %v14381_v0 = vsub.f32 %v14354_v58, %v6813_v41 }
0x226a   :  { %v6804_v52 = vpop.xlane.xlu1 %6803 }
0x226b   :  { %v6814_v5 = vmul.f32 0.015625, %v6804_v52  ;;  %v6825_v21 = vmul.f32 %v14381_v0, %v14381_v0 }
0x226d   :  { %v14388_v54 = vsub.f32 %v14359_v10, %v6814_v5  ;;  %v6835_v46 = vsel %vm663_vm14, %v6825_v21, 0.0 }
0x226e   :  { %6836 = vadd.xlane.f32.xlu0 %v6835_v46  ;;  %v6807_v38 = vpop.xlane.xlu0 %6806 }
0x226f   :  { %v6815_v45 = vmul.f32 0.015625, %v6807_v38  ;;  %v6826_v36 = vmul.f32 %v14388_v54, %v14388_v54 }
0x2271   :  { %v6821_v22 = vsub.f32 %v14364_v35, %v6815_v45  ;;  %v6838_v13 = vsel %vm663_vm14, %v6826_v36, 0.0 }
0x2272   :  { %6839 = vadd.xlane.f32.xlu1 %v6838_v13  ;;  %v6810_v16 = vpop.xlane.xlu1 %6809 }
0x2273   :  { %v6816_v60 = vmul.f32 0.015625, %v6810_v16  ;;  %v6827_v20 = vmul.f32 %v6821_v22, %v6821_v22 }
0x2275   :  { %v6822_v15 = vsub.f32 %v14369_v61, %v6816_v60  ;;  %v6841_v29 = vsel %vm663_vm14, %v6827_v20, 0.0 }
0x2276   :  { %6842 = vadd.xlane.f32.xlu0 %v6841_v29 }
0x2277   :  { %v6828_v17 = vmul.f32 %v6822_v15, %v6822_v15 }
0x2279   :  { %v6844_v59 = vsel %vm663_vm14, %v6828_v17, 0.0 }
0x227a   :  { %6845 = vadd.xlane.f32.xlu1 %v6844_v59 }
0x22d5   :  { %v6831_v14 = vpop.xlane.xlu0 %6830 }
0x22d6   :  { %v6847_v2 = vmul.f32 0.015625, %v6831_v14 }
0x22d8   :  { %v6853_v1 = vadd.f32 1e-05, %v6847_v2 }
0x22d9   :  { %v6834_v3 = vpop.xlane.xlu1 %6833 }
0x22da   :  { %11868 = vrsqrt.f32 %v6853_v1  ;;  %v6848_v33 = vmul.f32 0.015625, %v6834_v3 }
0x22dc   :  { %v6854_v47 = vadd.f32 1e-05, %v6848_v33 }
0x22de   :  { %11870 = vrsqrt.f32 %v6854_v47 }
0x22e7   :  { %v11869_v8 = vpop.eup %11868 }
0x22e8   :  { %v6865_v48 = vmul.f32 %v11869_v8, %v6817_v32 }
0x22ea   :  { %v6877_v51 = vmul.f32 %v9686_v62, %v6865_v48 }
0x22eb   :  { %v11871_v50 = vpop.eup %11870 }
0x22ec   :  { %v6866_v49 = vmul.f32 %v11871_v50, %v6818_v18  ;;  %v6889_v7 = vadd.f32 %v9687_v6, %v6877_v51 }
0x22ee   :  { %v6878_v11 = vmul.f32 %v9686_v62, %v6866_v49 }
0x22f0   :  { %v6890_v63 = vadd.f32 %v9687_v6, %v6878_v11 }
0x22f2   :  { %v6895_v31 = vpack.c.bf16 %v6890_v63, %v6889_v7 }
0x22f4   :  { %9704 = vmatmul.mubr.msk.bf16.vlgmr.msra.gmra.mxu0 %vm663_vm14, %v6895_v31 }
0x22f5   :  { %6998 = vmatprep.mubr.bf16.mxu0 %v12085_v34 }
0x22f7   :  { %v6837_v37 = vpop.xlane.xlu0 %6836 }
0x22f8   :  { %v6849_v28 = vmul.f32 0.015625, %v6837_v37 }
0x22fa   :  { %v6855_v40 = vadd.f32 1e-05, %v6849_v28 }
0x22fb   :  { %v6840_v4 = vpop.xlane.xlu1 %6839 }
0x22fc   :  { %11872 = vrsqrt.f32 %v6855_v40  ;;  %v6850_v24 = vmul.f32 0.015625, %v6840_v4 }
0x22fe   :  { %v6856_v32 = vadd.f32 1e-05, %v6850_v24 }
0x22ff   :  { %v6843_v12 = vpop.xlane.xlu0 %6842 }
0x2300   :  { %11874 = vrsqrt.f32 %v6856_v32  ;;  %v6851_v57 = vmul.f32 0.015625, %v6843_v12 }
0x2302   :  { %v6857_v18 = vadd.f32 1e-05, %v6851_v57 }
0x2303   :  { %v6846_v26 = vpop.xlane.xlu1 %6845 }
0x2304   :  { %11876 = vrsqrt.f32 %v6857_v18  ;;  %v6852_v41 = vmul.f32 0.015625, %v6846_v26 }
0x2306   :  { %v6858_v25 = vadd.f32 1e-05, %v6852_v41 }
0x2308   :  { %11878 = vrsqrt.f32 %v6858_v25 }
0x2309   :  { %v11873_v23 = vpop.eup %11872 }
0x230a   :  { %v6867_v52 = vmul.f32 %v11873_v23, %v14381_v0 }
0x230c   :  { %v6879_v56 = vmul.f32 %v9686_v62, %v6867_v52 }
0x230d   :  { %v11875_v5 = vpop.eup %11874 }
0x230e   :  { %v6868_v21 = vmul.f32 %v11875_v5, %v14388_v54  ;;  %v6891_v45 = vadd.f32 %v9687_v6, %v6879_v56 }
0x2310   :  { %v6880_v46 = vmul.f32 %v9686_v62, %v6868_v21 }
0x2311   :  { %v11877_v9 = vpop.eup %11876 }
0x2312   :  { %v6869_v38 = vmul.f32 %v11877_v9, %v6821_v22  ;;  %v6892_v36 = vadd.f32 %v9687_v6, %v6880_v46 }
0x2314   :  { %v6896_v55 = vpack.c.bf16 %v6892_v36, %v6891_v45  ;;  %v6881_v16 = vmul.f32 %v9686_v62, %v6869_v38 }
0x2315   :  { %v11879_v13 = vpop.eup %11878 }
0x2316   :  { %v6870_v53 = vmul.f32 %v11879_v13, %v6822_v15  ;;  %9705 = vmatmul.mubr.msk.bf16.gmra.mxu0 %vm663_vm14, %v6896_v55  ;;  %v6893_v20 = vadd.f32 %v9687_v6, %v6881_v16 }
0x2317   :  { %7008 = vmatprep.mubr.bf16.mxu0 %v12085_v34 }
0x2318   :  { %v6882_v60 = vmul.f32 %v9686_v62, %v6870_v53 }
0x231a   :  { %v6894_v0 = vadd.f32 %v9687_v6, %v6882_v60 }
0x231c   :  { %v6897_v29 = vpack.c.bf16 %v6894_v0, %v6893_v20 }
0x231e   :  { %9706 = vmatmul.mubr.msk.bf16.gmra.mxu0 %vm663_vm14, %v6897_v29 }
0x23b4   :  { %v6990_v54 = vpop.f32.mrf.mxu0 }
0x23b6   :  { %v14410_v17 = vpop.f32.mrf.mxu0 }
0x23b8   :  { %v6994_v22 = vpop.f32.mrf.mxu0 }
0x23b9   :  { %v11310_v59 = vpack.i.bf16 %v6994_v22, %v6990_v54  ;;  %v7079_v14 = vpack.c.bf16 %v6994_v22, %v6990_v54 }
0x23ba   :  { %v14414_v15 = vpop.f32.mrf.mxu0 }
0x23bb   :  { %11311 = vrot.lane.b32.xlu1 %v11310_v59, %s12086_s13  ;;  %10682 = vmatprep.mubr.msk.bf16.mxu0 %vm387_vm9, %v7079_v14 }
0x23d6   :  { %v7000_v2 = vpop.f32.mrf.mxu0 }
0x23d7   :  { %7029 = vrot.lane.b32.xlu0 %v7000_v2, %s12086_s13  ;;  %v14430_v6 = vpack.c.bf16 %v7000_v2, %v7000_v2 }
0x23d8   :  { %v14417_v1 = vpop.f32.mrf.mxu0 }
0x23da   :  { %v7004_v3 = vpop.f32.mrf.mxu0 }
0x23db   :  { %7047 = vrot.lane.b32.xlu0 %v7000_v2, %s12087_s17 }
0x23dc   :  { %v7006_v33 = vpop.f32.mrf.mxu0 }
0x23de   :  { %v7010_v47 = vpop.f32.mrf.mxu0 }
0x23df   :  { %v7081_v8 = vpack.c.bf16 %v7010_v47, %v7004_v3  ;;  %11321 = vrot.lane.b32.xlu0 %v11310_v59, %s12087_s17  ;;  %v11315_v49 = vpack.i.bf16 %v7010_v47, %v7004_v3 }
0x23e0   :  { %v7012_v48 = vpop.f32.mrf.mxu0 }
0x23e1   :  { %v14421_v62 = vpack.i.bf16 %v7012_v48, %v7006_v33  ;;  %10690 = vmatprep.mubr.msk.bf16.mxu1 %vm387_vm9, %v7081_v8  ;;  %v14424_v50 = vpack.c.bf16 %v7012_v48, %v7006_v33 }
0x23e2   :  { %v7014_v51 = vpop.f32.mrf.mxu0 }
0x23e3   :  { %7065 = vrot.lane.b32.xlu0 %v7000_v2, %s12089_s21  ;;  %7035 = vrot.lane.b32.xlu1 %v7014_v51, %s12086_s13  ;;  %v14439_v11 = vpack.c.bf16 %v7014_v51, %v7014_v51 }
0x23e4   :  { %v14484_v2 = vpop.f32.mrf.mxu0 }
0x23e7   :  { %11331 = vrot.lane.b32.xlu0 %v11310_v59, %s12089_s21  ;;  %11316 = vrot.lane.b32.xlu1 %v11315_v49, %s12086_s13 }
0x23eb   :  { %7175 = vrot.lane.b32.xlu0 %v14430_v6, %s12090_s25  ;;  %7053 = vrot.lane.b32.xlu1 %v7014_v51, %s12087_s17 }
0x23ef   :  { %7173 = vrot.lane.b32.xlu0 %v7079_v14, %s12090_s25  ;;  %11326 = vrot.lane.b32.xlu1 %v11315_v49, %s12087_s17 }
0x23f3   :  { %7071 = vrot.lane.b32.xlu1 %v7014_v51, %s12089_s21 }
0x23f7   :  { %11336 = vrot.lane.b32.xlu1 %v11315_v49, %s12089_s21  ;;  %v11340_v49 = vpack.i.bf16 %v14410_v17, %v14417_v1 }
0x23fb   :  { %7241 = vrot.lane.b32.xlu1 %v14439_v11, %s12090_s25 }
0x23ff   :  { %7239 = vrot.lane.b32.xlu1 %v7081_v8, %s12090_s25  ;;  %v11345_v8 = vpack.i.bf16 %v14484_v2, %v14414_v15 }
0x242d   :  { %v11312_v7 = vpop.permute.xlu1 %11311 }
0x242e   :  { %v11314_v31 = vunpack.i.h.bf16 %v11312_v7  ;;  %v11313_v37 = vunpack.i.l.bf16 %v11312_v7 }
0x2430   :  { %v7083_v4 = vpack.c.bf16 %v11314_v31, %v11313_v37 }
0x2449   :  { %v7030_v63 = vpop.permute.xlu0 %7029 }
0x244a   :  { %v14444_v28 = vpack.c.bf16 %v7030_v63, %v7030_v63 }
0x244c   :  { %7307 = vrot.lane.b32.xlu0 %v14444_v28, %s12090_s25 }
0x244d   :  { %v7048_v40 = vpop.permute.xlu0 %7047 }
0x244e   :  { %v14449_v32 = vpack.c.bf16 %v7048_v40, %v7048_v40 }
0x2450   :  { %7305 = vrot.lane.b32.xlu0 %v7083_v4, %s12090_s25 }
0x2451   :  { %v11322_v24 = vpop.permute.xlu0 %11321 }
0x2452   :  { %v11324_v12 = vunpack.i.h.bf16 %v11322_v24  ;;  %v11323_v57 = vunpack.i.l.bf16 %v11322_v24 }
0x2454   :  { %7439 = vrot.lane.b32.xlu0 %v14449_v32, %s12090_s25  ;;  %v14453_v41 = vpack.c.bf16 %v11324_v12, %v11323_v57 }
0x2455   :  { %v7066_v18 = vpop.permute.xlu0 %7065  ;;  %v7036_v26 = vpop.permute.xlu1 %7035 }
0x2456   :  { %v14455_v25 = vpack.c.bf16 %v7036_v26, %v7036_v26  ;;  %v14461_v23 = vpack.c.bf16 %v7066_v18, %v7066_v18 }
0x2458   :  { %7373 = vrot.lane.b32.xlu1 %v14455_v25, %s12090_s25  ;;  %7437 = vrot.lane.b32.xlu0 %v14453_v41, %s12090_s25 }
0x2459   :  { %v11332_v52 = vpop.permute.xlu0 %11331  ;;  %v11317_v5 = vpop.permute.xlu1 %11316 }
0x245a   :  { %v11334_v21 = vunpack.i.h.bf16 %v11332_v52  ;;  %v11333_v56 = vunpack.i.l.bf16 %v11332_v52  ;;  %v11319_v46 = vunpack.i.h.bf16 %v11317_v5  ;;  %v11318_v9 = vunpack.i.l.bf16 %v11317_v5 }
0x245c   :  { %v7085_v38 = vpack.c.bf16 %v11319_v46, %v11318_v9  ;;  %7571 = vrot.lane.b32.xlu0 %v14461_v23, %s12090_s25  ;;  %v14465_v55 = vpack.c.bf16 %v11334_v21, %v11333_v56 }
0x245d   :  { %v7176_v45 = vpop.permute.xlu0 %7175  ;;  %v7054_v36 = vpop.permute.xlu1 %7053 }
0x245e   :  { %10908 = vmatprep.subr.msk.bf16.mxu0 %vm387_vm9, %v7176_v45  ;;  %7371 = vrot.lane.b32.xlu1 %v7085_v38, %s12090_s25  ;;  %v7187_v13 = vsel %vm387_vm9, %v7176_v45, 0  ;;  %v14470_v53 = vpack.c.bf16 %v7054_v36, %v7054_v36 }
0x245f   :  { %10679 = vmatpush3.bf16.xpose.msra.mxu0 %v7187_v13 }
0x2460   :  { %7569 = vrot.lane.b32.xlu0 %v14465_v55, %s12090_s25 }
0x2461   :  { %v7174_v16 = vpop.permute.xlu0 %7173  ;;  %v11327_v60 = vpop.permute.xlu1 %11326 }
0x2462   :  { %v11329_v20 = vunpack.i.h.bf16 %v11327_v60  ;;  %v11328_v0 = vunpack.i.l.bf16 %v11327_v60  ;;  %10909 = vmatprep.subr.msk.bf16.mxu0 %vm387_vm9, %v7174_v16  ;;  %7505 = vrot.lane.b32.xlu1 %v14470_v53, %s12090_s25  ;;  %v7184_v22 = vsel %vm387_vm9, %v7174_v16, 0  ;;  %v7156_v60 = vpack.c.bf16 %v14417_v1, %v14417_v1 }
0x2464   :  { %v14477_v29 = vpack.c.bf16 %v11329_v20, %v11328_v0 }
0x2465   :  { %v7072_v54 = vpop.permute.xlu1 %7071 }
0x2466   :  { %7503 = vrot.lane.b32.xlu1 %v14477_v29, %s12090_s25  ;;  %v14482_v59 = vpack.c.bf16 %v7072_v54, %v7072_v54 }
0x2467   :  { %10681 = vmatpush3.bf16.xpose.msra.mxu0 %v7184_v22 }
0x2469   :  { %v11337_v14 = vpop.permute.xlu1 %11336 }
0x246a   :  { %v11339_v3 = vunpack.i.h.bf16 %v11337_v14  ;;  %v11338_v33 = vunpack.i.l.bf16 %v11337_v14  ;;  %7637 = vrot.lane.b32.xlu1 %v14482_v59, %s12090_s25  ;;  %v8034_v14 = vsel %vm245_vm0, %v7156_v60, 0 }
0x246c   :  { %v14488_v47 = vpack.c.bf16 %v11339_v3, %v11338_v33  ;;  %v7155_v3 = vpack.c.bf16 %v14414_v15, %v14410_v17 }
0x246d   :  { %v7242_v48 = vpop.permute.xlu1 %7241 }
0x246e   :  { %v7253_v51 = vsel %vm387_vm9, %v7242_v48, 0  ;;  %10683 = vmatmul.mubr.msk.bf16.vlgmr.msra.gmra.mxu0 %vm387_vm9, %v14430_v6  ;;  %10910 = vmatprep.subr.msk.bf16.mxu1 %vm387_vm9, %v7242_v48 }
0x246f   :  { %11346 = vrot.lane.b32.xlu1 %v11345_v8, %s12086_s13  ;;  %7635 = vrot.lane.b32.xlu0 %v14488_v47, %s12090_s25 }
0x2470   :  { %10687 = vmatpush3.bf16.xpose.msra.mxu1 %v7253_v51  ;;  %10698 = vmatprep.mubr.msk.bf16.mxu0 %vm387_vm9, %v7083_v4 }
0x2471   :  { %v7240_v7 = vpop.permute.xlu1 %7239 }
0x2472   :  { %10911 = vmatprep.subr.msk.bf16.mxu1 %vm387_vm9, %v7240_v7  ;;  %v7250_v6 = vsel %vm387_vm9, %v7240_v7, 0 }
0x2473   :  { %7121 = vrot.lane.b32.xlu1 %v14414_v15, %s12087_s17  ;;  %11341 = vrot.lane.b32.xlu0 %v11340_v49, %s12086_s13 }
0x2477   :  { %7129 = vrot.lane.b32.xlu1 %v14484_v2, %s12087_s17  ;;  %11351 = vrot.lane.b32.xlu0 %v11340_v49, %s12087_s17 }
0x2478   :  { %10689 = vmatpush3.bf16.xpose.msra.mxu1 %v7250_v6 }
0x247b   :  { %11356 = vrot.lane.b32.xlu0 %v14421_v62, %s12086_s13  ;;  %s15209_s13 = sld [smem:[#allocation29_spill]] }
0x247f   :  { %10691 = vmatmul.mubr.msk.bf16.vlgmr.msra.gmra.mxu1 %vm387_vm9, %v14439_v11  ;;  %7141 = vrot.lane.b32.xlu0 %v14417_v1, %s12089_s21 }
0x2480   :  { %10706 = vmatprep.mubr.msk.bf16.mxu1 %vm387_vm9, %v7085_v38 }
0x24be   :  { %v7308_v63 = vpop.permute.xlu0 %7307 }
0x24bf   :  { %v7319_v31 = vsel %vm387_vm9, %v7308_v63, 0  ;;  %10912 = vmatprep.subr.msk.bf16.mxu0 %vm387_vm9, %v7308_v63 }
0x24c0   :  { %10695 = vmatpush3.bf16.xpose.msra.mxu0 %v7319_v31 }
0x24c2   :  { %v7306_v37 = vpop.permute.xlu0 %7305 }
0x24c3   :  { %10913 = vmatprep.subr.msk.bf16.mxu0 %vm387_vm9, %v7306_v37  ;;  %v7316_v40 = vsel %vm387_vm9, %v7306_v37, 0 }
0x24c6   :  { %v7440_v4 = vpop.permute.xlu0 %7439 }
0x24c7   :  { %v7451_v12 = vsel %vm387_vm9, %v7440_v4, 0 }
0x24c8   :  { %10697 = vmatpush3.bf16.xpose.msra.mxu0 %v7316_v40 }
0x24c9   :  { %10916 = vmatprep.subr.msk.bf16.mxu0 %vm387_vm9, %v7440_v4 }
0x24ca   :  { %v7374_v11 = vpop.permute.xlu1 %7373  ;;  %v7438_v57 = vpop.permute.xlu0 %7437 }
0x24cb   :  { %v7385_v24 = vsel %vm387_vm9, %v7374_v11, 0  ;;  %10914 = vmatprep.subr.msk.bf16.mxu1 %vm387_vm9, %v7374_v11  ;;  %v7448_v5 = vsel %vm387_vm9, %v7438_v57, 0 }
0x24cc   :  { %10703 = vmatpush3.bf16.xpose.msra.mxu1 %v7385_v24 }
0x24ce   :  { %v7572_v21 = vpop.permute.xlu0 %7571 }
0x24cf   :  { %10699 = vmatmul.mubr.msk.bf16.vlgmr.msra.gmra.mxu0 %vm387_vm9, %v14444_v28  ;;  %v7583_v9 = vsel %vm387_vm9, %v7572_v21, 0 }
0x24d0   :  { %v7372_v18 = vpop.permute.xlu1 %7371  ;;  %10711 = vmatpush3.bf16.xpose.msra.mxu0 %v7451_v12  ;;  %10714 = vmatprep.mubr.msk.bf16.mxu0 %vm387_vm9, %v14453_v41 }
0x24d1   :  { %10915 = vmatprep.subr.msk.bf16.mxu1 %vm387_vm9, %v7372_v18  ;;  %10917 = vmatprep.subr.msk.bf16.mxu0 %vm387_vm9, %v7438_v57  ;;  %v7382_v26 = vsel %vm387_vm9, %v7372_v18, 0 }
0x24d2   :  { %v7570_v41 = vpop.permute.xlu0 %7569 }
0x24d4   :  { %10705 = vmatpush3.bf16.xpose.msra.mxu1 %v7382_v26  ;;  %v7506_v52 = vpop.permute.xlu1 %7505 }
0x24d5   :  { %10918 = vmatprep.subr.msk.bf16.mxu1 %vm387_vm9, %v7506_v52  ;;  %v7517_v56 = vsel %vm387_vm9, %v7506_v52, 0 }
0x24d8   :  { %v7504_v28 = vpop.permute.xlu1 %7503  ;;  %10713 = vmatpush3.bf16.xpose.msra.mxu0 %v7448_v5 }
0x24d9   :  { %10920 = vmatprep.subr.msk.bf16.mxu0 %vm387_vm9, %v7572_v21 }
0x24db   :  { %10707 = vmatmul.mubr.msk.bf16.vlgmr.msra.gmra.mxu1 %vm387_vm9, %v14455_v25  ;;  %v7514_v25 = vsel %vm387_vm9, %v7504_v28, 0 }
0x24dc   :  { %10719 = vmatpush3.bf16.xpose.msra.mxu1 %v7517_v56  ;;  %10722 = vmatprep.mubr.msk.bf16.mxu1 %vm387_vm9, %v14477_v29  ;;  %v7638_v46 = vpop.permute.xlu1 %7637 }
0x24dd   :  { %10919 = vmatprep.subr.msk.bf16.mxu1 %vm387_vm9, %v7504_v28  ;;  %v7649_v29 = vsel %vm387_vm9, %v7638_v46, 0 }
0x24df   :  { %10715 = vmatmul.mubr.msk.bf16.vlgmr.msra.gmra.mxu0 %vm387_vm9, %v14449_v32  ;;  %v7580_v32 = vsel %vm387_vm9, %v7570_v41, 0 }
0x24e0   :  { %10727 = vmatpush3.bf16.xpose.msra.mxu0 %v7583_v9  ;;  %10730 = vmatprep.mubr.msk.bf16.mxu0 %vm387_vm9, %v14465_v55 }
0x24e1   :  { %v7636_v38 = vpop.permute.xlu0 %7635  ;;  %10921 = vmatprep.subr.msk.bf16.mxu0 %vm387_vm9, %v7570_v41  ;;  %v11347_v45 = vpop.permute.xlu1 %11346 }
0x24e2   :  { %v11348_v13 = vunpack.i.l.bf16 %v11347_v45  ;;  %v7646_v33 = vsel %vm387_vm9, %v7636_v38, 0 }
0x24e4   :  { %10721 = vmatpush3.bf16.xpose.msra.mxu1 %v7514_v25 }
0x24e5   :  { %v11342_v36 = vpop.permute.xlu0 %11341  ;;  %10922 = vmatprep.subr.msk.bf16.mxu1 %vm387_vm9, %v7638_v46  ;;  %v7122_v54 = vpop.permute.xlu1 %7121 }
0x24e6   :  { %v11344_v16 = vunpack.i.h.bf16 %v11342_v36  ;;  %v11343_v1 = vunpack.i.l.bf16 %v11342_v36 }
0x24e8   :  { %v14552_v20 = vpack.c.bf16 %v11348_v13, %v11344_v16  ;;  %10729 = vmatpush3.bf16.xpose.msra.mxu0 %v7580_v32  ;;  %v14574_v8 = vpack.c.bf16 %v11343_v1, %v11343_v1 }
0x24e9   :  { %v14554_v55 = vpop.permute.xlu0 %11351  ;;  %10924 = vmatprep.subr.msk.bf16.mxu0 %vm245_vm0, %v7156_v60 }
0x24ea   :  { %v11354_v0 = vunpack.i.h.bf16 %v14554_v55 }
0x24eb   :  { %10723 = vmatmul.mubr.msk.bf16.vlgmr.msra.gmra.mxu1 %vm387_vm9, %v14470_v53  ;;  %v7158_v53 = vpack.c.bf16 %v14484_v2, %v14484_v2 }
0x24ec   :  { %v14561_v22 = vpack.c.bf16 %v7122_v54, %v11354_v0  ;;  %10735 = vmatpush3.bf16.xpose.msra.mxu1 %v7649_v29  ;;  %10738 = vmatprep.mubr.msk.bf16.mxu1 %vm387_vm9, %v14488_v47 }
0x24ed   :  { %10923 = vmatprep.subr.msk.bf16.mxu1 %vm387_vm9, %v7636_v38  ;;  %v8091_v47 = vsel %vm245_vm0, %v7158_v53, 0 }
0x24ef   :  { %10731 = vmatmul.mubr.msk.bf16.vlgmr.msra.gmra.mxu0 %vm387_vm9, %v14461_v23  ;;  %v11349_v23 = vunpack.i.h.bf16 %v11347_v45 }
0x24f0   :  { %10743 = vmatpush3.bf16.msra.mxu0 %v8034_v14 }
0x24f1   :  { %10744 = vmatprep.subr.bf16.mxu0 %v7155_v3  ;;  %v14583_v48 = vpack.c.bf16 %v11349_v23, %v11349_v23 }
0x24f4   :  { %10737 = vmatpush3.bf16.xpose.msra.mxu1 %v7646_v33  ;;  %10745 = vmatpush3.bf16.msra.mxu0 %v7155_v3 }
0x24f5   :  { %10925 = vmatprep.subr.msk.bf16.mxu1 %vm245_vm0, %v7158_v53  ;;  %10926 = vmatprep.subr.msk.bf16.mxu0 %vm245_vm0, %v14574_v8 }
0x24fb   :  { %10739 = vmatmul.mubr.msk.bf16.vlgmr.msra.gmra.mxu1 %vm387_vm9, %v14482_v59 }
0x24fc   :  { %10751 = vmatpush3.bf16.msra.mxu1 %v8091_v47 }
0x24fd   :  { %10752 = vmatprep.subr.bf16.mxu1 %v14424_v50 }
0x2500   :  { %10753 = vmatpush3.bf16.msra.mxu1 %v14424_v50 }
0x2501   :  { %10927 = vmatprep.subr.msk.bf16.mxu1 %vm245_vm0, %v14583_v48 }
0x252e   :  { %v10684_v51 = vpop.f32.mrf.mxu0 }
0x252f   :  { %v7701_v49 = vmul.f32 0.25, %v10684_v51 }
0x2530   :  { %v7223_v7 = vpop.f32.mrf.mxu0 }
0x2531   :  { %v14589_v6 = vadd.f32 %v7701_v49, %v12714_v27  ;;  %v7699_v63 = vmul.f32 0.25, %v7223_v7 }
0x2532   :  { %v10685_v59 = vpop.f32.mrf.mxu0 }
0x2533   :  { %v14592_v31 = vadd.f32 %v7699_v63, %v12714_v27  ;;  %v7753_v37 = vsel %vm5463_vm8, %v14589_v6, -inf }
0x2534   :  { %v7226_v40 = vpop.f32.mrf.mxu0  ;;  %7754 = vmax.xlane.f32.xlu0 %v7753_v37 }
0x2535   :  { %v7700_v50 = vmul.f32 0.25, %v7226_v40  ;;  %v7747_v4 = vsel %vm5463_vm8, %v14592_v31, -inf }
0x2536   :  { %7748 = vmax.xlane.f32.xlu1 %v7747_v4 }
0x2537   :  { %v14599_v11 = vadd.f32 %v7700_v50, %v12714_v27 }
0x2539   :  { %v7750_v24 = vsel %vm5463_vm8, %v14599_v11, -inf }
0x253a   :  { %7751 = vmax.xlane.f32.xlu0 %v7750_v24 }
0x253f   :  { %v10692_v12 = vpop.f32.mrf.mxu1 }
0x2540   :  { %v7704_v57 = vmul.f32 0.25, %v10692_v12 }
0x2541   :  { %v7289_v18 = vpop.f32.mrf.mxu1 }
0x2542   :  { %v14604_v26 = vadd.f32 %v7704_v57, %v12714_v27  ;;  %v7702_v52 = vmul.f32 0.25, %v7289_v18 }
0x2543   :  { %v10693_v5 = vpop.f32.mrf.mxu1 }
0x2544   :  { %v14607_v21 = vadd.f32 %v7702_v52, %v12714_v27  ;;  %v7762_v28 = vsel %vm5463_vm8, %v14604_v26, -inf }
0x2545   :  { %7763 = vmax.xlane.f32.xlu0 %v7762_v28  ;;  %v7292_v56 = vpop.f32.mrf.mxu1 }
0x2546   :  { %v7703_v41 = vmul.f32 0.25, %v7292_v56  ;;  %v7756_v9 = vsel %vm5463_vm8, %v14607_v21, -inf }
0x2548   :  { %v14612_v46 = vadd.f32 %v7703_v41, %v12714_v27 }
0x2549   :  { %7757 = vmax.xlane.f32.xlu0 %v7756_v9 }
0x254a   :  { %v7759_v38 = vsel %vm5463_vm8, %v14612_v46, -inf }
0x254b   :  { %7760 = vmax.xlane.f32.xlu1 %v7759_v38 }
0x258f   :  { %v10700_v25 = vpop.f32.mrf.mxu0 }
0x2590   :  { %v7707_v45 = vmul.f32 0.25, %v10700_v25 }
0x2591   :  { %v7355_v36 = vpop.f32.mrf.mxu0 }
0x2592   :  { %v14619_v13 = vadd.f32 %v7707_v45, %v12714_v27  ;;  %v7705_v16 = vmul.f32 0.25, %v7355_v36 }
0x2593   :  { %v10701_v60 = vpop.f32.mrf.mxu0 }
0x2594   :  { %v14622_v32 = vadd.f32 %v7705_v16, %v12714_v27  ;;  %v7771_v0 = vsel %vm5463_vm8, %v14619_v13, -inf }
0x2595   :  { %v7358_v29 = vpop.f32.mrf.mxu0  ;;  %7772 = vmax.xlane.f32.xlu1 %v7771_v0 }
0x2596   :  { %v7706_v54 = vmul.f32 0.25, %v7358_v29  ;;  %v7765_v14 = vsel %vm5463_vm8, %v14622_v32, -inf }
0x2598   :  { %v14627_v1 = vadd.f32 %v7706_v54, %v12714_v27 }
0x2599   :  { %7766 = vmax.xlane.f32.xlu1 %v7765_v14 }
0x259a   :  { %v7768_v3 = vsel %vm5463_vm8, %v14627_v1, -inf }
0x259b   :  { %7769 = vmax.xlane.f32.xlu0 %v7768_v3  ;;  %v10708_v53 = vpop.f32.mrf.mxu1 }
0x259c   :  { %v7710_v33 = vmul.f32 0.25, %v10708_v53 }
0x259d   :  { %v7421_v23 = vpop.f32.mrf.mxu1 }
0x259e   :  { %v14634_v47 = vadd.f32 %v7710_v33, %v12714_v27  ;;  %v7708_v51 = vmul.f32 0.25, %v7421_v23 }
0x259f   :  { %v10709_v49 = vpop.f32.mrf.mxu1  ;;  %v10716_v7 = vpop.f32.mrf.mxu0 }
0x25a0   :  { %v14637_v63 = vadd.f32 %v7708_v51, %v12714_v27  ;;  %v7713_v59 = vmul.f32 0.25, %v10716_v7  ;;  %v7780_v37 = vsel %vm5463_vm8, %v14634_v47, -inf }
0x25a1   :  { %v7487_v40 = vpop.f32.mrf.mxu0  ;;  %7781 = vmax.xlane.f32.xlu0 %v7780_v37  ;;  %v7424_v50 = vpop.f32.mrf.mxu1 }
0x25a2   :  { %v14642_v4 = vadd.f32 %v7713_v59, %v12714_v27  ;;  %v7711_v24 = vmul.f32 0.25, %v7487_v40  ;;  %v7709_v18 = vmul.f32 0.25, %v7424_v50  ;;  %v7774_v5 = vsel %vm5463_vm8, %v14637_v63, -inf  ;;  %v14674_v59 = vpop.permute.xlu0 %11356 }
0x25a3   :  { %v10717_v12 = vpop.f32.mrf.mxu0 }
0x25a4   :  { %v14645_v57 = vadd.f32 %v7711_v24, %v12714_v27  ;;  %v7789_v52 = vsel %vm5463_vm8, %v14642_v4, -inf  ;;  %v14652_v41 = vadd.f32 %v7709_v18, %v12714_v27 }
0x25a5   :  { %v7490_v28 = vpop.f32.mrf.mxu0  ;;  %7790 = vmax.xlane.f32.xlu1 %v7789_v52  ;;  %7775 = vmax.xlane.f32.xlu0 %v7774_v5 }
0x25a6   :  { %v7712_v56 = vmul.f32 0.25, %v7490_v28  ;;  %v7783_v38 = vsel %vm5463_vm8, %v14645_v57, -inf  ;;  %v7777_v16 = vsel %vm5463_vm8, %v14652_v41, -inf }
0x25a8   :  { %v14655_v9 = vadd.f32 %v7712_v56, %v12714_v27 }
0x25a9   :  { %7784 = vmax.xlane.f32.xlu1 %v7783_v38  ;;  %v14691_v38 = vpop.permute.xlu0 %7141 }
0x25aa   :  { %v7786_v25 = vsel %vm5463_vm8, %v14655_v9, -inf }
0x25ab   :  { %7787 = vmax.xlane.f32.xlu0 %v7786_v25  ;;  %v10724_v45 = vpop.f32.mrf.mxu1 }
0x25ac   :  { %v7716_v36 = vmul.f32 0.25, %v10724_v45  ;;  %v14695_v45 = vpop.permute.xlu1 %7129 }
0x25ad   :  { %7778 = vmax.xlane.f32.xlu1 %v7777_v16  ;;  %v7553_v60 = vpop.f32.mrf.mxu1 }
0x25ae   :  { %v14664_v0 = vadd.f32 %v7716_v36, %v12714_v27  ;;  %v7714_v29 = vmul.f32 0.25, %v7553_v60 }
0x25af   :  { %v10725_v54 = vpop.f32.mrf.mxu1  ;;  %v10732_v14 = vpop.f32.mrf.mxu0 }
0x25b0   :  { %v14667_v3 = vadd.f32 %v7714_v29, %v12714_v27  ;;  %v7719_v53 = vmul.f32 0.25, %v10732_v14  ;;  %v7798_v33 = vsel %vm5463_vm8, %v14664_v0, -inf }
0x25b1   :  { %v7619_v23 = vpop.f32.mrf.mxu0  ;;  %7799 = vmax.xlane.f32.xlu0 %v7798_v33  ;;  %v7556_v51 = vpop.f32.mrf.mxu1 }
0x25b2   :  { %v14672_v49 = vadd.f32 %v7719_v53, %v12714_v27  ;;  %v7717_v7 = vmul.f32 0.25, %v7619_v23  ;;  %v7715_v50 = vmul.f32 0.25, %v7556_v51  ;;  %v7792_v12 = vsel %vm5463_vm8, %v14667_v3, -inf }
0x25b3   :  { %v10733_v37 = vpop.f32.mrf.mxu0 }
0x25b4   :  { %v14677_v40 = vadd.f32 %v7717_v7, %v12714_v27  ;;  %v7807_v24 = vsel %vm5463_vm8, %v14672_v49, -inf  ;;  %v14684_v5 = vadd.f32 %v7715_v50, %v12714_v27 }
0x25b5   :  { %v7622_v18 = vpop.f32.mrf.mxu0  ;;  %7808 = vmax.xlane.f32.xlu1 %v7807_v24  ;;  %7793 = vmax.xlane.f32.xlu0 %v7792_v12 }
0x25b6   :  { %v7718_v52 = vmul.f32 0.25, %v7622_v18  ;;  %v7801_v56 = vsel %vm5463_vm8, %v14677_v40, -inf  ;;  %v7795_v60 = vsel %vm5463_vm8, %v14684_v5, -inf }
0x25b8   :  { %v14687_v28 = vadd.f32 %v7718_v52, %v12714_v27 }
0x25b9   :  { %7802 = vmax.xlane.f32.xlu1 %v7801_v56 }
0x25ba   :  { %v7804_v25 = vsel %vm5463_vm8, %v14687_v28, -inf }
0x25bb   :  { %7805 = vmax.xlane.f32.xlu0 %v7804_v25  ;;  %v10740_v36 = vpop.f32.mrf.mxu1 }
0x25bc   :  { %v7722_v16 = vmul.f32 0.25, %v10740_v36 }
0x25bd   :  { %v7755_v29 = vpop.xlane.xlu0 %7754  ;;  %7796 = vmax.xlane.f32.xlu1 %v7795_v60  ;;  %v7685_v54 = vpop.f32.mrf.mxu1 }
0x25be   :  { %v14700_v14 = vadd.f32 %v7722_v16, %v12714_v27  ;;  %v7821_v53 = vsub.f32 %v14589_v6, %v7755_v29  ;;  %v7720_v33 = vmul.f32 0.25, %v7685_v54 }
0x25bf   :  { %v7749_v23 = vpop.xlane.xlu1 %7748  ;;  %v10741_v51 = vpop.f32.mrf.mxu1 }
0x25c0   :  { %v7847_v7 = vmul.f32 1.442695, %v7821_v53  ;;  %v14704_v37 = vadd.f32 %v7720_v33, %v12714_v27  ;;  %v7819_v50 = vsub.f32 %v14592_v31, %v7749_v23  ;;  %v7816_v24 = vsel %vm5463_vm8, %v14700_v14, -inf }
0x25c1   :  { %7817 = vmax.xlane.f32.xlu1 %v7816_v24  ;;  %v7688_v25 = vpop.f32.mrf.mxu1 }
0x25c2   :  { %11880 = vpow2.f32 %v7847_v7  ;;  %v7843_v12 = vmul.f32 1.442695, %v7819_v50  ;;  %v7810_v6 = vsel %vm5463_vm8, %v14704_v37, -inf  ;;  %v7721_v31 = vmul.f32 0.25, %v7688_v25 }
0x25c3   :  { %v7752_v18 = vpop.xlane.xlu0 %7751 }
0x25c4   :  { %11882 = vpow2.f32 %v7843_v12  ;;  %v7820_v52 = vsub.f32 %v14599_v11, %v7752_v18  ;;  %v14719_v29 = vadd.f32 %v7721_v31, %v12714_v27  ;;  %v11360_v27 = vpack.i.bf16 %v14414_v15, %v14410_v17 }
0x25c5   :  { %7811 = vmax.xlane.f32.xlu1 %v7810_v6 }
0x25c6   :  { %v7845_v56 = vmul.f32 1.442695, %v7820_v52  ;;  %v7813_v33 = vsel %vm5463_vm8, %v14719_v29, -inf }
0x25c8   :  { %11884 = vpow2.f32 %v7845_v56 }
0x25ce   :  { %v7764_v23 = vpop.xlane.xlu0 %7763 }
0x25cf   :  { %v14712_v36 = vpop.eup %11880  ;;  %v7824_v50 = vsub.f32 %v14604_v26, %v7764_v23 }
0x25d0   :  { %v7897_v16 = vsel %vm5463_vm8, %v14712_v36, 0.0 }
0x25d1   :  { %v14716_v60 = vpop.eup %11882  ;;  %7898 = vadd.xlane.f32.xlu0 %v7897_v16  ;;  %v7853_v18 = vmul.f32 1.442695, %v7824_v50 }
0x25d2   :  { %v7891_v11 = vsel %vm5463_vm8, %v14716_v60, 0.0  ;;  %v7758_v24 = vpop.xlane.xlu0 %7757 }
0x25d3   :  { %v7822_v52 = vsub.f32 %v14607_v21, %v7758_v24 }
0x25d4   :  { %v7761_v51 = vpop.xlane.xlu1 %7760 }
0x25d5   :  { %v14723_v54 = vpop.eup %11884  ;;  %7892 = vadd.xlane.f32.xlu0 %v7891_v11  ;;  %v7823_v7 = vsub.f32 %v14612_v46, %v7761_v51  ;;  %v7849_v6 = vmul.f32 1.442695, %v7822_v52 }
0x25d6   :  { %v7894_v53 = vsel %vm5463_vm8, %v14723_v54, 0.0 }
0x25d7   :  { %7895 = vadd.xlane.f32.xlu1 %v7894_v53  ;;  %v7851_v12 = vmul.f32 1.442695, %v7823_v7 }
0x25d9   :  { %7814 = vmax.xlane.f32.xlu0 %v7813_v33  ;;  %11886 = vpow2.f32 %v7851_v12 }
0x25da   :  { %11888 = vpow2.f32 %v7853_v18 }
0x25db   :  { %11890 = vpow2.f32 %v7849_v6 }
0x25e6   :  { %v14737_v56 = vpop.eup %11886 }
0x25e7   :  { %v14739_v17 = vpop.eup %11888  ;;  %v7903_v15 = vsel %vm5463_vm8, %v14737_v56, 0.0 }
0x25e8   :  { %11366 = vrot.lane.b32.xlu1 %v14421_v62, %s12087_s17  ;;  %v7906_v26 = vsel %vm5463_vm8, %v14739_v17, 0.0  ;;  %v14745_v46 = vpop.eup %11890  ;;  %s15210_s17 = sld [smem:[#allocation27_spill]] }
0x25e9   :  { %v7900_v21 = vsel %vm5463_vm8, %v14745_v46, 0.0 }
0x25ef   :  { %11361 = vrot.lane.b32.xlu0 %v11360_v27, %s12089_s21 }
0x260c   :  { %7904 = vadd.xlane.f32.xlu1 %v7903_v15 }
0x260e   :  { %7907 = vadd.xlane.f32.xlu0 %v7906_v26 }
0x2612   :  { %7901 = vadd.xlane.f32.xlu0 %v7900_v21 }
0x261e   :  { %v7773_v25 = vpop.xlane.xlu1 %7772 }
0x261f   :  { %v7827_v31 = vsub.f32 %v14619_v13, %v7773_v25 }
0x2621   :  { %v7859_v16 = vmul.f32 1.442695, %v7827_v31 }
0x2622   :  { %v7767_v11 = vpop.xlane.xlu1 %7766 }
0x2623   :  { %11892 = vpow2.f32 %v7859_v16  ;;  %v7825_v53 = vsub.f32 %v14622_v32, %v7767_v11 }
0x2624   :  { %v7770_v33 = vpop.xlane.xlu0 %7769 }
0x2625   :  { %v7855_v27 = vmul.f32 1.442695, %v7825_v53  ;;  %v7826_v23 = vsub.f32 %v14627_v1, %v7770_v33 }
0x2627   :  { %11894 = vpow2.f32 %v7855_v27  ;;  %v7857_v51 = vmul.f32 1.442695, %v7826_v23 }
0x2629   :  { %11896 = vpow2.f32 %v7857_v51 }
0x262a   :  { %v7782_v7 = vpop.xlane.xlu0 %7781 }
0x262b   :  { %v7830_v50 = vsub.f32 %v14634_v47, %v7782_v7 }
0x262d   :  { %v7865_v24 = vmul.f32 1.442695, %v7830_v50 }
0x262e   :  { %v7791_v12 = vpop.xlane.xlu1 %7790  ;;  %v7776_v18 = vpop.xlane.xlu0 %7775 }
0x262f   :  { %11898 = vpow2.f32 %v7865_v24  ;;  %v7833_v13 = vsub.f32 %v14642_v4, %v7791_v12  ;;  %v7828_v52 = vsub.f32 %v14637_v63, %v7776_v18 }
0x2630   :  { %v14755_v6 = vpop.eup %11892 }
0x2631   :  { %v7871_v32 = vmul.f32 1.442695, %v7833_v13  ;;  %v7861_v15 = vmul.f32 1.442695, %v7828_v52  ;;  %v7915_v1 = vsel %vm5463_vm8, %v14755_v6, 0.0 }
0x2632   :  { %v7785_v26 = vpop.xlane.xlu1 %7784  ;;  %7916 = vadd.xlane.f32.xlu1 %v7915_v1 }
0x2633   :  { %11900 = vpow2.f32 %v7871_v32  ;;  %v7831_v47 = vsub.f32 %v14645_v57, %v7785_v26 }
0x2634   :  { %v14760_v21 = vpop.eup %11894  ;;  %11902 = vpow2.f32 %v7861_v15  ;;  %v7788_v25 = vpop.xlane.xlu0 %7787 }
0x2635   :  { %v7867_v31 = vmul.f32 1.442695, %v7831_v47  ;;  %v7832_v4 = vsub.f32 %v14655_v9, %v7788_v25  ;;  %v7909_v63 = vsel %vm5463_vm8, %v14760_v21, 0.0 }
0x2636   :  { %v14765_v16 = vpop.eup %11896  ;;  %v7779_v11 = vpop.xlane.xlu1 %7778  ;;  %7910 = vadd.xlane.f32.xlu1 %v7909_v63 }
0x2637   :  { %11904 = vpow2.f32 %v7867_v31  ;;  %v7869_v53 = vmul.f32 1.442695, %v7832_v4  ;;  %v7829_v33 = vsub.f32 %v14652_v41, %v7779_v11  ;;  %v7912_v57 = vsel %vm5463_vm8, %v14765_v16, 0.0 }
0x2638   :  { %7913 = vadd.xlane.f32.xlu0 %v7912_v57 }
0x2639   :  { %11906 = vpow2.f32 %v7869_v53  ;;  %v7863_v27 = vmul.f32 1.442695, %v7829_v33 }
0x263a   :  { %v7800_v23 = vpop.xlane.xlu0 %7799 }
0x263b   :  { %11908 = vpow2.f32 %v7863_v27  ;;  %v7836_v9 = vsub.f32 %v14664_v0, %v7800_v23 }
0x263c   :  { %v14771_v51 = vpop.eup %11898 }
0x263d   :  { %v7877_v7 = vmul.f32 1.442695, %v7836_v9  ;;  %v7924_v50 = vsel %vm5463_vm8, %v14771_v51, 0.0 }
0x263e   :  { %v7809_v24 = vpop.xlane.xlu1 %7808  ;;  %v7794_v12 = vpop.xlane.xlu0 %7793  ;;  %7925 = vadd.xlane.f32.xlu0 %v7924_v50 }
0x263f   :  { %11910 = vpow2.f32 %v7877_v7  ;;  %v7839_v41 = vsub.f32 %v14672_v49, %v7809_v24  ;;  %v7834_v18 = vsub.f32 %v14667_v3, %v7794_v12 }
0x2640   :  { %v14777_v13 = vpop.eup %11900 }
0x2641   :  { %v14779_v52 = vpop.eup %11902  ;;  %v7883_v32 = vmul.f32 1.442695, %v7839_v41  ;;  %v7873_v0 = vmul.f32 1.442695, %v7834_v18  ;;  %v7933_v15 = vsel %vm5463_vm8, %v14777_v13, 0.0 }
0x2642   :  { %v7803_v1 = vpop.xlane.xlu1 %7802  ;;  %7934 = vadd.xlane.f32.xlu1 %v7933_v15  ;;  %v7918_v26 = vsel %vm5463_vm8, %v14779_v52, 0.0 }
0x2643   :  { %11912 = vpow2.f32 %v7883_v32  ;;  %v7837_v47 = vsub.f32 %v14677_v40, %v7803_v1  ;;  %7919 = vadd.xlane.f32.xlu0 %v7918_v26 }
0x2644   :  { %v14786_v49 = vpop.eup %11904  ;;  %11914 = vpow2.f32 %v7873_v0  ;;  %v7806_v3 = vpop.xlane.xlu0 %7805 }
0x2645   :  { %v7879_v25 = vmul.f32 1.442695, %v7837_v47  ;;  %v7838_v31 = vsub.f32 %v14687_v28, %v7806_v3  ;;  %v7927_v4 = vsel %vm5463_vm8, %v14786_v49, 0.0 }
0x2646   :  { %v14791_v63 = vpop.eup %11906  ;;  %v7797_v11 = vpop.xlane.xlu1 %7796  ;;  %7928 = vadd.xlane.f32.xlu1 %v7927_v4 }
0x2647   :  { %11916 = vpow2.f32 %v7879_v25  ;;  %v7881_v53 = vmul.f32 1.442695, %v7838_v31  ;;  %v7835_v33 = vsub.f32 %v14684_v5, %v7797_v11  ;;  %v7930_v40 = vsel %vm5463_vm8, %v14791_v63, 0.0 }
0x2648   :  { %v14796_v57 = vpop.eup %11908  ;;  %7931 = vadd.xlane.f32.xlu0 %v7930_v40 }
0x2649   :  { %11918 = vpow2.f32 %v7881_v53  ;;  %v7875_v27 = vmul.f32 1.442695, %v7835_v33  ;;  %v7921_v28 = vsel %vm5463_vm8, %v14796_v57, 0.0 }
0x264a   :  { %v7818_v23 = vpop.xlane.xlu1 %7817  ;;  %7922 = vadd.xlane.f32.xlu1 %v7921_v28 }
0x264b   :  { %11920 = vpow2.f32 %v7875_v27  ;;  %v7842_v9 = vsub.f32 %v14700_v14, %v7818_v23 }
0x264c   :  { %v14801_v7 = vpop.eup %11910 }
0x264d   :  { %v7889_v50 = vmul.f32 1.442695, %v7842_v9  ;;  %v7942_v5 = vsel %vm5463_vm8, %v14801_v7, 0.0 }
0x264e   :  { %7943 = vadd.xlane.f32.xlu1 %v7942_v5  ;;  %v7812_v24 = vpop.xlane.xlu1 %7811 }
0x264f   :  { %11922 = vpow2.f32 %v7889_v50  ;;  %v7840_v12 = vsub.f32 %v14704_v37, %v7812_v24 }
0x2650   :  { %v14806_v41 = vpop.eup %11912 }
0x2651   :  { %v14808_v18 = vpop.eup %11914  ;;  %v7885_v32 = vmul.f32 1.442695, %v7840_v12  ;;  %v7951_v0 = vsel %vm5463_vm8, %v14806_v41, 0.0 }
0x2652   :  { %7952 = vadd.xlane.f32.xlu1 %v7951_v0  ;;  %v7936_v14 = vsel %vm5463_vm8, %v14808_v18, 0.0 }
0x2653   :  { %11924 = vpow2.f32 %v7885_v32  ;;  %7937 = vadd.xlane.f32.xlu0 %v7936_v14 }
0x2654   :  { %v14814_v15 = vpop.eup %11916 }
0x2655   :  { %v7945_v1 = vsel %vm5463_vm8, %v14814_v15, 0.0 }
0x2656   :  { %v14818_v37 = vpop.eup %11918  ;;  %7946 = vadd.xlane.f32.xlu1 %v7945_v1 }
0x2657   :  { %v7948_v26 = vsel %vm5463_vm8, %v14818_v37, 0.0 }
0x2658   :  { %v14822_v47 = vpop.eup %11920  ;;  %7949 = vadd.xlane.f32.xlu0 %v7948_v26  ;;  %v11353_v26 = vunpack.i.l.bf16 %v14554_v55 }
0x2659   :  { %v7939_v3 = vsel %vm5463_vm8, %v14822_v47, 0.0 }
0x265a   :  { %v7899_v25 = vpop.xlane.xlu0 %7898  ;;  %7940 = vadd.xlane.f32.xlu1 %v7939_v3 }
0x265b   :  { %11926 = vrcp.f32 %v7899_v25 }
0x265c   :  { %v14826_v31 = vpop.eup %11922 }
0x265d   :  { %v7960_v4 = vsel %vm5463_vm8, %v14826_v31, 0.0 }
0x265e   :  { %v7893_v11 = vpop.xlane.xlu0 %7892  ;;  %7961 = vadd.xlane.f32.xlu1 %v7960_v4 }
0x265f   :  { %11928 = vrcp.f32 %v7893_v11 }
0x2660   :  { %v14830_v53 = vpop.eup %11924  ;;  %v7896_v33 = vpop.xlane.xlu1 %7895 }
0x2661   :  { %11930 = vrcp.f32 %v7896_v33  ;;  %v7954_v40 = vsel %vm5463_vm8, %v14830_v53, 0.0 }
0x2662   :  { %7955 = vadd.xlane.f32.xlu0 %v7954_v40  ;;  %v7815_v27 = vpop.xlane.xlu0 %7814 }
0x2663   :  { %v7841_v28 = vsub.f32 %v14719_v29, %v7815_v27  ;;  %v8148_v29 = vsel %vm245_vm0, %v14574_v8, 0  ;;  %v11358_v27 = vunpack.i.l.bf16 %v14674_v59 }
0x2664   :  { %v14854_v55 = vpop.permute.xlu1 %11366 }
0x2665   :  { %v7887_v23 = vmul.f32 1.442695, %v7841_v28 }
0x2666   :  { %v14856_v8 = vpop.permute.xlu0 %11361 }
0x2667   :  { %11932 = vpow2.f32 %v7887_v23 }
0x2668   :  { %v11927_v9 = vpop.eup %11926 }
0x2669   :  { %v7989_v24 = vmul.f32 %v11927_v9, %v14712_v36 }
0x266b   :  { %v8012_v14 = vpack.c.bf16 %v7989_v24, %v7989_v24 }
0x266c   :  { %v11929_v50 = vpop.eup %11928 }
0x266d   :  { %v7987_v12 = vmul.f32 %v11929_v50, %v14716_v60  ;;  %v7164_v60 = vpack.c.bf16 %v11353_v26, %v11353_v26  ;;  %v8205_v50 = vsel %vm245_vm0, %v14583_v48, 0 }
0x266e   :  { %v11931_v5 = vpop.eup %11930 }
0x266f   :  { %v7988_v32 = vmul.f32 %v11931_v5, %v14723_v54 }
0x2671   :  { %v8011_v0 = vpack.c.bf16 %v7988_v32, %v7987_v12 }
0x2673   :  { %10746 = vmatprep.mubr.msk.bf16.mxu0 %vm5463_vm8, %v8011_v0 }
0x2674   :  { %v14839_v1 = vpop.eup %11932  ;;  %10747 = vmatmul.mubr.msk.bf16.vlgmr.msra.gmra.mxu0 %vm5463_vm8, %v8012_v14 }
0x2675   :  { %10759 = vmatpush3.bf16.msra.mxu0 %v8148_v29  ;;  %v7957_v36 = vsel %vm5463_vm8, %v14839_v1, 0.0 }
0x2676   :  { %10760 = vmatprep.subr.bf16.mxu0 %v14552_v20  ;;  %7958 = vadd.xlane.f32.xlu1 %v7957_v36 }
0x2678   :  { %7147 = vrot.lane.b32.xlu0 %v14484_v2, %s12089_s21 }
0x2679   :  { %10761 = vmatpush3.bf16.msra.mxu0 %v14552_v20 }
0x267a   :  { %10928 = vmatprep.subr.msk.bf16.mxu0 %vm245_vm0, %v7164_v60 }
0x2687   :  { %11371 = vrot.lane.b32.xlu1 %v14421_v62, %s12089_s21  ;;  %v11359_v62 = vunpack.i.h.bf16 %v14674_v59  ;;  %s15211_s21 = sld [smem:[#allocation28_spill]] }
0x2689   :  { %v7161_v9 = vpack.c.bf16 %v11359_v62, %v11358_v27 }
0x2695   :  { %v7905_v54 = vpop.xlane.xlu1 %7904 }
0x2697   :  { %v7908_v3 = vpop.xlane.xlu0 %7907 }
0x2698   :  { %11934 = vrcp.f32 %v7908_v3 }
0x2699   :  { %11936 = vrcp.f32 %v7905_v54 }
0x269b   :  { %v7902_v25 = vpop.xlane.xlu0 %7901 }
0x269c   :  { %11938 = vrcp.f32 %v7902_v25 }
0x26a5   :  { %v11935_v4 = vpop.eup %11934 }
0x26a6   :  { %v11937_v11 = vpop.eup %11936  ;;  %v7992_v20 = vmul.f32 %v11935_v4, %v14739_v17  ;;  %v14869_v17 = vpack.c.bf16 %v14695_v45, %v14695_v45 }
0x26a7   :  { %v7991_v40 = vmul.f32 %v11937_v11, %v14737_v56 }
0x26a8   :  { %v8014_v23 = vpack.c.bf16 %v7992_v20, %v7992_v20 }
0x26a9   :  { %v11939_v2 = vpop.eup %11938 }
0x26aa   :  { %v7990_v33 = vmul.f32 %v11939_v2, %v14745_v46 }
0x26ac   :  { %v8013_v28 = vpack.c.bf16 %v7991_v40, %v7990_v33 }
0x26ae   :  { %10754 = vmatprep.mubr.msk.bf16.mxu1 %vm5463_vm8, %v8013_v28 }
0x26af   :  { %10755 = vmatmul.mubr.msk.bf16.vlgmr.msra.gmra.mxu1 %vm5463_vm8, %v8014_v23  ;;  %v11364_v23 = vunpack.i.h.bf16 %v14856_v8 }
0x26b0   :  { %10767 = vmatpush3.bf16.msra.mxu1 %v8205_v50 }
0x26b1   :  { %10768 = vmatprep.subr.bf16.mxu1 %v7161_v9 }
0x26b4   :  { %10769 = vmatpush3.bf16.msra.mxu1 %v7161_v9  ;;  %v11363_v9 = vunpack.i.l.bf16 %v14856_v8 }
0x26b5   :  { %10929 = vmatprep.subr.msk.bf16.mxu1 %vm245_vm0, %v14869_v17 }
0x26bb   :  { %v7917_v59 = vpop.xlane.xlu1 %7916 }
0x26bc   :  { %11940 = vrcp.f32 %v7917_v59 }
0x26bf   :  { %v7911_v56 = vpop.xlane.xlu1 %7910 }
0x26c0   :  { %11942 = vrcp.f32 %v7911_v56 }
0x26c1   :  { %v7914_v46 = vpop.xlane.xlu0 %7913 }
0x26c2   :  { %11944 = vrcp.f32 %v7914_v46 }
0x26c7   :  { %v7926_v5 = vpop.xlane.xlu0 %7925 }
0x26c8   :  { %11946 = vrcp.f32 %v7926_v5  ;;  %v11369_v5 = vunpack.i.h.bf16 %v14854_v55 }
0x26c9   :  { %v11941_v12 = vpop.eup %11940 }
0x26ca   :  { %v7995_v45 = vmul.f32 %v11941_v12, %v14755_v6  ;;  %v8262_v6 = vsel %vm245_vm0, %v7164_v60, 0  ;;  %v7167_v12 = vpack.c.bf16 %v11364_v23, %v11363_v9 }
0x26cb   :  { %v7935_v24 = vpop.xlane.xlu1 %7934 }
0x26cc   :  { %v7920_v32 = vpop.xlane.xlu0 %7919  ;;  %11948 = vrcp.f32 %v7935_v24  ;;  %v8016_v3 = vpack.c.bf16 %v7995_v45, %v7995_v45 }
0x26cd   :  { %v11943_v48 = vpop.eup %11942 }
0x26ce   :  { %v7993_v26 = vmul.f32 %v11943_v48, %v14760_v21  ;;  %v7168_v21 = vpack.c.bf16 %v14691_v38, %v14691_v38 }
0x26cf   :  { %v11945_v0 = vpop.eup %11944  ;;  %v7929_v14 = vpop.xlane.xlu1 %7928 }
0x26d0   :  { %11950 = vrcp.f32 %v7929_v14  ;;  %v7994_v29 = vmul.f32 %v11945_v0, %v14765_v16 }
0x26d1   :  { %11952 = vrcp.f32 %v7920_v32  ;;  %v7932_v36 = vpop.xlane.xlu0 %7931 }
0x26d2   :  { %11954 = vrcp.f32 %v7932_v36  ;;  %v8015_v54 = vpack.c.bf16 %v7994_v29, %v7993_v26 }
0x26d3   :  { %v7923_v25 = vpop.xlane.xlu1 %7922 }
0x26d4   :  { %11956 = vrcp.f32 %v7923_v25  ;;  %10762 = vmatprep.mubr.msk.bf16.mxu0 %vm5463_vm8, %v8015_v54 }
0x26d5   :  { %10763 = vmatmul.mubr.msk.bf16.vlgmr.msra.gmra.mxu0 %vm5463_vm8, %v8016_v3  ;;  %v11947_v16 = vpop.eup %11946 }
0x26d6   :  { %10775 = vmatpush3.bf16.msra.mxu0 %v8262_v6  ;;  %v7998_v50 = vmul.f32 %v11947_v16, %v14771_v51  ;;  %v8376_v51 = vsel %vm245_vm0, %v7168_v21, 0 }
0x26d7   :  { %10776 = vmatprep.subr.bf16.mxu0 %v14561_v22  ;;  %v7944_v4 = vpop.xlane.xlu1 %7943 }
0x26d8   :  { %11958 = vrcp.f32 %v7944_v4  ;;  %v8018_v48 = vpack.c.bf16 %v7998_v50, %v7998_v50 }
0x26d9   :  { %v11949_v2 = vpop.eup %11948 }
0x26da   :  { %10777 = vmatpush3.bf16.msra.mxu0 %v14561_v22  ;;  %v8001_v60 = vmul.f32 %v11949_v2, %v14777_v13 }
0x26db   :  { %10930 = vmatprep.subr.msk.bf16.mxu0 %vm245_vm0, %v7168_v21  ;;  %v7953_v11 = vpop.xlane.xlu1 %7952 }
0x26dc   :  { %v7938_v33 = vpop.xlane.xlu0 %7937  ;;  %11960 = vrcp.f32 %v7953_v11 }
0x26dd   :  { %v11951_v20 = vpop.eup %11950 }
0x26de   :  { %v11953_v40 = vpop.eup %11952  ;;  %v7999_v28 = vmul.f32 %v11951_v20, %v14786_v49  ;;  %v11368_v49 = vunpack.i.l.bf16 %v14854_v55 }
0x26df   :  { %v11955_v62 = vpop.eup %11954  ;;  %v7947_v27 = vpop.xlane.xlu1 %7946  ;;  %v7996_v13 = vmul.f32 %v11953_v40, %v14779_v52  ;;  %v8319_v52 = vsel %vm245_vm0, %v14869_v17, 0 }
0x26e0   :  { %11962 = vrcp.f32 %v7947_v27  ;;  %v8000_v38 = vmul.f32 %v11955_v62, %v14791_v63  ;;  %v8020_v63 = vpack.c.bf16 %v8001_v60, %v8001_v60 }
0x26e1   :  { %v11957_v22 = vpop.eup %11956  ;;  %11964 = vrcp.f32 %v7938_v33  ;;  %v7950_v59 = vpop.xlane.xlu0 %7949 }
0x26e2   :  { %11966 = vrcp.f32 %v7950_v59  ;;  %v8019_v56 = vpack.c.bf16 %v8000_v38, %v7999_v28  ;;  %v7997_v46 = vmul.f32 %v11957_v22, %v14796_v57  ;;  %v7165_v57 = vpack.c.bf16 %v11369_v5, %v11368_v49 }
0x26e3   :  { %v7941_v24 = vpop.xlane.xlu1 %7940 }
0x26e4   :  { %11968 = vrcp.f32 %v7941_v24  ;;  %10778 = vmatprep.mubr.msk.bf16.mxu0 %vm5463_vm8, %v8019_v56  ;;  %v8017_v8 = vpack.c.bf16 %v7997_v46, %v7996_v13 }
0x26e5   :  { %10779 = vmatmul.mubr.msk.bf16.vlgmr.msra.gmra.mxu0 %vm5463_vm8, %v8020_v63  ;;  %v11959_v55 = vpop.eup %11958 }
0x26e6   :  { %10791 = vmatpush3.bf16.msra.mxu0 %v8376_v51  ;;  %10770 = vmatprep.mubr.msk.bf16.mxu1 %vm5463_vm8, %v8017_v8  ;;  %v8004_v6 = vmul.f32 %v11959_v55, %v14801_v7  ;;  %v11517_v55 = vld [vmem:[%s15200_s15 + $0x30] sm:$0xff]  }
0x26e7   :  { %10792 = vmatprep.subr.bf16.mxu0 %v7167_v12  ;;  %10771 = vmatmul.mubr.msk.bf16.vlgmr.msra.gmra.mxu1 %vm5463_vm8, %v8018_v48  ;;  %v11516_v48 = vld [vmem:[%s15200_s15 + $0x38] sm:$0xff]  }
0x26e8   :  { %10783 = vmatpush3.bf16.msra.mxu1 %v8319_v52  ;;  %v8022_v2 = vpack.c.bf16 %v8004_v6, %v8004_v6 }
0x26e9   :  { %10784 = vmatprep.subr.bf16.mxu1 %v7165_v57  ;;  %v11961_v0 = vpop.eup %11960 }
0x26ea   :  { %10793 = vmatpush3.bf16.msra.mxu0 %v7167_v12  ;;  %v8007_v29 = vmul.f32 %v11961_v0, %v14806_v41 }
0x26eb   :  { %v7956_v32 = vpop.xlane.xlu0 %7955  ;;  %10806 = vmatprep.subr.bf16.mxu0 %v12080_v43 }
0x26ec   :  { %10785 = vmatpush3.bf16.msra.mxu1 %v7165_v57  ;;  %v8024_v11 = vpack.c.bf16 %v8007_v29, %v8007_v29  ;;  %v11519_v29 = vld [vmem:[%s15200_s15 + $0x20] sm:$0xff]  }
0x26ed   :  { %v11963_v45 = vpop.eup %11962 }
0x26ee   :  { %v11965_v14 = vpop.eup %11964  ;;  %v8005_v54 = vmul.f32 %v11963_v45, %v14814_v15 }
0x26ef   :  { %v11967_v26 = vpop.eup %11966  ;;  %v7148_v36 = vpop.permute.xlu0 %7147  ;;  %v8002_v21 = vmul.f32 %v11965_v14, %v14808_v18  ;;  %v11518_v14 = vld [vmem:[%s15200_s15 + $0x28] sm:$0xff]  }
0x26f0   :  { %v7170_v17 = vpack.c.bf16 %v7148_v36, %v7148_v36  ;;  %v8006_v3 = vmul.f32 %v11967_v26, %v14818_v37  ;;  %v7962_v18 = vpop.xlane.xlu1 %7961 }
0x26f1   :  { %v11969_v25 = vpop.eup %11968  ;;  %11970 = vrcp.f32 %v7962_v18 }
0x26f2   :  { %10931 = vmatprep.subr.msk.bf16.mxu1 %vm245_vm0, %v7170_v17  ;;  %v8023_v4 = vpack.c.bf16 %v8006_v3, %v8005_v54  ;;  %v8003_v16 = vmul.f32 %v11969_v25, %v14822_v47  ;;  %v8433_v7 = vsel %vm245_vm0, %v7170_v17, 0  ;;  %11972 = vrcp.f32 %v7956_v32 }
0x26f4   :  { %10794 = vmatprep.mubr.msk.bf16.mxu0 %vm5463_vm8, %v8023_v4  ;;  %v8021_v41 = vpack.c.bf16 %v8003_v16, %v8002_v21 }
0x26f5   :  { %10795 = vmatmul.mubr.msk.bf16.vlgmr.msra.gmra.mxu0 %vm5463_vm8, %v8024_v11 }
0x26f6   :  { %10786 = vmatprep.mubr.msk.bf16.mxu1 %vm5463_vm8, %v8021_v41  ;;  %10814 = vmatprep.mubr.msk.bf16.mxu0 %vm12088_vm1, %v12080_v43 }
0x26f7   :  { %10787 = vmatmul.mubr.msk.bf16.vlgmr.msra.gmra.mxu1 %vm5463_vm8, %v8022_v2  ;;  %10807 = vmatpush3.bf16.msra.mxu0 %v11516_v48 }
0x26f8   :  { %10799 = vmatpush3.bf16.msra.mxu1 %v8433_v7  ;;  %10808 = vmatprep.subr.bf16.mxu0 %v12080_v43 }
0x26fb   :  { %10809 = vmatpush3.bf16.msra.mxu0 %v11517_v55 }
0x26fc   :  { %10810 = vmatprep.subr.bf16.mxu0 %v12080_v43 }
0x26fe   :  { %v11971_v40 = vpop.eup %11970 }
0x26ff   :  { %v7959_v15 = vpop.xlane.xlu1 %7958  ;;  %v11973_v62 = vpop.eup %11972  ;;  %v8010_v27 = vmul.f32 %v11971_v40, %v14826_v31  ;;  %10811 = vmatpush3.bf16.msra.mxu0 %v11518_v14 }
0x2700   :  { %11974 = vrcp.f32 %v7959_v15  ;;  %v8008_v28 = vmul.f32 %v11973_v62, %v14830_v53  ;;  %10812 = vmatprep.subr.bf16.mxu0 %v12080_v43 }
0x2701   :  { %v8026_v23 = vpack.c.bf16 %v8010_v27, %v8010_v27 }
0x2703   :  { %v11372_v37 = vpop.permute.xlu1 %11371  ;;  %10813 = vmatpush3.bf16.msra.mxu0 %v11519_v29 }
0x2704   :  { %v11374_v47 = vunpack.i.h.bf16 %v11372_v37  ;;  %v11373_v20 = vunpack.i.l.bf16 %v11372_v37  ;;  %10846 = vmatprep.subr.bf16.mxu0 %v12080_v43 }
0x2706   :  { %v7169_v33 = vpack.c.bf16 %v11374_v47, %v11373_v20 }
0x2708   :  { %10800 = vmatprep.subr.bf16.mxu1 %v7169_v33 }
0x2709   :  { %10801 = vmatpush3.bf16.msra.mxu1 %v7169_v33 }
0x270a   :  { %10826 = vmatprep.subr.bf16.mxu1 %v12080_v43 }
0x270d   :  { %v11975_v60 = vpop.eup %11974 }
0x270e   :  { %v8009_v38 = vmul.f32 %v11975_v60, %v14839_v1 }
0x2710   :  { %v8025_v22 = vpack.c.bf16 %v8009_v38, %v8008_v28 }
0x2712   :  { %10802 = vmatprep.mubr.msk.bf16.mxu1 %vm5463_vm8, %v8025_v22 }
0x2713   :  { %10803 = vmatmul.mubr.msk.bf16.vlgmr.msra.gmra.mxu1 %vm5463_vm8, %v8026_v23 }
0x2714   :  { %10834 = vmatprep.mubr.msk.bf16.mxu1 %vm12088_vm1, %v12080_v43 }
0x2734   :  { %v14924_v9 = vpop.f32.mrf.mxu0 }
0x2736   :  { %v14926_v50 = vpop.f32.mrf.mxu0 }
0x2738   :  { %v10749_v59 = vpop.f32.mrf.mxu0 }
0x273a   :  { %v14932_v56 = vpop.f32.mrf.mxu0 }
0x276f   :  { %v14928_v31 = vpop.f32.mrf.mxu1 }
0x2771   :  { %v14930_v53 = vpop.f32.mrf.mxu1 }
0x2773   :  { %v10757_v1 = vpop.f32.mrf.mxu1 }
0x2775   :  { %v14935_v24 = vpop.f32.mrf.mxu1 }
0x2795   :  { %v10764_v13 = vpop.f32.mrf.mxu0 }
0x2797   :  { %v8184_v46 = vpop.f32.mrf.mxu0 }
0x2799   :  { %v10765_v5 = vpop.f32.mrf.mxu0 }
0x279b   :  { %v8187_v49 = vpop.f32.mrf.mxu0 }
0x279c   :  { %v11375_v63 = vpack.i.bf16 %v8187_v49, %v8184_v46 }
0x279e   :  { %11376 = vrot.lane.b32.xlu0 %v11375_v63, %s12082_s26 }
0x27a5   :  { %v10780_v8 = vpop.f32.mrf.mxu0 }
0x27a7   :  { %v10772_v51 = vpop.f32.mrf.mxu1  ;;  %v8298_v12 = vpop.f32.mrf.mxu0 }
0x27a9   :  { %v8241_v52 = vpop.f32.mrf.mxu1  ;;  %v10781_v57 = vpop.f32.mrf.mxu0 }
0x27aa   :  { %v11390_v26 = vpack.i.bf16 %v8241_v52, %v10764_v13 }
0x27ab   :  { %v10773_v32 = vpop.f32.mrf.mxu1  ;;  %v8301_v0 = vpop.f32.mrf.mxu0 }
0x27ac   :  { %v11380_v45 = vpack.i.bf16 %v8301_v0, %v8298_v12 }
0x27ad   :  { %v8244_v36 = vpop.f32.mrf.mxu1 }
0x27ae   :  { %11381 = vrot.lane.b32.xlu1 %v11380_v45, %s12092_s29  ;;  %v11405_v41 = vpack.i.bf16 %v10772_v51, %v8244_v36 }
0x27b2   :  { %11391 = vrot.lane.b32.xlu1 %v11390_v26, %s12082_s26 }
0x27b5   :  { %v10796_v17 = vpop.f32.mrf.mxu0 }
0x27b7   :  { %v10788_v54 = vpop.f32.mrf.mxu1  ;;  %v8412_v3 = vpop.f32.mrf.mxu0 }
0x27b9   :  { %v8355_v25 = vpop.f32.mrf.mxu1  ;;  %v10797_v6 = vpop.f32.mrf.mxu0 }
0x27ba   :  { %v11395_v11 = vpack.i.bf16 %v8355_v25, %v10780_v8 }
0x27bb   :  { %v10789_v4 = vpop.f32.mrf.mxu1  ;;  %v8415_v21 = vpop.f32.mrf.mxu0 }
0x27bc   :  { %v11385_v16 = vpack.i.bf16 %v8415_v21, %v8412_v3 }
0x27bd   :  { %v8358_v2 = vpop.f32.mrf.mxu1 }
0x27be   :  { %11386 = vrot.lane.b32.xlu0 %v11385_v16, %s12093_s3  ;;  %v11410_v20 = vpack.i.bf16 %v10788_v54, %v8358_v2 }
0x27c2   :  { %11396 = vrot.lane.b32.xlu0 %v11395_v11, %s12092_s29 }
0x27c6   :  { %11406 = vrot.lane.b32.xlu0 %v11405_v41, %s12082_s26  ;;  %s15208_s26 = sld [smem:[#allocation5_spill]] }
0x27d3   :  { %v10804_v7 = vpop.f32.mrf.mxu1 }
0x27d5   :  { %v8469_v18 = vpop.f32.mrf.mxu1 }
0x27d6   :  { %v11400_v15 = vpack.i.bf16 %v8469_v18, %v10796_v17 }
0x27d7   :  { %v10805_v37 = vpop.f32.mrf.mxu1 }
0x27d8   :  { %11401 = vrot.lane.b32.xlu1 %v11400_v15, %s12093_s3 }
0x27d9   :  { %v8472_v47 = vpop.f32.mrf.mxu1 }
0x27da   :  { %v11415_v33 = vpack.i.bf16 %v10804_v7, %v8472_v47 }
0x27dc   :  { %11411 = vrot.lane.b32.xlu1 %v11410_v20, %s12092_s29  ;;  %11416 = vrot.lane.b32.xlu0 %v11415_v33, %s12093_s3 }
0x2810   :  { %v11377_v40 = vpop.permute.xlu0 %11376 }
0x2811   :  { %v11379_v60 = vunpack.i.h.bf16 %v11377_v40  ;;  %v11378_v27 = vunpack.i.l.bf16 %v11377_v40 }
0x2813   :  { %v8556_v23 = vsel %vm387_vm9, %v14932_v56, %v11379_v60  ;;  %v8555_v59 = vsel %vm387_vm9, %v14926_v50, %v11378_v27 }
0x2820   :  { %v11382_v62 = vpop.permute.xlu1 %11381 }
0x2821   :  { %v11384_v28 = vunpack.i.h.bf16 %v11382_v62  ;;  %v11383_v38 = vunpack.i.l.bf16 %v11382_v62 }
0x2823   :  { %v8561_v46 = vsel %vm2068_vm4, %v8555_v59, %v11383_v38  ;;  %v8562_v5 = vsel %vm2068_vm4, %v8556_v23, %v11384_v28 }
0x2824   :  { %v11392_v51 = vpop.permute.xlu1 %11391 }
0x2825   :  { %v11394_v12 = vunpack.i.h.bf16 %v11392_v51  ;;  %v11393_v50 = vunpack.i.l.bf16 %v11392_v51 }
0x2827   :  { %v8558_v32 = vsel %vm387_vm9, %v14930_v53, %v11394_v12  ;;  %v8557_v0 = vsel %vm387_vm9, %v14924_v9, %v11393_v50 }
0x2830   :  { %v11387_v22 = vpop.permute.xlu0 %11386 }
0x2831   :  { %v11389_v1 = vunpack.i.h.bf16 %v11387_v22  ;;  %v11388_v13 = vunpack.i.l.bf16 %v11387_v22 }
0x2833   :  { %v8568_v49 = vsel %vm2073_vm6, %v8562_v5, %v11389_v1  ;;  %v8567_v63 = vsel %vm2073_vm6, %v8561_v46, %v11388_v13 }
0x2834   :  { %v8573_v8 = vpack.c.bf16 %v8568_v49, %v8567_v63  ;;  %v11397_v56 = vpop.permute.xlu0 %11396 }
0x2835   :  { %v11399_v48 = vunpack.i.h.bf16 %v11397_v56  ;;  %v11398_v52 = vunpack.i.l.bf16 %v11397_v56 }
0x2836   :  { %10815 = vmatmul.mubr.msk.bf16.vlgmr.msra.gmra.mxu0 %vm663_vm14, %v8573_v8 }
0x2837   :  { %10818 = vmatprep.mubr.msk.bf16.mxu0 %vm12088_vm1, %v12080_v43  ;;  %v8564_v26 = vsel %vm2068_vm4, %v8558_v32, %v11399_v48  ;;  %v8563_v29 = vsel %vm2068_vm4, %v8557_v0, %v11398_v52 }
0x2838   :  { %v11407_v57 = vpop.permute.xlu0 %11406 }
0x2839   :  { %v11409_v36 = vunpack.i.h.bf16 %v11407_v57  ;;  %v11408_v17 = vunpack.i.l.bf16 %v11407_v57 }
0x283b   :  { %v8560_v11 = vsel %vm387_vm9, %v14928_v31, %v11409_v36  ;;  %v8559_v41 = vsel %vm387_vm9, %v14935_v24, %v11408_v17  ;;  %v9755_v24 = vld [vmem:[%s15201_s16 + $0x1] ss:$0 sm:$0xff]  ;;  %vm9129_vm9 = vcmask 50176  }
0x284a   :  { %v11402_v55 = vpop.permute.xlu1 %11401 }
0x284b   :  { %v11404_v45 = vunpack.i.h.bf16 %v11402_v55  ;;  %v11403_v14 = vunpack.i.l.bf16 %v11402_v55 }
0x284d   :  { %v8569_v54 = vsel %vm2073_vm6, %v8563_v29, %v11403_v14  ;;  %v8570_v3 = vsel %vm2073_vm6, %v8564_v26, %v11404_v45 }
0x284e   :  { %v8574_v25 = vpack.c.bf16 %v8570_v3, %v8569_v54  ;;  %v11412_v6 = vpop.permute.xlu1 %11411  ;;  %v11417_v4 = vpop.permute.xlu0 %11416 }
0x284f   :  { %v11414_v21 = vunpack.i.h.bf16 %v11412_v6  ;;  %v11413_v53 = vunpack.i.l.bf16 %v11412_v6  ;;  %v11419_v16 = vunpack.i.h.bf16 %v11417_v4  ;;  %v11418_v9 = vunpack.i.l.bf16 %v11417_v4 }
0x2850   :  { %10819 = vmatmul.mubr.msk.bf16.gmra.mxu0 %vm663_vm14, %v8574_v25 }
0x2851   :  { %v8565_v2 = vsel %vm2068_vm4, %v8559_v41, %v11413_v53  ;;  %v8566_v7 = vsel %vm2068_vm4, %v8560_v11, %v11414_v21  ;;  %10822 = vmatprep.mubr.msk.bf16.mxu0 %vm12088_vm1, %v12080_v43  ;;  %v11520_v53 = vld [vmem:[%s15202_s18 + $0x38] sm:$0xff]  }
0x2852   :  { %v8571_v18 = vsel %vm2073_vm6, %v8565_v2, %v11418_v9  ;;  %v8572_v15 = vsel %vm2073_vm6, %v8566_v7, %v11419_v16  ;;  %10827 = vmatpush3.bf16.msra.mxu1 %v11520_v53  ;;  %v11521_v7 = vld [vmem:[%s15202_s18 + $0x30] sm:$0xff]  }
0x2853   :  { %v8575_v37 = vpack.c.bf16 %v8572_v15, %v8571_v18  ;;  %10828 = vmatprep.subr.bf16.mxu1 %v12080_v43 }
0x2856   :  { %10829 = vmatpush3.bf16.msra.mxu1 %v11521_v7 }
0x2857   :  { %10830 = vmatprep.subr.bf16.mxu1 %v12080_v43 }
0x2858   :  { %10823 = vmatmul.mubr.msk.bf16.gmra.mxu0 %vm663_vm14, %v8575_v37 }
0x2859   :  { %10862 = vmatprep.mubr.msk.bf16.mxu0 %vm12088_vm1, %v12080_v43 }
0x28f6   :  { %v8652_v31 = vpop.f32.mrf.mxu0 }
0x28f7   :  { %v8675_v47 = vadd.f32 %v8652_v31, %v14344_v39 }
0x28f8   :  { %v10816_v20 = vpop.f32.mrf.mxu0 }
0x28f9   :  { %v14988_v33 = vadd.f32 %v9755_v24, %v8675_v47  ;;  %v11522_v47 = vld [vmem:[%s15202_s18 + $0x28] sm:$0xff]  }
0x28fa   :  { %v8655_v40 = vpop.f32.mrf.mxu0  ;;  %10831 = vmatpush3.bf16.msra.mxu1 %v11522_v47  ;;  %v11525_v47 = vld [vmem:[%s15203_s22 + $0x70] sm:$0xff]  }
0x28fb   :  { %v8676_v62 = vadd.f32 %v8655_v40, %v14349_v42  ;;  %v8699_v60 = vsel %vm663_vm14, %v14988_v33, 0.0  ;;  %10832 = vmatprep.subr.bf16.mxu1 %v12080_v43 }
0x28fc   :  { %8700 = vadd.xlane.f32.xlu1 %v8699_v60  ;;  %v10817_v27 = vpop.f32.mrf.mxu0  ;;  %v11524_v60 = vld [vmem:[%s15203_s22 + $0x78] sm:$0xff]  }
0x28fd   :  { %v14993_v28 = vadd.f32 %v9755_v24, %v8676_v62  ;;  %v11523_v62 = vld [vmem:[%s15202_s18 + $0x20] sm:$0xff]   ;;  %10847 = vmatpush3.bf16.msra.mxu0 %v11524_v60  ;;  %v11530_v60 = vld [vmem:[%s15203_s22 + $0x48] sm:$0xff]  }
0x28fe   :  { %10833 = vmatpush3.bf16.msra.mxu1 %v11523_v62  ;;  %10848 = vmatprep.subr.bf16.mxu0 %v12080_v43  ;;  %v11529_v62 = vld [vmem:[%s15203_s22 + $0x50] sm:$0xff]  }
0x28ff   :  { %v8702_v38 = vsel %vm663_vm14, %v14993_v28, 0.0  ;;  %9263 = vmatprep.subr.bf16.mxu1 %v12085_v34 }
0x2900   :  { %8703 = vadd.xlane.f32.xlu0 %v8702_v38 }
0x2901   :  { %10849 = vmatpush3.bf16.msra.mxu0 %v11525_v47 }
0x2902   :  { %10850 = vmatprep.subr.bf16.mxu0 %v12080_v43 }
0x2910   :  { %v8660_v22 = vpop.f32.mrf.mxu0 }
0x2911   :  { %v8677_v39 = vadd.f32 %v8660_v22, %v14354_v58 }
0x2912   :  { %v10820_v23 = vpop.f32.mrf.mxu0 }
0x2913   :  { %v14998_v59 = vadd.f32 %v9755_v24, %v8677_v39 }
0x2914   :  { %v8663_v1 = vpop.f32.mrf.mxu0 }
0x2915   :  { %v8678_v42 = vadd.f32 %v8663_v1, %v14359_v10  ;;  %v8705_v13 = vsel %vm663_vm14, %v14998_v59, 0.0 }
0x2916   :  { %8706 = vadd.xlane.f32.xlu0 %v8705_v13  ;;  %v10821_v46 = vpop.f32.mrf.mxu0 }
0x2917   :  { %v15003_v5 = vadd.f32 %v9755_v24, %v8678_v42  ;;  %v9758_v46 = vld [vmem:[%s15204_s23 + $0x1] ss:$0 sm:$0xff] }
0x2918   :  { %v8668_v49 = vpop.f32.mrf.mxu0 }
0x2919   :  { %v8679_v63 = vadd.f32 %v8668_v49, %v14364_v35  ;;  %v8708_v8 = vsel %vm663_vm14, %v15003_v5, 0.0 }
0x291a   :  { %8709 = vadd.xlane.f32.xlu1 %v8708_v8  ;;  %v10824_v58 = vpop.f32.mrf.mxu0 }
0x291b   :  { %v15008_v56 = vadd.f32 %v9755_v24, %v8679_v63  ;;  %v9759_v58 = vld [vmem:[%s15205_s28 + $0x1] ss:$0 sm:$0xff] }
0x291c   :  { %v8671_v51 = vpop.f32.mrf.mxu0 }
0x291d   :  { %v8680_v10 = vadd.f32 %v8671_v51, %v14369_v61  ;;  %v8711_v12 = vsel %vm663_vm14, %v15008_v56, 0.0 }
0x291e   :  { %8712 = vadd.xlane.f32.xlu0 %v8711_v12  ;;  %v10825_v50 = vpop.f32.mrf.mxu0 }
0x291f   :  { %v15013_v48 = vadd.f32 %v9755_v24, %v8680_v10 }
0x2921   :  { %v8714_v35 = vsel %vm663_vm14, %v15013_v48, 0.0 }
0x2922   :  { %8715 = vadd.xlane.f32.xlu1 %v8714_v35 }
0x2985   :  { %v8701_v52 = vpop.xlane.xlu1 %8700 }
0x2986   :  { %v8717_v57 = vmul.f32 0.015625, %v8701_v52 }
0x2988   :  { %v8723_v55 = vsub.f32 %v14988_v33, %v8717_v57 }
0x2989   :  { %v8704_v32 = vpop.xlane.xlu0 %8703 }
0x298a   :  { %v8718_v0 = vmul.f32 0.015625, %v8704_v32  ;;  %v8729_v45 = vmul.f32 %v8723_v55, %v8723_v55 }
0x298c   :  { %v8724_v61 = vsub.f32 %v14993_v28, %v8718_v0  ;;  %v8735_v14 = vsel %vm663_vm14, %v8729_v45, 0.0 }
0x298d   :  { %8736 = vadd.xlane.f32.xlu0 %v8735_v14 }
0x298e   :  { %v8730_v26 = vmul.f32 %v8724_v61, %v8724_v61 }
0x2990   :  { %v8738_v29 = vsel %vm663_vm14, %v8730_v26, 0.0 }
0x2991   :  { %8739 = vadd.xlane.f32.xlu1 %v8738_v29 }
0x299f   :  { %v8707_v36 = vpop.xlane.xlu0 %8706 }
0x29a0   :  { %v8719_v17 = vmul.f32 0.015625, %v8707_v36 }
0x29a2   :  { %v15022_v54 = vsub.f32 %v14998_v59, %v8719_v17 }
0x29a3   :  { %v8710_v3 = vpop.xlane.xlu1 %8709 }
0x29a4   :  { %v8720_v25 = vmul.f32 0.015625, %v8710_v3  ;;  %v8731_v6 = vmul.f32 %v15022_v54, %v15022_v54 }
0x29a6   :  { %v15027_v4 = vsub.f32 %v15003_v5, %v8720_v25  ;;  %v8741_v21 = vsel %vm663_vm14, %v8731_v6, 0.0 }
0x29a7   :  { %8742 = vadd.xlane.f32.xlu0 %v8741_v21  ;;  %v8713_v16 = vpop.xlane.xlu0 %8712 }
0x29a8   :  { %v8721_v9 = vmul.f32 0.015625, %v8713_v16  ;;  %v8732_v11 = vmul.f32 %v15027_v4, %v15027_v4 }
0x29aa   :  { %v15035_v41 = vsub.f32 %v15008_v56, %v8721_v9  ;;  %v8744_v2 = vsel %vm663_vm14, %v8732_v11, 0.0 }
0x29ab   :  { %8745 = vadd.xlane.f32.xlu1 %v8744_v2  ;;  %v8716_v18 = vpop.xlane.xlu1 %8715 }
0x29ac   :  { %v8722_v15 = vmul.f32 0.015625, %v8716_v18  ;;  %v8733_v37 = vmul.f32 %v15035_v41, %v15035_v41 }
0x29ae   :  { %v15043_v31 = vsub.f32 %v15013_v48, %v8722_v15  ;;  %v8747_v24 = vsel %vm663_vm14, %v8733_v37, 0.0 }
0x29af   :  { %8748 = vadd.xlane.f32.xlu0 %v8747_v24 }
0x29b0   :  { %v8734_v20 = vmul.f32 %v15043_v31, %v15043_v31 }
0x29b2   :  { %v8750_v40 = vsel %vm663_vm14, %v8734_v20, 0.0  ;;  %v11527_v20 = vld [vmem:[%s15203_s22 + $0x60] sm:$0xff]  }
0x29b3   :  { %8751 = vadd.xlane.f32.xlu1 %v8750_v40  ;;  %v11528_v40 = vld [vmem:[%s15203_s22 + $0x58] sm:$0xff]  }
0x2a16   :  { %v8737_v27 = vpop.xlane.xlu0 %8736 }
0x2a17   :  { %v8753_v38 = vmul.f32 0.015625, %v8737_v27  ;;  %v11531_v27 = vld [vmem:[%s15203_s22 + $0x40] sm:$0xff]  }
0x2a19   :  { %v8759_v22 = vadd.f32 1e-05, %v8753_v38  ;;  %v9769_v38 = vld [vmem:[%s15206_s1 + $0x1] ss:$0 sm:$0xff] }
0x2a1a   :  { %v8740_v39 = vpop.xlane.xlu1 %8739 }
0x2a1b   :  { %11976 = vrsqrt.f32 %v8759_v22  ;;  %v8754_v23 = vmul.f32 0.015625, %v8740_v39 }
0x2a1d   :  { %v8760_v1 = vadd.f32 1e-05, %v8754_v23 }
0x2a1f   :  { %11978 = vrsqrt.f32 %v8760_v1 }
0x2a28   :  { %v11977_v42 = vpop.eup %11976 }
0x2a29   :  { %v8771_v13 = vmul.f32 %v11977_v42, %v8723_v55 }
0x2a2b   :  { %v8783_v63 = vmul.f32 %v9758_v46, %v8771_v13 }
0x2a2c   :  { %v11979_v49 = vpop.eup %11978 }
0x2a2d   :  { %v8772_v8 = vmul.f32 %v11979_v49, %v8724_v61  ;;  %v8795_v50 = vadd.f32 %v9759_v58, %v8783_v63 }
0x2a2f   :  { %v8784_v51 = vmul.f32 %v9758_v46, %v8772_v8 }
0x2a30   :  { %v8743_v10 = vpop.xlane.xlu0 %8742 }
0x2a31   :  { %v8755_v12 = vmul.f32 0.015625, %v8743_v10  ;;  %v8796_v35 = vadd.f32 %v9759_v58, %v8784_v51 }
0x2a33   :  { %v8761_v52 = vadd.f32 1e-05, %v8755_v12  ;;  %v8801_v57 = vpack.c.bf16 %v8796_v35, %v8795_v50 }
0x2a34   :  { %v8746_v32 = vpop.xlane.xlu1 %8745 }
0x2a35   :  { %11980 = vrsqrt.f32 %v8761_v52  ;;  %v8756_v0 = vmul.f32 0.015625, %v8746_v32  ;;  %10835 = vmatmul.mubr.msk.bf16.vlgmr.msra.gmra.mxu1 %vm663_vm14, %v8801_v57 }
0x2a36   :  { %10838 = vmatprep.mubr.msk.bf16.mxu1 %vm12088_vm1, %v12080_v43 }
0x2a37   :  { %v8762_v55 = vadd.f32 1e-05, %v8756_v0 }
0x2a38   :  { %v8749_v45 = vpop.xlane.xlu0 %8748 }
0x2a39   :  { %11982 = vrsqrt.f32 %v8762_v55  ;;  %v8757_v61 = vmul.f32 0.015625, %v8749_v45 }
0x2a3b   :  { %v8763_v14 = vadd.f32 1e-05, %v8757_v61 }
0x2a3c   :  { %v8752_v26 = vpop.xlane.xlu1 %8751 }
0x2a3d   :  { %11984 = vrsqrt.f32 %v8763_v14  ;;  %v8758_v29 = vmul.f32 0.015625, %v8752_v26 }
0x2a3f   :  { %v8764_v36 = vadd.f32 1e-05, %v8758_v29 }
0x2a41   :  { %11986 = vrsqrt.f32 %v8764_v36 }
0x2a42   :  { %v11981_v17 = vpop.eup %11980 }
0x2a43   :  { %v8773_v3 = vmul.f32 %v11981_v17, %v15022_v54 }
0x2a45   :  { %v8785_v21 = vmul.f32 %v9758_v46, %v8773_v3 }
0x2a46   :  { %v11983_v25 = vpop.eup %11982 }
0x2a47   :  { %v8774_v6 = vmul.f32 %v11983_v25, %v15027_v4  ;;  %v8797_v11 = vadd.f32 %v9759_v58, %v8785_v21 }
0x2a49   :  { %v8786_v53 = vmul.f32 %v9758_v46, %v8774_v6 }
0x2a4a   :  { %v11985_v16 = vpop.eup %11984 }
0x2a4b   :  { %v8775_v9 = vmul.f32 %v11985_v16, %v15035_v41  ;;  %v8798_v2 = vadd.f32 %v9759_v58, %v8786_v53 }
0x2a4d   :  { %v8802_v7 = vpack.c.bf16 %v8798_v2, %v8797_v11  ;;  %v8787_v54 = vmul.f32 %v9758_v46, %v8775_v9 }
0x2a4e   :  { %v11987_v18 = vpop.eup %11986 }
0x2a4f   :  { %v8776_v15 = vmul.f32 %v11987_v18, %v15043_v31  ;;  %10839 = vmatmul.mubr.msk.bf16.gmra.mxu1 %vm663_vm14, %v8802_v7  ;;  %v8799_v37 = vadd.f32 %v9759_v58, %v8787_v54  ;;  %v11526_v31 = vld [vmem:[%s15203_s22 + $0x68] sm:$0xff]  }
0x2a50   :  { %10842 = vmatprep.mubr.msk.bf16.mxu1 %vm12088_vm1, %v12080_v43  ;;  %10851 = vmatpush3.bf16.msra.mxu0 %v11526_v31 }
0x2a51   :  { %v8788_v4 = vmul.f32 %v9758_v46, %v8776_v15  ;;  %10852 = vmatprep.subr.bf16.mxu0 %v12080_v43 }
0x2a53   :  { %v8800_v24 = vadd.f32 %v9759_v58, %v8788_v4 }
0x2a54   :  { %10853 = vmatpush3.bf16.msra.mxu0 %v11527_v20 }
0x2a55   :  { %v8803_v41 = vpack.c.bf16 %v8800_v24, %v8799_v37  ;;  %10854 = vmatprep.subr.bf16.mxu0 %v12080_v43 }
0x2a57   :  { %10843 = vmatmul.mubr.msk.bf16.gmra.mxu1 %vm663_vm14, %v8803_v41 }
0x2a58   :  { %10855 = vmatpush3.bf16.msra.mxu0 %v11528_v40 }
0x2a59   :  { %10856 = vmatprep.subr.bf16.mxu0 %v12080_v43 }
0x2a5c   :  { %10857 = vmatpush3.bf16.msra.mxu0 %v11529_v62 }
0x2a5d   :  { %10858 = vmatprep.subr.bf16.mxu0 %v12080_v43 }
0x2a60   :  { %10859 = vmatpush3.bf16.msra.mxu0 %v11530_v60 }
0x2a61   :  { %10860 = vmatprep.subr.bf16.mxu0 %v12080_v43 }
0x2a64   :  { %10861 = vmatpush3.bf16.msra.mxu0 %v11531_v27 }
0x2af5   :  { %v8888_v22 = vpop.f32.mrf.mxu1 }
0x2af6   :  { %v8889_v39 = vadd.f32 %v9769_v38, %v8888_v22 }
0x2af7   :  { %v10836_v23 = vpop.f32.mrf.mxu1 }
0x2af8   :  { %v8917_v1 = vmul.f32 0.70710677, %v8889_v39  ;;  %v8911_v51 = vmul.f32 0.5, %v8889_v39  ;;  %v9794_v23 = vld [vmem:[%s15207_s2 + $0x1] ss:$0 sm:$0xff] }
0x2af9   :  { %v8891_v42 = vpop.f32.mrf.mxu1 }
0x2afa   :  { %11988 = verf.f32 %v8917_v1  ;;  %v8892_v13 = vadd.f32 %v9769_v38, %v8891_v42 }
0x2afb   :  { %v10837_v46 = vpop.f32.mrf.mxu1 }
0x2afc   :  { %v8918_v49 = vmul.f32 0.70710677, %v8892_v13  ;;  %v8912_v10 = vmul.f32 0.5, %v8892_v13 }
0x2afe   :  { %11990 = verf.f32 %v8918_v49 }
0x2b07   :  { %v11989_v63 = vpop.eup %11988 }
0x2b08   :  { %v8929_v8 = vadd.f32 1.0, %v11989_v63 }
0x2b0a   :  { %v8935_v50 = vmul.f32 %v8929_v8, %v8911_v51 }
0x2b0b   :  { %v11991_v58 = vpop.eup %11990 }
0x2b0c   :  { %v8930_v12 = vadd.f32 1.0, %v11991_v58 }
0x2b0e   :  { %v8936_v35 = vmul.f32 %v8930_v12, %v8912_v10 }
0x2b0f   :  { %v8896_v52 = vpop.f32.mrf.mxu1 }
0x2b10   :  { %v8941_v57 = vpack.c.bf16 %v8936_v35, %v8935_v50  ;;  %v8897_v32 = vadd.f32 %v9769_v38, %v8896_v52 }
0x2b11   :  { %v10840_v0 = vpop.f32.mrf.mxu1 }
0x2b12   :  { %v8919_v55 = vmul.f32 0.70710677, %v8897_v32  ;;  %10863 = vmatmul.mubr.bf16.vlgmr.msra.gmra.mxu0 %v8941_v57  ;;  %v8913_v2 = vmul.f32 0.5, %v8897_v32 }
0x2b13   :  { %v8899_v45 = vpop.f32.mrf.mxu1  ;;  %10866 = vmatprep.mubr.msk.bf16.mxu0 %vm12088_vm1, %v12080_v43 }
0x2b14   :  { %11992 = verf.f32 %v8919_v55  ;;  %v8900_v61 = vadd.f32 %v9769_v38, %v8899_v45 }
0x2b15   :  { %v10841_v14 = vpop.f32.mrf.mxu1 }
0x2b16   :  { %v8920_v26 = vmul.f32 0.70710677, %v8900_v61  ;;  %v8914_v7 = vmul.f32 0.5, %v8900_v61 }
0x2b17   :  { %v8904_v29 = vpop.f32.mrf.mxu1 }
0x2b18   :  { %11994 = verf.f32 %v8920_v26  ;;  %v8905_v36 = vadd.f32 %v9769_v38, %v8904_v29 }
0x2b19   :  { %v10844_v17 = vpop.f32.mrf.mxu1 }
0x2b1a   :  { %v8921_v3 = vmul.f32 0.70710677, %v8905_v36  ;;  %v8915_v47 = vmul.f32 0.5, %v8905_v36 }
0x2b1b   :  { %v8907_v25 = vpop.f32.mrf.mxu1 }
0x2b1c   :  { %11996 = verf.f32 %v8921_v3  ;;  %v8908_v6 = vadd.f32 %v9769_v38, %v8907_v25 }
0x2b1d   :  { %v10845_v21 = vpop.f32.mrf.mxu1 }
0x2b1e   :  { %v8922_v53 = vmul.f32 0.70710677, %v8908_v6  ;;  %v8916_v31 = vmul.f32 0.5, %v8908_v6 }
0x2b20   :  { %11998 = verf.f32 %v8922_v53 }
0x2b21   :  { %v11993_v16 = vpop.eup %11992 }
0x2b22   :  { %v8931_v9 = vadd.f32 1.0, %v11993_v16 }
0x2b24   :  { %v8937_v15 = vmul.f32 %v8931_v9, %v8913_v2 }
0x2b25   :  { %v11995_v11 = vpop.eup %11994 }
0x2b26   :  { %v8932_v18 = vadd.f32 1.0, %v11995_v11 }
0x2b28   :  { %v8938_v54 = vmul.f32 %v8932_v18, %v8914_v7 }
0x2b29   :  { %v11997_v4 = vpop.eup %11996 }
0x2b2a   :  { %v8942_v37 = vpack.c.bf16 %v8938_v54, %v8937_v15  ;;  %v8933_v24 = vadd.f32 1.0, %v11997_v4 }
0x2b2c   :  { %10867 = vmatmul.mubr.bf16.gmra.mxu0 %v8942_v37  ;;  %v8939_v40 = vmul.f32 %v8933_v24, %v8915_v47  ;;  %v9112_v47 = vld [vmem:[%s15208_s26] sm:$0x3] }
0x2b2d   :  { %v11999_v41 = vpop.eup %11998  ;;  %10870 = vmatprep.mubr.msk.bf16.mxu0 %vm12088_vm1, %v12080_v43 }
0x2b2e   :  { %v8934_v20 = vadd.f32 1.0, %v11999_v41 }
0x2b30   :  { %v8940_v62 = vmul.f32 %v8934_v20, %v8916_v31  ;;  %v9130_v31 = vsel %vm9129_vm9, %v9112_v47, 0.0 }
0x2b32   :  { %v8943_v60 = vpack.c.bf16 %v8940_v62, %v8939_v40 }
0x2b34   :  { %10871 = vmatmul.mubr.bf16.gmra.mxu0 %v8943_v60 }
0x2bd2   :  { %v9051_v27 = vpop.f32.mrf.mxu0 }
0x2bd3   :  { %v9052_v42 = vadd.f32 %v9794_v23, %v9051_v27  ;;  %v11532_v27 = vld [vmem:[%s15209_s13 + $0x38] sm:$0xff]  }
0x2bd4   :  { %v10864_v38 = vpop.f32.mrf.mxu0  ;;  %9264 = vmatpush1.bf16.msra.mxu1 %v11532_v27 }
0x2bd5   :  { %v9074_v46 = vadd.f32 %v9052_v42, %v14988_v33  ;;  %v11533_v38 = vld [vmem:[%s15209_s13 + $0x30] sm:$0xff]   ;;  %9265 = vmatprep.subr.bf16.mxu1 %v12085_v34 }
0x2bd6   :  { %v9054_v22 = vpop.f32.mrf.mxu0 }
0x2bd7   :  { %v9055_v1 = vadd.f32 %v9794_v23, %v9054_v22  ;;  %v9084_v8 = vmul.f32 %v13558_v19, %v9074_v46 }
0x2bd8   :  { %v10865_v39 = vpop.f32.mrf.mxu0  ;;  %9266 = vmatpush1.bf16.msra.mxu1 %v11533_v38 }
0x2bd9   :  { %v9075_v13 = vadd.f32 %v9055_v1, %v14993_v28  ;;  %v9090_v35 = vsel %vm663_vm14, %v9084_v8, 0.0  ;;  %9267 = vmatprep.subr.bf16.mxu1 %v12085_v34  ;;  %v11535_v8 = vld [vmem:[%s15209_s13 + $0x20] sm:$0xff]  }
0x2bdb   :  { %v9085_v49 = vmul.f32 0.0, %v9075_v13 }
0x2bdd   :  { %v9091_v10 = vsel %vm663_vm14, %v9085_v49, 0.0 }
0x2bde   :  { %v9092_v32 = vadd.f32 %v9091_v10, %v9090_v35  ;;  %v11538_v10 = vld [vmem:[%s15209_s13 + $0x8] sm:$0xff]   ;;  %v12094_v35 = vmov 65535  }
0x2bec   :  { %v9059_v63 = vpop.f32.mrf.mxu0 }
0x2bed   :  { %v9060_v58 = vadd.f32 %v9794_v23, %v9059_v63  ;;  %v11534_v63 = vld [vmem:[%s15209_s13 + $0x28] sm:$0xff]  }
0x2bee   :  { %v10868_v51 = vpop.f32.mrf.mxu0  ;;  %9268 = vmatpush1.bf16.msra.mxu1 %v11534_v63 }
0x2bef   :  { %v9076_v12 = vadd.f32 %v9060_v58, %v14998_v59  ;;  %9269 = vmatprep.subr.bf16.mxu1 %v12085_v34  ;;  %v11536_v58 = vld [vmem:[%s15209_s13 + $0x18] sm:$0xff]   ;;  %v11537_v51 = vld [vmem:[%s15209_s13 + $0x10] sm:$0xff]  }
0x2bf0   :  { %v9062_v50 = vpop.f32.mrf.mxu0 }
0x2bf1   :  { %v9086_v52 = vmul.f32 0.0, %v9076_v12  ;;  %v9063_v57 = vadd.f32 %v9794_v23, %v9062_v50  ;;  %v11539_v12 = vld [vmem:[%s15209_s13] sm:$0xff]  }
0x2bf2   :  { %v10869_v0 = vpop.f32.mrf.mxu0  ;;  %9270 = vmatpush1.bf16.msra.mxu1 %v11535_v8  ;;  %v11540_v50 = vld [vmem:[%s15209_s13 + $0x40] ss:$0 sps:$4 sm:$0xff]  }
0x2bf3   :  { %v9093_v28 = vsel %vm663_vm14, %v9086_v52, 0.0  ;;  %v9077_v45 = vadd.f32 %v9063_v57, %v15003_v5  ;;  %9271 = vmatprep.subr.bf16.mxu1 %v12085_v34  ;;  %v9258_v52 = vsel %vm9257_vm11, 4294967295, %v12094_v35 }
0x2bf4   :  { %v9094_v33 = vadd.f32 %v9093_v28, %v9092_v32  ;;  %v9067_v55 = vpop.f32.mrf.mxu0  ;;  %v9259_v57 = vsel %vm245_vm0, %v9258_v52, 0  ;;  %vm9253_vm0 = vcmask 56320  }
0x2bf5   :  { %v9068_v61 = vadd.f32 %v9794_v23, %v9067_v55  ;;  %v9087_v59 = vmul.f32 %v13558_v19, %v9077_v45  ;;  %v9261_v32 = vand.u32 %v11540_v50, %v9259_v57  ;;  %v9153_v55 = vsub.s32 0, %v13552_v30 }
0x2bf6   :  { %v10872_v14 = vpop.f32.mrf.mxu0  ;;  %v9095_v29 = vrot.slane %v9094_v33, 4  ;;  %9272 = vmatpush1.bf16.msra.mxu1 %v11536_v58  ;;  %v9157_v45 = vsub.s32 1, %v13552_v30 }
0x2bf7   :  { %v9078_v26 = vadd.f32 %v9068_v61, %v15008_v56  ;;  %v9101_v16 = vsel %vm663_vm14, %v9087_v59, 0.0  ;;  %9273 = vmatprep.subr.bf16.mxu1 %v12085_v34  ;;  %v9125_v61 = vld [vmem:[%s15210_s17] sm:$0x3] }
0x2bf8   :  { %v9070_v36 = vpop.f32.mrf.mxu0  ;;  %v9096_v53 = vadd.f32 %v9095_v29, %v9094_v33  ;;  %v9126_v14 = vld [vmem:[%s15211_s21] sm:$0x3]  ;;  %v9158_v29 = vrot.slane %v9125_v61, %v9157_v45 }
0x2bf9   :  { %v9088_v17 = vmul.f32 0.0, %v9078_v26  ;;  %v9071_v3 = vadd.f32 %v9794_v23, %v9070_v36  ;;  %v9154_v26 = vrot.slane %v9125_v61, %v9153_v55 }
0x2bfa   :  { %v10873_v25 = vpop.f32.mrf.mxu0  ;;  %v9097_v56 = vrot.slane %v9096_v53, 2  ;;  %9274 = vmatpush1.bf16.msra.mxu1 %v11537_v51 }
0x2bfb   :  { %v9102_v6 = vsel %vm663_vm14, %v9088_v17, 0.0  ;;  %v9079_v21 = vadd.f32 %v9071_v3, %v15013_v48  ;;  %9275 = vmatprep.subr.bf16.mxu1 %v12085_v34  ;;  %v9167_v17 = vrot.slane %v9126_v14, %v9153_v55  ;;  %v9171_v3 = vrot.slane %v9126_v14, %v9157_v45 }
0x2bfc   :  { %v9103_v5 = vadd.f32 %v9102_v6, %v9101_v16  ;;  %v9098_v19 = vadd.f32 %v9097_v56, %v9096_v53  ;;  %v11543_v56 = vld [vmem:[%s12304_s27] sm:$0xff]  }
0x2bfd   :  { %v9089_v9 = vmul.f32 0.0, %v9079_v21  ;;  %v11541_v21 = vld [vmem:[%s12304_s27 + $0x10] ss:$0 sps:$4 sm:$0xff]  }
0x2bfe   :  { %v9099_v54 = vrot.slane %v9098_v19, 1  ;;  %9276 = vmatpush1.bf16.msra.mxu1 %v11538_v10 }
0x2bff   :  { %v9104_v11 = vsel %vm663_vm14, %v9089_v9, 0.0  ;;  %9277 = vmatprep.subr.bf16.mxu1 %v12085_v34 }
0x2c00   :  { %v9105_v2 = vadd.f32 %v9104_v11, %v9103_v5  ;;  %v9100_v48 = vadd.f32 %v9099_v54, %v9098_v19  ;;  %v9336_v5 = vand.u32 %v11541_v21, %v9259_v57  ;;  %v11542_v11 = vld [vmem:[%s12304_s27 + $0x8] sm:$0xff]  }
0x2c02   :  { %v9106_v7 = vrot.slane %v9105_v2, 4  ;;  %9278 = vmatpush1.bf16.msra.mxu1 %v11539_v12 }
0x2c03   :  { %9293 = vmatprep.subr.bf16.mxu1 %v12085_v34 }
0x2c04   :  { %v9107_v18 = vadd.f32 %v9106_v7, %v9105_v2  ;;  %v9803_v2 = vld [vmem:[%s12299_s12] ss:$0 sm:$0xff] }
0x2c06   :  { %v9108_v15 = vrot.slane %v9107_v18, 2  ;;  %9294 = vmatpush2.bf16.msra.mxu1 %v9261_v32 }
0x2c07   :  { %10874 = vmatprep.subr.bf16.mxu1 %v12080_v43 }
0x2c08   :  { %v9109_v4 = vadd.f32 %v9108_v15, %v9107_v18 }
0x2c0a   :  { %v9110_v37 = vrot.slane %v9109_v4, 1 }
0x2c0c   :  { %v9111_v24 = vadd.f32 %v9110_v37, %v9109_v4  ;;  %v9814_v37 = vld [vmem:[%s12309_s4] ss:$0 sm:$0xff] }
0x2c0e   :  { %v9120_v41 = vsel %vm9115_vm7, %v9111_v24, %v9100_v48 }
0x2c0f   :  { %9121 = vrot.lane.b32.xlu0 %v9120_v41, %s12090_s25  ;;  %s12095_s25 = smov [#allocation2]  }
0x2c10   :  { %s9386_s29 = sshll.u32 %s12095_s25, 4  ;;  %s9387_s29 = int_to_ptr.vmem [resolvable:$true] %s9386_s29 }
0x2c11   :  { %s12011_s27 = scalar_lea.vmem %s9387_s29, 32  ;;  %p12016_p1 = scmp.lt.s32.totalorder %s9387_s29, %s9387_s29 }
0x2c12   :  { %p12012_p0 = scmp.ne.s32.totalorder %s9387_s29, %s12011_s27  ;;  %p12017_p2 = scmp.lt.s32.totalorder %s12011_s27, %s12011_s27 }
0x2c14   :  { %p12018_p3 = por %p12017_p2, %p12016_p1 }
0x2c16   :  { %p12019_p4 = pnand %p12018_p3, %p12012_p0 }
0x2c81   :  { %v9122_v20 = vpop.permute.xlu0 %9121 }
0x2c82   :  { %v9124_v40 = vsel %vm663_vm14, %v13570_v44, %v9122_v20 }
0x2c83   :  { %v9128_v62 = vsel %vm9127_vm10, %v9124_v40, 0.0 }
0x2c84   :  { %v9131_v60 = vadd.f32 %v9130_v31, %v9128_v62 }
0x2c86   :  { %9132 = vadd.xlane.f32.xlu1 %v9131_v60 }
0x2d0f   :  { %v9133_v22 = vpop.xlane.xlu1 %9132 }
0x2d10   :  { %v9135_v39 = vmul.f32 0.0074074073, %v9133_v22 }
0x2d12   :  { %v9136_v23 = vsub.f32 %v9124_v40, %v9135_v39  ;;  %v9137_v1 = vsub.f32 %v9112_v47, %v9135_v39 }
0x2d14   :  { %v9138_v44 = vmul.f32 %v9136_v23, %v9136_v23  ;;  %v9139_v42 = vmul.f32 %v9137_v1, %v9137_v1 }
0x2d16   :  { %v9140_v13 = vsel %vm9127_vm10, %v9138_v44, 0.0  ;;  %v9141_v46 = vsel %vm9129_vm9, %v9139_v42, 0.0 }
0x2d17   :  { %v9142_v49 = vadd.f32 %v9141_v46, %v9140_v13 }
0x2d19   :  { %9143 = vadd.xlane.f32.xlu1 %v9142_v49 }
0x2da2   :  { %v9144_v0 = vpop.xlane.xlu1 %9143 }
0x2da3   :  { %v9145_v28 = vmul.f32 0.0074074073, %v9144_v0 }
0x2da5   :  { %v9146_v33 = vadd.f32 1e-05, %v9145_v28 }
0x2da7   :  { %12000 = vrsqrt.f32 %v9146_v33 }
0x2db4   :  { %v12001_v36 = vpop.eup %12000 }
0x2db5   :  { %v9148_v59 = vmul.f32 %v12001_v36, %v9136_v23  ;;  %v9149_v34 = vmul.f32 %v12001_v36, %v9137_v1 }
0x2db7   :  { %v9161_v25 = vmul.f32 %v9154_v26, %v9148_v59  ;;  %v9162_v6 = vmul.f32 %v9158_v29, %v9149_v34 }
0x2db9   :  { %v9174_v53 = vadd.f32 %v9167_v17, %v9161_v25  ;;  %v9175_v16 = vadd.f32 %v9171_v3, %v9162_v6 }
0x2dbb   :  { %v9176_v9 = vpack.c.bf16 %v9174_v53, %v9174_v53  ;;  %v9177_v30 = vpack.c.bf16 %v9175_v16, %v9175_v16 }
0x2dbd   :  { %9813 = vmatprep.mubr.msk.bf16.mxu1 %vm9253_vm0, %v9177_v30 }
0x2dbe   :  { %9296 = vmatmul.mubr.bf16.vlgmr.msra.gmra.mxu1 %v9176_v9 }
0x2dbf   :  { %10875 = vmatpush3.bf16.msra.mxu1 %v9336_v5  ;;  %10880 = vmatprep.mubr.msk.bf16.mxu1 %vm12088_vm1, %v12080_v43 }
0x2dc0   :  { %10876 = vmatprep.subr.bf16.mxu1 %v12080_v43 }
0x2dc3   :  { %10877 = vmatpush3.bf16.msra.mxu1 %v11542_v11 }
0x2dc4   :  { %10878 = vmatprep.subr.bf16.mxu1 %v12080_v43 }
0x2dc7   :  { %10879 = vmatpush3.bf16.msra.mxu1 %v11543_v56 }
0x2e7e   :  { %v9297_v7 = vpop.f32.mrf.mxu1 }
0x2e7f   :  { %v9298_v18 = vadd.f32 %v9803_v2, %v9297_v7 }
0x2e80   :  { %v9299_v19 = vpop.f32.mrf.mxu1 }
0x2e81   :  { %v9303_v15 = vpack.c.bf16 %v9298_v18, %v9298_v18 }
0x2e82   :  { %v9300_v54 = vpop.f32.mrf.mxu1 }
0x2e83   :  { %10881 = vmatmul.mubr.msk.bf16.vlgmr.msra.gmra.mxu1 %vm9331_vm12, %v9303_v15 }
0x2e84   :  { %v9301_v4 = vpop.f32.mrf.mxu1 }
0x2f43   :  { %v9372_v48 = vpop.f32.mrf.mxu1 }
0x2f44   :  { %v9373_v24 = vadd.f32 %v9814_v37, %v9372_v48 }
0x2f45   :  { %v10882_v41 = vpop.f32.mrf.mxu1 }
0x2f46   :  { %9379 = vst.msk [vmem:[#allocation2] sm:$0x3] %vm9378_vm13, %v9373_v24 }
0x2f47   :  { %v9375_v43 = vpop.f32.mrf.mxu1 }
0x2f48   :  { %12022 = shalt.err (!%p12019_p4)
}
0x2f49   :  { %9389 = dma.vmem_to_hbm [thread:$0]  %s9387_s29, 32, %s12314_s9, [#allocation3]   ;;  %v10883_v47 = vpop.f32.mrf.mxu1 }
0x2f4a   :  { %12031 = dma.done.wait [#allocation3], 32  }
0x2f4b   :  { %12032 = vsyncadd [#allocation3], 4294967264 }
0x2f4c   :  { %9393 = vsyncpa [#allocation3], 1 }

</bundles_post_ra>
